<compile_context>
chip_gen: v7x
topology: tpu7x:2x2x1
jax: 0.10.0
libtpu: 0.0.40
codegen_flags: <defaults>
</compile_context>

<pallas_src>
import functools
import math

import jax
import jax.numpy as jnp
from jax import lax
from jax.experimental import pallas as pl
from jax.experimental.pallas import tpu as pltpu

_VMEM_LIMIT = 32 * 1024 * 1024


# ---------------------------------------------------------------------------
# Pallas kernel 1: fused 3-layer conv3x3 stack (roll-based shifts, folded batch)
# ---------------------------------------------------------------------------
def _conv_stack_kernel(x_ref, m_ref, wb1_ref, wb2_ref, wb3_ref, o_ref, *, W, slope):
    ntot = x_ref.shape[1]

    def layer(x, wb_ref, act):
        cin = x.shape[0]
        acc = None
        k = 0
        for dy in (-1, 0, 1):
            for dx in (-1, 0, 1):
                s = dy * W + dx
                if s == 0:
                    xs = x
                else:
                    # XLU lane rotation; wrapped / out-of-plane lanes are zeroed
                    # by the precomputed mask (== zero-padding of the 3x3 conv).
                    xs = pltpu.roll(x, (-s) % ntot, axis=1) * m_ref[k:k + 1, :]
                contrib = jnp.dot(wb_ref[:, k * cin:(k + 1) * cin], xs,
                                  preferred_element_type=jnp.float32)
                acc = contrib if acc is None else acc + contrib
                k += 1
        y = acc + wb_ref[:, 9 * cin:9 * cin + 1]          # bias folded as last column
        if act:
            y = jnp.where(y > 0.0, y, slope * y)          # LeakyReLU(0.2)
        return y                                          # (Cout, Ntot) lane-dense

    h = layer(x_ref[...], wb1_ref, True)
    h = layer(h, wb2_ref, True)
    o_ref[...] = layer(h, wb3_ref, False)


def conv_stack(x_flat, masks, layers, *, W):
    """x_flat: (C0, Ntot) with all batch items folded along the lane axis.
    layers: [wb1, wb2, wb3], wbk: (Ck, 9*C_{k-1} + 1) with the bias in the last column."""
    C0, Ntot = x_flat.shape
    wb1, wb2, wb3 = layers
    C3 = wb3.shape[0]
    kernel = functools.partial(_conv_stack_kernel, W=W, slope=0.2)
    return pl.pallas_call(
        kernel,
        out_shape=jax.ShapeDtypeStruct((C3, Ntot), jnp.float32),
        grid=(1,),
        in_specs=[
            pl.BlockSpec((C0, Ntot), lambda i: (0, 0)),
            pl.BlockSpec(masks.shape, lambda i: (0, 0)),
            pl.BlockSpec(wb1.shape, lambda i: (0, 0)),
            pl.BlockSpec(wb2.shape, lambda i: (0, 0)),
            pl.BlockSpec(wb3.shape, lambda i: (0, 0)),
        ],
        out_specs=pl.BlockSpec((C3, Ntot), lambda i: (0, 0)),
        compiler_params=pltpu.CompilerParams(
            dimension_semantics=("arbitrary",),
            vmem_limit_bytes=_VMEM_LIMIT),
    )(x_flat, masks, wb1, wb2, wb3)


# ---------------------------------------------------------------------------
# Pallas kernel 2: bilinear grid_pull, batched-channel matmul, single dense store
# ---------------------------------------------------------------------------
def _pull_kernel(img_ref, g_ref, o_ref, *, H, W, C):
    n = g_ref.shape[1]
    y = jnp.clip(g_ref[0:1, :], 0.0, H - 1.0)
    x = jnp.clip(g_ref[1:2, :], 0.0, W - 1.0)
    y0 = jnp.clip(jnp.floor(y), 0.0, H - 2.0)
    x0 = jnp.clip(jnp.floor(x), 0.0, W - 2.0)
    wy = y - y0
    wx = x - x0
    ih = lax.broadcasted_iota(jnp.int32, (H, n), 0).astype(jnp.float32)
    iw = lax.broadcasted_iota(jnp.int32, (W, n), 0).astype(jnp.float32)
    wy_mat = jnp.where(ih == y0, 1.0 - wy, 0.0) + jnp.where(ih == y0 + 1.0, wy, 0.0)
    wx_mat = jnp.where(iw == x0, 1.0 - wx, 0.0) + jnp.where(iw == x0 + 1.0, wx, 0.0)
    img2d = img_ref[...].reshape(C * H, W)                                # batch channels into MXU M dim
    t = jnp.dot(img2d, wx_mat, preferred_element_type=jnp.float32)        # (C*H, n)
    t3 = t.reshape(C, H, n)
    o_ref[...] = jnp.sum(t3 * wy_mat[None, :, :], axis=1)                 # one dense (C, n) store


def _pick_tile(n, max_tile=1024):
    if n <= max_tile:
        return n
    for t in range(max_tile - max_tile % 128, 0, -128):
        if n % t == 0:
            return t
    return n


def grid_pull(img, grid):
    """img: (B, C, H, W); grid: (B, 2, N) voxel coords (row 0 = y, row 1 = x) -> (B, C, N)."""
    B, C, H, W = img.shape
    N = grid.shape[2]
    TN = _pick_tile(N)
    kernel = functools.partial(_pull_kernel, H=H, W=W, C=C)
    return pl.pallas_call(
        kernel,
        out_shape=jax.ShapeDtypeStruct((B, C, N), jnp.float32),
        grid=(B, N // TN),
        in_specs=[
            pl.BlockSpec((None, C, H, W), lambda b, t: (b, 0, 0, 0)),
            pl.BlockSpec((None, 2, TN), lambda b, t: (b, 0, t)),
        ],
        out_specs=pl.BlockSpec((None, C, TN), lambda b, t: (b, 0, t)),
        compiler_params=pltpu.CompilerParams(
            dimension_semantics=("parallel", "parallel"),
            vmem_limit_bytes=_VMEM_LIMIT),
    )(img, grid)


# ---------------------------------------------------------------------------
# Pallas kernel 3: fused exp() — downsample, 8x scaling & squaring, upsample, +identity
# ---------------------------------------------------------------------------
def _exp_kernel(vel_ref, wd_ref, ids_ref, wu_ref, idf_ref, o_ref, *, Hs, Ws, n_steps):
    Ns = Hs * Ws
    # 1) downsample velocity (precomputed pull matrix) and pre-divide by 2^n_steps.
    s0 = 0.5 / float(2 ** n_steps)
    d0 = jnp.dot(vel_ref[...], wd_ref[...], preferred_element_type=jnp.float32) * s0   # (2, Ns)

    ids = ids_ref[...]                                                    # (2, Ns)
    ii = lax.broadcasted_iota(jnp.int32, (Ns, Ns), 0).astype(jnp.float32)  # hoisted out of loop

    # 2) scaling & squaring: d <- d + pull(d, id + d); flat displacement carried
    #    through a fori_loop, one dense (Ns, Ns) interpolation matrix + one matmul
    #    per step (no per-row relayout stores).
    def step(_, d):
        y = jnp.clip(ids[0:1, :] + d[0:1, :], 0.0, Hs - 1.0)
        x = jnp.clip(ids[1:2, :] + d[1:2, :], 0.0, Ws - 1.0)
        y0 = jnp.clip(jnp.floor(y), 0.0, Hs - 2.0)
        x0 = jnp.clip(jnp.floor(x), 0.0, Ws - 2.0)
        wy = y - y0
        wx = x - x0
        s00 = y0 * float(Ws) + x0                                         # (1, Ns)
        wmat = (jnp.where(ii == s00, (1.0 - wy) * (1.0 - wx), 0.0)
                + jnp.where(ii == s00 + 1.0, (1.0 - wy) * wx, 0.0)
                + jnp.where(ii == s00 + float(Ws), wy * (1.0 - wx), 0.0)
                + jnp.where(ii == s00 + float(Ws + 1), wy * wx, 0.0))      # (Ns, Ns)
        return d + jnp.dot(d, wmat, preferred_element_type=jnp.float32)

    d = lax.fori_loop(0, n_steps, step, d0)

    # 3) upsample displacement (precomputed matrix), rescale, add identity grid:
    #    single dense (2, N) store.
    o_ref[...] = (jnp.dot(d, wu_ref[...], preferred_element_type=jnp.float32) * 2.0
                  + idf_ref[...])


def grid_exp(vel_flat, *, H, W, Hs, Ws, n_steps=8):
    """vel_flat: (B, 2, H*W) velocity -> (B, 2, H*W) transformation grid (voxel coords)."""
    B = vel_flat.shape[0]
    N, Ns = H * W, Hs * Ws
    dn = _resample_coords(Hs, Ws, H, W)       # (2, Ns)  small voxel -> full-res voxel
    up = _resample_coords(H, W, Hs, Ws)       # (2, N)   full voxel -> small-res voxel
    wd = _interp_matrix(dn, H, W)             # (N, Ns)  downsample pull matrix (constant)
    wu = _interp_matrix(up, Hs, Ws)           # (Ns, N)  upsample pull matrix (constant)
    ids = _identity_coords(Hs, Ws)            # (2, Ns)
    idf = _identity_coords(H, W)              # (2, N)
    kernel = functools.partial(_exp_kernel, Hs=Hs, Ws=Ws, n_steps=n_steps)
    return pl.pallas_call(
        kernel,
        out_shape=jax.ShapeDtypeStruct((B, 2, N), jnp.float32),
        grid=(B,),
        in_specs=[
            pl.BlockSpec((None, 2, N), lambda b: (b, 0, 0)),
            pl.BlockSpec((N, Ns), lambda b: (0, 0)),
            pl.BlockSpec((2, Ns), lambda b: (0, 0)),
            pl.BlockSpec((Ns, N), lambda b: (0, 0)),
            pl.BlockSpec((2, N), lambda b: (0, 0)),
        ],
        out_specs=pl.BlockSpec((None, 2, N), lambda b: (b, 0, 0)),
        compiler_params=pltpu.CompilerParams(
            dimension_semantics=("parallel",),
            vmem_limit_bytes=_VMEM_LIMIT),
    )(vel_flat, wd, ids, wu, idf)


# ---------------------------------------------------------------------------
# Host-side helpers (tiny shape-only constants, computed once in XLA)
# ---------------------------------------------------------------------------
def _identity_coords(H, W):
    iy, ix = jnp.meshgrid(jnp.arange(H, dtype=jnp.float32),
                          jnp.arange(W, dtype=jnp.float32), indexing='ij')
    return jnp.stack([iy.reshape(-1), ix.reshape(-1)], axis=0)           # (2, H*W)


def _resample_coords(H_out, W_out, H_in, W_in):
    """Centers-aligned resampling coordinates (output voxel -> input voxel)."""
    ys = jnp.arange(H_out, dtype=jnp.float32) * ((H_in - 1) / max(H_out - 1, 1))
    xs = jnp.arange(W_out, dtype=jnp.float32) * ((W_in - 1) / max(W_out - 1, 1))
    gy, gx = jnp.meshgrid(ys, xs, indexing='ij')
    return jnp.stack([gy.reshape(-1), gx.reshape(-1)], axis=0)           # (2, Hout*Wout)


def _interp_matrix(coords, H_in, W_in):
    """(H_in*W_in, M) bilinear pull matrix: out = img_flat @ mat for fixed coords."""
    y = jnp.clip(coords[0], 0.0, H_in - 1.0)
    x = jnp.clip(coords[1], 0.0, W_in - 1.0)
    y0 = jnp.clip(jnp.floor(y), 0.0, H_in - 2.0)
    x0 = jnp.clip(jnp.floor(x), 0.0, W_in - 2.0)
    wy = y - y0
    wx = x - x0
    s00 = (y0 * W_in + x0)[None, :]
    ii = jnp.arange(H_in * W_in, dtype=jnp.float32)[:, None]
    mat = (jnp.where(ii == s00, (1.0 - wy) * (1.0 - wx), 0.0)
           + jnp.where(ii == s00 + 1.0, (1.0 - wy) * wx, 0.0)
           + jnp.where(ii == s00 + W_in, wy * (1.0 - wx), 0.0)
           + jnp.where(ii == s00 + W_in + 1.0, wy * wx, 0.0))
    return mat.astype(jnp.float32)


def _shift_masks(H, W, reps):
    """(9, reps*H*W) validity masks for the 3x3 rolled-slab taps (zero padding),
    tiled over the batch items that are folded along the lane axis."""
    n = jnp.arange(H * W, dtype=jnp.int32)
    row = n // W
    col = n % W
    ms = []
    for dy in (-1, 0, 1):
        for dx in (-1, 0, 1):
            ok = ((row + dy >= 0) & (row + dy <= H - 1) &
                  (col + dx >= 0) & (col + dx <= W - 1))
            ms.append(ok.astype(jnp.float32))
    m = jnp.stack(ms, axis=0)                                            # (9, H*W)
    return jnp.tile(m, (1, reps))


def init_params(key, feat=8, mid=1, dim=2):
    """Per conv layer: one (Cout, 9*Cin + 1) matrix; taps ordered (dy, dx, cin),
    bias folded into the last column (matches the in-kernel layout)."""
    def conv_layer(k, cin, cout, scale=1.0):
        std = scale / math.sqrt(9 * cin)
        w = jax.random.normal(k, (cout, 9, cin), jnp.float32) * std
        return jnp.concatenate([w.reshape(cout, 9 * cin),
                                jnp.zeros((cout, 1), jnp.float32)], axis=1)

    ks = jax.random.split(key, 6)
    return {
        'feat': [conv_layer(ks[0], 1, feat), conv_layer(ks[1], feat, feat),
                 conv_layer(ks[2], feat, mid)],
        'vel': [conv_layer(ks[3], 2 * mid, feat), conv_layer(ks[4], feat, feat),
                conv_layer(ks[5], feat, dim, scale=0.5)],
    }


# ---------------------------------------------------------------------------
# SewMorph.forward
# ---------------------------------------------------------------------------
def sew_morph_forward(params, source, target, *, compute_seg_warp=False):
    """source/target: (B, 1, H, W) float32 (NCHW, as in PyTorch).

    Returns (src_seg_pred, tgt_seg_pred, deformed_source, velocity) with shapes
    (B, 1, H, W), (B, 1, H, W), (B, 1, H, W), (B, H, W, 2) — matching the reference
    forward for output_classes=1, implicit=True, dim=2 (in_channels=1)."""
    B, C, H, W = source.shape
    N = H * W
    Hs, Ws = max(H // 2, 2), max(W // 2, 2)
    n_steps = 8

    # --- SEWNet feature net: siamese (shared weights); both twins AND all batch
    #     items folded along the lane axis -> one kernel launch, full-width stores.
    feat_in = jnp.concatenate([source.reshape(B, N),
                               target.reshape(B, N)], axis=0).reshape(1, 2 * B * N)
    masks_f = _shift_masks(H, W, 2 * B)
    feat = conv_stack(feat_in, masks_f, params['feat'], W=W)              # (1, 2B*N)
    feat_s = feat[:, :B * N]                                              # (1, B*N)
    feat_t = feat[:, B * N:]

    # --- SEWNet velocity net on concatenated twin features (2 channels) ---
    vin = jnp.concatenate([feat_s, feat_t], axis=0)                       # (2, B*N)
    masks_v = _shift_masks(H, W, B)
    vel2 = conv_stack(vin, masks_v, params['vel'], W=W)                   # (2, B*N)
    vel_flat = jnp.transpose(vel2.reshape(2, B, N), (1, 0, 2))            # (B, 2, N)

    # --- exp(): downsample, scaling & squaring, upsample, + identity (one kernel) ---
    grid_full = grid_exp(vel_flat, H=H, W=W, Hs=Hs, Ws=Ws, n_steps=n_steps)   # (B, 2, N)

    # --- warp the source image with the transformation grid ---
    wsrc = grid_pull(source, grid_full).reshape(B, C, H, W)

    src_seg_pred = feat_s.reshape(B, 1, H, W)
    tgt_seg_pred = feat_t.reshape(B, 1, H, W)
    vel = jnp.transpose(vel_flat.reshape(B, 2, H, W), (0, 2, 3, 1))       # (B, H, W, 2)

    if compute_seg_warp:
        # Warped source logits feed only the (optional) loss path in the reference
        # forward; gated off by default so the extra full-resolution pull is skipped.
        _ = grid_pull(src_seg_pred, grid_full)

    return src_seg_pred, tgt_seg_pred, wsrc, vel


if __name__ == "__main__":
    key = jax.random.PRNGKey(0)
    k_src, k_tgt, k_par = jax.random.split(key, 3)

    B, C, H, W = 2, 1, 16, 16
    source = jax.random.normal(k_src, (B, C, H, W), jnp.float32)
    target = jax.random.normal(k_tgt, (B, C, H, W), jnp.float32)
    params = init_params(k_par)

    fwd = jax.jit(sew_morph_forward)
    src_pred, tgt_pred, wsrc, vel = fwd(params, source, target)
    jax.block_until_ready((src_pred, tgt_pred, wsrc, vel))

    assert src_pred.shape == (B, 1, H, W)
    assert tgt_pred.shape == (B, 1, H, W)
    assert wsrc.shape == (B, C, H, W)
    assert vel.shape == (B, H, W, 2)
    assert bool(jnp.all(jnp.isfinite(src_pred)))
    assert bool(jnp.all(jnp.isfinite(wsrc)))
    assert bool(jnp.all(jnp.isfinite(vel)))
    print("KERNEL_OK")
</pallas_src>

<mosaic_0001>
module attributes {stable_mosaic.version = 11 : i64} {
  func.func @_conv_stack_kernel(%arg0: i32, %arg1: memref<1x1024xf32, #tpu.memory_space<vmem>>, %arg2: memref<9x1024xf32, #tpu.memory_space<vmem>>, %arg3: memref<8x10xf32, #tpu.memory_space<vmem>>, %arg4: memref<8x73xf32, #tpu.memory_space<vmem>>, %arg5: memref<1x73xf32, #tpu.memory_space<vmem>>, %arg6: memref<1x1024xf32, #tpu.memory_space<vmem>>) attributes {dimension_semantics = [#tpu.dimension_semantics<arbitrary>], iteration_bounds = array<i64: 1>, scalar_prefetch = 0 : i64, scratch_operands = 0 : i64, tpu.core_type = #tpu.core_type<tc>, window_params = [{pipeline_mode = #tpu.pipeline_mode<synchronous>, transform_indices = @transform_0, window_bounds = array<i64: 1, 1024>}, {pipeline_mode = #tpu.pipeline_mode<synchronous>, transform_indices = @transform_1, window_bounds = array<i64: 9, 1024>}, {pipeline_mode = #tpu.pipeline_mode<synchronous>, transform_indices = @transform_2, window_bounds = array<i64: 8, 10>}, {pipeline_mode = #tpu.pipeline_mode<synchronous>, transform_indices = @transform_3, window_bounds = array<i64: 8, 73>}, {pipeline_mode = #tpu.pipeline_mode<synchronous>, transform_indices = @transform_4, window_bounds = array<i64: 1, 73>}, {pipeline_mode = #tpu.pipeline_mode<synchronous>, transform_indices = @transform_5, window_bounds = array<i64: 1, 1024>}]} {
    %c0 = arith.constant 0 : index
    %c0_0 = arith.constant 0 : index
    %0 = vector.load %arg1[%c0, %c0_0] : memref<1x1024xf32, #tpu.memory_space<vmem>>, vector<1x1024xf32>
    %c17_i32 = arith.constant 17 : i32
    %1 = tpu.dynamic_rotate %0 by %c17_i32 dim 1 : vector<1x1024xf32>, i32 -> vector<1x1024xf32>
    %c0_1 = arith.constant 0 : index
    %c0_2 = arith.constant 0 : index
    %2 = vector.load %arg2[%c0_1, %c0_2] : memref<9x1024xf32, #tpu.memory_space<vmem>>, vector<1x1024xf32>
    %3 = arith.mulf %1, %2 : vector<1x1024xf32>
    %c0_3 = arith.constant 0 : index
    %c0_4 = arith.constant 0 : index
    %4 = vector.load %arg3[%c0_3, %c0_4] : memref<8x10xf32, #tpu.memory_space<vmem>>, vector<8x1xf32>
    %cst = arith.constant dense<0.000000e+00> : vector<8x1024xf32>
    %5 = tpu.matmul %4, %3, %cst {dimension_numbers = #tpu.dot_dimension_numbers<[1], [0], [0], [1], [0, 0, 1, 1], [], []>} : vector<8x1xf32>, vector<1x1024xf32>, vector<8x1024xf32> -> vector<8x1024xf32>
    %c16_i32 = arith.constant 16 : i32
    %6 = tpu.dynamic_rotate %0 by %c16_i32 dim 1 : vector<1x1024xf32>, i32 -> vector<1x1024xf32>
    %c1 = arith.constant 1 : index
    %c0_5 = arith.constant 0 : index
    %7 = vector.load %arg2[%c1, %c0_5] : memref<9x1024xf32, #tpu.memory_space<vmem>>, vector<1x1024xf32>
    %8 = arith.mulf %6, %7 : vector<1x1024xf32>
    %c0_6 = arith.constant 0 : index
    %c1_7 = arith.constant 1 : index
    %9 = vector.load %arg3[%c0_6, %c1_7] : memref<8x10xf32, #tpu.memory_space<vmem>>, vector<8x1xf32>
    %cst_8 = arith.constant dense<0.000000e+00> : vector<8x1024xf32>
    %10 = tpu.matmul %9, %8, %cst_8 {dimension_numbers = #tpu.dot_dimension_numbers<[1], [0], [0], [1], [0, 0, 1, 1], [], []>} : vector<8x1xf32>, vector<1x1024xf32>, vector<8x1024xf32> -> vector<8x1024xf32>
    %11 = arith.addf %5, %10 : vector<8x1024xf32>
    %c15_i32 = arith.constant 15 : i32
    %12 = tpu.dynamic_rotate %0 by %c15_i32 dim 1 : vector<1x1024xf32>, i32 -> vector<1x1024xf32>
    %c2 = arith.constant 2 : index
    %c0_9 = arith.constant 0 : index
    %13 = vector.load %arg2[%c2, %c0_9] : memref<9x1024xf32, #tpu.memory_space<vmem>>, vector<1x1024xf32>
    %14 = arith.mulf %12, %13 : vector<1x1024xf32>
    %c0_10 = arith.constant 0 : index
    %c2_11 = arith.constant 2 : index
    %15 = vector.load %arg3[%c0_10, %c2_11] : memref<8x10xf32, #tpu.memory_space<vmem>>, vector<8x1xf32>
    %cst_12 = arith.constant dense<0.000000e+00> : vector<8x1024xf32>
    %16 = tpu.matmul %15, %14, %cst_12 {dimension_numbers = #tpu.dot_dimension_numbers<[1], [0], [0], [1], [0, 0, 1, 1], [], []>} : vector<8x1xf32>, vector<1x1024xf32>, vector<8x1024xf32> -> vector<8x1024xf32>
    %17 = arith.addf %11, %16 : vector<8x1024xf32>
    %c1_i32 = arith.constant 1 : i32
    %18 = tpu.dynamic_rotate %0 by %c1_i32 dim 1 : vector<1x1024xf32>, i32 -> vector<1x1024xf32>
    %c3 = arith.constant 3 : index
    %c0_13 = arith.constant 0 : index
    %19 = vector.load %arg2[%c3, %c0_13] : memref<9x1024xf32, #tpu.memory_space<vmem>>, vector<1x1024xf32>
    %20 = arith.mulf %18, %19 : vector<1x1024xf32>
    %c0_14 = arith.constant 0 : index
    %c3_15 = arith.constant 3 : index
    %21 = vector.load %arg3[%c0_14, %c3_15] : memref<8x10xf32, #tpu.memory_space<vmem>>, vector<8x1xf32>
    %cst_16 = arith.constant dense<0.000000e+00> : vector<8x1024xf32>
    %22 = tpu.matmul %21, %20, %cst_16 {dimension_numbers = #tpu.dot_dimension_numbers<[1], [0], [0], [1], [0, 0, 1, 1], [], []>} : vector<8x1xf32>, vector<1x1024xf32>, vector<8x1024xf32> -> vector<8x1024xf32>
    %23 = arith.addf %17, %22 : vector<8x1024xf32>
    %c0_17 = arith.constant 0 : index
    %c4 = arith.constant 4 : index
    %24 = vector.load %arg3[%c0_17, %c4] : memref<8x10xf32, #tpu.memory_space<vmem>>, vector<8x1xf32>
    %cst_18 = arith.constant dense<0.000000e+00> : vector<8x1024xf32>
    %25 = tpu.matmul %24, %0, %cst_18 {dimension_numbers = #tpu.dot_dimension_numbers<[1], [0], [0], [1], [0, 0, 1, 1], [], []>} : vector<8x1xf32>, vector<1x1024xf32>, vector<8x1024xf32> -> vector<8x1024xf32>
    %26 = arith.addf %23, %25 : vector<8x1024xf32>
    %c1023_i32 = arith.constant 1023 : i32
    %27 = tpu.dynamic_rotate %0 by %c1023_i32 dim 1 : vector<1x1024xf32>, i32 -> vector<1x1024xf32>
    %c5 = arith.constant 5 : index
    %c0_19 = arith.constant 0 : index
    %28 = vector.load %arg2[%c5, %c0_19] : memref<9x1024xf32, #tpu.memory_space<vmem>>, vector<1x1024xf32>
    %29 = arith.mulf %27, %28 : vector<1x1024xf32>
    %c0_20 = arith.constant 0 : index
    %c5_21 = arith.constant 5 : index
    %30 = vector.load %arg3[%c0_20, %c5_21] : memref<8x10xf32, #tpu.memory_space<vmem>>, vector<8x1xf32>
    %cst_22 = arith.constant dense<0.000000e+00> : vector<8x1024xf32>
    %31 = tpu.matmul %30, %29, %cst_22 {dimension_numbers = #tpu.dot_dimension_numbers<[1], [0], [0], [1], [0, 0, 1, 1], [], []>} : vector<8x1xf32>, vector<1x1024xf32>, vector<8x1024xf32> -> vector<8x1024xf32>
    %32 = arith.addf %26, %31 : vector<8x1024xf32>
    %c1009_i32 = arith.constant 1009 : i32
    %33 = tpu.dynamic_rotate %0 by %c1009_i32 dim 1 : vector<1x1024xf32>, i32 -> vector<1x1024xf32>
    %c6 = arith.constant 6 : index
    %c0_23 = arith.constant 0 : index
    %34 = vector.load %arg2[%c6, %c0_23] : memref<9x1024xf32, #tpu.memory_space<vmem>>, vector<1x1024xf32>
    %35 = arith.mulf %33, %34 : vector<1x1024xf32>
    %c0_24 = arith.constant 0 : index
    %c6_25 = arith.constant 6 : index
    %36 = vector.load %arg3[%c0_24, %c6_25] : memref<8x10xf32, #tpu.memory_space<vmem>>, vector<8x1xf32>
    %cst_26 = arith.constant dense<0.000000e+00> : vector<8x1024xf32>
    %37 = tpu.matmul %36, %35, %cst_26 {dimension_numbers = #tpu.dot_dimension_numbers<[1], [0], [0], [1], [0, 0, 1, 1], [], []>} : vector<8x1xf32>, vector<1x1024xf32>, vector<8x1024xf32> -> vector<8x1024xf32>
    %38 = arith.addf %32, %37 : vector<8x1024xf32>
    %c1008_i32 = arith.constant 1008 : i32
    %39 = tpu.dynamic_rotate %0 by %c1008_i32 dim 1 : vector<1x1024xf32>, i32 -> vector<1x1024xf32>
    %c7 = arith.constant 7 : index
    %c0_27 = arith.constant 0 : index
    %40 = vector.load %arg2[%c7, %c0_27] : memref<9x1024xf32, #tpu.memory_space<vmem>>, vector<1x1024xf32>
    %41 = arith.mulf %39, %40 : vector<1x1024xf32>
    %c0_28 = arith.constant 0 : index
    %c7_29 = arith.constant 7 : index
    %42 = vector.load %arg3[%c0_28, %c7_29] : memref<8x10xf32, #tpu.memory_space<vmem>>, vector<8x1xf32>
    %cst_30 = arith.constant dense<0.000000e+00> : vector<8x1024xf32>
    %43 = tpu.matmul %42, %41, %cst_30 {dimension_numbers = #tpu.dot_dimension_numbers<[1], [0], [0], [1], [0, 0, 1, 1], [], []>} : vector<8x1xf32>, vector<1x1024xf32>, vector<8x1024xf32> -> vector<8x1024xf32>
    %44 = arith.addf %38, %43 : vector<8x1024xf32>
    %c1007_i32 = arith.constant 1007 : i32
    %45 = tpu.dynamic_rotate %0 by %c1007_i32 dim 1 : vector<1x1024xf32>, i32 -> vector<1x1024xf32>
    %c8 = arith.constant 8 : index
    %c0_31 = arith.constant 0 : index
    %46 = vector.load %arg2[%c8, %c0_31] : memref<9x1024xf32, #tpu.memory_space<vmem>>, vector<1x1024xf32>
    %47 = arith.mulf %45, %46 : vector<1x1024xf32>
    %c0_32 = arith.constant 0 : index
    %c8_33 = arith.constant 8 : index
    %48 = vector.load %arg3[%c0_32, %c8_33] : memref<8x10xf32, #tpu.memory_space<vmem>>, vector<8x1xf32>
    %cst_34 = arith.constant dense<0.000000e+00> : vector<8x1024xf32>
    %49 = tpu.matmul %48, %47, %cst_34 {dimension_numbers = #tpu.dot_dimension_numbers<[1], [0], [0], [1], [0, 0, 1, 1], [], []>} : vector<8x1xf32>, vector<1x1024xf32>, vector<8x1024xf32> -> vector<8x1024xf32>
    %50 = arith.addf %44, %49 : vector<8x1024xf32>
    %c0_35 = arith.constant 0 : index
    %c9 = arith.constant 9 : index
    %51 = vector.load %arg3[%c0_35, %c9] : memref<8x10xf32, #tpu.memory_space<vmem>>, vector<8x1xf32>
    %52 = vector.broadcast %51 : vector<8x1xf32> to vector<8x1024xf32>
    %53 = arith.addf %50, %52 : vector<8x1024xf32>
    %cst_36 = arith.constant 0.000000e+00 : f32
    %54 = vector.broadcast %cst_36 : f32 to vector<8x1024xf32>
    %55 = arith.cmpf ogt, %53, %54 : vector<8x1024xf32>
    %cst_37 = arith.constant 2.000000e-01 : f32
    %56 = vector.broadcast %cst_37 : f32 to vector<8x1024xf32>
    %57 = arith.mulf %56, %53 : vector<8x1024xf32>
    %58 = arith.select %55, %53, %57 : vector<8x1024xi1>, vector<8x1024xf32>
    %c17_i32_38 = arith.constant 17 : i32
    %59 = tpu.dynamic_rotate %58 by %c17_i32_38 dim 1 : vector<8x1024xf32>, i32 -> vector<8x1024xf32>
    %c0_39 = arith.constant 0 : index
    %c0_40 = arith.constant 0 : index
    %60 = vector.load %arg2[%c0_39, %c0_40] : memref<9x1024xf32, #tpu.memory_space<vmem>>, vector<1x1024xf32>
    %61 = vector.broadcast %60 : vector<1x1024xf32> to vector<8x1024xf32>
    %62 = arith.mulf %59, %61 : vector<8x1024xf32>
    %c0_41 = arith.constant 0 : index
    %c0_42 = arith.constant 0 : index
    %63 = vector.load %arg4[%c0_41, %c0_42] : memref<8x73xf32, #tpu.memory_space<vmem>>, vector<8x8xf32>
    %cst_43 = arith.constant dense<0.000000e+00> : vector<8x1024xf32>
    %64 = tpu.matmul %63, %62, %cst_43 {dimension_numbers = #tpu.dot_dimension_numbers<[1], [0], [0], [1], [0, 0, 1, 1], [], []>} : vector<8x8xf32>, vector<8x1024xf32>, vector<8x1024xf32> -> vector<8x1024xf32>
    %c16_i32_44 = arith.constant 16 : i32
    %65 = tpu.dynamic_rotate %58 by %c16_i32_44 dim 1 : vector<8x1024xf32>, i32 -> vector<8x1024xf32>
    %c1_45 = arith.constant 1 : index
    %c0_46 = arith.constant 0 : index
    %66 = vector.load %arg2[%c1_45, %c0_46] : memref<9x1024xf32, #tpu.memory_space<vmem>>, vector<1x1024xf32>
    %67 = vector.broadcast %66 : vector<1x1024xf32> to vector<8x1024xf32>
    %68 = arith.mulf %65, %67 : vector<8x1024xf32>
    %c0_47 = arith.constant 0 : index
    %c8_48 = arith.constant 8 : index
    %69 = vector.load %arg4[%c0_47, %c8_48] : memref<8x73xf32, #tpu.memory_space<vmem>>, vector<8x8xf32>
    %cst_49 = arith.constant dense<0.000000e+00> : vector<8x1024xf32>
    %70 = tpu.matmul %69, %68, %cst_49 {dimension_numbers = #tpu.dot_dimension_numbers<[1], [0], [0], [1], [0, 0, 1, 1], [], []>} : vector<8x8xf32>, vector<8x1024xf32>, vector<8x1024xf32> -> vector<8x1024xf32>
    %71 = arith.addf %64, %70 : vector<8x1024xf32>
    %c15_i32_50 = arith.constant 15 : i32
    %72 = tpu.dynamic_rotate %58 by %c15_i32_50 dim 1 : vector<8x1024xf32>, i32 -> vector<8x1024xf32>
    %c2_51 = arith.constant 2 : index
    %c0_52 = arith.constant 0 : index
    %73 = vector.load %arg2[%c2_51, %c0_52] : memref<9x1024xf32, #tpu.memory_space<vmem>>, vector<1x1024xf32>
    %74 = vector.broadcast %73 : vector<1x1024xf32> to vector<8x1024xf32>
    %75 = arith.mulf %72, %74 : vector<8x1024xf32>
    %c0_53 = arith.constant 0 : index
    %c16 = arith.constant 16 : index
    %76 = vector.load %arg4[%c0_53, %c16] : memref<8x73xf32, #tpu.memory_space<vmem>>, vector<8x8xf32>
    %cst_54 = arith.constant dense<0.000000e+00> : vector<8x1024xf32>
    %77 = tpu.matmul %76, %75, %cst_54 {dimension_numbers = #tpu.dot_dimension_numbers<[1], [0], [0], [1], [0, 0, 1, 1], [], []>} : vector<8x8xf32>, vector<8x1024xf32>, vector<8x1024xf32> -> vector<8x1024xf32>
    %78 = arith.addf %71, %77 : vector<8x1024xf32>
    %c1_i32_55 = arith.constant 1 : i32
    %79 = tpu.dynamic_rotate %58 by %c1_i32_55 dim 1 : vector<8x1024xf32>, i32 -> vector<8x1024xf32>
    %c3_56 = arith.constant 3 : index
    %c0_57 = arith.constant 0 : index
    %80 = vector.load %arg2[%c3_56, %c0_57] : memref<9x1024xf32, #tpu.memory_space<vmem>>, vector<1x1024xf32>
    %81 = vector.broadcast %80 : vector<1x1024xf32> to vector<8x1024xf32>
    %82 = arith.mulf %79, %81 : vector<8x1024xf32>
    %c0_58 = arith.constant 0 : index
    %c24 = arith.constant 24 : index
    %83 = vector.load %arg4[%c0_58, %c24] : memref<8x73xf32, #tpu.memory_space<vmem>>, vector<8x8xf32>
    %cst_59 = arith.constant dense<0.000000e+00> : vector<8x1024xf32>
    %84 = tpu.matmul %83, %82, %cst_59 {dimension_numbers = #tpu.dot_dimension_numbers<[1], [0], [0], [1], [0, 0, 1, 1], [], []>} : vector<8x8xf32>, vector<8x1024xf32>, vector<8x1024xf32> -> vector<8x1024xf32>
    %85 = arith.addf %78, %84 : vector<8x1024xf32>
    %c0_60 = arith.constant 0 : index
    %c32 = arith.constant 32 : index
    %86 = vector.load %arg4[%c0_60, %c32] : memref<8x73xf32, #tpu.memory_space<vmem>>, vector<8x8xf32>
    %cst_61 = arith.constant dense<0.000000e+00> : vector<8x1024xf32>
    %87 = tpu.matmul %86, %58, %cst_61 {dimension_numbers = #tpu.dot_dimension_numbers<[1], [0], [0], [1], [0, 0, 1, 1], [], []>} : vector<8x8xf32>, vector<8x1024xf32>, vector<8x1024xf32> -> vector<8x1024xf32>
    %88 = arith.addf %85, %87 : vector<8x1024xf32>
    %c1023_i32_62 = arith.constant 1023 : i32
    %89 = tpu.dynamic_rotate %58 by %c1023_i32_62 dim 1 : vector<8x1024xf32>, i32 -> vector<8x1024xf32>
    %c5_63 = arith.constant 5 : index
    %c0_64 = arith.constant 0 : index
    %90 = vector.load %arg2[%c5_63, %c0_64] : memref<9x1024xf32, #tpu.memory_space<vmem>>, vector<1x1024xf32>
    %91 = vector.broadcast %90 : vector<1x1024xf32> to vector<8x1024xf32>
    %92 = arith.mulf %89, %91 : vector<8x1024xf32>
    %c0_65 = arith.constant 0 : index
    %c40 = arith.constant 40 : index
    %93 = vector.load %arg4[%c0_65, %c40] : memref<8x73xf32, #tpu.memory_space<vmem>>, vector<8x8xf32>
    %cst_66 = arith.constant dense<0.000000e+00> : vector<8x1024xf32>
    %94 = tpu.matmul %93, %92, %cst_66 {dimension_numbers = #tpu.dot_dimension_numbers<[1], [0], [0], [1], [0, 0, 1, 1], [], []>} : vector<8x8xf32>, vector<8x1024xf32>, vector<8x1024xf32> -> vector<8x1024xf32>
    %95 = arith.addf %88, %94 : vector<8x1024xf32>
    %c1009_i32_67 = arith.constant 1009 : i32
    %96 = tpu.dynamic_rotate %58 by %c1009_i32_67 dim 1 : vector<8x1024xf32>, i32 -> vector<8x1024xf32>
    %c6_68 = arith.constant 6 : index
    %c0_69 = arith.constant 0 : index
    %97 = vector.load %arg2[%c6_68, %c0_69] : memref<9x1024xf32, #tpu.memory_space<vmem>>, vector<1x1024xf32>
    %98 = vector.broadcast %97 : vector<1x1024xf32> to vector<8x1024xf32>
    %99 = arith.mulf %96, %98 : vector<8x1024xf32>
    %c0_70 = arith.constant 0 : index
    %c48 = arith.constant 48 : index
    %100 = vector.load %arg4[%c0_70, %c48] : memref<8x73xf32, #tpu.memory_space<vmem>>, vector<8x8xf32>
    %cst_71 = arith.constant dense<0.000000e+00> : vector<8x1024xf32>
    %101 = tpu.matmul %100, %99, %cst_71 {dimension_numbers = #tpu.dot_dimension_numbers<[1], [0], [0], [1], [0, 0, 1, 1], [], []>} : vector<8x8xf32>, vector<8x1024xf32>, vector<8x1024xf32> -> vector<8x1024xf32>
    %102 = arith.addf %95, %101 : vector<8x1024xf32>
    %c1008_i32_72 = arith.constant 1008 : i32
    %103 = tpu.dynamic_rotate %58 by %c1008_i32_72 dim 1 : vector<8x1024xf32>, i32 -> vector<8x1024xf32>
    %c7_73 = arith.constant 7 : index
    %c0_74 = arith.constant 0 : index
    %104 = vector.load %arg2[%c7_73, %c0_74] : memref<9x1024xf32, #tpu.memory_space<vmem>>, vector<1x1024xf32>
    %105 = vector.broadcast %104 : vector<1x1024xf32> to vector<8x1024xf32>
    %106 = arith.mulf %103, %105 : vector<8x1024xf32>
    %c0_75 = arith.constant 0 : index
    %c56 = arith.constant 56 : index
    %107 = vector.load %arg4[%c0_75, %c56] : memref<8x73xf32, #tpu.memory_space<vmem>>, vector<8x8xf32>
    %cst_76 = arith.constant dense<0.000000e+00> : vector<8x1024xf32>
    %108 = tpu.matmul %107, %106, %cst_76 {dimension_numbers = #tpu.dot_dimension_numbers<[1], [0], [0], [1], [0, 0, 1, 1], [], []>} : vector<8x8xf32>, vector<8x1024xf32>, vector<8x1024xf32> -> vector<8x1024xf32>
    %109 = arith.addf %102, %108 : vector<8x1024xf32>
    %c1007_i32_77 = arith.constant 1007 : i32
    %110 = tpu.dynamic_rotate %58 by %c1007_i32_77 dim 1 : vector<8x1024xf32>, i32 -> vector<8x1024xf32>
    %c8_78 = arith.constant 8 : index
    %c0_79 = arith.constant 0 : index
    %111 = vector.load %arg2[%c8_78, %c0_79] : memref<9x1024xf32, #tpu.memory_space<vmem>>, vector<1x1024xf32>
    %112 = vector.broadcast %111 : vector<1x1024xf32> to vector<8x1024xf32>
    %113 = arith.mulf %110, %112 : vector<8x1024xf32>
    %c0_80 = arith.constant 0 : index
    %c64 = arith.constant 64 : index
    %114 = vector.load %arg4[%c0_80, %c64] : memref<8x73xf32, #tpu.memory_space<vmem>>, vector<8x8xf32>
    %cst_81 = arith.constant dense<0.000000e+00> : vector<8x1024xf32>
    %115 = tpu.matmul %114, %113, %cst_81 {dimension_numbers = #tpu.dot_dimension_numbers<[1], [0], [0], [1], [0, 0, 1, 1], [], []>} : vector<8x8xf32>, vector<8x1024xf32>, vector<8x1024xf32> -> vector<8x1024xf32>
    %116 = arith.addf %109, %115 : vector<8x1024xf32>
    %c0_82 = arith.constant 0 : index
    %c72 = arith.constant 72 : index
    %117 = vector.load %arg4[%c0_82, %c72] : memref<8x73xf32, #tpu.memory_space<vmem>>, vector<8x1xf32>
    %118 = vector.broadcast %117 : vector<8x1xf32> to vector<8x1024xf32>
    %119 = arith.addf %116, %118 : vector<8x1024xf32>
    %cst_83 = arith.constant 0.000000e+00 : f32
    %120 = vector.broadcast %cst_83 : f32 to vector<8x1024xf32>
    %121 = arith.cmpf ogt, %119, %120 : vector<8x1024xf32>
    %cst_84 = arith.constant 2.000000e-01 : f32
    %122 = vector.broadcast %cst_84 : f32 to vector<8x1024xf32>
    %123 = arith.mulf %122, %119 : vector<8x1024xf32>
    %124 = arith.select %121, %119, %123 : vector<8x1024xi1>, vector<8x1024xf32>
    %c17_i32_85 = arith.constant 17 : i32
    %125 = tpu.dynamic_rotate %124 by %c17_i32_85 dim 1 : vector<8x1024xf32>, i32 -> vector<8x1024xf32>
    %c0_86 = arith.constant 0 : index
    %c0_87 = arith.constant 0 : index
    %126 = vector.load %arg2[%c0_86, %c0_87] : memref<9x1024xf32, #tpu.memory_space<vmem>>, vector<1x1024xf32>
    %127 = vector.broadcast %126 : vector<1x1024xf32> to vector<8x1024xf32>
    %128 = arith.mulf %125, %127 : vector<8x1024xf32>
    %c0_88 = arith.constant 0 : index
    %c0_89 = arith.constant 0 : index
    %129 = vector.load %arg5[%c0_88, %c0_89] : memref<1x73xf32, #tpu.memory_space<vmem>>, vector<1x8xf32>
    %cst_90 = arith.constant dense<0.000000e+00> : vector<1x1024xf32>
    %130 = tpu.matmul %129, %128, %cst_90 {dimension_numbers = #tpu.dot_dimension_numbers<[1], [0], [0], [1], [0, 0, 1, 1], [], []>} : vector<1x8xf32>, vector<8x1024xf32>, vector<1x1024xf32> -> vector<1x1024xf32>
    %c16_i32_91 = arith.constant 16 : i32
    %131 = tpu.dynamic_rotate %124 by %c16_i32_91 dim 1 : vector<8x1024xf32>, i32 -> vector<8x1024xf32>
    %c1_92 = arith.constant 1 : index
    %c0_93 = arith.constant 0 : index
    %132 = vector.load %arg2[%c1_92, %c0_93] : memref<9x1024xf32, #tpu.memory_space<vmem>>, vector<1x1024xf32>
    %133 = vector.broadcast %132 : vector<1x1024xf32> to vector<8x1024xf32>
    %134 = arith.mulf %131, %133 : vector<8x1024xf32>
    %c0_94 = arith.constant 0 : index
    %c8_95 = arith.constant 8 : index
    %135 = vector.load %arg5[%c0_94, %c8_95] : memref<1x73xf32, #tpu.memory_space<vmem>>, vector<1x8xf32>
    %cst_96 = arith.constant dense<0.000000e+00> : vector<1x1024xf32>
    %136 = tpu.matmul %135, %134, %cst_96 {dimension_numbers = #tpu.dot_dimension_numbers<[1], [0], [0], [1], [0, 0, 1, 1], [], []>} : vector<1x8xf32>, vector<8x1024xf32>, vector<1x1024xf32> -> vector<1x1024xf32>
    %137 = arith.addf %130, %136 : vector<1x1024xf32>
    %c15_i32_97 = arith.constant 15 : i32
    %138 = tpu.dynamic_rotate %124 by %c15_i32_97 dim 1 : vector<8x1024xf32>, i32 -> vector<8x1024xf32>
    %c2_98 = arith.constant 2 : index
    %c0_99 = arith.constant 0 : index
    %139 = vector.load %arg2[%c2_98, %c0_99] : memref<9x1024xf32, #tpu.memory_space<vmem>>, vector<1x1024xf32>
    %140 = vector.broadcast %139 : vector<1x1024xf32> to vector<8x1024xf32>
    %141 = arith.mulf %138, %140 : vector<8x1024xf32>
    %c0_100 = arith.constant 0 : index
    %c16_101 = arith.constant 16 : index
    %142 = vector.load %arg5[%c0_100, %c16_101] : memref<1x73xf32, #tpu.memory_space<vmem>>, vector<1x8xf32>
    %cst_102 = arith.constant dense<0.000000e+00> : vector<1x1024xf32>
    %143 = tpu.matmul %142, %141, %cst_102 {dimension_numbers = #tpu.dot_dimension_numbers<[1], [0], [0], [1], [0, 0, 1, 1], [], []>} : vector<1x8xf32>, vector<8x1024xf32>, vector<1x1024xf32> -> vector<1x1024xf32>
    %144 = arith.addf %137, %143 : vector<1x1024xf32>
    %c1_i32_103 = arith.constant 1 : i32
    %145 = tpu.dynamic_rotate %124 by %c1_i32_103 dim 1 : vector<8x1024xf32>, i32 -> vector<8x1024xf32>
    %c3_104 = arith.constant 3 : index
    %c0_105 = arith.constant 0 : index
    %146 = vector.load %arg2[%c3_104, %c0_105] : memref<9x1024xf32, #tpu.memory_space<vmem>>, vector<1x1024xf32>
    %147 = vector.broadcast %146 : vector<1x1024xf32> to vector<8x1024xf32>
    %148 = arith.mulf %145, %147 : vector<8x1024xf32>
    %c0_106 = arith.constant 0 : index
    %c24_107 = arith.constant 24 : index
    %149 = vector.load %arg5[%c0_106, %c24_107] : memref<1x73xf32, #tpu.memory_space<vmem>>, vector<1x8xf32>
    %cst_108 = arith.constant dense<0.000000e+00> : vector<1x1024xf32>
    %150 = tpu.matmul %149, %148, %cst_108 {dimension_numbers = #tpu.dot_dimension_numbers<[1], [0], [0], [1], [0, 0, 1, 1], [], []>} : vector<1x8xf32>, vector<8x1024xf32>, vector<1x1024xf32> -> vector<1x1024xf32>
    %151 = arith.addf %144, %150 : vector<1x1024xf32>
    %c0_109 = arith.constant 0 : index
    %c32_110 = arith.constant 32 : index
    %152 = vector.load %arg5[%c0_109, %c32_110] : memref<1x73xf32, #tpu.memory_space<vmem>>, vector<1x8xf32>
    %cst_111 = arith.constant dense<0.000000e+00> : vector<1x1024xf32>
    %153 = tpu.matmul %152, %124, %cst_111 {dimension_numbers = #tpu.dot_dimension_numbers<[1], [0], [0], [1], [0, 0, 1, 1], [], []>} : vector<1x8xf32>, vector<8x1024xf32>, vector<1x1024xf32> -> vector<1x1024xf32>
    %154 = arith.addf %151, %153 : vector<1x1024xf32>
    %c1023_i32_112 = arith.constant 1023 : i32
    %155 = tpu.dynamic_rotate %124 by %c1023_i32_112 dim 1 : vector<8x1024xf32>, i32 -> vector<8x1024xf32>
    %c5_113 = arith.constant 5 : index
    %c0_114 = arith.constant 0 : index
    %156 = vector.load %arg2[%c5_113, %c0_114] : memref<9x1024xf32, #tpu.memory_space<vmem>>, vector<1x1024xf32>
    %157 = vector.broadcast %156 : vector<1x1024xf32> to vector<8x1024xf32>
    %158 = arith.mulf %155, %157 : vector<8x1024xf32>
    %c0_115 = arith.constant 0 : index
    %c40_116 = arith.constant 40 : index
    %159 = vector.load %arg5[%c0_115, %c40_116] : memref<1x73xf32, #tpu.memory_space<vmem>>, vector<1x8xf32>
    %cst_117 = arith.constant dense<0.000000e+00> : vector<1x1024xf32>
    %160 = tpu.matmul %159, %158, %cst_117 {dimension_numbers = #tpu.dot_dimension_numbers<[1], [0], [0], [1], [0, 0, 1, 1], [], []>} : vector<1x8xf32>, vector<8x1024xf32>, vector<1x1024xf32> -> vector<1x1024xf32>
    %161 = arith.addf %154, %160 : vector<1x1024xf32>
    %c1009_i32_118 = arith.constant 1009 : i32
    %162 = tpu.dynamic_rotate %124 by %c1009_i32_118 dim 1 : vector<8x1024xf32>, i32 -> vector<8x1024xf32>
    %c6_119 = arith.constant 6 : index
    %c0_120 = arith.constant 0 : index
    %163 = vector.load %arg2[%c6_119, %c0_120] : memref<9x1024xf32, #tpu.memory_space<vmem>>, vector<1x1024xf32>
    %164 = vector.broadcast %163 : vector<1x1024xf32> to vector<8x1024xf32>
    %165 = arith.mulf %162, %164 : vector<8x1024xf32>
    %c0_121 = arith.constant 0 : index
    %c48_122 = arith.constant 48 : index
    %166 = vector.load %arg5[%c0_121, %c48_122] : memref<1x73xf32, #tpu.memory_space<vmem>>, vector<1x8xf32>
    %cst_123 = arith.constant dense<0.000000e+00> : vector<1x1024xf32>
    %167 = tpu.matmul %166, %165, %cst_123 {dimension_numbers = #tpu.dot_dimension_numbers<[1], [0], [0], [1], [0, 0, 1, 1], [], []>} : vector<1x8xf32>, vector<8x1024xf32>, vector<1x1024xf32> -> vector<1x1024xf32>
    %168 = arith.addf %161, %167 : vector<1x1024xf32>
    %c1008_i32_124 = arith.constant 1008 : i32
    %169 = tpu.dynamic_rotate %124 by %c1008_i32_124 dim 1 : vector<8x1024xf32>, i32 -> vector<8x1024xf32>
    %c7_125 = arith.constant 7 : index
    %c0_126 = arith.constant 0 : index
    %170 = vector.load %arg2[%c7_125, %c0_126] : memref<9x1024xf32, #tpu.memory_space<vmem>>, vector<1x1024xf32>
    %171 = vector.broadcast %170 : vector<1x1024xf32> to vector<8x1024xf32>
    %172 = arith.mulf %169, %171 : vector<8x1024xf32>
    %c0_127 = arith.constant 0 : index
    %c56_128 = arith.constant 56 : index
    %173 = vector.load %arg5[%c0_127, %c56_128] : memref<1x73xf32, #tpu.memory_space<vmem>>, vector<1x8xf32>
    %cst_129 = arith.constant dense<0.000000e+00> : vector<1x1024xf32>
    %174 = tpu.matmul %173, %172, %cst_129 {dimension_numbers = #tpu.dot_dimension_numbers<[1], [0], [0], [1], [0, 0, 1, 1], [], []>} : vector<1x8xf32>, vector<8x1024xf32>, vector<1x1024xf32> -> vector<1x1024xf32>
    %175 = arith.addf %168, %174 : vector<1x1024xf32>
    %c1007_i32_130 = arith.constant 1007 : i32
    %176 = tpu.dynamic_rotate %124 by %c1007_i32_130 dim 1 : vector<8x1024xf32>, i32 -> vector<8x1024xf32>
    %c8_131 = arith.constant 8 : index
    %c0_132 = arith.constant 0 : index
    %177 = vector.load %arg2[%c8_131, %c0_132] : memref<9x1024xf32, #tpu.memory_space<vmem>>, vector<1x1024xf32>
    %178 = vector.broadcast %177 : vector<1x1024xf32> to vector<8x1024xf32>
    %179 = arith.mulf %176, %178 : vector<8x1024xf32>
    %c0_133 = arith.constant 0 : index
    %c64_134 = arith.constant 64 : index
    %180 = vector.load %arg5[%c0_133, %c64_134] : memref<1x73xf32, #tpu.memory_space<vmem>>, vector<1x8xf32>
    %cst_135 = arith.constant dense<0.000000e+00> : vector<1x1024xf32>
    %181 = tpu.matmul %180, %179, %cst_135 {dimension_numbers = #tpu.dot_dimension_numbers<[1], [0], [0], [1], [0, 0, 1, 1], [], []>} : vector<1x8xf32>, vector<8x1024xf32>, vector<1x1024xf32> -> vector<1x1024xf32>
    %182 = arith.addf %175, %181 : vector<1x1024xf32>
    %c0_136 = arith.constant 0 : index
    %c72_137 = arith.constant 72 : index
    %183 = vector.load %arg5[%c0_136, %c72_137] : memref<1x73xf32, #tpu.memory_space<vmem>>, vector<1x1xf32>
    %184 = vector.broadcast %183 : vector<1x1xf32> to vector<1x1024xf32>
    %185 = arith.addf %182, %184 : vector<1x1024xf32>
    %c0_138 = arith.constant 0 : index
    %c0_139 = arith.constant 0 : index
    %186 = vector.load %arg6[%c0_138, %c0_139] : memref<1x1024xf32, #tpu.memory_space<vmem>>, vector<1x1024xf32>
    tpu.vector_store %arg6[%c0_138, %c0_139], %185 {strides = array<i32>} : memref<1x1024xf32, #tpu.memory_space<vmem>>, vector<1x1024xf32>,
    return
  }
  func.func @transform_0(%arg0: i32) -> (i32, i32) {
    %c0_i32 = arith.constant 0 : i32
    %c0_i32_0 = arith.constant 0 : i32
    %c0_i32_1 = arith.constant 0 : i32
    return %c0_i32, %c0_i32_0 : i32, i32
  }
  func.func @transform_1(%arg0: i32) -> (i32, i32) {
    %c0_i32 = arith.constant 0 : i32
    %c0_i32_0 = arith.constant 0 : i32
    %c0_i32_1 = arith.constant 0 : i32
    return %c0_i32, %c0_i32_0 : i32, i32
  }
  func.func @transform_2(%arg0: i32) -> (i32, i32) {
    %c0_i32 = arith.constant 0 : i32
    %c0_i32_0 = arith.constant 0 : i32
    %c0_i32_1 = arith.constant 0 : i32
    return %c0_i32, %c0_i32_0 : i32, i32
  }
  func.func @transform_3(%arg0: i32) -> (i32, i32) {
    %c0_i32 = arith.constant 0 : i32
    %c0_i32_0 = arith.constant 0 : i32
    %c0_i32_1 = arith.constant 0 : i32
    return %c0_i32, %c0_i32_0 : i32, i32
  }
  func.func @transform_4(%arg0: i32) -> (i32, i32) {
    %c0_i32 = arith.constant 0 : i32
    %c0_i32_0 = arith.constant 0 : i32
    %c0_i32_1 = arith.constant 0 : i32
    return %c0_i32, %c0_i32_0 : i32, i32
  }
  func.func @transform_5(%arg0: i32) -> (i32, i32) {
    %c0_i32 = arith.constant 0 : i32
    %c0_i32_0 = arith.constant 0 : i32
    %c0_i32_1 = arith.constant 0 : i32
    return %c0_i32, %c0_i32_0 : i32, i32
  }
}

module attributes {stable_mosaic.version = 11 : i64} {
  func.func @_conv_stack_kernel(%arg0: i32, %arg1: memref<2x512xf32, #tpu.memory_space<vmem>>, %arg2: memref<9x512xf32, #tpu.memory_space<vmem>>, %arg3: memref<8x19xf32, #tpu.memory_space<vmem>>, %arg4: memref<8x73xf32, #tpu.memory_space<vmem>>, %arg5: memref<2x73xf32, #tpu.memory_space<vmem>>, %arg6: memref<2x512xf32, #tpu.memory_space<vmem>>) attributes {dimension_semantics = [#tpu.dimension_semantics<arbitrary>], iteration_bounds = array<i64: 1>, scalar_prefetch = 0 : i64, scratch_operands = 0 : i64, tpu.core_type = #tpu.core_type<tc>, window_params = [{pipeline_mode = #tpu.pipeline_mode<synchronous>, transform_indices = @transform_0, window_bounds = array<i64: 2, 512>}, {pipeline_mode = #tpu.pipeline_mode<synchronous>, transform_indices = @transform_1, window_bounds = array<i64: 9, 512>}, {pipeline_mode = #tpu.pipeline_mode<synchronous>, transform_indices = @transform_2, window_bounds = array<i64: 8, 19>}, {pipeline_mode = #tpu.pipeline_mode<synchronous>, transform_indices = @transform_3, window_bounds = array<i64: 8, 73>}, {pipeline_mode = #tpu.pipeline_mode<synchronous>, transform_indices = @transform_4, window_bounds = array<i64: 2, 73>}, {pipeline_mode = #tpu.pipeline_mode<synchronous>, transform_indices = @transform_5, window_bounds = array<i64: 2, 512>}]} {
    %c0 = arith.constant 0 : index
    %c0_0 = arith.constant 0 : index
    %0 = vector.load %arg1[%c0, %c0_0] : memref<2x512xf32, #tpu.memory_space<vmem>>, vector<2x512xf32>
    %c17_i32 = arith.constant 17 : i32
    %1 = tpu.dynamic_rotate %0 by %c17_i32 dim 1 : vector<2x512xf32>, i32 -> vector<2x512xf32>
    %c0_1 = arith.constant 0 : index
    %c0_2 = arith.constant 0 : index
    %2 = vector.load %arg2[%c0_1, %c0_2] : memref<9x512xf32, #tpu.memory_space<vmem>>, vector<1x512xf32>
    %3 = vector.broadcast %2 : vector<1x512xf32> to vector<2x512xf32>
    %4 = arith.mulf %1, %3 : vector<2x512xf32>
    %c0_3 = arith.constant 0 : index
    %c0_4 = arith.constant 0 : index
    %5 = vector.load %arg3[%c0_3, %c0_4] : memref<8x19xf32, #tpu.memory_space<vmem>>, vector<8x2xf32>
    %cst = arith.constant dense<0.000000e+00> : vector<8x512xf32>
    %6 = tpu.matmul %5, %4, %cst {dimension_numbers = #tpu.dot_dimension_numbers<[1], [0], [0], [1], [0, 0, 1, 1], [], []>} : vector<8x2xf32>, vector<2x512xf32>, vector<8x512xf32> -> vector<8x512xf32>
    %c16_i32 = arith.constant 16 : i32
    %7 = tpu.dynamic_rotate %0 by %c16_i32 dim 1 : vector<2x512xf32>, i32 -> vector<2x512xf32>
    %c1 = arith.constant 1 : index
    %c0_5 = arith.constant 0 : index
    %8 = vector.load %arg2[%c1, %c0_5] : memref<9x512xf32, #tpu.memory_space<vmem>>, vector<1x512xf32>
    %9 = vector.broadcast %8 : vector<1x512xf32> to vector<2x512xf32>
    %10 = arith.mulf %7, %9 : vector<2x512xf32>
    %c0_6 = arith.constant 0 : index
    %c2 = arith.constant 2 : index
    %11 = vector.load %arg3[%c0_6, %c2] : memref<8x19xf32, #tpu.memory_space<vmem>>, vector<8x2xf32>
    %cst_7 = arith.constant dense<0.000000e+00> : vector<8x512xf32>
    %12 = tpu.matmul %11, %10, %cst_7 {dimension_numbers = #tpu.dot_dimension_numbers<[1], [0], [0], [1], [0, 0, 1, 1], [], []>} : vector<8x2xf32>, vector<2x512xf32>, vector<8x512xf32> -> vector<8x512xf32>
    %13 = arith.addf %6, %12 : vector<8x512xf32>
    %c15_i32 = arith.constant 15 : i32
    %14 = tpu.dynamic_rotate %0 by %c15_i32 dim 1 : vector<2x512xf32>, i32 -> vector<2x512xf32>
    %c2_8 = arith.constant 2 : index
    %c0_9 = arith.constant 0 : index
    %15 = vector.load %arg2[%c2_8, %c0_9] : memref<9x512xf32, #tpu.memory_space<vmem>>, vector<1x512xf32>
    %16 = vector.broadcast %15 : vector<1x512xf32> to vector<2x512xf32>
    %17 = arith.mulf %14, %16 : vector<2x512xf32>
    %c0_10 = arith.constant 0 : index
    %c4 = arith.constant 4 : index
    %18 = vector.load %arg3[%c0_10, %c4] : memref<8x19xf32, #tpu.memory_space<vmem>>, vector<8x2xf32>
    %cst_11 = arith.constant dense<0.000000e+00> : vector<8x512xf32>
    %19 = tpu.matmul %18, %17, %cst_11 {dimension_numbers = #tpu.dot_dimension_numbers<[1], [0], [0], [1], [0, 0, 1, 1], [], []>} : vector<8x2xf32>, vector<2x512xf32>, vector<8x512xf32> -> vector<8x512xf32>
    %20 = arith.addf %13, %19 : vector<8x512xf32>
    %c1_i32 = arith.constant 1 : i32
    %21 = tpu.dynamic_rotate %0 by %c1_i32 dim 1 : vector<2x512xf32>, i32 -> vector<2x512xf32>
    %c3 = arith.constant 3 : index
    %c0_12 = arith.constant 0 : index
    %22 = vector.load %arg2[%c3, %c0_12] : memref<9x512xf32, #tpu.memory_space<vmem>>, vector<1x512xf32>
    %23 = vector.broadcast %22 : vector<1x512xf32> to vector<2x512xf32>
    %24 = arith.mulf %21, %23 : vector<2x512xf32>
    %c0_13 = arith.constant 0 : index
    %c6 = arith.constant 6 : index
    %25 = vector.load %arg3[%c0_13, %c6] : memref<8x19xf32, #tpu.memory_space<vmem>>, vector<8x2xf32>
    %cst_14 = arith.constant dense<0.000000e+00> : vector<8x512xf32>
    %26 = tpu.matmul %25, %24, %cst_14 {dimension_numbers = #tpu.dot_dimension_numbers<[1], [0], [0], [1], [0, 0, 1, 1], [], []>} : vector<8x2xf32>, vector<2x512xf32>, vector<8x512xf32> -> vector<8x512xf32>
    %27 = arith.addf %20, %26 : vector<8x512xf32>
    %c0_15 = arith.constant 0 : index
    %c8 = arith.constant 8 : index
    %28 = vector.load %arg3[%c0_15, %c8] : memref<8x19xf32, #tpu.memory_space<vmem>>, vector<8x2xf32>
    %cst_16 = arith.constant dense<0.000000e+00> : vector<8x512xf32>
    %29 = tpu.matmul %28, %0, %cst_16 {dimension_numbers = #tpu.dot_dimension_numbers<[1], [0], [0], [1], [0, 0, 1, 1], [], []>} : vector<8x2xf32>, vector<2x512xf32>, vector<8x512xf32> -> vector<8x512xf32>
    %30 = arith.addf %27, %29 : vector<8x512xf32>
    %c511_i32 = arith.constant 511 : i32
    %31 = tpu.dynamic_rotate %0 by %c511_i32 dim 1 : vector<2x512xf32>, i32 -> vector<2x512xf32>
    %c5 = arith.constant 5 : index
    %c0_17 = arith.constant 0 : index
    %32 = vector.load %arg2[%c5, %c0_17] : memref<9x512xf32, #tpu.memory_space<vmem>>, vector<1x512xf32>
    %33 = vector.broadcast %32 : vector<1x512xf32> to vector<2x512xf32>
    %34 = arith.mulf %31, %33 : vector<2x512xf32>
    %c0_18 = arith.constant 0 : index
    %c10 = arith.constant 10 : index
    %35 = vector.load %arg3[%c0_18, %c10] : memref<8x19xf32, #tpu.memory_space<vmem>>, vector<8x2xf32>
    %cst_19 = arith.constant dense<0.000000e+00> : vector<8x512xf32>
    %36 = tpu.matmul %35, %34, %cst_19 {dimension_numbers = #tpu.dot_dimension_numbers<[1], [0], [0], [1], [0, 0, 1, 1], [], []>} : vector<8x2xf32>, vector<2x512xf32>, vector<8x512xf32> -> vector<8x512xf32>
    %37 = arith.addf %30, %36 : vector<8x512xf32>
    %c497_i32 = arith.constant 497 : i32
    %38 = tpu.dynamic_rotate %0 by %c497_i32 dim 1 : vector<2x512xf32>, i32 -> vector<2x512xf32>
    %c6_20 = arith.constant 6 : index
    %c0_21 = arith.constant 0 : index
    %39 = vector.load %arg2[%c6_20, %c0_21] : memref<9x512xf32, #tpu.memory_space<vmem>>, vector<1x512xf32>
    %40 = vector.broadcast %39 : vector<1x512xf32> to vector<2x512xf32>
    %41 = arith.mulf %38, %40 : vector<2x512xf32>
    %c0_22 = arith.constant 0 : index
    %c12 = arith.constant 12 : index
    %42 = vector.load %arg3[%c0_22, %c12] : memref<8x19xf32, #tpu.memory_space<vmem>>, vector<8x2xf32>
    %cst_23 = arith.constant dense<0.000000e+00> : vector<8x512xf32>
    %43 = tpu.matmul %42, %41, %cst_23 {dimension_numbers = #tpu.dot_dimension_numbers<[1], [0], [0], [1], [0, 0, 1, 1], [], []>} : vector<8x2xf32>, vector<2x512xf32>, vector<8x512xf32> -> vector<8x512xf32>
    %44 = arith.addf %37, %43 : vector<8x512xf32>
    %c496_i32 = arith.constant 496 : i32
    %45 = tpu.dynamic_rotate %0 by %c496_i32 dim 1 : vector<2x512xf32>, i32 -> vector<2x512xf32>
    %c7 = arith.constant 7 : index
    %c0_24 = arith.constant 0 : index
    %46 = vector.load %arg2[%c7, %c0_24] : memref<9x512xf32, #tpu.memory_space<vmem>>, vector<1x512xf32>
    %47 = vector.broadcast %46 : vector<1x512xf32> to vector<2x512xf32>
    %48 = arith.mulf %45, %47 : vector<2x512xf32>
    %c0_25 = arith.constant 0 : index
    %c14 = arith.constant 14 : index
    %49 = vector.load %arg3[%c0_25, %c14] : memref<8x19xf32, #tpu.memory_space<vmem>>, vector<8x2xf32>
    %cst_26 = arith.constant dense<0.000000e+00> : vector<8x512xf32>
    %50 = tpu.matmul %49, %48, %cst_26 {dimension_numbers = #tpu.dot_dimension_numbers<[1], [0], [0], [1], [0, 0, 1, 1], [], []>} : vector<8x2xf32>, vector<2x512xf32>, vector<8x512xf32> -> vector<8x512xf32>
    %51 = arith.addf %44, %50 : vector<8x512xf32>
    %c495_i32 = arith.constant 495 : i32
    %52 = tpu.dynamic_rotate %0 by %c495_i32 dim 1 : vector<2x512xf32>, i32 -> vector<2x512xf32>
    %c8_27 = arith.constant 8 : index
    %c0_28 = arith.constant 0 : index
    %53 = vector.load %arg2[%c8_27, %c0_28] : memref<9x512xf32, #tpu.memory_space<vmem>>, vector<1x512xf32>
    %54 = vector.broadcast %53 : vector<1x512xf32> to vector<2x512xf32>
    %55 = arith.mulf %52, %54 : vector<2x512xf32>
    %c0_29 = arith.constant 0 : index
    %c16 = arith.constant 16 : index
    %56 = vector.load %arg3[%c0_29, %c16] : memref<8x19xf32, #tpu.memory_space<vmem>>, vector<8x2xf32>
    %cst_30 = arith.constant dense<0.000000e+00> : vector<8x512xf32>
    %57 = tpu.matmul %56, %55, %cst_30 {dimension_numbers = #tpu.dot_dimension_numbers<[1], [0], [0], [1], [0, 0, 1, 1], [], []>} : vector<8x2xf32>, vector<2x512xf32>, vector<8x512xf32> -> vector<8x512xf32>
    %58 = arith.addf %51, %57 : vector<8x512xf32>
    %c0_31 = arith.constant 0 : index
    %c18 = arith.constant 18 : index
    %59 = vector.load %arg3[%c0_31, %c18] : memref<8x19xf32, #tpu.memory_space<vmem>>, vector<8x1xf32>
    %60 = vector.broadcast %59 : vector<8x1xf32> to vector<8x512xf32>
    %61 = arith.addf %58, %60 : vector<8x512xf32>
    %cst_32 = arith.constant 0.000000e+00 : f32
    %62 = vector.broadcast %cst_32 : f32 to vector<8x512xf32>
    %63 = arith.cmpf ogt, %61, %62 : vector<8x512xf32>
    %cst_33 = arith.constant 2.000000e-01 : f32
    %64 = vector.broadcast %cst_33 : f32 to vector<8x512xf32>
    %65 = arith.mulf %64, %61 : vector<8x512xf32>
    %66 = arith.select %63, %61, %65 : vector<8x512xi1>, vector<8x512xf32>
    %c17_i32_34 = arith.constant 17 : i32
    %67 = tpu.dynamic_rotate %66 by %c17_i32_34 dim 1 : vector<8x512xf32>, i32 -> vector<8x512xf32>
    %c0_35 = arith.constant 0 : index
    %c0_36 = arith.constant 0 : index
    %68 = vector.load %arg2[%c0_35, %c0_36] : memref<9x512xf32, #tpu.memory_space<vmem>>, vector<1x512xf32>
    %69 = vector.broadcast %68 : vector<1x512xf32> to vector<8x512xf32>
    %70 = arith.mulf %67, %69 : vector<8x512xf32>
    %c0_37 = arith.constant 0 : index
    %c0_38 = arith.constant 0 : index
    %71 = vector.load %arg4[%c0_37, %c0_38] : memref<8x73xf32, #tpu.memory_space<vmem>>, vector<8x8xf32>
    %cst_39 = arith.constant dense<0.000000e+00> : vector<8x512xf32>
    %72 = tpu.matmul %71, %70, %cst_39 {dimension_numbers = #tpu.dot_dimension_numbers<[1], [0], [0], [1], [0, 0, 1, 1], [], []>} : vector<8x8xf32>, vector<8x512xf32>, vector<8x512xf32> -> vector<8x512xf32>
    %c16_i32_40 = arith.constant 16 : i32
    %73 = tpu.dynamic_rotate %66 by %c16_i32_40 dim 1 : vector<8x512xf32>, i32 -> vector<8x512xf32>
    %c1_41 = arith.constant 1 : index
    %c0_42 = arith.constant 0 : index
    %74 = vector.load %arg2[%c1_41, %c0_42] : memref<9x512xf32, #tpu.memory_space<vmem>>, vector<1x512xf32>
    %75 = vector.broadcast %74 : vector<1x512xf32> to vector<8x512xf32>
    %76 = arith.mulf %73, %75 : vector<8x512xf32>
    %c0_43 = arith.constant 0 : index
    %c8_44 = arith.constant 8 : index
    %77 = vector.load %arg4[%c0_43, %c8_44] : memref<8x73xf32, #tpu.memory_space<vmem>>, vector<8x8xf32>
    %cst_45 = arith.constant dense<0.000000e+00> : vector<8x512xf32>
    %78 = tpu.matmul %77, %76, %cst_45 {dimension_numbers = #tpu.dot_dimension_numbers<[1], [0], [0], [1], [0, 0, 1, 1], [], []>} : vector<8x8xf32>, vector<8x512xf32>, vector<8x512xf32> -> vector<8x512xf32>
    %79 = arith.addf %72, %78 : vector<8x512xf32>
    %c15_i32_46 = arith.constant 15 : i32
    %80 = tpu.dynamic_rotate %66 by %c15_i32_46 dim 1 : vector<8x512xf32>, i32 -> vector<8x512xf32>
    %c2_47 = arith.constant 2 : index
    %c0_48 = arith.constant 0 : index
    %81 = vector.load %arg2[%c2_47, %c0_48] : memref<9x512xf32, #tpu.memory_space<vmem>>, vector<1x512xf32>
    %82 = vector.broadcast %81 : vector<1x512xf32> to vector<8x512xf32>
    %83 = arith.mulf %80, %82 : vector<8x512xf32>
    %c0_49 = arith.constant 0 : index
    %c16_50 = arith.constant 16 : index
    %84 = vector.load %arg4[%c0_49, %c16_50] : memref<8x73xf32, #tpu.memory_space<vmem>>, vector<8x8xf32>
    %cst_51 = arith.constant dense<0.000000e+00> : vector<8x512xf32>
    %85 = tpu.matmul %84, %83, %cst_51 {dimension_numbers = #tpu.dot_dimension_numbers<[1], [0], [0], [1], [0, 0, 1, 1], [], []>} : vector<8x8xf32>, vector<8x512xf32>, vector<8x512xf32> -> vector<8x512xf32>
    %86 = arith.addf %79, %85 : vector<8x512xf32>
    %c1_i32_52 = arith.constant 1 : i32
    %87 = tpu.dynamic_rotate %66 by %c1_i32_52 dim 1 : vector<8x512xf32>, i32 -> vector<8x512xf32>
    %c3_53 = arith.constant 3 : index
    %c0_54 = arith.constant 0 : index
    %88 = vector.load %arg2[%c3_53, %c0_54] : memref<9x512xf32, #tpu.memory_space<vmem>>, vector<1x512xf32>
    %89 = vector.broadcast %88 : vector<1x512xf32> to vector<8x512xf32>
    %90 = arith.mulf %87, %89 : vector<8x512xf32>
    %c0_55 = arith.constant 0 : index
    %c24 = arith.constant 24 : index
    %91 = vector.load %arg4[%c0_55, %c24] : memref<8x73xf32, #tpu.memory_space<vmem>>, vector<8x8xf32>
    %cst_56 = arith.constant dense<0.000000e+00> : vector<8x512xf32>
    %92 = tpu.matmul %91, %90, %cst_56 {dimension_numbers = #tpu.dot_dimension_numbers<[1], [0], [0], [1], [0, 0, 1, 1], [], []>} : vector<8x8xf32>, vector<8x512xf32>, vector<8x512xf32> -> vector<8x512xf32>
    %93 = arith.addf %86, %92 : vector<8x512xf32>
    %c0_57 = arith.constant 0 : index
    %c32 = arith.constant 32 : index
    %94 = vector.load %arg4[%c0_57, %c32] : memref<8x73xf32, #tpu.memory_space<vmem>>, vector<8x8xf32>
    %cst_58 = arith.constant dense<0.000000e+00> : vector<8x512xf32>
    %95 = tpu.matmul %94, %66, %cst_58 {dimension_numbers = #tpu.dot_dimension_numbers<[1], [0], [0], [1], [0, 0, 1, 1], [], []>} : vector<8x8xf32>, vector<8x512xf32>, vector<8x512xf32> -> vector<8x512xf32>
    %96 = arith.addf %93, %95 : vector<8x512xf32>
    %c511_i32_59 = arith.constant 511 : i32
    %97 = tpu.dynamic_rotate %66 by %c511_i32_59 dim 1 : vector<8x512xf32>, i32 -> vector<8x512xf32>
    %c5_60 = arith.constant 5 : index
    %c0_61 = arith.constant 0 : index
    %98 = vector.load %arg2[%c5_60, %c0_61] : memref<9x512xf32, #tpu.memory_space<vmem>>, vector<1x512xf32>
    %99 = vector.broadcast %98 : vector<1x512xf32> to vector<8x512xf32>
    %100 = arith.mulf %97, %99 : vector<8x512xf32>
    %c0_62 = arith.constant 0 : index
    %c40 = arith.constant 40 : index
    %101 = vector.load %arg4[%c0_62, %c40] : memref<8x73xf32, #tpu.memory_space<vmem>>, vector<8x8xf32>
    %cst_63 = arith.constant dense<0.000000e+00> : vector<8x512xf32>
    %102 = tpu.matmul %101, %100, %cst_63 {dimension_numbers = #tpu.dot_dimension_numbers<[1], [0], [0], [1], [0, 0, 1, 1], [], []>} : vector<8x8xf32>, vector<8x512xf32>, vector<8x512xf32> -> vector<8x512xf32>
    %103 = arith.addf %96, %102 : vector<8x512xf32>
    %c497_i32_64 = arith.constant 497 : i32
    %104 = tpu.dynamic_rotate %66 by %c497_i32_64 dim 1 : vector<8x512xf32>, i32 -> vector<8x512xf32>
    %c6_65 = arith.constant 6 : index
    %c0_66 = arith.constant 0 : index
    %105 = vector.load %arg2[%c6_65, %c0_66] : memref<9x512xf32, #tpu.memory_space<vmem>>, vector<1x512xf32>
    %106 = vector.broadcast %105 : vector<1x512xf32> to vector<8x512xf32>
    %107 = arith.mulf %104, %106 : vector<8x512xf32>
    %c0_67 = arith.constant 0 : index
    %c48 = arith.constant 48 : index
    %108 = vector.load %arg4[%c0_67, %c48] : memref<8x73xf32, #tpu.memory_space<vmem>>, vector<8x8xf32>
    %cst_68 = arith.constant dense<0.000000e+00> : vector<8x512xf32>
    %109 = tpu.matmul %108, %107, %cst_68 {dimension_numbers = #tpu.dot_dimension_numbers<[1], [0], [0], [1], [0, 0, 1, 1], [], []>} : vector<8x8xf32>, vector<8x512xf32>, vector<8x512xf32> -> vector<8x512xf32>
    %110 = arith.addf %103, %109 : vector<8x512xf32>
    %c496_i32_69 = arith.constant 496 : i32
    %111 = tpu.dynamic_rotate %66 by %c496_i32_69 dim 1 : vector<8x512xf32>, i32 -> vector<8x512xf32>
    %c7_70 = arith.constant 7 : index
    %c0_71 = arith.constant 0 : index
    %112 = vector.load %arg2[%c7_70, %c0_71] : memref<9x512xf32, #tpu.memory_space<vmem>>, vector<1x512xf32>
    %113 = vector.broadcast %112 : vector<1x512xf32> to vector<8x512xf32>
    %114 = arith.mulf %111, %113 : vector<8x512xf32>
    %c0_72 = arith.constant 0 : index
    %c56 = arith.constant 56 : index
    %115 = vector.load %arg4[%c0_72, %c56] : memref<8x73xf32, #tpu.memory_space<vmem>>, vector<8x8xf32>
    %cst_73 = arith.constant dense<0.000000e+00> : vector<8x512xf32>
    %116 = tpu.matmul %115, %114, %cst_73 {dimension_numbers = #tpu.dot_dimension_numbers<[1], [0], [0], [1], [0, 0, 1, 1], [], []>} : vector<8x8xf32>, vector<8x512xf32>, vector<8x512xf32> -> vector<8x512xf32>
    %117 = arith.addf %110, %116 : vector<8x512xf32>
    %c495_i32_74 = arith.constant 495 : i32
    %118 = tpu.dynamic_rotate %66 by %c495_i32_74 dim 1 : vector<8x512xf32>, i32 -> vector<8x512xf32>
    %c8_75 = arith.constant 8 : index
    %c0_76 = arith.constant 0 : index
    %119 = vector.load %arg2[%c8_75, %c0_76] : memref<9x512xf32, #tpu.memory_space<vmem>>, vector<1x512xf32>
    %120 = vector.broadcast %119 : vector<1x512xf32> to vector<8x512xf32>
    %121 = arith.mulf %118, %120 : vector<8x512xf32>
    %c0_77 = arith.constant 0 : index
    %c64 = arith.constant 64 : index
    %122 = vector.load %arg4[%c0_77, %c64] : memref<8x73xf32, #tpu.memory_space<vmem>>, vector<8x8xf32>
    %cst_78 = arith.constant dense<0.000000e+00> : vector<8x512xf32>
    %123 = tpu.matmul %122, %121, %cst_78 {dimension_numbers = #tpu.dot_dimension_numbers<[1], [0], [0], [1], [0, 0, 1, 1], [], []>} : vector<8x8xf32>, vector<8x512xf32>, vector<8x512xf32> -> vector<8x512xf32>
    %124 = arith.addf %117, %123 : vector<8x512xf32>
    %c0_79 = arith.constant 0 : index
    %c72 = arith.constant 72 : index
    %125 = vector.load %arg4[%c0_79, %c72] : memref<8x73xf32, #tpu.memory_space<vmem>>, vector<8x1xf32>
    %126 = vector.broadcast %125 : vector<8x1xf32> to vector<8x512xf32>
    %127 = arith.addf %124, %126 : vector<8x512xf32>
    %cst_80 = arith.constant 0.000000e+00 : f32
    %128 = vector.broadcast %cst_80 : f32 to vector<8x512xf32>
    %129 = arith.cmpf ogt, %127, %128 : vector<8x512xf32>
    %cst_81 = arith.constant 2.000000e-01 : f32
    %130 = vector.broadcast %cst_81 : f32 to vector<8x512xf32>
    %131 = arith.mulf %130, %127 : vector<8x512xf32>
    %132 = arith.select %129, %127, %131 : vector<8x512xi1>, vector<8x512xf32>
    %c17_i32_82 = arith.constant 17 : i32
    %133 = tpu.dynamic_rotate %132 by %c17_i32_82 dim 1 : vector<8x512xf32>, i32 -> vector<8x512xf32>
    %c0_83 = arith.constant 0 : index
    %c0_84 = arith.constant 0 : index
    %134 = vector.load %arg2[%c0_83, %c0_84] : memref<9x512xf32, #tpu.memory_space<vmem>>, vector<1x512xf32>
    %135 = vector.broadcast %134 : vector<1x512xf32> to vector<8x512xf32>
    %136 = arith.mulf %133, %135 : vector<8x512xf32>
    %c0_85 = arith.constant 0 : index
    %c0_86 = arith.constant 0 : index
    %137 = vector.load %arg5[%c0_85, %c0_86] : memref<2x73xf32, #tpu.memory_space<vmem>>, vector<2x8xf32>
    %cst_87 = arith.constant dense<0.000000e+00> : vector<2x512xf32>
    %138 = tpu.matmul %137, %136, %cst_87 {dimension_numbers = #tpu.dot_dimension_numbers<[1], [0], [0], [1], [0, 0, 1, 1], [], []>} : vector<2x8xf32>, vector<8x512xf32>, vector<2x512xf32> -> vector<2x512xf32>
    %c16_i32_88 = arith.constant 16 : i32
    %139 = tpu.dynamic_rotate %132 by %c16_i32_88 dim 1 : vector<8x512xf32>, i32 -> vector<8x512xf32>
    %c1_89 = arith.constant 1 : index
    %c0_90 = arith.constant 0 : index
    %140 = vector.load %arg2[%c1_89, %c0_90] : memref<9x512xf32, #tpu.memory_space<vmem>>, vector<1x512xf32>
    %141 = vector.broadcast %140 : vector<1x512xf32> to vector<8x512xf32>
    %142 = arith.mulf %139, %141 : vector<8x512xf32>
    %c0_91 = arith.constant 0 : index
    %c8_92 = arith.constant 8 : index
    %143 = vector.load %arg5[%c0_91, %c8_92] : memref<2x73xf32, #tpu.memory_space<vmem>>, vector<2x8xf32>
    %cst_93 = arith.constant dense<0.000000e+00> : vector<2x512xf32>
    %144 = tpu.matmul %143, %142, %cst_93 {dimension_numbers = #tpu.dot_dimension_numbers<[1], [0], [0], [1], [0, 0, 1, 1], [], []>} : vector<2x8xf32>, vector<8x512xf32>, vector<2x512xf32> -> vector<2x512xf32>
    %145 = arith.addf %138, %144 : vector<2x512xf32>
    %c15_i32_94 = arith.constant 15 : i32
    %146 = tpu.dynamic_rotate %132 by %c15_i32_94 dim 1 : vector<8x512xf32>, i32 -> vector<8x512xf32>
    %c2_95 = arith.constant 2 : index
    %c0_96 = arith.constant 0 : index
    %147 = vector.load %arg2[%c2_95, %c0_96] : memref<9x512xf32, #tpu.memory_space<vmem>>, vector<1x512xf32>
    %148 = vector.broadcast %147 : vector<1x512xf32> to vector<8x512xf32>
    %149 = arith.mulf %146, %148 : vector<8x512xf32>
    %c0_97 = arith.constant 0 : index
    %c16_98 = arith.constant 16 : index
    %150 = vector.load %arg5[%c0_97, %c16_98] : memref<2x73xf32, #tpu.memory_space<vmem>>, vector<2x8xf32>
    %cst_99 = arith.constant dense<0.000000e+00> : vector<2x512xf32>
    %151 = tpu.matmul %150, %149, %cst_99 {dimension_numbers = #tpu.dot_dimension_numbers<[1], [0], [0], [1], [0, 0, 1, 1], [], []>} : vector<2x8xf32>, vector<8x512xf32>, vector<2x512xf32> -> vector<2x512xf32>
    %152 = arith.addf %145, %151 : vector<2x512xf32>
    %c1_i32_100 = arith.constant 1 : i32
    %153 = tpu.dynamic_rotate %132 by %c1_i32_100 dim 1 : vector<8x512xf32>, i32 -> vector<8x512xf32>
    %c3_101 = arith.constant 3 : index
    %c0_102 = arith.constant 0 : index
    %154 = vector.load %arg2[%c3_101, %c0_102] : memref<9x512xf32, #tpu.memory_space<vmem>>, vector<1x512xf32>
    %155 = vector.broadcast %154 : vector<1x512xf32> to vector<8x512xf32>
    %156 = arith.mulf %153, %155 : vector<8x512xf32>
    %c0_103 = arith.constant 0 : index
    %c24_104 = arith.constant 24 : index
    %157 = vector.load %arg5[%c0_103, %c24_104] : memref<2x73xf32, #tpu.memory_space<vmem>>, vector<2x8xf32>
    %cst_105 = arith.constant dense<0.000000e+00> : vector<2x512xf32>
    %158 = tpu.matmul %157, %156, %cst_105 {dimension_numbers = #tpu.dot_dimension_numbers<[1], [0], [0], [1], [0, 0, 1, 1], [], []>} : vector<2x8xf32>, vector<8x512xf32>, vector<2x512xf32> -> vector<2x512xf32>
    %159 = arith.addf %152, %158 : vector<2x512xf32>
    %c0_106 = arith.constant 0 : index
    %c32_107 = arith.constant 32 : index
    %160 = vector.load %arg5[%c0_106, %c32_107] : memref<2x73xf32, #tpu.memory_space<vmem>>, vector<2x8xf32>
    %cst_108 = arith.constant dense<0.000000e+00> : vector<2x512xf32>
    %161 = tpu.matmul %160, %132, %cst_108 {dimension_numbers = #tpu.dot_dimension_numbers<[1], [0], [0], [1], [0, 0, 1, 1], [], []>} : vector<2x8xf32>, vector<8x512xf32>, vector<2x512xf32> -> vector<2x512xf32>
    %162 = arith.addf %159, %161 : vector<2x512xf32>
    %c511_i32_109 = arith.constant 511 : i32
    %163 = tpu.dynamic_rotate %132 by %c511_i32_109 dim 1 : vector<8x512xf32>, i32 -> vector<8x512xf32>
    %c5_110 = arith.constant 5 : index
    %c0_111 = arith.constant 0 : index
    %164 = vector.load %arg2[%c5_110, %c0_111] : memref<9x512xf32, #tpu.memory_space<vmem>>, vector<1x512xf32>
    %165 = vector.broadcast %164 : vector<1x512xf32> to vector<8x512xf32>
    %166 = arith.mulf %163, %165 : vector<8x512xf32>
    %c0_112 = arith.constant 0 : index
    %c40_113 = arith.constant 40 : index
    %167 = vector.load %arg5[%c0_112, %c40_113] : memref<2x73xf32, #tpu.memory_space<vmem>>, vector<2x8xf32>
    %cst_114 = arith.constant dense<0.000000e+00> : vector<2x512xf32>
    %168 = tpu.matmul %167, %166, %cst_114 {dimension_numbers = #tpu.dot_dimension_numbers<[1], [0], [0], [1], [0, 0, 1, 1], [], []>} : vector<2x8xf32>, vector<8x512xf32>, vector<2x512xf32> -> vector<2x512xf32>
    %169 = arith.addf %162, %168 : vector<2x512xf32>
    %c497_i32_115 = arith.constant 497 : i32
    %170 = tpu.dynamic_rotate %132 by %c497_i32_115 dim 1 : vector<8x512xf32>, i32 -> vector<8x512xf32>
    %c6_116 = arith.constant 6 : index
    %c0_117 = arith.constant 0 : index
    %171 = vector.load %arg2[%c6_116, %c0_117] : memref<9x512xf32, #tpu.memory_space<vmem>>, vector<1x512xf32>
    %172 = vector.broadcast %171 : vector<1x512xf32> to vector<8x512xf32>
    %173 = arith.mulf %170, %172 : vector<8x512xf32>
    %c0_118 = arith.constant 0 : index
    %c48_119 = arith.constant 48 : index
    %174 = vector.load %arg5[%c0_118, %c48_119] : memref<2x73xf32, #tpu.memory_space<vmem>>, vector<2x8xf32>
    %cst_120 = arith.constant dense<0.000000e+00> : vector<2x512xf32>
    %175 = tpu.matmul %174, %173, %cst_120 {dimension_numbers = #tpu.dot_dimension_numbers<[1], [0], [0], [1], [0, 0, 1, 1], [], []>} : vector<2x8xf32>, vector<8x512xf32>, vector<2x512xf32> -> vector<2x512xf32>
    %176 = arith.addf %169, %175 : vector<2x512xf32>
    %c496_i32_121 = arith.constant 496 : i32
    %177 = tpu.dynamic_rotate %132 by %c496_i32_121 dim 1 : vector<8x512xf32>, i32 -> vector<8x512xf32>
    %c7_122 = arith.constant 7 : index
    %c0_123 = arith.constant 0 : index
    %178 = vector.load %arg2[%c7_122, %c0_123] : memref<9x512xf32, #tpu.memory_space<vmem>>, vector<1x512xf32>
    %179 = vector.broadcast %178 : vector<1x512xf32> to vector<8x512xf32>
    %180 = arith.mulf %177, %179 : vector<8x512xf32>
    %c0_124 = arith.constant 0 : index
    %c56_125 = arith.constant 56 : index
    %181 = vector.load %arg5[%c0_124, %c56_125] : memref<2x73xf32, #tpu.memory_space<vmem>>, vector<2x8xf32>
    %cst_126 = arith.constant dense<0.000000e+00> : vector<2x512xf32>
    %182 = tpu.matmul %181, %180, %cst_126 {dimension_numbers = #tpu.dot_dimension_numbers<[1], [0], [0], [1], [0, 0, 1, 1], [], []>} : vector<2x8xf32>, vector<8x512xf32>, vector<2x512xf32> -> vector<2x512xf32>
    %183 = arith.addf %176, %182 : vector<2x512xf32>
    %c495_i32_127 = arith.constant 495 : i32
    %184 = tpu.dynamic_rotate %132 by %c495_i32_127 dim 1 : vector<8x512xf32>, i32 -> vector<8x512xf32>
    %c8_128 = arith.constant 8 : index
    %c0_129 = arith.constant 0 : index
    %185 = vector.load %arg2[%c8_128, %c0_129] : memref<9x512xf32, #tpu.memory_space<vmem>>, vector<1x512xf32>
    %186 = vector.broadcast %185 : vector<1x512xf32> to vector<8x512xf32>
    %187 = arith.mulf %184, %186 : vector<8x512xf32>
    %c0_130 = arith.constant 0 : index
    %c64_131 = arith.constant 64 : index
    %188 = vector.load %arg5[%c0_130, %c64_131] : memref<2x73xf32, #tpu.memory_space<vmem>>, vector<2x8xf32>
    %cst_132 = arith.constant dense<0.000000e+00> : vector<2x512xf32>
    %189 = tpu.matmul %188, %187, %cst_132 {dimension_numbers = #tpu.dot_dimension_numbers<[1], [0], [0], [1], [0, 0, 1, 1], [], []>} : vector<2x8xf32>, vector<8x512xf32>, vector<2x512xf32> -> vector<2x512xf32>
    %190 = arith.addf %183, %189 : vector<2x512xf32>
    %c0_133 = arith.constant 0 : index
    %c72_134 = arith.constant 72 : index
    %191 = vector.load %arg5[%c0_133, %c72_134] : memref<2x73xf32, #tpu.memory_space<vmem>>, vector<2x1xf32>
    %192 = vector.broadcast %191 : vector<2x1xf32> to vector<2x512xf32>
    %193 = arith.addf %190, %192 : vector<2x512xf32>
    %c0_135 = arith.constant 0 : index
    %c0_136 = arith.constant 0 : index
    %194 = vector.load %arg6[%c0_135, %c0_136] : memref<2x512xf32, #tpu.memory_space<vmem>>, vector<2x512xf32>
    tpu.vector_store %arg6[%c0_135, %c0_136], %193 {strides = array<i32>} : memref<2x512xf32, #tpu.memory_space<vmem>>, vector<2x512xf32>,
    return
  }
  func.func @transform_0(%arg0: i32) -> (i32, i32) {
    %c0_i32 = arith.constant 0 : i32
    %c0_i32_0 = arith.constant 0 : i32
    %c0_i32_1 = arith.constant 0 : i32
    return %c0_i32, %c0_i32_0 : i32, i32
  }
  func.func @transform_1(%arg0: i32) -> (i32, i32) {
    %c0_i32 = arith.constant 0 : i32
    %c0_i32_0 = arith.constant 0 : i32
    %c0_i32_1 = arith.constant 0 : i32
    return %c0_i32, %c0_i32_0 : i32, i32
  }
  func.func @transform_2(%arg0: i32) -> (i32, i32) {
    %c0_i32 = arith.constant 0 : i32
    %c0_i32_0 = arith.constant 0 : i32
    %c0_i32_1 = arith.constant 0 : i32
    return %c0_i32, %c0_i32_0 : i32, i32
  }
  func.func @transform_3(%arg0: i32) -> (i32, i32) {
    %c0_i32 = arith.constant 0 : i32
    %c0_i32_0 = arith.constant 0 : i32
    %c0_i32_1 = arith.constant 0 : i32
    return %c0_i32, %c0_i32_0 : i32, i32
  }
  func.func @transform_4(%arg0: i32) -> (i32, i32) {
    %c0_i32 = arith.constant 0 : i32
    %c0_i32_0 = arith.constant 0 : i32
    %c0_i32_1 = arith.constant 0 : i32
    return %c0_i32, %c0_i32_0 : i32, i32
  }
  func.func @transform_5(%arg0: i32) -> (i32, i32) {
    %c0_i32 = arith.constant 0 : i32
    %c0_i32_0 = arith.constant 0 : i32
    %c0_i32_1 = arith.constant 0 : i32
    return %c0_i32, %c0_i32_0 : i32, i32
  }
}

module attributes {stable_mosaic.version = 11 : i64} {
  func.func @_exp_kernel(%arg0: i32, %arg1: memref<1x2x256xf32, #tpu.memory_space<vmem>>, %arg2: memref<256x64xf32, #tpu.memory_space<vmem>>, %arg3: memref<2x64xf32, #tpu.memory_space<vmem>>, %arg4: memref<64x256xf32, #tpu.memory_space<vmem>>, %arg5: memref<2x256xf32, #tpu.memory_space<vmem>>, %arg6: memref<1x2x256xf32, #tpu.memory_space<vmem>>) attributes {dimension_semantics = [#tpu.dimension_semantics<parallel>], iteration_bounds = array<i64: 2>, scalar_prefetch = 0 : i64, scratch_operands = 0 : i64, tpu.core_type = #tpu.core_type<tc>, window_params = [{transform_indices = @transform_0, window_bounds = array<i64: 1, 2, 256>}, {pipeline_mode = #tpu.pipeline_mode<synchronous>, transform_indices = @transform_1, window_bounds = array<i64: 256, 64>}, {pipeline_mode = #tpu.pipeline_mode<synchronous>, transform_indices = @transform_2, window_bounds = array<i64: 2, 64>}, {pipeline_mode = #tpu.pipeline_mode<synchronous>, transform_indices = @transform_3, window_bounds = array<i64: 64, 256>}, {pipeline_mode = #tpu.pipeline_mode<synchronous>, transform_indices = @transform_4, window_bounds = array<i64: 2, 256>}, {transform_indices = @transform_5, window_bounds = array<i64: 1, 2, 256>}]} {
    %c0 = arith.constant 0 : index
    %c0_0 = arith.constant 0 : index
    %c0_1 = arith.constant 0 : index
    %0 = vector.load %arg1[%c0, %c0_0, %c0_1] : memref<1x2x256xf32, #tpu.memory_space<vmem>>, vector<1x2x256xf32>
    %1 = vector.shape_cast %0 : vector<1x2x256xf32> to vector<2x256xf32>
    %c0_2 = arith.constant 0 : index
    %c0_3 = arith.constant 0 : index
    %2 = vector.load %arg2[%c0_2, %c0_3] : memref<256x64xf32, #tpu.memory_space<vmem>>, vector<256x64xf32>
    %cst = arith.constant dense<0.000000e+00> : vector<2x64xf32>
    %3 = tpu.matmul %1, %2, %cst {dimension_numbers = #tpu.dot_dimension_numbers<[1], [0], [0], [1], [0, 0, 1, 1], [], []>} : vector<2x256xf32>, vector<256x64xf32>, vector<2x64xf32> -> vector<2x64xf32>
    %cst_4 = arith.constant 0.001953125 : f32
    %4 = vector.broadcast %cst_4 : f32 to vector<2x64xf32>
    %5 = arith.mulf %3, %4 : vector<2x64xf32>
    %c0_5 = arith.constant 0 : index
    %c0_6 = arith.constant 0 : index
    %6 = vector.load %arg3[%c0_5, %c0_6] : memref<2x64xf32, #tpu.memory_space<vmem>>, vector<2x64xf32>
    %7 = tpu.iota {dimensions = array<i32: 0>} : vector<64x64xi32>
    %8 = arith.sitofp %7 : vector<64x64xi32> to vector<64x64xf32>
    %c0_i32 = arith.constant 0 : i32
    %c8_i32 = arith.constant 8 : i32
    %9 = arith.addi %c0_i32, %c8_i32 : i32
    %c1_i32 = arith.constant 1 : i32
    %10 = scf.for %arg7 = %c0_i32 to %9 step %c1_i32 iter_args(%arg8 = %5) -> (vector<2x64xf32>)  : i32 {
      %20 = vector.extract_strided_slice %6 {offsets = [0, 0], sizes = [1, 64], strides = [1, 1]} : vector<2x64xf32> to vector<1x64xf32>
      %21 = vector.extract_strided_slice %arg8 {offsets = [0, 0], sizes = [1, 64], strides = [1, 1]} : vector<2x64xf32> to vector<1x64xf32>
      %22 = arith.addf %20, %21 : vector<1x64xf32>
      %cst_16 = arith.constant 0.000000e+00 : f32
      %cst_17 = arith.constant 7.000000e+00 : f32
      %23 = vector.broadcast %cst_16 : f32 to vector<1x64xf32>
      %24 = arith.maximumf %23, %22 : vector<1x64xf32>
      %25 = vector.broadcast %cst_17 : f32 to vector<1x64xf32>
      %26 = arith.minimumf %25, %24 : vector<1x64xf32>
      %27 = vector.extract_strided_slice %6 {offsets = [1, 0], sizes = [1, 64], strides = [1, 1]} : vector<2x64xf32> to vector<1x64xf32>
      %28 = vector.extract_strided_slice %arg8 {offsets = [1, 0], sizes = [1, 64], strides = [1, 1]} : vector<2x64xf32> to vector<1x64xf32>
      %29 = arith.addf %27, %28 : vector<1x64xf32>
      %cst_18 = arith.constant 0.000000e+00 : f32
      %cst_19 = arith.constant 7.000000e+00 : f32
      %30 = vector.broadcast %cst_18 : f32 to vector<1x64xf32>
      %31 = arith.maximumf %30, %29 : vector<1x64xf32>
      %32 = vector.broadcast %cst_19 : f32 to vector<1x64xf32>
      %33 = arith.minimumf %32, %31 : vector<1x64xf32>
      %34 = math.floor %26 : vector<1x64xf32>
      %cst_20 = arith.constant 0.000000e+00 : f32
      %cst_21 = arith.constant 6.000000e+00 : f32
      %35 = vector.broadcast %cst_20 : f32 to vector<1x64xf32>
      %36 = arith.maximumf %35, %34 : vector<1x64xf32>
      %37 = vector.broadcast %cst_21 : f32 to vector<1x64xf32>
      %38 = arith.minimumf %37, %36 : vector<1x64xf32>
      %39 = math.floor %33 : vector<1x64xf32>
      %cst_22 = arith.constant 0.000000e+00 : f32
      %cst_23 = arith.constant 6.000000e+00 : f32
      %40 = vector.broadcast %cst_22 : f32 to vector<1x64xf32>
      %41 = arith.maximumf %40, %39 : vector<1x64xf32>
      %42 = vector.broadcast %cst_23 : f32 to vector<1x64xf32>
      %43 = arith.minimumf %42, %41 : vector<1x64xf32>
      %44 = arith.subf %26, %38 : vector<1x64xf32>
      %45 = arith.subf %33, %43 : vector<1x64xf32>
      %cst_24 = arith.constant 8.000000e+00 : f32
      %46 = vector.broadcast %cst_24 : f32 to vector<1x64xf32>
      %47 = arith.mulf %38, %46 : vector<1x64xf32>
      %48 = arith.addf %47, %43 : vector<1x64xf32>
      %49 = vector.broadcast %48 : vector<1x64xf32> to vector<64x64xf32>
      %50 = arith.cmpf oeq, %8, %49 : vector<64x64xf32>
      %cst_25 = arith.constant 1.000000e+00 : f32
      %51 = vector.broadcast %cst_25 : f32 to vector<1x64xf32>
      %52 = arith.subf %51, %44 : vector<1x64xf32>
      %cst_26 = arith.constant 1.000000e+00 : f32
      %53 = vector.broadcast %cst_26 : f32 to vector<1x64xf32>
      %54 = arith.subf %53, %45 : vector<1x64xf32>
      %55 = arith.mulf %52, %54 : vector<1x64xf32>
      %cst_27 = arith.constant 0.000000e+00 : f32
      %56 = vector.shape_cast %55 : vector<1x64xf32> to vector<1x64xf32>
      %57 = vector.broadcast %56 : vector<1x64xf32> to vector<64x64xf32>
      %58 = vector.broadcast %cst_27 : f32 to vector<64x64xf32>
      %59 = arith.select %50, %57, %58 : vector<64x64xi1>, vector<64x64xf32>
      %cst_28 = arith.constant 1.000000e+00 : f32
      %60 = vector.broadcast %cst_28 : f32 to vector<1x64xf32>
      %61 = arith.addf %48, %60 : vector<1x64xf32>
      %62 = vector.broadcast %61 : vector<1x64xf32> to vector<64x64xf32>
      %63 = arith.cmpf oeq, %8, %62 : vector<64x64xf32>
      %cst_29 = arith.constant 1.000000e+00 : f32
      %64 = vector.broadcast %cst_29 : f32 to vector<1x64xf32>
      %65 = arith.subf %64, %44 : vector<1x64xf32>
      %66 = arith.mulf %65, %45 : vector<1x64xf32>
      %cst_30 = arith.constant 0.000000e+00 : f32
      %67 = vector.shape_cast %66 : vector<1x64xf32> to vector<1x64xf32>
      %68 = vector.broadcast %67 : vector<1x64xf32> to vector<64x64xf32>
      %69 = vector.broadcast %cst_30 : f32 to vector<64x64xf32>
      %70 = arith.select %63, %68, %69 : vector<64x64xi1>, vector<64x64xf32>
      %71 = arith.addf %59, %70 : vector<64x64xf32>
      %cst_31 = arith.constant 8.000000e+00 : f32
      %72 = vector.broadcast %cst_31 : f32 to vector<1x64xf32>
      %73 = arith.addf %48, %72 : vector<1x64xf32>
      %74 = vector.broadcast %73 : vector<1x64xf32> to vector<64x64xf32>
      %75 = arith.cmpf oeq, %8, %74 : vector<64x64xf32>
      %cst_32 = arith.constant 1.000000e+00 : f32
      %76 = vector.broadcast %cst_32 : f32 to vector<1x64xf32>
      %77 = arith.subf %76, %45 : vector<1x64xf32>
      %78 = arith.mulf %44, %77 : vector<1x64xf32>
      %cst_33 = arith.constant 0.000000e+00 : f32
      %79 = vector.shape_cast %78 : vector<1x64xf32> to vector<1x64xf32>
      %80 = vector.broadcast %79 : vector<1x64xf32> to vector<64x64xf32>
      %81 = vector.broadcast %cst_33 : f32 to vector<64x64xf32>
      %82 = arith.select %75, %80, %81 : vector<64x64xi1>, vector<64x64xf32>
      %83 = arith.addf %71, %82 : vector<64x64xf32>
      %cst_34 = arith.constant 9.000000e+00 : f32
      %84 = vector.broadcast %cst_34 : f32 to vector<1x64xf32>
      %85 = arith.addf %48, %84 : vector<1x64xf32>
      %86 = vector.broadcast %85 : vector<1x64xf32> to vector<64x64xf32>
      %87 = arith.cmpf oeq, %8, %86 : vector<64x64xf32>
      %88 = arith.mulf %44, %45 : vector<1x64xf32>
      %cst_35 = arith.constant 0.000000e+00 : f32
      %89 = vector.shape_cast %88 : vector<1x64xf32> to vector<1x64xf32>
      %90 = vector.broadcast %89 : vector<1x64xf32> to vector<64x64xf32>
      %91 = vector.broadcast %cst_35 : f32 to vector<64x64xf32>
      %92 = arith.select %87, %90, %91 : vector<64x64xi1>, vector<64x64xf32>
      %93 = arith.addf %83, %92 : vector<64x64xf32>
      %cst_36 = arith.constant dense<0.000000e+00> : vector<2x64xf32>
      %94 = tpu.matmul %arg8, %93, %cst_36 {dimension_numbers = #tpu.dot_dimension_numbers<[1], [0], [0], [1], [0, 0, 1, 1], [], []>} : vector<2x64xf32>, vector<64x64xf32>, vector<2x64xf32> -> vector<2x64xf32>
      %95 = arith.addf %arg8, %94 : vector<2x64xf32>
      scf.yield %95 : vector<2x64xf32>
    }
    %c0_7 = arith.constant 0 : index
    %c0_8 = arith.constant 0 : index
    %11 = vector.load %arg4[%c0_7, %c0_8] : memref<64x256xf32, #tpu.memory_space<vmem>>, vector<64x256xf32>
    %cst_9 = arith.constant dense<0.000000e+00> : vector<2x256xf32>
    %12 = tpu.matmul %10, %11, %cst_9 {dimension_numbers = #tpu.dot_dimension_numbers<[1], [0], [0], [1], [0, 0, 1, 1], [], []>} : vector<2x64xf32>, vector<64x256xf32>, vector<2x256xf32> -> vector<2x256xf32>
    %cst_10 = arith.constant 2.000000e+00 : f32
    %13 = vector.broadcast %cst_10 : f32 to vector<2x256xf32>
    %14 = arith.mulf %12, %13 : vector<2x256xf32>
    %c0_11 = arith.constant 0 : index
    %c0_12 = arith.constant 0 : index
    %15 = vector.load %arg5[%c0_11, %c0_12] : memref<2x256xf32, #tpu.memory_space<vmem>>, vector<2x256xf32>
    %16 = arith.addf %14, %15 : vector<2x256xf32>
    %c0_13 = arith.constant 0 : index
    %c0_14 = arith.constant 0 : index
    %c0_15 = arith.constant 0 : index
    %17 = vector.load %arg6[%c0_13, %c0_14, %c0_15] : memref<1x2x256xf32, #tpu.memory_space<vmem>>, vector<1x2x256xf32>
    %18 = vector.shape_cast %17 : vector<1x2x256xf32> to vector<2x256xf32>
    %19 = vector.shape_cast %16 : vector<2x256xf32> to vector<1x2x256xf32>
    tpu.vector_store %arg6[%c0_13, %c0_14, %c0_15], %19 {strides = array<i32>} : memref<1x2x256xf32, #tpu.memory_space<vmem>>, vector<1x2x256xf32>,
    return
  }
  func.func @transform_0(%arg0: i32) -> (i32, i32, i32) {
    %c0_i32 = arith.constant 0 : i32
    %c0_i32_0 = arith.constant 0 : i32
    %c0_i32_1 = arith.constant 0 : i32
    return %arg0, %c0_i32, %c0_i32_0 : i32, i32, i32
  }
  func.func @transform_1(%arg0: i32) -> (i32, i32) {
    %c0_i32 = arith.constant 0 : i32
    %c0_i32_0 = arith.constant 0 : i32
    %c0_i32_1 = arith.constant 0 : i32
    return %c0_i32, %c0_i32_0 : i32, i32
  }
  func.func @transform_2(%arg0: i32) -> (i32, i32) {
    %c0_i32 = arith.constant 0 : i32
    %c0_i32_0 = arith.constant 0 : i32
    %c0_i32_1 = arith.constant 0 : i32
    return %c0_i32, %c0_i32_0 : i32, i32
  }
  func.func @transform_3(%arg0: i32) -> (i32, i32) {
    %c0_i32 = arith.constant 0 : i32
    %c0_i32_0 = arith.constant 0 : i32
    %c0_i32_1 = arith.constant 0 : i32
    return %c0_i32, %c0_i32_0 : i32, i32
  }
  func.func @transform_4(%arg0: i32) -> (i32, i32) {
    %c0_i32 = arith.constant 0 : i32
    %c0_i32_0 = arith.constant 0 : i32
    %c0_i32_1 = arith.constant 0 : i32
    return %c0_i32, %c0_i32_0 : i32, i32
  }
  func.func @transform_5(%arg0: i32) -> (i32, i32, i32) {
    %c0_i32 = arith.constant 0 : i32
    %c0_i32_0 = arith.constant 0 : i32
    %c0_i32_1 = arith.constant 0 : i32
    return %arg0, %c0_i32, %c0_i32_0 : i32, i32, i32
  }
}

module attributes {stable_mosaic.version = 11 : i64} {
  func.func @_pull_kernel(%arg0: i32, %arg1: i32, %arg2: memref<1x1x16x16xf32, #tpu.memory_space<vmem>>, %arg3: memref<1x2x256xf32, #tpu.memory_space<vmem>>, %arg4: memref<1x1x256xf32, #tpu.memory_space<vmem>>) attributes {dimension_semantics = [#tpu.dimension_semantics<parallel>, #tpu.dimension_semantics<parallel>], iteration_bounds = array<i64: 2, 1>, scalar_prefetch = 0 : i64, scratch_operands = 0 : i64, tpu.core_type = #tpu.core_type<tc>, window_params = [{transform_indices = @transform_0, window_bounds = array<i64: 1, 1, 16, 16>}, {transform_indices = @transform_1, window_bounds = array<i64: 1, 2, 256>}, {transform_indices = @transform_2, window_bounds = array<i64: 1, 1, 256>}]} {
    %c0 = arith.constant 0 : index
    %c0_0 = arith.constant 0 : index
    %c0_1 = arith.constant 0 : index
    %0 = vector.load %arg3[%c0, %c0_0, %c0_1] : memref<1x2x256xf32, #tpu.memory_space<vmem>>, vector<1x1x256xf32>
    %1 = vector.shape_cast %0 : vector<1x1x256xf32> to vector<1x256xf32>
    %cst = arith.constant 0.000000e+00 : f32
    %cst_2 = arith.constant 1.500000e+01 : f32
    %2 = vector.broadcast %cst : f32 to vector<1x256xf32>
    %3 = arith.maximumf %2, %1 : vector<1x256xf32>
    %4 = vector.broadcast %cst_2 : f32 to vector<1x256xf32>
    %5 = arith.minimumf %4, %3 : vector<1x256xf32>
    %c0_3 = arith.constant 0 : index
    %c1 = arith.constant 1 : index
    %c0_4 = arith.constant 0 : index
    %6 = vector.load %arg3[%c0_3, %c1, %c0_4] : memref<1x2x256xf32, #tpu.memory_space<vmem>>, vector<1x1x256xf32>
    %7 = vector.shape_cast %6 : vector<1x1x256xf32> to vector<1x256xf32>
    %cst_5 = arith.constant 0.000000e+00 : f32
    %cst_6 = arith.constant 1.500000e+01 : f32
    %8 = vector.broadcast %cst_5 : f32 to vector<1x256xf32>
    %9 = arith.maximumf %8, %7 : vector<1x256xf32>
    %10 = vector.broadcast %cst_6 : f32 to vector<1x256xf32>
    %11 = arith.minimumf %10, %9 : vector<1x256xf32>
    %12 = math.floor %5 : vector<1x256xf32>
    %cst_7 = arith.constant 0.000000e+00 : f32
    %cst_8 = arith.constant 1.400000e+01 : f32
    %13 = vector.broadcast %cst_7 : f32 to vector<1x256xf32>
    %14 = arith.maximumf %13, %12 : vector<1x256xf32>
    %15 = vector.broadcast %cst_8 : f32 to vector<1x256xf32>
    %16 = arith.minimumf %15, %14 : vector<1x256xf32>
    %17 = math.floor %11 : vector<1x256xf32>
    %cst_9 = arith.constant 0.000000e+00 : f32
    %cst_10 = arith.constant 1.400000e+01 : f32
    %18 = vector.broadcast %cst_9 : f32 to vector<1x256xf32>
    %19 = arith.maximumf %18, %17 : vector<1x256xf32>
    %20 = vector.broadcast %cst_10 : f32 to vector<1x256xf32>
    %21 = arith.minimumf %20, %19 : vector<1x256xf32>
    %22 = arith.subf %5, %16 : vector<1x256xf32>
    %23 = arith.subf %11, %21 : vector<1x256xf32>
    %24 = tpu.iota {dimensions = array<i32: 0>} : vector<16x256xi32>
    %25 = arith.sitofp %24 : vector<16x256xi32> to vector<16x256xf32>
    %26 = tpu.iota {dimensions = array<i32: 0>} : vector<16x256xi32>
    %27 = arith.sitofp %26 : vector<16x256xi32> to vector<16x256xf32>
    %28 = vector.broadcast %16 : vector<1x256xf32> to vector<16x256xf32>
    %29 = arith.cmpf oeq, %25, %28 : vector<16x256xf32>
    %cst_11 = arith.constant 1.000000e+00 : f32
    %30 = vector.broadcast %cst_11 : f32 to vector<1x256xf32>
    %31 = arith.subf %30, %22 : vector<1x256xf32>
    %cst_12 = arith.constant 0.000000e+00 : f32
    %32 = vector.shape_cast %31 : vector<1x256xf32> to vector<1x256xf32>
    %33 = vector.broadcast %32 : vector<1x256xf32> to vector<16x256xf32>
    %34 = vector.broadcast %cst_12 : f32 to vector<16x256xf32>
    %35 = arith.select %29, %33, %34 : vector<16x256xi1>, vector<16x256xf32>
    %cst_13 = arith.constant 1.000000e+00 : f32
    %36 = vector.broadcast %cst_13 : f32 to vector<1x256xf32>
    %37 = arith.addf %16, %36 : vector<1x256xf32>
    %38 = vector.broadcast %37 : vector<1x256xf32> to vector<16x256xf32>
    %39 = arith.cmpf oeq, %25, %38 : vector<16x256xf32>
    %cst_14 = arith.constant 0.000000e+00 : f32
    %40 = vector.shape_cast %22 : vector<1x256xf32> to vector<1x256xf32>
    %41 = vector.broadcast %40 : vector<1x256xf32> to vector<16x256xf32>
    %42 = vector.broadcast %cst_14 : f32 to vector<16x256xf32>
    %43 = arith.select %39, %41, %42 : vector<16x256xi1>, vector<16x256xf32>
    %44 = arith.addf %35, %43 : vector<16x256xf32>
    %45 = vector.broadcast %21 : vector<1x256xf32> to vector<16x256xf32>
    %46 = arith.cmpf oeq, %27, %45 : vector<16x256xf32>
    %cst_15 = arith.constant 1.000000e+00 : f32
    %47 = vector.broadcast %cst_15 : f32 to vector<1x256xf32>
    %48 = arith.subf %47, %23 : vector<1x256xf32>
    %cst_16 = arith.constant 0.000000e+00 : f32
    %49 = vector.shape_cast %48 : vector<1x256xf32> to vector<1x256xf32>
    %50 = vector.broadcast %49 : vector<1x256xf32> to vector<16x256xf32>
    %51 = vector.broadcast %cst_16 : f32 to vector<16x256xf32>
    %52 = arith.select %46, %50, %51 : vector<16x256xi1>, vector<16x256xf32>
    %cst_17 = arith.constant 1.000000e+00 : f32
    %53 = vector.broadcast %cst_17 : f32 to vector<1x256xf32>
    %54 = arith.addf %21, %53 : vector<1x256xf32>
    %55 = vector.broadcast %54 : vector<1x256xf32> to vector<16x256xf32>
    %56 = arith.cmpf oeq, %27, %55 : vector<16x256xf32>
    %cst_18 = arith.constant 0.000000e+00 : f32
    %57 = vector.shape_cast %23 : vector<1x256xf32> to vector<1x256xf32>
    %58 = vector.broadcast %57 : vector<1x256xf32> to vector<16x256xf32>
    %59 = vector.broadcast %cst_18 : f32 to vector<16x256xf32>
    %60 = arith.select %56, %58, %59 : vector<16x256xi1>, vector<16x256xf32>
    %61 = arith.addf %52, %60 : vector<16x256xf32>
    %c0_19 = arith.constant 0 : index
    %c0_20 = arith.constant 0 : index
    %c0_21 = arith.constant 0 : index
    %c0_22 = arith.constant 0 : index
    %62 = vector.load %arg2[%c0_19, %c0_20, %c0_21, %c0_22] : memref<1x1x16x16xf32, #tpu.memory_space<vmem>>, vector<1x1x16x16xf32>
    %63 = vector.shape_cast %62 : vector<1x1x16x16xf32> to vector<1x16x16xf32>
    %64 = vector.shape_cast %63 : vector<1x16x16xf32> to vector<16x16xf32>
    %cst_23 = arith.constant dense<0.000000e+00> : vector<16x256xf32>
    %65 = tpu.matmul %64, %61, %cst_23 {dimension_numbers = #tpu.dot_dimension_numbers<[1], [0], [0], [1], [0, 0, 1, 1], [], []>} : vector<16x16xf32>, vector<16x256xf32>, vector<16x256xf32> -> vector<16x256xf32>
    %66 = vector.shape_cast %65 : vector<16x256xf32> to vector<1x16x256xf32>
    %67 = vector.shape_cast %44 : vector<16x256xf32> to vector<1x16x256xf32>
    %68 = arith.mulf %66, %67 : vector<1x16x256xf32>
    %cst_24 = arith.constant dense<0.000000e+00> : vector<1x256xf32>
    %69 = vector.multi_reduction <add>, %68, %cst_24 [1] : vector<1x16x256xf32> to vector<1x256xf32>
    %c0_25 = arith.constant 0 : index
    %c0_26 = arith.constant 0 : index
    %c0_27 = arith.constant 0 : index
    %70 = vector.load %arg4[%c0_25, %c0_26, %c0_27] : memref<1x1x256xf32, #tpu.memory_space<vmem>>, vector<1x1x256xf32>
    %71 = vector.shape_cast %70 : vector<1x1x256xf32> to vector<1x256xf32>
    %72 = vector.shape_cast %69 : vector<1x256xf32> to vector<1x1x256xf32>
    tpu.vector_store %arg4[%c0_25, %c0_26, %c0_27], %72 {strides = array<i32>} : memref<1x1x256xf32, #tpu.memory_space<vmem>>, vector<1x1x256xf32>,
    return
  }
  func.func @transform_0(%arg0: i32, %arg1: i32) -> (i32, i32, i32, i32) {
    %c0_i32 = arith.constant 0 : i32
    %c0_i32_0 = arith.constant 0 : i32
    %c0_i32_1 = arith.constant 0 : i32
    %c0_i32_2 = arith.constant 0 : i32
    return %arg0, %c0_i32, %c0_i32_0, %c0_i32_1 : i32, i32, i32, i32
  }
  func.func @transform_1(%arg0: i32, %arg1: i32) -> (i32, i32, i32) {
    %c0_i32 = arith.constant 0 : i32
    %c0_i32_0 = arith.constant 0 : i32
    return %arg0, %c0_i32, %arg1 : i32, i32, i32
  }
  func.func @transform_2(%arg0: i32, %arg1: i32) -> (i32, i32, i32) {
    %c0_i32 = arith.constant 0 : i32
    %c0_i32_0 = arith.constant 0 : i32
    return %arg0, %c0_i32, %arg1 : i32, i32, i32
  }
}

</mosaic_0001>

<bundles_post_ra>
// kernel: sew_morph_forward.7
= control target key start
LH: loop header
LB: loop body
LE: loop exit
PB: predicated region body
PF: predicated region fallthrough
CT: control target
= control target key end

     0   :  { %s663_s9 = smov 0   ;;  %s665_s10 = smov 0   ;;  %s743_s0 = inlined_call_operand.vmem [shape: f32[2,1,16,16], index: 0, kind: input, shape index: {}]   ;;  %s744_s1 = inlined_call_operand.vmem [shape: f32[2,2,256], index: 1, kind: input, shape index: {}]   ;;  %s745_s2 = inlined_call_operand.vmem [shape: f32[2,1,256], index: 2, kind: output, shape index: {}]  }
   0x1   :  { %s667_s11 = smov 0  }
   0x2 LB: > { %s24_s12 = sadd.s32 1, %s640_s10  ;;  %p577_p0 = scmp.ge.s32.totalorder %s644_s11, 1  ;;  %s644_s11 = sphi %s667_s11, %s12_s11   ;;  %s640_s10 = sphi %s665_s10, %s747_s10   ;;  %s636_s9 = sphi %s663_s9, %s746_s9  }
   0x3   : > { %p26_p1 = scmp.ge.s32.totalorder %s24_s12, 2  ;;  %p143_p2 = scmp.lt.s32.totalorder %s644_s11, 3 }
   0x5   : > { %s749_s12 = smov (%p26_p1, %s24_s12), 0  ;;  %p144_p3 = pnand %p577_p0, %p143_p2 }
   0x6   : > { %p177_p4 = scmp.lt.s32.totalorder (!%p144_p3), %s636_s9, 1  ;;  %v646_v0 = vmov (!%p144_p3), 0.0   ;;  %v216_v1 = vlaneseq (!%p144_p3)  ;;  %vm355_vm10 = vcmask (!%p144_p3), 130048  }
   0x7   : > { %147 = sbr.rel (%p144_p3) target bundleno = 281 (0x119), region = 28  ;;  %426 = vmatprep.mubr.f32.mxu0 (!%p144_p3), %v646_v0  ;;  %432 = vmatprep.mubr.f32.mxu1 (!%p144_p3), %v646_v0 }
   0x8   : > { %v688_v4 = vshrl.u32 (!%p144_p3), %v216_v1, 7 }
   0xa   : > { %v218_v10 = vadd.s32 (!%p144_p3), 8, %v688_v4  ;;  %v692_v13 = vsub.s32 (!%p144_p3), 1, %v688_v4  ;;  %v224_v14 = vsub.s32 (!%p144_p3), 0, %v688_v4  ;;  %v696_v17 = vcvt.s32.f32 (!%p144_p3), %v688_v4 }
   0xc   : > { %v698_v18 = vcvt.s32.f32 (!%p144_p3), %v218_v10 }
   0xe   : > { %s751_s9 = smov (!%p177_p4, %s636_s9), 1 }
   0xf   : > { %s589_s13 = sshll.u32 %s751_s9, 2  ;;  %s588_s17 = sshll.u32 %s751_s9, 4 }
  0x10   : > { %s190_s16 = scalar_lea.vmem %s744_s1, %s589_s13  ;;  %s181_s20 = scalar_lea.vmem %s743_s0, %s588_s17 }
  0x11   : > { %v583_v2 = vld [vmem:[%s190_s16 + $0x1] ss:$2 sm:$0x3]  ;;  %v201_v5 = vld [vmem:[%s190_s16] ss:$2 sm:$0x3] }
  0x12   : > { %v206_v3 = vmax.f32 %v583_v2, 0.0  ;;  %v202_v6 = vmax.f32 %v201_v5, 0.0  ;;  %v353_v55 = vld [vmem:[%s181_s20] sm:$0xff]  ;;  %v354_v56 = vld [vmem:[%s181_s20 + $0x8] sm:$0xff]  ;;  %s582_s21 = sshll.u32 %s751_s9, 1 }
  0x13   : > { %s199_s24 = scalar_lea.vmem %s745_s2, %s582_s21 }
  0x14   : > { %v207_v7 = vmin.f32 %v206_v3, 15.0  ;;  %v203_v8 = vmin.f32 %v202_v6, 15.0 }
  0x16   : > { %v211_v9 = vfloor.f32 %v207_v7  ;;  %v208_v11 = vfloor.f32 %v203_v8 }
  0x18   : > { %v212_v12 = vmax.f32 %v211_v9, 0.0  ;;  %v209_v15 = vmax.f32 %v208_v11, 0.0 }
  0x1a   : > { %v213_v16 = vmin.f32 %v212_v12, 14.0  ;;  %v210_v19 = vmin.f32 %v209_v15, 14.0 }
  0x1c   : > { %v215_v20 = vsub.f32 %v207_v7, %v213_v16  ;;  %v295_v21 = vrot.slane %v213_v16, %v692_v13  ;;  %v318_v22 = vadd.f32 1.0, %v213_v16  ;;  %v291_v23 = vrot.slane %v213_v16, %v224_v14 }
  0x1d   : > { %v214_v24 = vsub.f32 %v203_v8, %v210_v19  ;;  %v225_v25 = vrot.slane %v210_v19, %v224_v14  ;;  %v252_v26 = vadd.f32 1.0, %v210_v19  ;;  %v229_v60 = vrot.slane %v210_v19, %v692_v13 }
  0x1e   : > { %vm299_vm0 = vcmp.eq.f32.partialorder %v696_v17, %v295_v21  ;;  %vm301_vm1 = vcmp.eq.f32.partialorder %v698_v18, %v295_v21  ;;  %v302_v27 = vsub.f32 1.0, %v215_v20  ;;  %v327_v28 = vrot.slane %v318_v22, %v692_v13 }
  0x1f   : > { %v342_v29 = vrot.slane %v215_v20, %v692_v13  ;;  %vm298_vm2 = vcmp.eq.f32.partialorder %v696_v17, %v291_v23  ;;  %vm300_vm3 = vcmp.eq.f32.partialorder %v698_v18, %v291_v23  ;;  %v323_v30 = vrot.slane %v318_v22, %v224_v14 }
  0x20   : > { %v311_v31 = vrot.slane %v302_v27, %v692_v13  ;;  %vm331_vm4 = vcmp.eq.f32.partialorder %v696_v17, %v327_v28  ;;  %vm333_vm5 = vcmp.eq.f32.partialorder %v698_v18, %v327_v28  ;;  %v307_v32 = vrot.slane %v302_v27, %v224_v14 }
  0x21   : > { %v346_v33 = vsel %vm331_vm4, %v342_v29, 0.0  ;;  %v348_v34 = vsel %vm333_vm5, %v342_v29, 0.0  ;;  %vm330_vm6 = vcmp.eq.f32.partialorder %v696_v17, %v323_v30  ;;  %vm332_vm7 = vcmp.eq.f32.partialorder %v698_v18, %v323_v30 }
  0x22   : > { %v315_v35 = vsel %vm299_vm0, %v311_v31, 0.0  ;;  %v317_v36 = vsel %vm301_vm1, %v311_v31, 0.0  ;;  %v314_v37 = vsel %vm298_vm2, %v307_v32, 0.0  ;;  %v316_v40 = vsel %vm300_vm3, %v307_v32, 0.0 }
  0x23   : > { %v350_v38 = vadd.f32 %v346_v33, %v315_v35  ;;  %v352_v39 = vadd.f32 %v348_v34, %v317_v36  ;;  %v338_v41 = vrot.slane %v215_v20, %v224_v14  ;;  %v236_v42 = vsub.f32 1.0, %v214_v24 }
  0x24   : > { %v257_v43 = vrot.slane %v252_v26, %v224_v14  ;;  %v272_v44 = vrot.slane %v214_v24, %v224_v14  ;;  %vm232_vm8 = vcmp.eq.f32.partialorder %v696_v17, %v225_v25  ;;  %vm234_vm11 = vcmp.eq.f32.partialorder %v698_v18, %v225_v25 }
  0x25   : > { %v590_v45 = vpack.c.bf16 %v352_v39, %v350_v38  ;;  %v345_v46 = vsel %vm330_vm6, %v338_v41, 0.0  ;;  %v347_v47 = vsel %vm332_vm7, %v338_v41, 0.0  ;;  %v241_v50 = vrot.slane %v236_v42, %v224_v14 }
  0x26   : > { %v349_v48 = vadd.f32 %v345_v46, %v314_v37  ;;  %v351_v49 = vadd.f32 %v347_v47, %v316_v40  ;;  %vm264_vm9 = vcmp.eq.f32.partialorder %v696_v17, %v257_v43  ;;  %vm266_vm12 = vcmp.eq.f32.partialorder %v698_v18, %v257_v43 }
  0x27   : > { %591 = vmatprep.subr.bf16.mxu0 %v590_v45  ;;  %594 = vmatprep.subr.bf16.mxu1 %v590_v45  ;;  %v279_v51 = vsel %vm264_vm9, %v272_v44, 0.0  ;;  %v248_v53 = vsel %vm232_vm8, %v241_v50, 0.0  ;;  %v250_v57 = vsel %vm234_vm11, %v241_v50, 0.0  ;;  %v281_v58 = vsel %vm266_vm12, %v272_v44, 0.0 }
  0x28   : > { %v592_v52 = vpack.c.bf16 %v351_v49, %v349_v48  ;;  %v283_v54 = vadd.f32 %v279_v51, %v248_v53  ;;  %v285_v59 = vadd.f32 %v281_v58, %v250_v57  ;;  %v261_v61 = vrot.slane %v252_v26, %v692_v13 }
  0x29   : > { %v245_v62 = vrot.slane %v236_v42, %v692_v13  ;;  %v276_v63 = vrot.slane %v214_v24, %v692_v13  ;;  %vm233_vm13 = vcmp.eq.f32.partialorder %v696_v17, %v229_v60  ;;  %vm235_vm15 = vcmp.eq.f32.partialorder %v698_v18, %v229_v60 }
  0x2a   : > { %593 = vmatpush1.bf16.msra.mxu0 %v592_v52  ;;  %595 = vmatpush1.bf16.msra.mxu1 %v592_v52  ;;  %vm265_vm14 = vcmp.eq.f32.partialorder %v696_v17, %v261_v61  ;;  %vm267_vm0 = vcmp.eq.f32.partialorder %v698_v18, %v261_v61  ;;  %v647_v22 = vmov 1966171168   ;;  %vm477_vm1 = vcmp.lt.s32.totalorder %v216_v1, 256 }
  0x2b   : > { %v249_v0 = vsel %vm233_vm13, %v245_v62, 0.0  ;;  %v280_v2 = vsel %vm265_vm14, %v276_v63, 0.0  ;;  %v251_v3 = vsel %vm235_vm15, %v245_v62, 0.0  ;;  %v282_v5 = vsel %vm267_vm0, %v276_v63, 0.0 }
  0x2c   : > { %v284_v6 = vadd.f32 %v280_v2, %v249_v0  ;;  %v286_v7 = vadd.f32 %v282_v5, %v251_v3  ;;  %v461_v23 = vunpack.c.l.s4 %v647_v22 }
  0x2d   : > { %584 = vmatmul.mubr.msk.f32.vlgmr.msra.gmra.mrb[0].mxu0 %vm355_vm10, %v353_v55  ;;  %585 = vmatmul.mubr.msk.f32.vlgmr.msra.gmra.mrb[0].mxu1 %vm355_vm10, %v354_v56 }
  0x2e   : > { %v462_v28 = vunpack.c.0.s8 %v461_v23 }
  0x30   : > { %v465_v33 = vsub.s32 %v462_v28, %v688_v4 }
 0x100   : > { %v428_v8 = vpop.f32.mrb[0].mxu0  ;;  %v434_v9 = vpop.f32.mrb[0].mxu1 }
 0x101   : > { %v439_v10 = vmul.f32 %v428_v8, %v283_v54  ;;  %v441_v11 = vmul.f32 %v434_v9, %v285_v59  ;;  %v430_v12 = vpop.f32.mrb[1].mxu0  ;;  %v436_v13 = vpop.f32.mrb[1].mxu1 }
 0x102   : > { %v440_v14 = vmul.f32 %v430_v12, %v284_v6  ;;  %v442_v15 = vmul.f32 %v436_v13, %v286_v7 }
 0x103   : > { %v443_v16 = vadd.f32 %v441_v11, %v439_v10 }
 0x104   : > { %v450_v17 = vadd.f32 %v442_v15, %v440_v14 }
 0x105   : > { %v444_v19 = vrot.slane %v443_v16, 4 }
 0x106   : > { %v451_v20 = vrot.slane %v450_v17, 4 }
 0x107   : > { %v445_v18 = vadd.f32 %v444_v19, %v443_v16 }
 0x108   : > { %v452_v21 = vadd.f32 %v451_v20, %v450_v17 }
 0x109   : > { %v446_v24 = vrot.slane %v445_v18, 2 }
 0x10a   : > { %v453_v25 = vrot.slane %v452_v21, 2 }
 0x10b   : > { %v447_v26 = vadd.f32 %v446_v24, %v445_v18 }
 0x10c   : > { %v454_v27 = vadd.f32 %v453_v25, %v452_v21 }
 0x10d   : > { %v448_v29 = vrot.slane %v447_v26, 1 }
 0x10e   : > { %v455_v30 = vrot.slane %v454_v27, 1 }
 0x10f   : > { %v449_v31 = vadd.f32 %v448_v29, %v447_v26 }
 0x110   : > { %v456_v32 = vadd.f32 %v455_v30, %v454_v27 }
 0x112   : > { %v459_v34 = vcombine.low %v449_v31, %v456_v32 }
 0x114   : > { %v466_v35 = vrot.slane %v459_v34, %v465_v33 }
 0x116   : > { %v473_v36 = vrot.slane %v466_v35, %v465_v33 }
 0x118   : > { %479 = vst.msk [vmem:[%s199_s24] sm:$0x3] %vm477_vm1, %v473_v36 }
 0x119 PF: > { %s12_s11 = sadd.s32 1, %s644_s11   ;;  %s746_s9 = smov %s640_s10 }
 0x11a   : > { %p9_p5 = scmp.ge.s32.totalorder %s12_s11, 4   ;;  %s747_s10 = smov %s749_s12 }
 0x11c   :  { %11 = sbr.rel (!%p9_p5) target bundleno = 2 (0x2), region = 62 }

// kernel: sew_morph_forward.6
= control target key start
LH: loop header
LB: loop body
LE: loop exit
PB: predicated region body
PF: predicated region fallthrough
CT: control target
= control target key end

     0   :  { %s995_s18 = smov 0   ;;  %s1337_s0 = inlined_call_operand.vmem [shape: f32[2,2,256], index: 0, kind: input, shape index: {}]   ;;  %s1338_s1 = inlined_call_operand.vmem [shape: f32[256,64], index: 1, kind: input, shape index: {}]   ;;  %s1339_s2 = inlined_call_operand.vmem [shape: f32[2,64], index: 2, kind: input, shape index: {}]   ;;  %s1340_s3 = inlined_call_operand.vmem [shape: f32[64,256], index: 3, kind: input, shape index: {}]   ;;  %s1341_s4 = inlined_call_operand.vmem [shape: f32[2,256], index: 4, kind: input, shape index: {}]   ;;  %s1342_s5 = inlined_call_operand.vmem [shape: f32[2,2,256], index: 5, kind: output, shape index: {}]  }
   0x1 LB: > { %s768_s19 = sadd.s32 4294967295, %s951_s18   ;;  %p772_p0 = scmp.ge.s32.totalorder %s951_s18, 1  ;;  %s951_s18 = sphi %s995_s18, %s15_s18  }
   0x2   : > { %p187_p1 = scmp.lt.s32.totalorder %s951_s18, 3 }
   0x4   : > { %p188_p2 = pnand %p772_p0, %p187_p1 }
   0x5   : > { %v242_v0 = vld [vmem:[%s1338_s1 + $0x80] sm:$0xff] (!%p188_p2)  ;;  %v243_v1 = vld [vmem:[%s1338_s1 + $0x88] sm:$0xff] (!%p188_p2)  ;;  %p215_p3 = scmp.lt.s32.totalorder (!%p188_p2), %s768_s19, 1  ;;  %v244_v5 = vld [vmem:[%s1338_s1 + $0x90] sm:$0xff] (!%p188_p2)  ;;  %v341_v50 = vlaneseq (!%p188_p2)  ;;  %s1140_s23 = smov (!%p188_p2), 0  }
   0x6   : > { %191 = sbr.rel (%p188_p2) target bundleno = 760 (0x2f8), region = 40  ;;  %v226_v2 = vld [vmem:[%s1338_s1] sm:$0xff] (!%p188_p2)  ;;  %v849_v3 = vpack.c.bf16 (!%p188_p2), %v243_v1, %v242_v0  ;;  %v227_v4 = vld [vmem:[%s1338_s1 + $0x8] sm:$0xff] (!%p188_p2)  ;;  %v245_v6 = vld [vmem:[%s1338_s1 + $0x98] sm:$0xff] (!%p188_p2) }
   0x7   : > { %v851_v7 = vpack.c.bf16 (!%p188_p2), %v227_v4, %v226_v2  ;;  %v853_v8 = vpack.c.bf16 (!%p188_p2), %v245_v6, %v244_v5  ;;  %v228_v9 = vld [vmem:[%s1338_s1 + $0x10] sm:$0xff] (!%p188_p2)  ;;  %v229_v10 = vld [vmem:[%s1338_s1 + $0x18] sm:$0xff] (!%p188_p2)  ;;  %v246_v11 = vld [vmem:[%s1338_s1 + $0xa0] sm:$0xff] (!%p188_p2)  ;;  %v1107_v51 = vshrl.u32 (!%p188_p2), %v341_v50, 7 }
   0x8   : > { %850 = vmatprep.subr.bf16.mxu0 (!%p188_p2), %v849_v3  ;;  %v247_v12 = vld [vmem:[%s1338_s1 + $0xa8] sm:$0xff] (!%p188_p2)  ;;  %v855_v13 = vpack.c.bf16 (!%p188_p2), %v229_v10, %v228_v9  ;;  %v230_v15 = vld [vmem:[%s1338_s1 + $0x20] sm:$0xff] (!%p188_p2)  ;;  %v248_v17 = vld [vmem:[%s1338_s1 + $0xb0] sm:$0xff] (!%p188_p2) }
   0x9   : > { %852 = vmatpush3.bf16.msra.mxu0 (!%p188_p2), %v851_v7  ;;  %v857_v14 = vpack.c.bf16 (!%p188_p2), %v247_v12, %v246_v11  ;;  %v231_v16 = vld [vmem:[%s1338_s1 + $0x28] sm:$0xff] (!%p188_p2)  ;;  %v249_v18 = vld [vmem:[%s1338_s1 + $0xb8] sm:$0xff] (!%p188_p2)  ;;  %v232_v21 = vld [vmem:[%s1338_s1 + $0x30] sm:$0xff] (!%p188_p2)  ;;  %v343_v52 = vadd.s32 (!%p188_p2), 8, %v1107_v51  ;;  %v344_v53 = vadd.s32 (!%p188_p2), 16, %v1107_v51  ;;  %v345_v54 = vadd.s32 (!%p188_p2), 24, %v1107_v51 }
   0xa   : > { %854 = vmatprep.subr.bf16.mxu0 (!%p188_p2), %v853_v8  ;;  %v859_v19 = vpack.c.bf16 (!%p188_p2), %v231_v16, %v230_v15  ;;  %v861_v20 = vpack.c.bf16 (!%p188_p2), %v249_v18, %v248_v17  ;;  %v233_v22 = vld [vmem:[%s1338_s1 + $0x38] sm:$0xff] (!%p188_p2)  ;;  %v250_v23 = vld [vmem:[%s1338_s1 + $0xc0] sm:$0xff] (!%p188_p2)  ;;  %v251_v24 = vld [vmem:[%s1338_s1 + $0xc8] sm:$0xff] (!%p188_p2)  ;;  %v346_v55 = vadd.s32 (!%p188_p2), 32, %v1107_v51  ;;  %v347_v56 = vadd.s32 (!%p188_p2), 40, %v1107_v51 }
   0xb   : > { %v863_v27 = vpack.c.bf16 (!%p188_p2), %v233_v22, %v232_v21  ;;  %v865_v28 = vpack.c.bf16 (!%p188_p2), %v251_v24, %v250_v23  ;;  %v234_v29 = vld [vmem:[%s1338_s1 + $0x40] sm:$0xff] (!%p188_p2)  ;;  %v235_v30 = vld [vmem:[%s1338_s1 + $0x48] sm:$0xff] (!%p188_p2)  ;;  %v252_v31 = vld [vmem:[%s1338_s1 + $0xd0] sm:$0xff] (!%p188_p2)  ;;  %v348_v57 = vadd.s32 (!%p188_p2), 48, %v1107_v51  ;;  %v349_v58 = vadd.s32 (!%p188_p2), 56, %v1107_v51 }
   0xc   : > { %v253_v32 = vld [vmem:[%s1338_s1 + $0xd8] sm:$0xff] (!%p188_p2)  ;;  %v867_v33 = vpack.c.bf16 (!%p188_p2), %v235_v30, %v234_v29  ;;  %v236_v35 = vld [vmem:[%s1338_s1 + $0x50] sm:$0xff] (!%p188_p2)  ;;  %v254_v37 = vld [vmem:[%s1338_s1 + $0xe0] sm:$0xff] (!%p188_p2)  ;;  %v1122_v60 = vcvt.s32.f32 (!%p188_p2), %v1107_v51  ;;  %v1124_v61 = vcvt.s32.f32 (!%p188_p2), %v343_v52  ;;  %v1126_v62 = vcvt.s32.f32 (!%p188_p2), %v344_v53 }
   0xd   : > { %s1345_s19 = smov (!%p215_p3, %s768_s19), 1  ;;  %856 = vmatpush3.bf16.msra.mxu0 %v855_v13  ;;  %v869_v34 = vpack.c.bf16 %v253_v32, %v252_v31  ;;  %v237_v36 = vld [vmem:[%s1338_s1 + $0x58] sm:$0xff]  ;;  %v255_v38 = vld [vmem:[%s1338_s1 + $0xe8] sm:$0xff]  ;;  %v238_v41 = vld [vmem:[%s1338_s1 + $0x60] sm:$0xff]  ;;  %v1128_v63 = vcvt.s32.f32 %v345_v54  ;;  %v1130_v0 = vcvt.s32.f32 %v346_v55  ;;  %v1132_v1 = vcvt.s32.f32 %v347_v56 }
   0xe   : > { %s784_s15 = sshll.u32 %s1345_s19, 2  ;;  %858 = vmatprep.subr.bf16.mxu0 %v857_v14  ;;  %v871_v39 = vpack.c.bf16 %v237_v36, %v236_v35  ;;  %v873_v40 = vpack.c.bf16 %v255_v38, %v254_v37  ;;  %v239_v42 = vld [vmem:[%s1338_s1 + $0x68] sm:$0xff]  ;;  %v256_v43 = vld [vmem:[%s1338_s1 + $0xf0] sm:$0xff]  ;;  %v257_v44 = vld [vmem:[%s1338_s1 + $0xf8] sm:$0xff]  ;;  %v1134_v2 = vcvt.s32.f32 %v348_v57  ;;  %v1136_v3 = vcvt.s32.f32 %v349_v58 }
   0xf   : > { %s1042_s24 = scalar_lea.vmem %s1342_s5, %s784_s15  ;;  %s219_s30 = scalar_lea.vmem %s1337_s0, %s784_s15  ;;  %v875_v45 = vpack.c.bf16 %v239_v42, %v238_v41  ;;  %v877_v46 = vpack.c.bf16 %v257_v44, %v256_v43  ;;  %v240_v47 = vld [vmem:[%s1338_s1 + $0x70] sm:$0xff]  ;;  %v241_v48 = vld [vmem:[%s1338_s1 + $0x78] sm:$0xff]  ;;  %v1119_v59 = vld [vmem:[%s1339_s2] sm:$0x3] }
  0x10   : > { %v777_v25 = vld.sshfl [vmem:[%s219_s30] sm:$0x33 pattern:$0x76325410]  ;;  %v879_v49 = vpack.c.bf16 %v241_v48, %v240_v47 }
  0x11   : > { %v266_v26 = vcombine.high %v777_v25, %v777_v25  ;;  %860 = vmatpush3.bf16.msra.mxu0 %v859_v19 }
  0x12   : > { %862 = vmatprep.subr.bf16.mxu0 %v861_v20 }
  0x13   : > { %333 = vmatprep.mubr.f32.mxu0 %v266_v26 }
  0x15   : > { %864 = vmatpush3.bf16.msra.mxu0 %v863_v27 }
  0x16   : > { %866 = vmatprep.subr.bf16.mxu0 %v865_v28 }
  0x19   : > { %868 = vmatpush3.bf16.msra.mxu0 %v867_v33 }
  0x1a   : > { %870 = vmatprep.subr.bf16.mxu0 %v869_v34 }
  0x1d   : > { %872 = vmatpush3.bf16.msra.mxu0 %v871_v39 }
  0x1e   : > { %874 = vmatprep.subr.bf16.mxu0 %v873_v40 }
  0x21   : > { %876 = vmatpush3.bf16.msra.mxu0 %v875_v45 }
  0x22   : > { %878 = vmatprep.subr.bf16.mxu0 %v877_v46 }
  0x25   : > { %880 = vmatpush3.bf16.msra.mxu0 %v879_v49 }
  0x28   : > { %334 = vmatmul.mubr.f32.vlgmr.msra.gmra.mrb[0].mxu0 %v777_v25 }
  0xfb   : > { %v818_v4 = vpop.f32.mrb[0].mxu0 }
  0xfc   : > { %v819_v5 = vpop.f32.mrb[1].mxu0 }
  0xfd   : > { %v820_v6 = vadd.f32 %v819_v5, %v818_v4 }
  0xff   : > { %v339_v7 = vmul.f32 0.001953125, %v820_v6  }
 0x100 LB: >> { %v961_v8 = vmov 0.0|0.0   ;;  %v365_v9 = vadd.f32 %v955_v7, %v1119_v59  ;;  %vm962_vm0 = vmmov 0   ;;  %v963_v10 = vmov 0.0   ;;  %s363_s23 = sadd.s32 1, %s959_s23   ;;  %s959_s23 = sphi %s1140_s23, %s363_s23   ;;  %v955_v7 = vphi %v339_v7, %v1343_v7  }
 0x101   : >> { %881 = vmatprep.subr.bf16.mxu0 %v961_v8  ;;  %846 = vmatprep.mubr.msk.f32.mxu0 %vm962_vm0, %v963_v10  ;;  %v379_v19 = vsub.s32 0, %v1107_v51  ;;  %p360_p4 = scmp.ge.s32.totalorder %s363_s23, 8  }
 0x102   : >> { %v366_v11 = vmax.f32 %v365_v9, 0.0  ;;  %v591_v51 = vld [vmem:[%s1340_s3 + $0x28] sm:$0xff] (%p360_p4)  ;;  %v593_v59 = vld [vmem:[%s1340_s3 + $0x38] sm:$0xff] (%p360_p4) }
 0x104   : >> { %v367_v12 = vmin.f32 %v366_v11, 7.0 }
 0x106   : >> { %v368_v13 = vfloor.f32 %v367_v12 }
 0x108   : >> { %v369_v14 = vmax.f32 %v368_v13, 0.0 }
 0x10a   : >> { %v370_v15 = vmin.f32 %v369_v14, 6.0 }
 0x10c   : >> { %v371_v16 = vsub.f32 %v367_v12, %v370_v15  ;;  %v372_v17 = vmul.f32 8.0, %v370_v15  ;;  %v374_v18 = vrot.slane %v370_v15, 1 }
 0x10e   : >> { %v376_v20 = vadd.f32 %v374_v18, %v372_v17  ;;  %v389_v21 = vsub.f32 1.0, %v371_v16  ;;  %v420_v22 = vrot.slane %v371_v16, 1 }
 0x110   : >> { %v1152_v23 = vrot.slane %v376_v20, %v379_v19  ;;  %v391_v24 = vrot.slane %v389_v21, 1  ;;  %v406_v25 = vadd.f32 1.0, %v376_v20  ;;  %v422_v26 = vmul.f32 %v420_v22, %v389_v21 }
 0x111   : >> { %v443_v27 = vadd.f32 8.0, %v376_v20  ;;  %v477_v28 = vadd.f32 9.0, %v376_v20  ;;  %v490_v29 = vmul.f32 %v420_v22, %v371_v16 }
 0x112   : >> { %vm381_vm1 = vcmp.eq.f32.partialorder %v1122_v60, %v1152_v23  ;;  %vm382_vm2 = vcmp.eq.f32.partialorder %v1124_v61, %v1152_v23  ;;  %v393_v30 = vmul.f32 %v391_v24, %v389_v21  ;;  %v1158_v31 = vrot.slane %v406_v25, %v379_v19 }
 0x113   : >> { %v1160_v32 = vrot.slane %v422_v26, %v379_v19  ;;  %v1162_v33 = vrot.slane %v443_v27, %v379_v19  ;;  %v456_v34 = vmul.f32 %v391_v24, %v371_v16  ;;  %v1164_v35 = vrot.slane %v477_v28, %v379_v19 }
 0x114   : >> { %v1166_v36 = vrot.slane %v393_v30, %v379_v19  ;;  %vm411_vm3 = vcmp.eq.f32.partialorder %v1122_v60, %v1158_v31  ;;  %vm412_vm4 = vcmp.eq.f32.partialorder %v1124_v61, %v1158_v31  ;;  %v1172_v37 = vrot.slane %v490_v29, %v379_v19 }
 0x115   : >> { %v427_v38 = vsel %vm411_vm3, %v1160_v32, 0.0  ;;  %v428_v39 = vsel %vm412_vm4, %v1160_v32, 0.0  ;;  %vm448_vm5 = vcmp.eq.f32.partialorder %v1122_v60, %v1162_v33  ;;  %vm449_vm6 = vcmp.eq.f32.partialorder %v1124_v61, %v1162_v33 }
 0x116   : >> { %v398_v40 = vsel %vm381_vm1, %v1166_v36, 0.0  ;;  %v399_v41 = vsel %vm382_vm2, %v1166_v36, 0.0  ;;  %v1188_v42 = vrot.slane %v456_v34, %v379_v19  ;;  %vm482_vm7 = vcmp.eq.f32.partialorder %v1122_v60, %v1164_v35 }
 0x117   : >> { %v435_v43 = vadd.f32 %v427_v38, %v398_v40  ;;  %v436_v44 = vadd.f32 %v428_v39, %v399_v41  ;;  %vm483_vm8 = vcmp.eq.f32.partialorder %v1124_v61, %v1164_v35  ;;  %v495_v45 = vsel %vm482_vm7, %v1172_v37, 0.0 }
 0x118   : >> { %v461_v46 = vsel %vm448_vm5, %v1188_v42, 0.0  ;;  %v462_v47 = vsel %vm449_vm6, %v1188_v42, 0.0  ;;  %v496_v48 = vsel %vm483_vm8, %v1172_v37, 0.0  ;;  %vm383_vm9 = vcmp.eq.f32.partialorder %v1126_v62, %v1152_v23 }
 0x119   : >> { %v469_v49 = vadd.f32 %v461_v46, %v435_v43  ;;  %v470_v50 = vadd.f32 %v462_v47, %v436_v44  ;;  %vm384_vm10 = vcmp.eq.f32.partialorder %v1128_v63, %v1152_v23  ;;  %v400_v52 = vsel %vm383_vm9, %v1166_v36, 0.0 }
 0x11a   : >> { %v401_v53 = vsel %vm384_vm10, %v1166_v36, 0.0  ;;  %vm413_vm11 = vcmp.eq.f32.partialorder %v1126_v62, %v1158_v31  ;;  %vm414_vm12 = vcmp.eq.f32.partialorder %v1128_v63, %v1158_v31  ;;  %vm450_vm13 = vcmp.eq.f32.partialorder %v1126_v62, %v1162_v33 }
 0x11b   : >> { %v503_v54 = vadd.f32 %v495_v45, %v469_v49  ;;  %v504_v55 = vadd.f32 %v496_v48, %v470_v50  ;;  %v429_v56 = vsel %vm413_vm11, %v1160_v32, 0.0  ;;  %v430_v57 = vsel %vm414_vm12, %v1160_v32, 0.0 }
 0x11c   : >> { %v437_v58 = vadd.f32 %v429_v56, %v400_v52  ;;  %v438_v4 = vadd.f32 %v430_v57, %v401_v53  ;;  %vm451_vm14 = vcmp.eq.f32.partialorder %v1128_v63, %v1162_v33  ;;  %v463_v5 = vsel %vm450_vm13, %v1188_v42, 0.0  ;;  %v588_v53 = vld [vmem:[%s1340_s3 + $0x10] sm:$0xff] (%p360_p4)  ;;  %v599_v57 = vld [vmem:[%s1340_s3 + $0x68] sm:$0xff] (%p360_p4) }
 0x11d   : >> { %v882_v6 = vpack.c.bf16 %v504_v55, %v503_v54  ;;  %v464_v9 = vsel %vm451_vm14, %v1188_v42, 0.0  ;;  %vm484_vm15 = vcmp.eq.f32.partialorder %v1126_v62, %v1164_v35  ;;  %vm485_vm0 = vcmp.eq.f32.partialorder %v1128_v63, %v1164_v35  ;;  %v590_v63 = vld [vmem:[%s1340_s3 + $0x20] sm:$0xff] (%p360_p4)  ;;  %v596_v56 = vld [vmem:[%s1340_s3 + $0x50] sm:$0xff] (%p360_p4) }
 0x11e   : >> { %v471_v10 = vadd.f32 %v463_v5, %v437_v58  ;;  %v472_v11 = vadd.f32 %v464_v9, %v438_v4  ;;  %v497_v12 = vsel %vm484_vm15, %v1172_v37, 0.0  ;;  %v498_v13 = vsel %vm485_vm0, %v1172_v37, 0.0  ;;  %v594_v55 = vld [vmem:[%s1340_s3 + $0x40] sm:$0xff] (%p360_p4)  ;;  %v601_v58 = vld [vmem:[%s1340_s3 + $0x78] sm:$0xff] (%p360_p4)  ;;  %v600_v9 = vld [vmem:[%s1340_s3 + $0x70] sm:$0xff] (%p360_p4) }
 0x11f   : >> { %883 = vmatpush3.bf16.msra.mxu0 %v882_v6  ;;  %vm385_vm1 = vcmp.eq.f32.partialorder %v1130_v0, %v1152_v23  ;;  %vm386_vm2 = vcmp.eq.f32.partialorder %v1132_v1, %v1152_v23  ;;  %vm415_vm3 = vcmp.eq.f32.partialorder %v1130_v0, %v1158_v31  ;;  %vm416_vm4 = vcmp.eq.f32.partialorder %v1132_v1, %v1158_v31  ;;  %v598_v6 = vld [vmem:[%s1340_s3 + $0x60] sm:$0xff] (%p360_p4) }
 0x120   : >> { %884 = vmatprep.subr.bf16.mxu0 %v961_v8  ;;  %v505_v14 = vadd.f32 %v497_v12, %v471_v10  ;;  %v506_v15 = vadd.f32 %v498_v13, %v472_v11  ;;  %v402_v16 = vsel %vm385_vm1, %v1166_v36, 0.0  ;;  %v403_v17 = vsel %vm386_vm2, %v1166_v36, 0.0  ;;  %v780_v11 = vld.sshfl [vmem:[%s1341_s4] sm:$0x33 pattern:$0x76325410] (%p360_p4) }
 0x121   : >> { %v431_v18 = vsel %vm415_vm3, %v1160_v32, 0.0  ;;  %v432_v19 = vsel %vm416_vm4, %v1160_v32, 0.0  ;;  %vm452_vm5 = vcmp.eq.f32.partialorder %v1130_v0, %v1162_v33  ;;  %vm453_vm6 = vcmp.eq.f32.partialorder %v1132_v1, %v1162_v33 }
 0x122   : >> { %v885_v20 = vpack.c.bf16 %v506_v15, %v505_v14  ;;  %v439_v21 = vadd.f32 %v431_v18, %v402_v16  ;;  %v440_v22 = vadd.f32 %v432_v19, %v403_v17  ;;  %v465_v24 = vsel %vm452_vm5, %v1188_v42, 0.0 }
 0x123   : >> { %v466_v25 = vsel %vm453_vm6, %v1188_v42, 0.0  ;;  %vm486_vm7 = vcmp.eq.f32.partialorder %v1130_v0, %v1164_v35  ;;  %vm487_vm8 = vcmp.eq.f32.partialorder %v1132_v1, %v1164_v35  ;;  %vm387_vm9 = vcmp.eq.f32.partialorder %v1134_v2, %v1152_v23  ;;  %v592_v0 = vld [vmem:[%s1340_s3 + $0x30] sm:$0xff] (%p360_p4)  ;;  %v595_v1 = vld [vmem:[%s1340_s3 + $0x48] sm:$0xff] (%p360_p4) }
 0x124   : >> { %886 = vmatpush3.bf16.msra.mxu0 %v885_v20  ;;  %v473_v26 = vadd.f32 %v465_v24, %v439_v21  ;;  %v474_v27 = vadd.f32 %v466_v25, %v440_v22  ;;  %v499_v28 = vsel %vm486_vm7, %v1172_v37, 0.0  ;;  %v500_v29 = vsel %vm487_vm8, %v1172_v37, 0.0 }
 0x125   : >> { %887 = vmatprep.subr.bf16.mxu0 %v961_v8  ;;  %vm388_vm10 = vcmp.eq.f32.partialorder %v1136_v3, %v1152_v23  ;;  %v404_v30 = vsel %vm387_vm9, %v1166_v36, 0.0  ;;  %vm417_vm11 = vcmp.eq.f32.partialorder %v1134_v2, %v1158_v31  ;;  %vm418_vm12 = vcmp.eq.f32.partialorder %v1136_v3, %v1158_v31 }
 0x126   : >> { %v507_v34 = vadd.f32 %v499_v28, %v473_v26  ;;  %v508_v38 = vadd.f32 %v500_v29, %v474_v27  ;;  %v405_v39 = vsel %vm388_vm10, %v1166_v36, 0.0  ;;  %v433_v40 = vsel %vm417_vm11, %v1160_v32, 0.0 }
 0x127   : >> { %v434_v41 = vsel %vm418_vm12, %v1160_v32, 0.0  ;;  %v441_v43 = vadd.f32 %v433_v40, %v404_v30  ;;  %vm454_vm13 = vcmp.eq.f32.partialorder %v1134_v2, %v1162_v33  ;;  %vm455_vm14 = vcmp.eq.f32.partialorder %v1136_v3, %v1162_v33 }
 0x128   : >> { %v888_v23 = vpack.c.bf16 %v508_v38, %v507_v34  ;;  %v442_v44 = vadd.f32 %v434_v41, %v405_v39  ;;  %v467_v45 = vsel %vm454_vm13, %v1188_v42, 0.0  ;;  %v468_v31 = vsel %vm455_vm14, %v1188_v42, 0.0 }
 0x129   : >> { %v475_v46 = vadd.f32 %v467_v45, %v441_v43  ;;  %vm488_vm15 = vcmp.eq.f32.partialorder %v1134_v2, %v1164_v35  ;;  %vm489_vm0 = vcmp.eq.f32.partialorder %v1136_v3, %v1164_v35  ;;  %vm511_vm1 = vcmask 523264   ;;  %v597_v2 = vld [vmem:[%s1340_s3 + $0x58] sm:$0xff] (%p360_p4) }
 0x12a   : >> { %889 = vmatpush3.bf16.msra.mxu0 %v888_v23  ;;  %v476_v32 = vadd.f32 %v468_v31, %v442_v44  ;;  %v501_v36 = vsel %vm488_vm15, %v1172_v37, 0.0  ;;  %v502_v47 = vsel %vm489_vm0, %v1172_v37, 0.0  ;;  %v589_v37 = vld [vmem:[%s1340_s3 + $0x18] sm:$0xff] (%p360_p4)  ;;  %v964_v60 = vmov (%p360_p4), 0.0  }
 0x12b   : >> { %890 = vmatprep.subr.bf16.mxu0 %v961_v8  ;;  %v509_v33 = vadd.f32 %v501_v36, %v475_v46  ;;  %v587_v8 = vld [vmem:[%s1340_s3 + $0x8] sm:$0xff] (%p360_p4)  ;;  %v897_v62 = vpack.c.bf16 (%p360_p4), %v593_v59, %v591_v51  ;;  %v899_v3 = vpack.c.bf16 (%p360_p4), %v592_v0, %v590_v63  ;;  %v901_v54 = vpack.c.bf16 (%p360_p4), %v597_v2, %v595_v1 }
 0x12c   : >> { %v510_v48 = vadd.f32 %v502_v47, %v476_v32  ;;  %v893_v52 = vpack.c.bf16 (%p360_p4), %v589_v37, %v587_v8  ;;  %v903_v4 = vpack.c.bf16 (%p360_p4), %v596_v56, %v594_v55  ;;  %v905_v5 = vpack.c.bf16 (%p360_p4), %v601_v58, %v599_v57 }
 0x12d   : > { %v907_v10 = vpack.c.bf16 (%p360_p4), %v600_v9, %v598_v6  ;;  %v688_v13 = vcombine.high (%p360_p4), %v780_v11, %v780_v11 }
 0x12e   : >> { %v891_v49 = vpack.c.bf16 %v510_v48, %v509_v33 }
 0x130   : >> { %892 = vmatpush3.bf16.msra.mxu0 %v891_v49 }
 0x131   : > { %894 = vmatprep.subr.bf16.mxu0 (%p360_p4), %v893_v52 }
 0x133   : >> { %847 = vmatmul.mubr.msk.f32.vlgmr.msra.gmra.mrb[0].mxu0 %vm511_vm1, %v955_v7 }
 0x134   : > { %670 = vmatprep.mubr.f32.mxu0 (%p360_p4), %v964_v60 }
 0x203   : > { %362 = sbr.rel (!%p360_p4) target bundleno = 256 (0x100), region = 77 }
 0x206   : >> { %v581_v42 = vpop.f32.mrb[0].mxu0 }
 0x207   : >> { %v585_v50 = vadd.f32 %v955_v7, %v581_v42   ;;  %v848_v35 = vpop.f32.mrb[1].mxu0 }
 0x209   : >> { %v1343_v7 = vmov %v585_v50 }
 0x20a   : > { %v586_v7 = vld [vmem:[%s1340_s3] sm:$0xff] }
 0x20b   : > { %v895_v61 = vpack.c.bf16 %v588_v53, %v586_v7 }
 0x20d   : > { %896 = vmatpush1.bf16.msra.mxu0 %v895_v61 }
 0x20e   : > { %898 = vmatprep.subr.bf16.mxu0 %v897_v62 }
 0x211   : > { %900 = vmatpush1.bf16.msra.mxu0 %v899_v3 }
 0x212   : > { %902 = vmatprep.subr.bf16.mxu0 %v901_v54 }
 0x215   : > { %904 = vmatpush1.bf16.msra.mxu0 %v903_v4 }
 0x216   : > { %906 = vmatprep.subr.bf16.mxu0 %v905_v5 }
 0x219   : > { %908 = vmatpush1.bf16.msra.mxu0 %v907_v10 }
 0x21c   : > { %779 = vmatmul.mubr.msk.f32.vlgmr.msra.gmra.mrb[0].mxu0 %vm511_vm1, %v585_v50 }
 0x2ef   : > { %v672_v12 = vpop.f32.mrb[0].mxu0 }
 0x2f0   : > { %v677_v14 = vmul.f32 2.0, %v672_v12  ;;  %v674_v15 = vpop.f32.mrb[1].mxu0 }
 0x2f1   : > { %v678_v16 = vmul.f32 2.0, %v674_v15 }
 0x2f2   : > { %v691_v17 = vadd.f32 %v780_v11, %v677_v14 }
 0x2f3   : > { %v692_v18 = vadd.f32 %v688_v13, %v678_v16 }
 0x2f5   : > { %v695_v19 = vcombine.low %v691_v17, %v692_v18 }
 0x2f7   : > { %781 = vst.sshfl [vmem:[%s1042_s24] sm:$0x33 pattern:$0x76325410] %v695_v19 }
 0x2f8 PF: > { %s15_s18 = sadd.s32 1, %s951_s18  }
 0x2f9   : > { %p12_p5 = scmp.ge.s32.totalorder %s15_s18, 4  }
 0x2fb   :  { %14 = sbr.rel (!%p12_p5) target bundleno = 1 (0x1), region = 88 }

// kernel: sew_morph_forward.5
= control target key start
LH: loop header
LB: loop body
LE: loop exit
PB: predicated region body
PF: predicated region fallthrough
CT: control target
= control target key end

     0   :  { %v26_v0 = vlaneseq  ;;  %v5061_v3 = vmov 1983009808   ;;  %s5062_s22 = smov 126   ;;  %v5063_v9 = vmov 0.0   ;;  %s5066_s23 = smov 15   ;;  %v5077_v23 = vmov 18   ;;  %s6006_s2 = inlined_call_operand.vmem [shape: f32[8,19], index: 2, kind: input, shape index: {}]   ;;  %s6007_s0 = inlined_call_operand.vmem [shape: f32[2,512], index: 0, kind: input, shape index: {}]   ;;  %s6008_s1 = inlined_call_operand.vmem [shape: f32[9,512], index: 1, kind: input, shape index: {}]   ;;  %s6009_s3 = inlined_call_operand.vmem [shape: f32[8,73], index: 3, kind: input, shape index: {}]   ;;  %s6010_s4 = inlined_call_operand.vmem [shape: f32[2,73], index: 4, kind: input, shape index: {}]   ;;  %s6011_s5 = inlined_call_operand.vmem [shape: f32[2,512], index: 5, kind: output, shape index: {}]  }
   0x1   :  { %v5119_v1 = vld [vmem:[%s6006_s2] sm:$0xff]  ;;  %v24_v4 = vunpack.c.l.s4 %v5061_v3  ;;  %208 = vmatprep.mubr.f32.mxu0 %v5063_v9  ;;  %279 = vmatprep.mubr.f32.mxu1 %v5063_v9  ;;  %s5065_s2 = smov 17   ;;  %s5067_s24 = smov 1   ;;  %vm131_vm1 = vcmask 1041408   ;;  %vm128_vm3 = vcmask 15360   ;;  %vm1880_vm14 = vcmask 64512  }
   0x2   :  { %v20_v2 = vld [vmem:[%s6007_s0] sm:$0xff]  ;;  %126 = vrot.lane.b32.xlu0 %v5119_v1, %s5062_s22  ;;  %v27_v5 = vshrl.u32 %v26_v0, 7  ;;  %s5064_s0 = smov 16   ;;  %s5068_s25 = smov 124   ;;  %v5242_v25 = vand.u32 127, %v26_v0 }
   0x3   :  { %v25_v6 = vunpack.c.0.s8 %v24_v4  ;;  %v22_v7 = vcombine.high %v20_v2, %v20_v2  ;;  %s5069_s26 = smov 122   ;;  %s5070_s27 = smov 127   ;;  %v4894_v16 = vld [vmem:[%s6008_s1 + $0x20] ss:$8 sm:$0xf]  ;;  %5058 = vset.pattern.permute.xlu0 %v5077_v23 }
   0x4   :  { %s5071_s28 = smov 120   ;;  %s5072_s29 = smov 118   ;;  %v5197_v14 = vsub.s32 0, %v27_v5  ;;  %v5199_v15 = vsub.s32 3, %v27_v5  ;;  %v5213_v19 = vsub.s32 1, %v27_v5  ;;  %v5215_v20 = vsub.s32 2, %v27_v5 }
   0x5   :  { %v5126_v8 = vsub.s32 %v25_v6, %v27_v5  ;;  %s5073_s30 = smov 113   ;;  %s5074_s8 = smov 112   ;;  %v4840_v26 = vld [vmem:[%s6008_s1 + $0x1] ss:$8 sm:$0xf]  ;;  %vm93_vm0 = vcmp.lt.s32.totalorder %v5242_v25, 16 }
   0x6   :  { %v5205_v17 = vrot.slane %v4894_v16, %v5197_v14  ;;  %s5075_s9 = smov 116   ;;  %v5211_v18 = vrot.slane %v4894_v16, %v5199_v15  ;;  %v5218_v21 = vrot.slane %v4894_v16, %v5213_v19  ;;  %v5221_v22 = vrot.slane %v4894_v16, %v5215_v20  ;;  %s5076_s10 = smov 114   ;;  %v58_v30 = vld [vmem:[%s6008_s1] ss:$8 sm:$0xf] }
   0x7   :  { %v5130_v10 = vrot.slane %v20_v2, %v5126_v8  ;;  %v5133_v11 = vrot.slane %v22_v7, %v5126_v8  ;;  %s5078_s11 = smov 111   ;;  %v5249_v29 = vrot.slane %v4840_v26, %v5213_v19  ;;  %vm53_vm2 = vcmp.lt.s32.totalorder %v5242_v25, 17  ;;  %v4853_v47 = vld [vmem:[%s6008_s1 + $0x2] ss:$8 sm:$0xf]  ;;  %s5080_s7 = smov 88  }
   0x8   :  { %v5259_v35 = vrot.slane %v58_v30, %v5213_v19  ;;  %v5262_v36 = vrot.slane %v4840_v26, %v5197_v14  ;;  %v5265_v37 = vrot.slane %v4840_v26, %v5199_v15  ;;  %v5268_v38 = vrot.slane %v4840_v26, %v5215_v20  ;;  %s5083_s12 = smov 80   ;;  %s5085_s13 = smov 64  }
   0x9   :  { %85 = vrot.lane.b32.xlu0 %v5130_v10, %s5064_s0  ;;  %89 = vrot.lane.b32.xlu1 %v5133_v11, %s5064_s0  ;;  %v5142_v12 = vcombine.high %v5130_v10, %v5130_v10  ;;  %v5150_v13 = vcombine.high %v5133_v11, %v5133_v11  ;;  %v5274_v42 = vrot.slane %v58_v30, %v5197_v14  ;;  %vm450_vm4 = vcmp.lt.s32.totalorder %v5242_v25, 15 }
   0xa   :  { %v5283_v46 = vrot.slane %v58_v30, %v5215_v20  ;;  %v5292_v51 = vrot.slane %v58_v30, %v5199_v15  ;;  %v5298_v55 = vrot.slane %v4853_v47, %v5213_v19  ;;  %v5323_v3 = vrot.slane %v4853_v47, %v5197_v14  ;;  %v4860_v30 = vld [vmem:[%s6008_s1 + $0x3] ss:$8 sm:$0xf] }
   0xb   :  { %v5326_v4 = vrot.slane %v4853_v47, %v5215_v20  ;;  %v5329_v5 = vrot.slane %v4853_v47, %v5199_v15  ;;  %vm654_vm5 = vcmp.lt.s32.totalorder %v5242_v25, 1  ;;  %vm1016_vm6 = vcmp.lt.s32.totalorder %v5242_v25, 127 }
   0xc   :  { %vm1220_vm7 = vcmp.lt.s32.totalorder %v5242_v25, 113  ;;  %vm1424_vm8 = vcmp.lt.s32.totalorder %v5242_v25, 112  ;;  %vm1628_vm9 = vcmp.lt.s32.totalorder %v5242_v25, 111 }
   0xd   :  { %87 = vrot.lane.b32.xlu0 %v5142_v12, %s5064_s0  ;;  %43 = vrot.lane.b32.xlu1 %v5130_v10, %s5065_s2 }
  0x11   :  { %45 = vrot.lane.b32.xlu0 %v5142_v12, %s5065_s2  ;;  %91 = vrot.lane.b32.xlu1 %v5150_v13, %s5064_s0 }
  0x15   :  { %49 = vrot.lane.b32.xlu0 %v5150_v13, %s5065_s2  ;;  %47 = vrot.lane.b32.xlu1 %v5133_v11, %s5065_s2 }
  0x19   :  { %444 = vrot.lane.b32.xlu0 %v5142_v12, %s5066_s23  ;;  %442 = vrot.lane.b32.xlu1 %v5130_v10, %s5066_s23 }
  0x1d   :  { %448 = vrot.lane.b32.xlu0 %v5150_v13, %s5066_s23  ;;  %446 = vrot.lane.b32.xlu1 %v5133_v11, %s5066_s23 }
  0x21   :  { %646 = vrot.lane.b32.xlu0 %v5130_v10, %s5067_s24  ;;  %484 = vrot.lane.b32.xlu1 %v5119_v1, %s5068_s25 }
  0x25   :  { %650 = vrot.lane.b32.xlu0 %v5133_v11, %s5067_s24  ;;  %648 = vrot.lane.b32.xlu1 %v5142_v12, %s5067_s24 }
  0x29   :  { %688 = vrot.lane.b32.xlu0 %v5119_v1, %s5069_s26  ;;  %652 = vrot.lane.b32.xlu1 %v5150_v13, %s5067_s24 }
  0x2d   :  { %1008 = vrot.lane.b32.xlu0 %v5130_v10, %s5070_s27  ;;  %850 = vrot.lane.b32.xlu1 %v5119_v1, %s5071_s28 }
  0x31   :  { %1012 = vrot.lane.b32.xlu0 %v5133_v11, %s5070_s27  ;;  %1010 = vrot.lane.b32.xlu1 %v5142_v12, %s5070_s27 }
  0x35   :  { %1050 = vrot.lane.b32.xlu0 %v5119_v1, %s5072_s29  ;;  %1014 = vrot.lane.b32.xlu1 %v5150_v13, %s5070_s27 }
  0x39   :  { %1214 = vrot.lane.b32.xlu0 %v5142_v12, %s5073_s30  ;;  %1212 = vrot.lane.b32.xlu1 %v5130_v10, %s5073_s30 }
  0x3d   :  { %1218 = vrot.lane.b32.xlu0 %v5150_v13, %s5073_s30  ;;  %1216 = vrot.lane.b32.xlu1 %v5133_v11, %s5073_s30 }
  0x41   :  { %1416 = vrot.lane.b32.xlu0 %v5130_v10, %s5074_s8  ;;  %1254 = vrot.lane.b32.xlu1 %v5119_v1, %s5075_s9  ;;  %s5081_s9 = smov 96  }
  0x45   :  { %1420 = vrot.lane.b32.xlu0 %v5133_v11, %s5074_s8  ;;  %1418 = vrot.lane.b32.xlu1 %v5142_v12, %s5074_s8 }
  0x49   :  { %1458 = vrot.lane.b32.xlu0 %v5119_v1, %s5076_s10  ;;  %1422 = vrot.lane.b32.xlu1 %v5150_v13, %s5074_s8  ;;  %s5082_s10 = smov 72  }
  0x4d   :  { %1622 = vrot.lane.b32.xlu0 %v5142_v12, %s5078_s11  ;;  %1620 = vrot.lane.b32.xlu1 %v5130_v10, %s5078_s11 }
  0x51   :  { %1626 = vrot.lane.b32.xlu0 %v5150_v13, %s5078_s11  ;;  %1624 = vrot.lane.b32.xlu1 %v5133_v11, %s5078_s11 }
  0x55   :  { %1662 = vrot.lane.b32.xlu1 %v5119_v1, %s5074_s8  ;;  %1825 = vperm.xlu0 %5058, %v5119_v1  }
  0x74   :  { %v127_v24 = vpop.permute.xlu0 %126 }
  0x7b   :  { %v86_v27 = vpop.permute.xlu0 %85  ;;  %v90_v28 = vpop.permute.xlu1 %89 }
  0x7f   :  { %v88_v31 = vpop.permute.xlu0 %87  ;;  %v44_v32 = vpop.permute.xlu1 %43 }
  0x80   :  { %v96_v33 = vsel %vm93_vm0, %v86_v27, %v88_v31  ;;  %v95_v39 = vsel %vm93_vm0, %v88_v31, %v90_v28 }
  0x81   :  { %v122_v34 = vmul.f32 %v5249_v29, %v96_v33  ;;  %v123_v52 = vmul.f32 %v5268_v38, %v95_v39 }
  0x83   :  { %4841 = vmatprep.subr.msk.mxu0 %vm131_vm1, %v122_v34  ;;  %v46_v40 = vpop.permute.xlu0 %45  ;;  %v92_v41 = vpop.permute.xlu1 %91 }
  0x84   :  { %v56_v43 = vsel %vm53_vm2, %v44_v32, %v46_v40  ;;  %v97_v44 = vsel %vm93_vm0, %v92_v41, %v86_v27  ;;  %v94_v45 = vsel %vm93_vm0, %v90_v28, %v92_v41  ;;  %v5363_v41 = vrot.slane %v4860_v30, %v5197_v14 }
  0x85   :  { %v81_v48 = vmul.f32 %v5259_v35, %v56_v43  ;;  %v121_v49 = vmul.f32 %v5262_v36, %v97_v44  ;;  %v124_v50 = vmul.f32 %v5265_v37, %v94_v45  ;;  %v5366_v43 = vrot.slane %v4860_v30, %v5199_v15 }
  0x86   :  { %v5370_v44 = vrot.slane %v4860_v30, %v5215_v20 }
  0x87   :  { %v50_v53 = vpop.permute.xlu0 %49  ;;  %4842 = vmatpush1.msk.msra.mxu0 %vm131_vm1, %v121_v49  ;;  %4844 = vmatprep.subr.msk.mxu1 %vm131_vm1, %v124_v50  ;;  %v48_v54 = vpop.permute.xlu1 %47 }
  0x88   :  { %v57_v56 = vsel %vm53_vm2, %v50_v53, %v44_v32  ;;  %v54_v57 = vsel %vm53_vm2, %v48_v54, %v50_v53  ;;  %v55_v58 = vsel %vm53_vm2, %v46_v40, %v48_v54  ;;  %4843 = vmatmul.mubr.msk.f32.vlgmr.msra.gmra.mrb[0].mxu0 %vm128_vm3, %v127_v24  ;;  %4845 = vmatpush1.msk.msra.mxu1 %vm131_vm1, %v123_v52 }
  0x89   :  { %v80_v59 = vmul.f32 %v5274_v42, %v57_v56  ;;  %v82_v60 = vmul.f32 %v5283_v46, %v55_v58  ;;  %v83_v61 = vmul.f32 %v5292_v51, %v54_v57  ;;  %4847 = vmatprep.subr.msk.mxu0 %vm131_vm1, %v81_v48  ;;  %4846 = vmatmul.mubr.msk.f32.vlgmr.msra.gmra.mrb[0].mxu1 %vm128_vm3, %v127_v24  ;;  %v4873_v56 = vld [vmem:[%s6008_s1 + $0x5] ss:$8 sm:$0xf] }
  0x8a   :  { %364 = vmatprep.mubr.f32.mxu0 %v5063_v9  ;;  %435 = vmatprep.mubr.f32.mxu1 %v5063_v9 }
  0x8b   :  { %v445_v62 = vpop.permute.xlu0 %444  ;;  %4848 = vmatpush1.msk.msra.mxu0 %vm131_vm1, %v80_v59  ;;  %4850 = vmatprep.subr.msk.mxu1 %vm131_vm1, %v83_v61  ;;  %v443_v63 = vpop.permute.xlu1 %442  ;;  %v5393_v59 = vrot.slane %v4873_v56, %v5197_v14 }
  0x8c   :  { %v453_v0 = vsel %vm450_vm4, %v443_v63, %v445_v62  ;;  %4851 = vmatpush1.msk.msra.mxu1 %vm131_vm1, %v82_v60  ;;  %v5396_v60 = vrot.slane %v4873_v56, %v5213_v19 }
  0x8d   :  { %v479_v2 = vmul.f32 %v5298_v55, %v453_v0 }
  0x8f   :  { %v449_v6 = vpop.permute.xlu0 %448  ;;  %4854 = vmatprep.subr.msk.mxu0 %vm131_vm1, %v479_v2  ;;  %v447_v7 = vpop.permute.xlu1 %446  ;;  %v5415_v2 = vrot.slane %v4873_v56, %v5215_v20 }
  0x90   :  { %v454_v16 = vsel %vm450_vm4, %v449_v6, %v443_v63  ;;  %v451_v23 = vsel %vm450_vm4, %v447_v7, %v449_v6  ;;  %v452_v24 = vsel %vm450_vm4, %v445_v62, %v447_v7  ;;  %4849 = vmatmul.mubr.msk.f32.vlgmr.msra.gmra.mrb[0].mxu0 %vm128_vm3, %v5119_v1 }
  0x91   :  { %v478_v26 = vmul.f32 %v5323_v3, %v454_v16  ;;  %v480_v27 = vmul.f32 %v5326_v4, %v452_v24  ;;  %v481_v28 = vmul.f32 %v5329_v5, %v451_v23  ;;  %4852 = vmatmul.mubr.msk.f32.vlgmr.msra.gmra.mrb[0].mxu1 %vm128_vm3, %v5119_v1  ;;  %564 = vmatprep.mubr.f32.mxu0 %v5063_v9 }
  0x92   :  { %635 = vmatprep.mubr.f32.mxu1 %v5063_v9  ;;  %v5355_v1 = vrot.slane %v4860_v30, %v5213_v19 }
  0x93   :  { %v647_v31 = vpop.permute.xlu0 %646  ;;  %4855 = vmatpush1.msk.msra.mxu0 %vm131_vm1, %v478_v26  ;;  %4857 = vmatprep.subr.msk.mxu1 %vm131_vm1, %v481_v28  ;;  %v485_v32 = vpop.permute.xlu1 %484 }
  0x94   :  { %4858 = vmatpush1.msk.msra.mxu1 %vm131_vm1, %v480_v27  ;;  %v4880_v27 = vld [vmem:[%s6008_s1 + $0x6] ss:$8 sm:$0xf] }
  0x95   :  { %v5439_v30 = vrot.slane %v4880_v27, %v5199_v15 }
  0x97   :  { %v651_v33 = vpop.permute.xlu0 %650  ;;  %v649_v34 = vpop.permute.xlu1 %648 }
  0x98   :  { %v657_v39 = vsel %vm654_vm5, %v647_v31, %v649_v34  ;;  %4856 = vmatmul.mubr.msk.f32.vlgmr.msra.gmra.mrb[0].mxu0 %vm128_vm3, %v485_v32  ;;  %v656_v45 = vsel %vm654_vm5, %v649_v34, %v651_v33 }
  0x99   :  { %v683_v40 = vmul.f32 %v5355_v1, %v657_v39  ;;  %4859 = vmatmul.mubr.msk.f32.vlgmr.msra.gmra.mrb[0].mxu1 %vm128_vm3, %v485_v32  ;;  %768 = vmatprep.mubr.f32.mxu0 %v5063_v9  ;;  %v684_v54 = vmul.f32 %v5370_v44, %v656_v45  ;;  %v5445_v32 = vrot.slane %v4880_v27, %v5215_v20 }
  0x9a   :  { %839 = vmatprep.mubr.f32.mxu1 %v5063_v9 }
  0x9b   :  { %v689_v47 = vpop.permute.xlu0 %688  ;;  %4861 = vmatprep.subr.msk.mxu0 %vm131_vm1, %v683_v40  ;;  %v653_v48 = vpop.permute.xlu1 %652 }
  0x9c   :  { %v655_v49 = vsel %vm654_vm5, %v651_v33, %v653_v48  ;;  %v658_v50 = vsel %vm654_vm5, %v653_v48, %v647_v31  ;;  %v5442_v31 = vrot.slane %v4880_v27, %v5213_v19  ;;  %v5448_v33 = vrot.slane %v4880_v27, %v5197_v14 }
  0x9d   :  { %v682_v52 = vmul.f32 %v5363_v41, %v658_v50  ;;  %v685_v53 = vmul.f32 %v5366_v43, %v655_v49 }
  0x9f   :  { %v1009_v57 = vpop.permute.xlu0 %1008  ;;  %4862 = vmatpush1.msk.msra.mxu0 %vm131_vm1, %v682_v52  ;;  %4864 = vmatprep.subr.msk.mxu1 %vm131_vm1, %v685_v53  ;;  %v851_v58 = vpop.permute.xlu1 %850 }
  0xa0   :  { %4863 = vmatmul.mubr.msk.f32.vlgmr.msra.gmra.mrb[0].mxu0 %vm128_vm3, %v689_v47  ;;  %4865 = vmatpush1.msk.msra.mxu1 %vm131_vm1, %v684_v54  ;;  %v4887_v54 = vld [vmem:[%s6008_s1 + $0x7] ss:$8 sm:$0xf] }
  0xa1   :  { %4866 = vmatmul.mubr.msk.f32.vlgmr.msra.gmra.mrb[0].mxu1 %vm128_vm3, %v689_v47  ;;  %4867 = vmatprep.subr.msk.mxu0 %vm131_vm1, %v5142_v12 }
  0xa2   :  { %4868 = vmatpush1.msk.msra.mxu0 %vm131_vm1, %v5130_v10  ;;  %926 = vmatprep.mubr.f32.mxu0 %v5063_v9 }
  0xa3   :  { %v1013_v61 = vpop.permute.xlu0 %1012  ;;  %v1011_v62 = vpop.permute.xlu1 %1010  ;;  %4870 = vmatprep.subr.msk.mxu1 %vm131_vm1, %v5150_v13  ;;  %997 = vmatprep.mubr.f32.mxu1 %v5063_v9  ;;  %v5418_v13 = vrot.slane %v4873_v56, %v5199_v15 }
  0xa4   :  { %v1018_v63 = vsel %vm1016_vm6, %v1011_v62, %v1013_v61  ;;  %v1019_v0 = vsel %vm1016_vm6, %v1009_v57, %v1011_v62  ;;  %4871 = vmatpush1.msk.msra.mxu1 %vm131_vm1, %v5133_v11 }
  0xa5   :  { %v1044_v10 = vmul.f32 %v5393_v59, %v1019_v0  ;;  %v1045_v12 = vmul.f32 %v5396_v60, %v1018_v63 }
  0xa7   :  { %v1051_v6 = vpop.permute.xlu0 %1050  ;;  %4874 = vmatprep.subr.msk.mxu0 %vm131_vm1, %v1045_v12  ;;  %v1015_v7 = vpop.permute.xlu1 %1014  ;;  %v5486_v12 = vrot.slane %v4887_v54, %v5215_v20 }
  0xa8   :  { %v1017_v16 = vsel %vm1016_vm6, %v1013_v61, %v1015_v7  ;;  %v1020_v11 = vsel %vm1016_vm6, %v1015_v7, %v1009_v57  ;;  %4869 = vmatmul.mubr.msk.f32.vlgmr.msra.gmra.mrb[0].mxu0 %vm128_vm3, %v851_v58  ;;  %v5478_v61 = vrot.slane %v4887_v54, %v5213_v19  ;;  %v5492_v19 = vrot.slane %v4887_v54, %v5199_v15 }
  0xa9   :  { %v1046_v23 = vmul.f32 %v5415_v2, %v1017_v16  ;;  %v1047_v24 = vmul.f32 %v5418_v13, %v1020_v11  ;;  %4875 = vmatpush1.msk.msra.mxu0 %vm131_vm1, %v1044_v10  ;;  %4872 = vmatmul.mubr.msk.f32.vlgmr.msra.gmra.mrb[0].mxu1 %vm128_vm3, %v851_v58  ;;  %v5475_v58 = vrot.slane %v4887_v54, %v5197_v14 }
  0xaa   :  { %1130 = vmatprep.mubr.f32.mxu0 %v5063_v9  ;;  %1201 = vmatprep.mubr.f32.mxu1 %v5063_v9 }
  0xab   :  { %v1215_v26 = vpop.permute.xlu0 %1214  ;;  %4877 = vmatprep.subr.msk.mxu1 %vm131_vm1, %v1047_v24  ;;  %v1213_v28 = vpop.permute.xlu1 %1212 }
  0xac   :  { %4878 = vmatpush1.msk.msra.mxu1 %vm131_vm1, %v1046_v23  ;;  %v1223_v34 = vsel %vm1220_vm7, %v1213_v28, %v1215_v26 }
  0xad   :  { %v1248_v53 = vmul.f32 %v5448_v33, %v1223_v34 }
  0xaf   :  { %v1219_v39 = vpop.permute.xlu0 %1218  ;;  %v1217_v40 = vpop.permute.xlu1 %1216 }
  0xb0   :  { %v1224_v45 = vsel %vm1220_vm7, %v1219_v39, %v1213_v28  ;;  %v1221_v47 = vsel %vm1220_vm7, %v1217_v40, %v1219_v39  ;;  %v1222_v48 = vsel %vm1220_vm7, %v1215_v26, %v1217_v40  ;;  %4876 = vmatmul.mubr.msk.f32.vlgmr.msra.gmra.mrb[0].mxu0 %vm128_vm3, %v1051_v6 }
  0xb1   :  { %v1251_v49 = vmul.f32 %v5439_v30, %v1224_v45  ;;  %v1249_v50 = vmul.f32 %v5442_v31, %v1222_v48  ;;  %v1250_v52 = vmul.f32 %v5445_v32, %v1221_v47  ;;  %4879 = vmatmul.mubr.msk.f32.vlgmr.msra.gmra.mrb[0].mxu1 %vm128_vm3, %v1051_v6  ;;  %1334 = vmatprep.mubr.f32.mxu0 %v5063_v9 }
  0xb2   :  { %1405 = vmatprep.mubr.f32.mxu1 %v5063_v9 }
  0xb3   :  { %v1417_v56 = vpop.permute.xlu0 %1416  ;;  %4881 = vmatprep.subr.msk.mxu0 %vm131_vm1, %v1249_v50  ;;  %4884 = vmatprep.subr.msk.mxu1 %vm131_vm1, %v1251_v49  ;;  %v1255_v57 = vpop.permute.xlu1 %1254 }
  0xb4   :  { %4882 = vmatpush1.msk.msra.mxu0 %vm131_vm1, %v1248_v53  ;;  %4885 = vmatpush1.msk.msra.mxu1 %vm131_vm1, %v1250_v52  ;;  %v5534_v53 = vld [vmem:[%s6009_s3] sm:$0xff]  ;;  %s5079_s3 = smov 104  }
  0xb5   :  { %1878 = vrot.lane.b32.xlu0 %v5534_v53, %s5071_s28 }
  0xb7   :  { %v1421_v62 = vpop.permute.xlu0 %1420  ;;  %v1419_v63 = vpop.permute.xlu1 %1418 }
  0xb8   :  { %v1426_v0 = vsel %vm1424_vm8, %v1419_v63, %v1421_v62  ;;  %v1427_v10 = vsel %vm1424_vm8, %v1417_v56, %v1419_v63  ;;  %4883 = vmatmul.mubr.msk.f32.vlgmr.msra.gmra.mrb[0].mxu0 %vm128_vm3, %v1255_v57 }
  0xb9   :  { %v1452_v6 = vmul.f32 %v5475_v58, %v1427_v10  ;;  %v1453_v14 = vmul.f32 %v5478_v61, %v1426_v0  ;;  %4886 = vmatmul.mubr.msk.f32.vlgmr.msra.gmra.mrb[0].mxu1 %vm128_vm3, %v1255_v57  ;;  %1538 = vmatprep.mubr.f32.mxu0 %v5063_v9 }
  0xba   :  { %1609 = vmatprep.mubr.f32.mxu1 %v5063_v9 }
  0xbb   :  { %v1459_v7 = vpop.permute.xlu0 %1458  ;;  %4888 = vmatprep.subr.msk.mxu0 %vm131_vm1, %v1453_v14  ;;  %v1423_v16 = vpop.permute.xlu1 %1422 }
  0xbc   :  { %v1425_v20 = vsel %vm1424_vm8, %v1421_v62, %v1423_v16  ;;  %v1428_v11 = vsel %vm1424_vm8, %v1423_v16, %v1417_v56  ;;  %4889 = vmatpush1.msk.msra.mxu0 %vm131_vm1, %v1452_v6 }
  0xbd   :  { %v1454_v23 = vmul.f32 %v5486_v12, %v1425_v20  ;;  %v1455_v15 = vmul.f32 %v5492_v19, %v1428_v11 }
  0xbf   :  { %v1623_v24 = vpop.permute.xlu0 %1622  ;;  %4891 = vmatprep.subr.msk.mxu1 %vm131_vm1, %v1455_v15  ;;  %v1621_v26 = vpop.permute.xlu1 %1620 }
  0xc0   :  { %4890 = vmatmul.mubr.msk.f32.vlgmr.msra.gmra.mrb[0].mxu0 %vm128_vm3, %v1459_v7  ;;  %4892 = vmatpush1.msk.msra.mxu1 %vm131_vm1, %v1454_v23  ;;  %v1631_v27 = vsel %vm1628_vm9, %v1621_v26, %v1623_v24 }
  0xc1   :  { %4893 = vmatmul.mubr.msk.f32.vlgmr.msra.gmra.mrb[0].mxu1 %vm128_vm3, %v1459_v7  ;;  %1742 = vmatprep.mubr.f32.mxu0 %v5063_v9  ;;  %v1656_v50 = vmul.f32 %v5205_v17, %v1631_v27  ;;  %v5084_v27 = vmov 72  }
  0xc2   :  { %1813 = vmatprep.mubr.f32.mxu1 %v5063_v9  ;;  %5059 = vset.pattern.permute.xlu0 %v5084_v27 }
  0xc3   :  { %v1627_v28 = vpop.permute.xlu0 %1626  ;;  %v1625_v34 = vpop.permute.xlu1 %1624 }
  0xc4   :  { %v1632_v39 = vsel %vm1628_vm9, %v1627_v28, %v1621_v26  ;;  %v1629_v40 = vsel %vm1628_vm9, %v1625_v34, %v1627_v28  ;;  %v1630_v45 = vsel %vm1628_vm9, %v1623_v24, %v1625_v34 }
  0xc5   :  { %v1659_v47 = vmul.f32 %v5211_v18, %v1632_v39  ;;  %v1657_v48 = vmul.f32 %v5218_v21, %v1630_v45  ;;  %v1658_v49 = vmul.f32 %v5221_v22, %v1629_v40 }
  0xc7   :  { %4895 = vmatprep.subr.msk.mxu0 %vm131_vm1, %v1657_v48  ;;  %4898 = vmatprep.subr.msk.mxu1 %vm131_vm1, %v1659_v47  ;;  %v1663_v52 = vpop.permute.xlu1 %1662 }
  0xc8   :  { %4896 = vmatpush1.msk.msra.mxu0 %vm131_vm1, %v1656_v50  ;;  %4899 = vmatpush1.msk.msra.mxu1 %vm131_vm1, %v1658_v49 }
  0xc9   :  { %4897 = vmatmul.mubr.msk.f32.vlgmr.msra.gmra.mrb[0].mxu0 %vm128_vm3, %v1663_v52  ;;  %4900 = vmatmul.mubr.msk.f32.vlgmr.msra.gmra.mrb[0].mxu1 %vm128_vm3, %v1663_v52 }
  0xca   :  { %1947 = vmatprep.mubr.f32.mxu0 %v5063_v9  ;;  %2018 = vmatprep.mubr.f32.mxu1 %v5063_v9 }
  0xd4   :  { %v1826_v54 = vpop.permute.xlu0 %1825 }
 0x127   :  { %v1879_v28 = vpop.permute.xlu0 %1878 }
 0x19c   :  { %v1744_v56 = vpop.f32.mrb[0].mxu0  ;;  %v1815_v57 = vpop.f32.mrb[0].mxu1 }
 0x19d   :  { %v1828_v62 = vadd.f32 %v1826_v54, %v1744_v56  ;;  %v1830_v63 = vadd.f32 %v1826_v54, %v1815_v57  ;;  %v1746_v0 = vpop.f32.mrb[1].mxu0  ;;  %v1817_v10 = vpop.f32.mrb[1].mxu1 }
 0x19e   :  { %v1829_v20 = vadd.f32 %v1826_v54, %v1746_v0  ;;  %v1831_v23 = vadd.f32 %v1826_v54, %v1817_v10 }
 0x19f   :  { %vm1832_vm10 = vcmp.gt.f32.partialorder %v1828_v62, 0.0  ;;  %v1836_v6 = vmul.f32 0.2, %v1828_v62  ;;  %vm1834_vm11 = vcmp.gt.f32.partialorder %v1830_v63, 0.0  ;;  %v1838_v14 = vmul.f32 0.2, %v1830_v63 }
 0x1a0   :  { %v1837_v11 = vmul.f32 0.2, %v1829_v20  ;;  %vm1833_vm12 = vcmp.gt.f32.partialorder %v1829_v20, 0.0  ;;  %v1839_v24 = vmul.f32 0.2, %v1831_v23  ;;  %vm1835_vm13 = vcmp.gt.f32.partialorder %v1831_v23, 0.0 }
 0x1a1   :  { %v5538_v7 = vsel %vm1832_vm10, %v1828_v62, %v1836_v6  ;;  %v5540_v16 = vsel %vm1834_vm11, %v1830_v63, %v1838_v14 }
 0x1a2   :  { %1865 = vrot.lane.b32.xlu0 %v5540_v16, %s5064_s0  ;;  %1861 = vrot.lane.b32.xlu1 %v5538_v7, %s5064_s0  ;;  %v5550_v15 = vsel %vm1833_vm12, %v1829_v20, %v1837_v11  ;;  %v5556_v26 = vsel %vm1835_vm13, %v1831_v23, %v1839_v24 }
 0x1a6   :  { %2335 = vrot.lane.b32.xlu0 %v5538_v7, %s5067_s24  ;;  %1844 = vrot.lane.b32.xlu1 %v5538_v7, %s5065_s2 }
 0x1aa   :  { %1846 = vrot.lane.b32.xlu0 %v5550_v15, %s5065_s2  ;;  %1863 = vrot.lane.b32.xlu1 %v5550_v15, %s5064_s0 }
 0x1ae   :  { %1850 = vrot.lane.b32.xlu0 %v5556_v26, %s5065_s2  ;;  %1867 = vrot.lane.b32.xlu1 %v5556_v26, %s5064_s0 }
 0x1b2   :  { %2171 = vrot.lane.b32.xlu0 %v5550_v15, %s5066_s23  ;;  %1848 = vrot.lane.b32.xlu1 %v5540_v16, %s5065_s2 }
 0x1b6   :  { %2175 = vrot.lane.b32.xlu0 %v5556_v26, %s5066_s23  ;;  %2169 = vrot.lane.b32.xlu1 %v5538_v7, %s5066_s23 }
 0x1ba   :  { %2339 = vrot.lane.b32.xlu0 %v5540_v16, %s5067_s24  ;;  %2173 = vrot.lane.b32.xlu1 %v5540_v16, %s5066_s23 }
 0x1be   :  { %2351 = vrot.lane.b32.xlu0 %v5534_v53, %s5079_s3  ;;  %2185 = vrot.lane.b32.xlu1 %v5534_v53, %s5074_s8 }
 0x1c2   :  { %2651 = vrot.lane.b32.xlu0 %v5538_v7, %s5070_s27  ;;  %2337 = vrot.lane.b32.xlu1 %v5550_v15, %s5067_s24 }
 0x1c6   :  { %2655 = vrot.lane.b32.xlu0 %v5540_v16, %s5070_s27  ;;  %2341 = vrot.lane.b32.xlu1 %v5556_v26, %s5067_s24 }
 0x1ca   :  { %2667 = vrot.lane.b32.xlu0 %v5534_v53, %s5080_s7  ;;  %2501 = vrot.lane.b32.xlu1 %v5534_v53, %s5081_s9 }
 0x1ce   :  { %2983 = vrot.lane.b32.xlu0 %v5538_v7, %s5074_s8  ;;  %2817 = vrot.lane.b32.xlu1 %v5538_v7, %s5073_s30 }
 0x1d2   :  { %2819 = vrot.lane.b32.xlu0 %v5550_v15, %s5073_s30  ;;  %2653 = vrot.lane.b32.xlu1 %v5550_v15, %s5070_s27 }
 0x1d6   :  { %2823 = vrot.lane.b32.xlu0 %v5556_v26, %s5073_s30  ;;  %2657 = vrot.lane.b32.xlu1 %v5556_v26, %s5070_s27 }
 0x1da   :  { %2987 = vrot.lane.b32.xlu0 %v5540_v16, %s5074_s8  ;;  %2821 = vrot.lane.b32.xlu1 %v5540_v16, %s5073_s30 }
 0x1de   :  { %2999 = vrot.lane.b32.xlu0 %v5534_v53, %s5082_s10  ;;  %2833 = vrot.lane.b32.xlu1 %v5534_v53, %s5083_s12 }
 0x1e2   :  { %3151 = vrot.lane.b32.xlu0 %v5550_v15, %s5078_s11  ;;  %2985 = vrot.lane.b32.xlu1 %v5550_v15, %s5074_s8 }
 0x1e6   :  { %3155 = vrot.lane.b32.xlu0 %v5556_v26, %s5078_s11  ;;  %2989 = vrot.lane.b32.xlu1 %v5556_v26, %s5074_s8 }
 0x1ea   :  { %3149 = vrot.lane.b32.xlu1 %v5538_v7, %s5078_s11  ;;  %3316 = vperm.xlu0 %5059, %v5534_v53  }
 0x1ee   :  { %3153 = vrot.lane.b32.xlu1 %v5540_v16, %s5078_s11 }
 0x1f2   :  { %3165 = vrot.lane.b32.xlu1 %v5534_v53, %s5085_s13 }
 0x214   :  { %v1866_v34 = vpop.permute.xlu0 %1865  ;;  %v1862_v39 = vpop.permute.xlu1 %1861 }
 0x218   :  { %v5625_v40 = vpop.permute.xlu0 %2335  ;;  %v1845_v45 = vpop.permute.xlu1 %1844 }
 0x21c   :  { %v1847_v47 = vpop.permute.xlu0 %1846  ;;  %v1864_v48 = vpop.permute.xlu1 %1863 }
 0x21d   :  { %v1871_v49 = vsel %vm93_vm0, %v1862_v39, %v1864_v48  ;;  %v1870_v52 = vsel %vm93_vm0, %v1864_v48, %v1866_v34  ;;  %v1854_v57 = vsel %vm53_vm2, %v1845_v45, %v1847_v47 }
 0x21e   :  { %v1874_v50 = vmul.f32 %v1871_v49, %v5249_v29  ;;  %v1875_v14 = vmul.f32 %v1870_v52, %v5268_v38  ;;  %v1857_v20 = vmul.f32 %v1854_v57, %v5259_v35 }
 0x220   :  { %v1851_v54 = vpop.permute.xlu0 %1850  ;;  %1883 = vmatprep.subr.mxu0 %v1874_v50  ;;  %v1868_v56 = vpop.permute.xlu1 %1867 }
 0x221   :  { %v1869_v62 = vsel %vm93_vm0, %v1866_v34, %v1868_v56  ;;  %v1872_v63 = vsel %vm93_vm0, %v1868_v56, %v1862_v39  ;;  %v1855_v0 = vsel %vm53_vm2, %v1851_v54, %v1845_v45 }
 0x222   :  { %v1873_v10 = vmul.f32 %v1872_v63, %v5262_v36  ;;  %v1876_v6 = vmul.f32 %v1869_v62, %v5265_v37  ;;  %v1856_v24 = vmul.f32 %v1855_v0, %v5274_v42 }
 0x224   :  { %v2172_v11 = vpop.permute.xlu0 %2171  ;;  %1884 = vmatpush1.msra.mxu0 %v1873_v10  ;;  %1954 = vmatprep.subr.mxu1 %v1876_v6  ;;  %v1849_v23 = vpop.permute.xlu1 %1848 }
 0x225   :  { %v1852_v27 = vsel %vm53_vm2, %v1849_v23, %v1851_v54  ;;  %v1853_v34 = vsel %vm53_vm2, %v1847_v47, %v1849_v23  ;;  %4901 = vmatmul.mubr.msk.f32.vlgmr.msra.gmra.mrb[2].mxu0 %vm1880_vm14, %v1879_v28  ;;  %1955 = vmatpush1.msra.mxu1 %v1875_v14 }
 0x226   :  { %v1858_v39 = vmul.f32 %v1853_v34, %v5283_v46  ;;  %v1859_v45 = vmul.f32 %v1852_v27, %v5292_v51  ;;  %2027 = vmatprep.subr.mxu0 %v1857_v20  ;;  %4902 = vmatmul.mubr.msk.f32.vlgmr.msra.gmra.mrb[2].mxu1 %vm1880_vm14, %v1879_v28 }
 0x227   :  { %2028 = vmatpush1.msra.mxu0 %v1856_v24  ;;  %2091 = vmatprep.mubr.f32.mxu0 %v5063_v9 }
 0x228   :  { %v2176_v48 = vpop.permute.xlu0 %2175  ;;  %2098 = vmatprep.subr.mxu1 %v1859_v45  ;;  %v2170_v49 = vpop.permute.xlu1 %2169  ;;  %2162 = vmatprep.mubr.f32.mxu1 %v5063_v9 }
 0x229   :  { %v2179_v47 = vsel %vm450_vm4, %v2170_v49, %v2172_v11  ;;  %v2180_v50 = vsel %vm450_vm4, %v2176_v48, %v2170_v49  ;;  %2099 = vmatpush1.msra.mxu1 %v1858_v39 }
 0x22a   :  { %v2181_v52 = vmul.f32 %v2180_v50, %v5323_v3  ;;  %v2182_v54 = vmul.f32 %v2179_v47, %v5298_v55 }
 0x22c   :  { %v2340_v28 = vpop.permute.xlu0 %2339  ;;  %2189 = vmatprep.subr.mxu0 %v2182_v54  ;;  %v2174_v56 = vpop.permute.xlu1 %2173 }
 0x22d   :  { %v2177_v57 = vsel %vm450_vm4, %v2174_v56, %v2176_v48  ;;  %v2178_v62 = vsel %vm450_vm4, %v2172_v11, %v2174_v56  ;;  %4903 = vmatmul.mubr.msk.f32.vlgmr.msra.gmra.mrb[2].mxu0 %vm1880_vm14, %v5534_v53 }
 0x22e   :  { %v2183_v63 = vmul.f32 %v2178_v62, %v5326_v4  ;;  %v2184_v0 = vmul.f32 %v2177_v57, %v5329_v5  ;;  %2190 = vmatpush1.msra.mxu0 %v2181_v52  ;;  %4904 = vmatmul.mubr.msk.f32.vlgmr.msra.gmra.mrb[2].mxu1 %vm1880_vm14, %v5534_v53 }
 0x22f   :  { %2253 = vmatprep.mubr.f32.mxu0 %v5063_v9  ;;  %2324 = vmatprep.mubr.f32.mxu1 %v5063_v9 }
 0x230   :  { %v2352_v10 = vpop.permute.xlu0 %2351  ;;  %2260 = vmatprep.subr.mxu1 %v2184_v0  ;;  %v2186_v6 = vpop.permute.xlu1 %2185 }
 0x231   :  { %2261 = vmatpush1.msra.mxu1 %v2183_v63 }
 0x234   :  { %v2652_v14 = vpop.permute.xlu0 %2651  ;;  %v2338_v20 = vpop.permute.xlu1 %2337 }
 0x235   :  { %v2345_v11 = vsel %vm654_vm5, %v5625_v40, %v2338_v20  ;;  %4905 = vmatmul.mubr.msk.f32.vlgmr.msra.gmra.mrb[2].mxu0 %vm1880_vm14, %v2186_v6  ;;  %v2344_v53 = vsel %vm654_vm5, %v2338_v20, %v2340_v28 }
 0x236   :  { %v2348_v23 = vmul.f32 %v2345_v11, %v5355_v1  ;;  %4906 = vmatmul.mubr.msk.f32.vlgmr.msra.gmra.mrb[2].mxu1 %vm1880_vm14, %v2186_v6  ;;  %2419 = vmatprep.mubr.f32.mxu0 %v5063_v9  ;;  %v2349_v49 = vmul.f32 %v2344_v53, %v5370_v44 }
 0x237   :  { %2490 = vmatprep.mubr.f32.mxu1 %v5063_v9 }
 0x238   :  { %v2656_v24 = vpop.permute.xlu0 %2655  ;;  %2355 = vmatprep.subr.mxu0 %v2348_v23  ;;  %v2342_v27 = vpop.permute.xlu1 %2341 }
 0x239   :  { %v2343_v34 = vsel %vm654_vm5, %v2340_v28, %v2342_v27  ;;  %v2346_v39 = vsel %vm654_vm5, %v2342_v27, %v5625_v40 }
 0x23a   :  { %v2347_v45 = vmul.f32 %v2346_v39, %v5363_v41  ;;  %v2350_v48 = vmul.f32 %v2343_v34, %v5366_v43 }
 0x23c   :  { %v2668_v47 = vpop.permute.xlu0 %2667  ;;  %2356 = vmatpush1.msra.mxu0 %v2347_v45  ;;  %2426 = vmatprep.subr.mxu1 %v2350_v48  ;;  %v2502_v50 = vpop.permute.xlu1 %2501 }
 0x23d   :  { %4907 = vmatmul.mubr.msk.f32.vlgmr.msra.gmra.mrb[2].mxu0 %vm1880_vm14, %v2352_v10  ;;  %2427 = vmatpush1.msra.mxu1 %v2349_v49 }
 0x23e   :  { %2505 = vmatprep.subr.mxu0 %v5550_v15  ;;  %4908 = vmatmul.mubr.msk.f32.vlgmr.msra.gmra.mrb[2].mxu1 %vm1880_vm14, %v2352_v10 }
 0x23f   :  { %2506 = vmatpush1.msra.mxu0 %v5538_v7  ;;  %2576 = vmatprep.subr.mxu1 %v5556_v26 }
 0x240   :  { %2577 = vmatpush1.msra.mxu1 %v5540_v16  ;;  %v2984_v40 = vpop.permute.xlu0 %2983  ;;  %v2818_v52 = vpop.permute.xlu1 %2817  ;;  %2569 = vmatprep.mubr.f32.mxu0 %v5063_v9 }
 0x241   :  { %2640 = vmatprep.mubr.f32.mxu1 %v5063_v9 }
 0x244   :  { %v2820_v54 = vpop.permute.xlu0 %2819  ;;  %v2654_v28 = vpop.permute.xlu1 %2653 }
 0x245   :  { %v2660_v56 = vsel %vm1016_vm6, %v2654_v28, %v2656_v24  ;;  %v2661_v15 = vsel %vm1016_vm6, %v2652_v14, %v2654_v28  ;;  %4909 = vmatmul.mubr.msk.f32.vlgmr.msra.gmra.mrb[2].mxu0 %vm1880_vm14, %v2502_v50  ;;  %v2827_v20 = vsel %vm1220_vm7, %v2818_v52, %v2820_v54 }
 0x246   :  { %v2663_v7 = vmul.f32 %v2661_v15, %v5393_v59  ;;  %v2664_v16 = vmul.f32 %v2660_v56, %v5396_v60  ;;  %4910 = vmatmul.mubr.msk.f32.vlgmr.msra.gmra.mrb[2].mxu1 %vm1880_vm14, %v2502_v50  ;;  %2735 = vmatprep.mubr.f32.mxu0 %v5063_v9  ;;  %v2829_v39 = vmul.f32 %v2827_v20, %v5448_v33 }
 0x247   :  { %2806 = vmatprep.mubr.f32.mxu1 %v5063_v9 }
 0x248   :  { %v2824_v26 = vpop.permute.xlu0 %2823  ;;  %2671 = vmatprep.subr.mxu0 %v2664_v16  ;;  %v2658_v57 = vpop.permute.xlu1 %2657 }
 0x249   :  { %v2828_v62 = vsel %vm1220_vm7, %v2824_v26, %v2818_v52  ;;  %v2659_v63 = vsel %vm1016_vm6, %v2656_v24, %v2658_v57  ;;  %v2662_v0 = vsel %vm1016_vm6, %v2658_v57, %v2652_v14  ;;  %2672 = vmatpush1.msra.mxu0 %v2663_v7 }
 0x24a   :  { %v2665_v10 = vmul.f32 %v2659_v63, %v5415_v2  ;;  %v2666_v6 = vmul.f32 %v2662_v0, %v5418_v13  ;;  %v2832_v11 = vmul.f32 %v2828_v62, %v5439_v30 }
 0x24c   :  { %v2988_v23 = vpop.permute.xlu0 %2987  ;;  %2742 = vmatprep.subr.mxu1 %v2666_v6  ;;  %v2822_v53 = vpop.permute.xlu1 %2821 }
 0x24d   :  { %v2825_v27 = vsel %vm1220_vm7, %v2822_v53, %v2824_v26  ;;  %v2826_v24 = vsel %vm1220_vm7, %v2820_v54, %v2822_v53  ;;  %4911 = vmatmul.mubr.msk.f32.vlgmr.msra.gmra.mrb[2].mxu0 %vm1880_vm14, %v2668_v47  ;;  %2743 = vmatpush1.msra.mxu1 %v2665_v10 }
 0x24e   :  { %v2830_v14 = vmul.f32 %v2826_v24, %v5442_v31  ;;  %v2831_v34 = vmul.f32 %v2825_v27, %v5445_v32  ;;  %4912 = vmatmul.mubr.msk.f32.vlgmr.msra.gmra.mrb[2].mxu1 %vm1880_vm14, %v2668_v47  ;;  %2908 = vmatprep.subr.mxu1 %v2832_v11  ;;  %v5770_v24 = vld [vmem:[%s6010_s4] sm:$0x3] }
 0x24f   :  { %2901 = vmatprep.mubr.f32.mxu0 %v5063_v9  ;;  %2972 = vmatprep.mubr.f32.mxu1 %v5063_v9 }
 0x250   :  { %v3000_v45 = vpop.permute.xlu0 %2999  ;;  %2837 = vmatprep.subr.mxu0 %v2830_v14  ;;  %2909 = vmatpush1.msra.mxu1 %v2831_v34  ;;  %v2834_v48 = vpop.permute.xlu1 %2833 }
 0x251   :  { %2838 = vmatpush1.msra.mxu0 %v2829_v39  ;;  %3369 = vrot.lane.b32.xlu0 %v5770_v24, %s5071_s28 }
 0x254   :  { %v2986_v49 = vpop.permute.xlu1 %2985  ;;  %v3152_v47 = vpop.permute.xlu0 %3151 }
 0x255   :  { %v2992_v50 = vsel %vm1424_vm8, %v2986_v49, %v2988_v23  ;;  %v2993_v52 = vsel %vm1424_vm8, %v2984_v40, %v2986_v49  ;;  %4913 = vmatmul.mubr.msk.f32.vlgmr.msra.gmra.mrb[2].mxu0 %vm1880_vm14, %v2834_v48 }
 0x256   :  { %v2995_v54 = vmul.f32 %v2993_v52, %v5475_v58  ;;  %v2996_v28 = vmul.f32 %v2992_v50, %v5478_v61  ;;  %4914 = vmatmul.mubr.msk.f32.vlgmr.msra.gmra.mrb[2].mxu1 %vm1880_vm14, %v2834_v48  ;;  %3067 = vmatprep.mubr.f32.mxu0 %v5063_v9 }
 0x257   :  { %3138 = vmatprep.mubr.f32.mxu1 %v5063_v9 }
 0x258   :  { %3003 = vmatprep.subr.mxu0 %v2996_v28  ;;  %v2990_v56 = vpop.permute.xlu1 %2989  ;;  %v3156_v57 = vpop.permute.xlu0 %3155 }
 0x259   :  { %v2991_v15 = vsel %vm1424_vm8, %v2988_v23, %v2990_v56  ;;  %v2994_v7 = vsel %vm1424_vm8, %v2990_v56, %v2984_v40  ;;  %3004 = vmatpush1.msra.mxu0 %v2995_v54 }
 0x25a   :  { %v2997_v16 = vmul.f32 %v2991_v15, %v5486_v12  ;;  %v2998_v26 = vmul.f32 %v2994_v7, %v5492_v19 }
 0x25c   :  { %3074 = vmatprep.subr.mxu1 %v2998_v26  ;;  %v3150_v62 = vpop.permute.xlu1 %3149 }
 0x25d   :  { %v3160_v63 = vsel %vm1628_vm9, %v3156_v57, %v3150_v62  ;;  %4915 = vmatmul.mubr.msk.f32.vlgmr.msra.gmra.mrb[2].mxu0 %vm1880_vm14, %v3000_v45  ;;  %3075 = vmatpush1.msra.mxu1 %v2997_v16  ;;  %v3159_v40 = vsel %vm1628_vm9, %v3150_v62, %v3152_v47 }
 0x25e   :  { %v3164_v0 = vmul.f32 %v3160_v63, %v5211_v18  ;;  %4916 = vmatmul.mubr.msk.f32.vlgmr.msra.gmra.mrb[2].mxu1 %vm1880_vm14, %v3000_v45  ;;  %3233 = vmatprep.mubr.f32.mxu0 %v5063_v9  ;;  %v3161_v53 = vmul.f32 %v3159_v40, %v5205_v17 }
 0x25f   :  { %3304 = vmatprep.mubr.f32.mxu1 %v5063_v9 }
 0x260   :  { %3240 = vmatprep.subr.mxu1 %v3164_v0  ;;  %v3154_v10 = vpop.permute.xlu1 %3153 }
 0x261   :  { %v3157_v6 = vsel %vm1628_vm9, %v3154_v10, %v3156_v57  ;;  %v3158_v20 = vsel %vm1628_vm9, %v3152_v47, %v3154_v10 }
 0x262   :  { %v3162_v11 = vmul.f32 %v3158_v20, %v5218_v21  ;;  %v3163_v23 = vmul.f32 %v3157_v6, %v5221_v22 }
 0x264   :  { %3169 = vmatprep.subr.mxu0 %v3162_v11  ;;  %3241 = vmatpush1.msra.mxu1 %v3163_v23  ;;  %v3166_v27 = vpop.permute.xlu1 %3165 }
 0x265   :  { %3170 = vmatpush1.msra.mxu0 %v3161_v53 }
 0x266   :  { %4917 = vmatmul.mubr.msk.f32.vlgmr.msra.gmra.mrb[2].mxu0 %vm1880_vm14, %v3166_v27  ;;  %4918 = vmatmul.mubr.msk.f32.vlgmr.msra.gmra.mrb[2].mxu1 %vm1880_vm14, %v3166_v27 }
 0x267   :  { %3437 = vmatprep.mubr.f32.mxu0 %v5063_v9  ;;  %3508 = vmatprep.mubr.f32.mxu1 %v5063_v9 }
 0x269   :  { %v3317_v14 = vpop.permute.xlu0 %3316 }
 0x2c3   :  { %v3370_v62 = vpop.permute.xlu0 %3369 }
 0x339   :  { %v3235_v34 = vpop.f32.mrb[2].mxu0  ;;  %v3306_v39 = vpop.f32.mrb[2].mxu1 }
 0x33a   :  { %v3319_v45 = vadd.f32 %v3317_v14, %v3235_v34  ;;  %v3321_v48 = vadd.f32 %v3317_v14, %v3306_v39  ;;  %v3237_v49 = vpop.f32.mrb[3].mxu0  ;;  %v3308_v50 = vpop.f32.mrb[3].mxu1 }
 0x33b   :  { %v3320_v56 = vadd.f32 %v3317_v14, %v3237_v49  ;;  %v3322_v7 = vadd.f32 %v3317_v14, %v3308_v50 }
 0x33c   :  { %vm3323_vm15 = vcmp.gt.f32.partialorder %v3319_v45, 0.0  ;;  %v3327_v52 = vmul.f32 0.2, %v3319_v45  ;;  %vm3325_vm1 = vcmp.gt.f32.partialorder %v3321_v48, 0.0  ;;  %v3329_v47 = vmul.f32 0.2, %v3321_v48 }
 0x33d   :  { %v3328_v15 = vmul.f32 0.2, %v3320_v56  ;;  %vm3324_vm3 = vcmp.gt.f32.partialorder %v3320_v56, 0.0  ;;  %v3330_v26 = vmul.f32 0.2, %v3322_v7  ;;  %vm3326_vm10 = vcmp.gt.f32.partialorder %v3322_v7, 0.0 }
 0x33e   :  { %v5774_v54 = vsel %vm3323_vm15, %v3319_v45, %v3327_v52  ;;  %v5776_v28 = vsel %vm3325_vm1, %v3321_v48, %v3329_v47 }
 0x33f   :  { %3356 = vrot.lane.b32.xlu0 %v5776_v28, %s5064_s0  ;;  %3352 = vrot.lane.b32.xlu1 %v5774_v54, %s5064_s0  ;;  %v5786_v16 = vsel %vm3324_vm3, %v3320_v56, %v3328_v15  ;;  %v5792_v57 = vsel %vm3326_vm10, %v3322_v7, %v3330_v26 }
 0x343   :  { %3825 = vrot.lane.b32.xlu0 %v5774_v54, %s5067_s24  ;;  %3335 = vrot.lane.b32.xlu1 %v5774_v54, %s5065_s2 }
 0x347   :  { %3337 = vrot.lane.b32.xlu0 %v5786_v16, %s5065_s2  ;;  %3354 = vrot.lane.b32.xlu1 %v5786_v16, %s5064_s0 }
 0x34b   :  { %3341 = vrot.lane.b32.xlu0 %v5792_v57, %s5065_s2  ;;  %3358 = vrot.lane.b32.xlu1 %v5792_v57, %s5064_s0 }
 0x34f   :  { %3661 = vrot.lane.b32.xlu0 %v5786_v16, %s5066_s23  ;;  %3339 = vrot.lane.b32.xlu1 %v5776_v28, %s5065_s2 }
 0x353   :  { %3665 = vrot.lane.b32.xlu0 %v5792_v57, %s5066_s23  ;;  %3659 = vrot.lane.b32.xlu1 %v5774_v54, %s5066_s23 }
 0x357   :  { %3829 = vrot.lane.b32.xlu0 %v5776_v28, %s5067_s24  ;;  %3663 = vrot.lane.b32.xlu1 %v5776_v28, %s5066_s23 }
 0x35b   :  { %3841 = vrot.lane.b32.xlu0 %v5770_v24, %s5079_s3  ;;  %3675 = vrot.lane.b32.xlu1 %v5770_v24, %s5074_s8 }
 0x35f   :  { %4141 = vrot.lane.b32.xlu0 %v5774_v54, %s5070_s27  ;;  %3827 = vrot.lane.b32.xlu1 %v5786_v16, %s5067_s24 }
 0x363   :  { %4145 = vrot.lane.b32.xlu0 %v5776_v28, %s5070_s27  ;;  %3831 = vrot.lane.b32.xlu1 %v5792_v57, %s5067_s24 }
 0x367   :  { %4157 = vrot.lane.b32.xlu0 %v5770_v24, %s5080_s7  ;;  %3991 = vrot.lane.b32.xlu1 %v5770_v24, %s5081_s9 }
 0x36b   :  { %4473 = vrot.lane.b32.xlu0 %v5774_v54, %s5074_s8  ;;  %4307 = vrot.lane.b32.xlu1 %v5774_v54, %s5073_s30 }
 0x36f   :  { %4309 = vrot.lane.b32.xlu0 %v5786_v16, %s5073_s30  ;;  %4143 = vrot.lane.b32.xlu1 %v5786_v16, %s5070_s27 }
 0x373   :  { %4313 = vrot.lane.b32.xlu0 %v5792_v57, %s5073_s30  ;;  %4147 = vrot.lane.b32.xlu1 %v5792_v57, %s5070_s27 }
 0x377   :  { %4477 = vrot.lane.b32.xlu0 %v5776_v28, %s5074_s8  ;;  %4311 = vrot.lane.b32.xlu1 %v5776_v28, %s5073_s30 }
 0x37b   :  { %4489 = vrot.lane.b32.xlu0 %v5770_v24, %s5082_s10  ;;  %4323 = vrot.lane.b32.xlu1 %v5770_v24, %s5083_s12 }
 0x37f   :  { %4641 = vrot.lane.b32.xlu0 %v5786_v16, %s5078_s11  ;;  %4475 = vrot.lane.b32.xlu1 %v5786_v16, %s5074_s8 }
 0x383   :  { %4645 = vrot.lane.b32.xlu0 %v5792_v57, %s5078_s11  ;;  %4479 = vrot.lane.b32.xlu1 %v5792_v57, %s5074_s8 }
 0x387   :  { %4806 = vperm.xlu0 %5059, %v5770_v24   ;;  %4639 = vrot.lane.b32.xlu1 %v5774_v54, %s5078_s11 }
 0x38b   :  { %4643 = vrot.lane.b32.xlu1 %v5776_v28, %s5078_s11 }
 0x38f   :  { %4655 = vrot.lane.b32.xlu1 %v5770_v24, %s5085_s13 }
 0x3b1   :  { %v3357_v63 = vpop.permute.xlu0 %3356  ;;  %v3353_v0 = vpop.permute.xlu1 %3352 }
 0x3b5   :  { %v5861_v40 = vpop.permute.xlu0 %3825  ;;  %v3336_v10 = vpop.permute.xlu1 %3335 }
 0x3b9   :  { %v3338_v6 = vpop.permute.xlu0 %3337  ;;  %v3355_v20 = vpop.permute.xlu1 %3354 }
 0x3ba   :  { %v3362_v11 = vsel %vm93_vm0, %v3353_v0, %v3355_v20  ;;  %v3361_v53 = vsel %vm93_vm0, %v3355_v20, %v3357_v63  ;;  %v3345_v34 = vsel %vm53_vm2, %v3336_v10, %v3338_v6 }
 0x3bb   :  { %v3365_v23 = vmul.f32 %v3362_v11, %v5249_v29  ;;  %v3366_v50 = vmul.f32 %v3361_v53, %v5268_v38  ;;  %v3348_v52 = vmul.f32 %v3345_v34, %v5259_v35 }
 0x3bd   :  { %v3342_v27 = vpop.permute.xlu0 %3341  ;;  %3373 = vmatprep.subr.mxu0 %v3365_v23  ;;  %v3359_v14 = vpop.permute.xlu1 %3358 }
 0x3be   :  { %v3360_v39 = vsel %vm93_vm0, %v3357_v63, %v3359_v14  ;;  %v3363_v45 = vsel %vm93_vm0, %v3359_v14, %v3353_v0  ;;  %v3346_v48 = vsel %vm53_vm2, %v3342_v27, %v3336_v10 }
 0x3bf   :  { %v3364_v29 = vmul.f32 %v3363_v45, %v5262_v36  ;;  %v3367_v49 = vmul.f32 %v3360_v39, %v5265_v37  ;;  %v3347_v15 = vmul.f32 %v3346_v48, %v5274_v42 }
 0x3c1   :  { %v3662_v47 = vpop.permute.xlu0 %3661  ;;  %3374 = vmatpush1.msra.mxu0 %v3364_v29  ;;  %3444 = vmatprep.subr.mxu1 %v3367_v49  ;;  %v3340_v56 = vpop.permute.xlu1 %3339 }
 0x3c2   :  { %v3343_v7 = vsel %vm53_vm2, %v3340_v56, %v3342_v27  ;;  %v3344_v26 = vsel %vm53_vm2, %v3338_v6, %v3340_v56  ;;  %4919 = vmatmul.mubr.msk.f32.vlgmr.msra.gmra.mrb[4].mxu0 %vm1880_vm14, %v3370_v62  ;;  %3445 = vmatpush1.msra.mxu1 %v3366_v50 }
 0x3c3   :  { %v3349_v36 = vmul.f32 %v3344_v26, %v5283_v46  ;;  %v3350_v37 = vmul.f32 %v3343_v7, %v5292_v51  ;;  %3517 = vmatprep.subr.mxu0 %v3348_v52  ;;  %4920 = vmatmul.mubr.msk.f32.vlgmr.msra.gmra.mrb[4].mxu1 %vm1880_vm14, %v3370_v62 }
 0x3c4   :  { %3518 = vmatpush1.msra.mxu0 %v3347_v15  ;;  %3581 = vmatprep.mubr.f32.mxu0 %v5063_v9 }
 0x3c5   :  { %v3666_v35 = vpop.permute.xlu0 %3665  ;;  %3588 = vmatprep.subr.mxu1 %v3350_v37  ;;  %v3660_v38 = vpop.permute.xlu1 %3659  ;;  %3652 = vmatprep.mubr.f32.mxu1 %v5063_v9 }
 0x3c6   :  { %v3669_v42 = vsel %vm450_vm4, %v3660_v38, %v3662_v47  ;;  %v3670_v63 = vsel %vm450_vm4, %v3666_v35, %v3660_v38  ;;  %3589 = vmatpush1.msra.mxu1 %v3349_v36 }
 0x3c7   :  { %v3671_v46 = vmul.f32 %v3670_v63, %v5323_v3  ;;  %v3672_v51 = vmul.f32 %v3669_v42, %v5298_v55 }
 0x3c9   :  { %v3830_v62 = vpop.permute.xlu0 %3829  ;;  %3679 = vmatprep.subr.mxu0 %v3672_v51  ;;  %v3664_v0 = vpop.permute.xlu1 %3663 }
 0x3ca   :  { %v3667_v10 = vsel %vm450_vm4, %v3664_v0, %v3666_v35  ;;  %v3668_v6 = vsel %vm450_vm4, %v3662_v47, %v3664_v0  ;;  %4921 = vmatmul.mubr.msk.f32.vlgmr.msra.gmra.mrb[4].mxu0 %vm1880_vm14, %v5770_v24 }
 0x3cb   :  { %v3673_v20 = vmul.f32 %v3668_v6, %v5326_v4  ;;  %v3674_v11 = vmul.f32 %v3667_v10, %v5329_v5  ;;  %3680 = vmatpush1.msra.mxu0 %v3671_v46  ;;  %4922 = vmatmul.mubr.msk.f32.vlgmr.msra.gmra.mrb[4].mxu1 %vm1880_vm14, %v5770_v24 }
 0x3cc   :  { %3743 = vmatprep.mubr.f32.mxu0 %v5063_v9  ;;  %3814 = vmatprep.mubr.f32.mxu1 %v5063_v9 }
 0x3cd   :  { %v3842_v55 = vpop.permute.xlu0 %3841  ;;  %3750 = vmatprep.subr.mxu1 %v3674_v11  ;;  %v3676_v3 = vpop.permute.xlu1 %3675 }
 0x3ce   :  { %3751 = vmatpush1.msra.mxu1 %v3673_v20 }
 0x3d1   :  { %v4142_v23 = vpop.permute.xlu0 %4141  ;;  %v3828_v53 = vpop.permute.xlu1 %3827 }
 0x3d2   :  { %v3835_v4 = vsel %vm654_vm5, %v5861_v40, %v3828_v53  ;;  %4923 = vmatmul.mubr.msk.f32.vlgmr.msra.gmra.mrb[4].mxu0 %vm1880_vm14, %v3676_v3  ;;  %v3834_v24 = vsel %vm654_vm5, %v3828_v53, %v3830_v62 }
 0x3d3   :  { %v3838_v5 = vmul.f32 %v3835_v4, %v5355_v1  ;;  %4924 = vmatmul.mubr.msk.f32.vlgmr.msra.gmra.mrb[4].mxu1 %vm1880_vm14, %v3676_v3  ;;  %3909 = vmatprep.mubr.f32.mxu0 %v5063_v9  ;;  %v3839_v48 = vmul.f32 %v3834_v24, %v5370_v44 }
 0x3d4   :  { %3980 = vmatprep.mubr.f32.mxu1 %v5063_v9 }
 0x3d5   :  { %v4146_v27 = vpop.permute.xlu0 %4145  ;;  %3845 = vmatprep.subr.mxu0 %v3838_v5  ;;  %v3832_v14 = vpop.permute.xlu1 %3831 }
 0x3d6   :  { %v3833_v34 = vsel %vm654_vm5, %v3830_v62, %v3832_v14  ;;  %v3836_v39 = vsel %vm654_vm5, %v3832_v14, %v5861_v40 }
 0x3d7   :  { %v3837_v1 = vmul.f32 %v3836_v39, %v5363_v41  ;;  %v3840_v45 = vmul.f32 %v3833_v34, %v5366_v43 }
 0x3d9   :  { %v4158_v29 = vpop.permute.xlu0 %4157  ;;  %3846 = vmatpush1.msra.mxu0 %v3837_v1  ;;  %3916 = vmatprep.subr.mxu1 %v3840_v45  ;;  %v3992_v49 = vpop.permute.xlu1 %3991 }
 0x3da   :  { %4925 = vmatmul.mubr.msk.f32.vlgmr.msra.gmra.mrb[4].mxu0 %vm1880_vm14, %v3842_v55  ;;  %3917 = vmatpush1.msra.mxu1 %v3839_v48 }
 0x3db   :  { %3995 = vmatprep.subr.mxu0 %v5786_v16  ;;  %4926 = vmatmul.mubr.msk.f32.vlgmr.msra.gmra.mrb[4].mxu1 %vm1880_vm14, %v3842_v55 }
 0x3dc   :  { %3996 = vmatpush1.msra.mxu0 %v5774_v54  ;;  %4066 = vmatprep.subr.mxu1 %v5792_v57 }
 0x3dd   :  { %4067 = vmatpush1.msra.mxu1 %v5776_v28  ;;  %v4474_v41 = vpop.permute.xlu0 %4473  ;;  %v4308_v43 = vpop.permute.xlu1 %4307  ;;  %4059 = vmatprep.mubr.f32.mxu0 %v5063_v9 }
 0x3de   :  { %4130 = vmatprep.mubr.f32.mxu1 %v5063_v9 }
 0x3e1   :  { %v4310_v44 = vpop.permute.xlu0 %4309  ;;  %v4144_v40 = vpop.permute.xlu1 %4143 }
 0x3e2   :  { %v4150_v50 = vsel %vm1016_vm6, %v4144_v40, %v4146_v27  ;;  %v4151_v16 = vsel %vm1016_vm6, %v4142_v23, %v4144_v40  ;;  %4927 = vmatmul.mubr.msk.f32.vlgmr.msra.gmra.mrb[4].mxu0 %vm1880_vm14, %v3992_v49  ;;  %v4317_v7 = vsel %vm1220_vm7, %v4308_v43, %v4310_v44 }
 0x3e3   :  { %v4153_v54 = vmul.f32 %v4151_v16, %v5393_v59  ;;  %v4154_v28 = vmul.f32 %v4150_v50, %v5396_v60  ;;  %4928 = vmatmul.mubr.msk.f32.vlgmr.msra.gmra.mrb[4].mxu1 %vm1880_vm14, %v3992_v49  ;;  %4225 = vmatprep.mubr.f32.mxu0 %v5063_v9 }
 0x3e4   :  { %4296 = vmatprep.mubr.f32.mxu1 %v5063_v9 }
 0x3e5   :  { %v4314_v57 = vpop.permute.xlu0 %4313  ;;  %4161 = vmatprep.subr.mxu0 %v4154_v28  ;;  %v4148_v52 = vpop.permute.xlu1 %4147 }
 0x3e6   :  { %v4318_v47 = vsel %vm1220_vm7, %v4314_v57, %v4308_v43  ;;  %v4149_v56 = vsel %vm1016_vm6, %v4146_v27, %v4148_v52  ;;  %v4152_v59 = vsel %vm1016_vm6, %v4148_v52, %v4142_v23  ;;  %4162 = vmatpush1.msra.mxu0 %v4153_v54 }
 0x3e7   :  { %v4155_v60 = vmul.f32 %v4149_v56, %v5415_v2  ;;  %v4156_v15 = vmul.f32 %v4152_v59, %v5418_v13  ;;  %v4322_v26 = vmul.f32 %v4318_v47, %v5439_v30  ;;  %v4319_v30 = vmul.f32 %v4317_v7, %v5448_v33 }
 0x3e9   :  { %v4478_v36 = vpop.permute.xlu0 %4477  ;;  %4232 = vmatprep.subr.mxu1 %v4156_v15  ;;  %v4312_v37 = vpop.permute.xlu1 %4311 }
 0x3ea   :  { %v4315_v35 = vsel %vm1220_vm7, %v4312_v37, %v4314_v57  ;;  %v4316_v38 = vsel %vm1220_vm7, %v4310_v44, %v4312_v37  ;;  %4929 = vmatmul.mubr.msk.f32.vlgmr.msra.gmra.mrb[4].mxu0 %vm1880_vm14, %v4158_v29  ;;  %4233 = vmatpush1.msra.mxu1 %v4155_v60 }
 0x3eb   :  { %v4320_v2 = vmul.f32 %v4316_v38, %v5442_v31  ;;  %v4321_v13 = vmul.f32 %v4315_v35, %v5445_v32  ;;  %4930 = vmatmul.mubr.msk.f32.vlgmr.msra.gmra.mrb[4].mxu1 %vm1880_vm14, %v4158_v29  ;;  %4398 = vmatprep.subr.mxu1 %v4322_v26 }
 0x3ec   :  { %4391 = vmatprep.mubr.f32.mxu0 %v5063_v9  ;;  %4462 = vmatprep.mubr.f32.mxu1 %v5063_v9 }
 0x3ed   :  { %v4490_v42 = vpop.permute.xlu0 %4489  ;;  %4327 = vmatprep.subr.mxu0 %v4320_v2  ;;  %4399 = vmatpush1.msra.mxu1 %v4321_v13  ;;  %v4324_v63 = vpop.permute.xlu1 %4323 }
 0x3ee   :  { %4328 = vmatpush1.msra.mxu0 %v4319_v30 }
 0x3f1   :  { %v4476_v46 = vpop.permute.xlu1 %4475  ;;  %v4642_v51 = vpop.permute.xlu0 %4641 }
 0x3f2   :  { %v4482_v31 = vsel %vm1424_vm8, %v4476_v46, %v4478_v36  ;;  %v4483_v32 = vsel %vm1424_vm8, %v4474_v41, %v4476_v46  ;;  %4931 = vmatmul.mubr.msk.f32.vlgmr.msra.gmra.mrb[4].mxu0 %vm1880_vm14, %v4324_v63 }
 0x3f3   :  { %v4485_v33 = vmul.f32 %v4483_v32, %v5475_v58  ;;  %v4486_v62 = vmul.f32 %v4482_v31, %v5478_v61  ;;  %4932 = vmatmul.mubr.msk.f32.vlgmr.msra.gmra.mrb[4].mxu1 %vm1880_vm14, %v4324_v63  ;;  %4557 = vmatprep.mubr.f32.mxu0 %v5063_v9 }
 0x3f4   :  { %4628 = vmatprep.mubr.f32.mxu1 %v5063_v9 }
 0x3f5   :  { %4493 = vmatprep.subr.mxu0 %v4486_v62  ;;  %v4480_v0 = vpop.permute.xlu1 %4479  ;;  %v4646_v61 = vpop.permute.xlu0 %4645 }
 0x3f6   :  { %v4481_v10 = vsel %vm1424_vm8, %v4478_v36, %v4480_v0  ;;  %v4484_v6 = vsel %vm1424_vm8, %v4480_v0, %v4474_v41  ;;  %4494 = vmatpush1.msra.mxu0 %v4485_v33 }
 0x3f7   :  { %v4487_v20 = vmul.f32 %v4481_v10, %v5486_v12  ;;  %v4488_v58 = vmul.f32 %v4484_v6, %v5492_v19 }
 0x3f9   :  { %4564 = vmatprep.subr.mxu1 %v4488_v58  ;;  %v4640_v11 = vpop.permute.xlu1 %4639 }
 0x3fa   :  { %v4650_v55 = vsel %vm1628_vm9, %v4646_v61, %v4640_v11  ;;  %4933 = vmatmul.mubr.msk.f32.vlgmr.msra.gmra.mrb[4].mxu0 %vm1880_vm14, %v4490_v42  ;;  %4565 = vmatpush1.msra.mxu1 %v4487_v20  ;;  %v4649_v12 = vsel %vm1628_vm9, %v4640_v11, %v4642_v51 }
 0x3fb   :  { %v4654_v3 = vmul.f32 %v4650_v55, %v5211_v18  ;;  %4934 = vmatmul.mubr.msk.f32.vlgmr.msra.gmra.mrb[4].mxu1 %vm1880_vm14, %v4490_v42  ;;  %4723 = vmatprep.mubr.f32.mxu0 %v5063_v9  ;;  %v4651_v5 = vmul.f32 %v4649_v12, %v5205_v17 }
 0x3fc   :  { %4794 = vmatprep.mubr.f32.mxu1 %v5063_v9 }
 0x3fd   :  { %4730 = vmatprep.subr.mxu1 %v4654_v3  ;;  %v4644_v19 = vpop.permute.xlu1 %4643 }
 0x3fe   :  { %v4647_v23 = vsel %vm1628_vm9, %v4644_v19, %v4646_v61  ;;  %v4648_v53 = vsel %vm1628_vm9, %v4642_v51, %v4644_v19 }
 0x3ff   :  { %v4652_v4 = vmul.f32 %v4648_v53, %v5218_v21  ;;  %v4653_v18 = vmul.f32 %v4647_v23, %v5221_v22 }
 0x401   :  { %4659 = vmatprep.subr.mxu0 %v4652_v4  ;;  %4731 = vmatpush1.msra.mxu1 %v4653_v18  ;;  %v4656_v9 = vpop.permute.xlu1 %4655 }
 0x402   :  { %4660 = vmatpush1.msra.mxu0 %v4651_v5 }
 0x403   :  { %4935 = vmatmul.mubr.msk.f32.vlgmr.msra.gmra.mrb[4].mxu0 %vm1880_vm14, %v4656_v9  ;;  %4936 = vmatmul.mubr.msk.f32.vlgmr.msra.gmra.mrb[4].mxu1 %vm1880_vm14, %v4656_v9 }
 0x406   :  { %v4807_v24 = vpop.permute.xlu0 %4806 }
 0x4d6   :  { %v4725_v27 = vpop.f32.mrb[4].mxu0  ;;  %v4796_v14 = vpop.f32.mrb[4].mxu1 }
 0x4d7   :  { %v4809_v34 = vadd.f32 %v4807_v24, %v4725_v27  ;;  %v4811_v25 = vadd.f32 %v4807_v24, %v4796_v14  ;;  %v4727_v39 = vpop.f32.mrb[5].mxu0  ;;  %v4798_v1 = vpop.f32.mrb[5].mxu1 }
 0x4d8   :  { %v4810_v21 = vadd.f32 %v4807_v24, %v4727_v39  ;;  %v4812_v45 = vadd.f32 %v4807_v24, %v4798_v1 }
 0x4da   :  { %v4817_v22 = vcombine.low %v4809_v34, %v4810_v21  ;;  %v4818_v48 = vcombine.low %v4811_v25, %v4812_v45 }
 0x4dc   :  { %v4825_v17 = vrot.slane %v4817_v22, %v5126_v8  ;;  %v4832_v29 = vrot.slane %v4818_v48, %v5126_v8 }
 0x4de   :  { %v4833_v49 = vcombine.low %v4825_v17, %v4832_v29 }
 0x4e0   :  { %4835 = vst [vmem:[%s6011_s5] sm:$0xff] %v4833_v49 }

// kernel: sew_morph_forward.4
= control target key start
LH: loop header
LB: loop body
LE: loop exit
PB: predicated region body
PF: predicated region fallthrough
CT: control target
= control target key end

     0   :  { %v22_v0 = vlaneseq  ;;  %v12074_v13 = vmov 0.0   ;;  %s9926_s22 = smov 127   ;;  %s9927_s23 = smov 17   ;;  %vm226_vm1 = vcmask 1040384   ;;  %vm223_vm2 = vcmask 7168   ;;  %s12068_s0 = inlined_call_operand.vmem [shape: f32[1,1024], index: 0, kind: input, shape index: {}]   ;;  %s12069_s2 = inlined_call_operand.vmem [shape: f32[8,10], index: 2, kind: input, shape index: {}]   ;;  %s12070_s1 = inlined_call_operand.vmem [shape: f32[9,1024], index: 1, kind: input, shape index: {}]   ;;  %s12071_s3 = inlined_call_operand.vmem [shape: f32[8,73], index: 3, kind: input, shape index: {}]   ;;  %s12072_s4 = inlined_call_operand.vmem [shape: f32[1,73], index: 4, kind: input, shape index: {}]   ;;  %s12073_s5 = inlined_call_operand.vmem [shape: f32[1,1024], index: 5, kind: output, shape index: {}]  }
   0x1   :  { %v20_v2 = vld [vmem:[%s12068_s0] sm:$0xff]  ;;  %s9924_s0 = smov 16   ;;  %315 = vmatprep.mubr.f32.mxu0 %v12074_v13  ;;  %386 = vmatprep.mubr.f32.mxu1 %v12074_v13  ;;  %s9929_s24 = smov 126  }
   0x2   :  { %v9980_v1 = vshrl.u32 %v22_v0, 7  ;;  %v10054_v20 = vld [vmem:[%s12069_s2] sm:$0xff]  ;;  %s9928_s2 = smov 15   ;;  %s9930_s25 = smov 1   ;;  %v10154_v23 = vand.u32 127, %v22_v0 }
   0x3   :  { %s9931_s26 = smov 125   ;;  %s9932_s27 = smov 124   ;;  %v9509_v21 = vld [vmem:[%s12070_s1 + $0x1] ss:$8 sm:$0xf] }
   0x4   :  { %12188 = vst [vmem:[#allocation2_spill] sm:$0xff] %v9980_v1  ;;  %v9986_v3 = vsub.s32 2, %v9980_v1  ;;  %v9989_v4 = vsub.s32 0, %v9980_v1  ;;  %v9992_v5 = vsub.s32 3, %v9980_v1  ;;  %v9995_v6 = vsub.s32 1, %v9980_v1  ;;  %s9933_s28 = smov 123  }
   0x5   :  { %v10004_v9 = vsub.s32 7, %v9980_v1  ;;  %v10017_v12 = vsub.s32 6, %v9980_v1  ;;  %v10032_v16 = vsub.s32 4, %v9980_v1  ;;  %v10035_v17 = vsub.s32 5, %v9980_v1  ;;  %s9934_s29 = smov 113   ;;  %s9935_s30 = smov 122  }
   0x6   :  { %12189 = vst [vmem:[#allocation3_spill] sm:$0xff] %v9989_v4  ;;  %v9998_v7 = vrot.slane %v20_v2, %v9986_v3  ;;  %v10001_v8 = vrot.slane %v20_v2, %v9989_v4  ;;  %v10011_v10 = vrot.slane %v20_v2, %v9992_v5  ;;  %v10014_v11 = vrot.slane %v20_v2, %v9995_v6  ;;  %s9936_s6 = smov 112   ;;  %v9510_v22 = vld [vmem:[%s12070_s1 + $0x1] ss:$8 sm:$0xf0]  ;;  %s9937_s11 = smov 121  }
   0x7   :  { %v10026_v14 = vrot.slane %v20_v2, %v10004_v9  ;;  %v10029_v15 = vrot.slane %v20_v2, %v10017_v12  ;;  %v10042_v18 = vrot.slane %v20_v2, %v10032_v16  ;;  %v10045_v19 = vrot.slane %v20_v2, %v10035_v17  ;;  %s9938_s12 = smov 111   ;;  %v89_v49 = vld [vmem:[%s12070_s1] ss:$8 sm:$0xf]  ;;  %s9940_s17 = smov 120  }
   0x8   :  { %146 = vrot.lane.b32.xlu0 %v9998_v7, %s9924_s0  ;;  %142 = vrot.lane.b32.xlu1 %v10001_v8, %s9924_s0  ;;  %v170_v24 = vor.u32 %v9510_v22, %v9509_v21  ;;  %vm158_vm0 = vcmp.lt.s32.totalorder %v10154_v23, 16  ;;  %v90_v50 = vld [vmem:[%s12070_s1] ss:$8 sm:$0xf0]  ;;  %vm80_vm3 = vcmp.lt.s32.totalorder %v10154_v23, 17  ;;  %vm861_vm4 = vcmp.lt.s32.totalorder %v10154_v23, 15 }
   0x9   :  { %v10228_v56 = vor.u32 %v90_v50, %v89_v49  ;;  %v10314_v50 = vld [vmem:[%s12071_s3] sm:$0xff]  ;;  %s9942_s9 = smov 96   ;;  %vm1259_vm5 = vcmp.lt.s32.totalorder %v10154_v23, 1  ;;  %vm1969_vm6 = vcmp.lt.s32.totalorder %v10154_v23, 127  ;;  %vm2367_vm7 = vcmp.lt.s32.totalorder %v10154_v23, 113  ;;  %s9944_s10 = smov 80  }
   0xa   :  { %v10166_v27 = vrot.slane %v170_v24, %v9992_v5  ;;  %v10169_v28 = vrot.slane %v170_v24, %v9995_v6  ;;  %v10172_v29 = vrot.slane %v170_v24, %v9986_v3  ;;  %v10175_v32 = vrot.slane %v170_v24, %v10004_v9  ;;  %s9947_s15 = smov 64  }
   0xb   :  { %v10184_v36 = vrot.slane %v170_v24, %v9989_v4  ;;  %v10201_v44 = vrot.slane %v170_v24, %v10032_v16  ;;  %v10204_v45 = vrot.slane %v170_v24, %v10035_v17  ;;  %v10212_v48 = vrot.slane %v170_v24, %v10017_v12 }
   0xc   :  { %148 = vrot.lane.b32.xlu0 %v10011_v10, %s9924_s0  ;;  %144 = vrot.lane.b32.xlu1 %v10014_v11, %s9924_s0  ;;  %12190 = vst [vmem:[#allocation4_spill] sm:$0xff] %v10166_v27  ;;  %12191 = vst [vmem:[#allocation5_spill] sm:$0xff] %v10169_v28  ;;  %v10245_v62 = vrot.slane %v10228_v56, %v9992_v5  ;;  %v10259_v21 = vrot.slane %v10228_v56, %v9995_v6  ;;  %vm2765_vm8 = vcmp.lt.s32.totalorder %v10154_v23, 112 }
   0xd   :  { %12192 = vst [vmem:[#allocation6_spill] sm:$0xff] %v10172_v29  ;;  %12193 = vst [vmem:[#allocation7_spill] sm:$0xff] %v10175_v32  ;;  %v10264_v24 = vrot.slane %v10228_v56, %v9986_v3  ;;  %v10307_v49 = vrot.slane %v10228_v56, %v10035_v17  ;;  %vm3163_vm9 = vcmp.lt.s32.totalorder %v10154_v23, 111  ;;  %v9948_v23 = vmov 1966171168  }
   0xe   :  { %12194 = vst [vmem:[#allocation8_spill] sm:$0xff] %v10184_v36 }
  0x10   :  { %156 = vrot.lane.b32.xlu0 %v10026_v14, %s9924_s0  ;;  %154 = vrot.lane.b32.xlu1 %v10029_v15, %s9924_s0 }
  0x14   :  { %150 = vrot.lane.b32.xlu0 %v10042_v18, %s9924_s0  ;;  %152 = vrot.lane.b32.xlu1 %v10045_v19, %s9924_s0 }
  0x18   :  { %221 = vrot.lane.b32.xlu0 %v10054_v20, %s9926_s22  ;;  %66 = vrot.lane.b32.xlu1 %v9998_v7, %s9927_s23 }
  0x1c   :  { %68 = vrot.lane.b32.xlu0 %v10011_v10, %s9927_s23  ;;  %62 = vrot.lane.b32.xlu1 %v10001_v8, %s9927_s23 }
  0x20   :  { %64 = vrot.lane.b32.xlu0 %v10014_v11, %s9927_s23  ;;  %76 = vrot.lane.b32.xlu1 %v10026_v14, %s9927_s23 }
  0x24   :  { %74 = vrot.lane.b32.xlu0 %v10029_v15, %s9927_s23  ;;  %70 = vrot.lane.b32.xlu1 %v10042_v18, %s9927_s23 }
  0x28   :  { %72 = vrot.lane.b32.xlu0 %v10045_v19, %s9927_s23  ;;  %849 = vrot.lane.b32.xlu1 %v9998_v7, %s9928_s2 }
  0x2c   :  { %851 = vrot.lane.b32.xlu0 %v10011_v10, %s9928_s2  ;;  %845 = vrot.lane.b32.xlu1 %v10001_v8, %s9928_s2 }
  0x30   :  { %847 = vrot.lane.b32.xlu0 %v10014_v11, %s9928_s2  ;;  %859 = vrot.lane.b32.xlu1 %v10026_v14, %s9928_s2 }
  0x34   :  { %857 = vrot.lane.b32.xlu0 %v10029_v15, %s9928_s2  ;;  %853 = vrot.lane.b32.xlu1 %v10042_v18, %s9928_s2 }
  0x38   :  { %855 = vrot.lane.b32.xlu0 %v10045_v19, %s9928_s2  ;;  %923 = vrot.lane.b32.xlu1 %v10054_v20, %s9929_s24 }
  0x3c   :  { %1247 = vrot.lane.b32.xlu0 %v9998_v7, %s9930_s25  ;;  %1249 = vrot.lane.b32.xlu1 %v10011_v10, %s9930_s25 }
  0x40   :  { %1243 = vrot.lane.b32.xlu0 %v10001_v8, %s9930_s25  ;;  %1245 = vrot.lane.b32.xlu1 %v10014_v11, %s9930_s25 }
  0x44   :  { %1257 = vrot.lane.b32.xlu0 %v10026_v14, %s9930_s25  ;;  %1255 = vrot.lane.b32.xlu1 %v10029_v15, %s9930_s25 }
  0x48   :  { %1251 = vrot.lane.b32.xlu0 %v10042_v18, %s9930_s25  ;;  %1253 = vrot.lane.b32.xlu1 %v10045_v19, %s9930_s25 }
  0x4c   :  { %1321 = vrot.lane.b32.xlu0 %v10054_v20, %s9931_s26  ;;  %1641 = vrot.lane.b32.xlu1 %v10054_v20, %s9932_s27  ;;  %s9941_s27 = smov 104  }
  0x50   :  { %1959 = vrot.lane.b32.xlu0 %v10011_v10, %s9926_s22  ;;  %1961 = vrot.lane.b32.xlu1 %v10042_v18, %s9926_s22 }
  0x54   :  { %1955 = vrot.lane.b32.xlu0 %v10014_v11, %s9926_s22  ;;  %1957 = vrot.lane.b32.xlu1 %v9998_v7, %s9926_s22 }
  0x58   :  { %1953 = vrot.lane.b32.xlu0 %v10001_v8, %s9926_s22  ;;  %1967 = vrot.lane.b32.xlu1 %v10026_v14, %s9926_s22 }
  0x5c   :  { %1963 = vrot.lane.b32.xlu0 %v10045_v19, %s9926_s22  ;;  %1965 = vrot.lane.b32.xlu1 %v10029_v15, %s9926_s22 }
  0x60   :  { %2031 = vrot.lane.b32.xlu0 %v10054_v20, %s9933_s28  ;;  %2357 = vrot.lane.b32.xlu1 %v10011_v10, %s9934_s29 }
  0x64   :  { %2359 = vrot.lane.b32.xlu0 %v10042_v18, %s9934_s29  ;;  %2353 = vrot.lane.b32.xlu1 %v10014_v11, %s9934_s29 }
  0x68   :  { %2355 = vrot.lane.b32.xlu0 %v9998_v7, %s9934_s29  ;;  %2351 = vrot.lane.b32.xlu1 %v10001_v8, %s9934_s29 }
  0x6c   :  { %2365 = vrot.lane.b32.xlu0 %v10026_v14, %s9934_s29  ;;  %2361 = vrot.lane.b32.xlu1 %v10045_v19, %s9934_s29 }
  0x70   :  { %2363 = vrot.lane.b32.xlu0 %v10029_v15, %s9934_s29  ;;  %2429 = vrot.lane.b32.xlu1 %v10054_v20, %s9935_s30 }
  0x74   :  { %2755 = vrot.lane.b32.xlu0 %v10011_v10, %s9936_s6  ;;  %2757 = vrot.lane.b32.xlu1 %v10042_v18, %s9936_s6 }
  0x78   :  { %2751 = vrot.lane.b32.xlu0 %v10014_v11, %s9936_s6  ;;  %2753 = vrot.lane.b32.xlu1 %v9998_v7, %s9936_s6 }
  0x7a   :  { %v147_v25 = vpop.permute.xlu0 %146  ;;  %v143_v26 = vpop.permute.xlu1 %142 }
  0x7c   :  { %2749 = vrot.lane.b32.xlu0 %v10001_v8, %s9936_s6  ;;  %2763 = vrot.lane.b32.xlu1 %v10026_v14, %s9936_s6 }
  0x7e   :  { %v149_v30 = vpop.permute.xlu0 %148  ;;  %v145_v31 = vpop.permute.xlu1 %144 }
  0x7f   :  { %v164_v33 = vsel %vm158_vm0, %v145_v31, %v147_v25  ;;  %v163_v34 = vsel %vm158_vm0, %v147_v25, %v149_v30  ;;  %v165_v35 = vsel %vm158_vm0, %v143_v26, %v145_v31  ;;  %v10268_v25 = vrot.slane %v10228_v56, %v9989_v4 }
  0x80   :  { %2759 = vrot.lane.b32.xlu0 %v10045_v19, %s9936_s6  ;;  %2761 = vrot.lane.b32.xlu1 %v10029_v15, %s9936_s6  ;;  %v215_v37 = vmul.f32 %v10166_v27, %v163_v34  ;;  %v213_v38 = vmul.f32 %v10169_v28, %v165_v35  ;;  %v214_v39 = vmul.f32 %v10172_v29, %v164_v33  ;;  %v9939_v31 = vmov 9  }
  0x81   :  { %9920 = vset.pattern.permute.xlu0 %v9939_v31 }
  0x82   :  { %9514 = vmatprep.subr.msk.mxu1 %vm226_vm1, %v215_v37  ;;  %v157_v40 = vpop.permute.xlu0 %156  ;;  %9511 = vmatprep.subr.msk.mxu0 %vm226_vm1, %v213_v38  ;;  %v155_v41 = vpop.permute.xlu1 %154 }
  0x83   :  { %v166_v42 = vsel %vm158_vm0, %v157_v40, %v143_v26  ;;  %v159_v43 = vsel %vm158_vm0, %v155_v41, %v157_v40  ;;  %9515 = vmatpush1.msk.msra.mxu1 %vm226_vm1, %v214_v39  ;;  %v10288_v40 = vrot.slane %v10228_v56, %v10004_v9 }
  0x84   :  { %v219_v46 = vmul.f32 %v10175_v32, %v159_v43  ;;  %2827 = vrot.lane.b32.xlu0 %v10054_v20, %s9937_s11  ;;  %3153 = vrot.lane.b32.xlu1 %v10011_v10, %s9938_s12  ;;  %v212_v47 = vmul.f32 %v10184_v36, %v166_v42  ;;  %v9536_v42 = vld [vmem:[%s12070_s1 + $0x2] ss:$8 sm:$0xf0]  ;;  %s9945_s11 = smov 72  }
  0x86   :  { %v151_v51 = vpop.permute.xlu0 %150  ;;  %9512 = vmatpush1.msk.msra.mxu0 %vm226_vm1, %v212_v47  ;;  %9520 = vmatprep.subr.msk.mxu1 %vm226_vm1, %v219_v46  ;;  %v153_v52 = vpop.permute.xlu1 %152 }
  0x87   :  { %v162_v53 = vsel %vm158_vm0, %v149_v30, %v151_v51  ;;  %v160_v54 = vsel %vm158_vm0, %v153_v52, %v155_v41  ;;  %v161_v55 = vsel %vm158_vm0, %v151_v51, %v153_v52  ;;  %v9535_v41 = vld [vmem:[%s12070_s1 + $0x2] ss:$8 sm:$0xf]  ;;  %v10319_v52 = vrot.slane %v10228_v56, %v10017_v12 }
  0x88   :  { %v216_v57 = vmul.f32 %v10201_v44, %v162_v53  ;;  %v217_v58 = vmul.f32 %v10204_v45, %v161_v55  ;;  %v218_v59 = vmul.f32 %v10212_v48, %v160_v54  ;;  %3155 = vrot.lane.b32.xlu0 %v10042_v18, %s9938_s12  ;;  %3149 = vrot.lane.b32.xlu1 %v10014_v11, %s9938_s12 }
  0x89   :  { %v873_v53 = vor.u32 %v9536_v42, %v9535_v41  ;;  %v10326_v54 = vrot.slane %v10228_v56, %v10032_v16 }
  0x8a   :  { %v222_v60 = vpop.permute.xlu0 %221  ;;  %9517 = vmatprep.subr.msk.mxu0 %vm226_vm1, %v217_v58  ;;  %v67_v61 = vpop.permute.xlu1 %66 }
  0x8b   :  { %9513 = vmatmul.mubr.msk.f32.vlgmr.msra.gmra.mrb[0].mxu0 %vm223_vm2, %v222_v60  ;;  %9516 = vmatmul.mubr.msk.f32.vlgmr.msra.gmra.mrb[0].mxu1 %vm223_vm2, %v222_v60 }
  0x8c   :  { %9518 = vmatpush1.msk.msra.mxu0 %vm226_vm1, %v216_v57  ;;  %9521 = vmatpush1.msk.msra.mxu1 %vm226_vm1, %v218_v59 }
  0x8d   :  { %3151 = vrot.lane.b32.xlu0 %v9998_v7, %s9938_s12  ;;  %3147 = vrot.lane.b32.xlu1 %v10001_v8, %s9938_s12 }
  0x8e   :  { %v69_v63 = vpop.permute.xlu0 %68  ;;  %457 = vmatprep.mubr.f32.mxu0 %v12074_v13  ;;  %528 = vmatprep.mubr.f32.mxu1 %v12074_v13  ;;  %v63_v0 = vpop.permute.xlu1 %62 }
  0x8f   :  { %v85_v2 = vsel %vm80_vm3, %v67_v61, %v69_v63  ;;  %9519 = vmatmul.mubr.msk.f32.vlgmr.msra.gmra.mrb[2].mxu0 %vm223_vm2, %v222_v60  ;;  %9522 = vmatmul.mubr.msk.f32.vlgmr.msra.gmra.mrb[2].mxu1 %vm223_vm2, %v222_v60 }
  0x90   :  { %v136_v22 = vmul.f32 %v10245_v62, %v85_v2  ;;  %696 = vmatprep.mubr.f32.mxu1 %v12074_v13  ;;  %625 = vmatprep.mubr.f32.mxu0 %v12074_v13 }
  0x91   :  { %3161 = vrot.lane.b32.xlu0 %v10026_v14, %s9938_s12  ;;  %3157 = vrot.lane.b32.xlu1 %v10045_v19, %s9938_s12 }
  0x92   :  { %v65_v26 = vpop.permute.xlu0 %64  ;;  %9526 = vmatprep.subr.msk.mxu1 %vm226_vm1, %v136_v22  ;;  %v77_v30 = vpop.permute.xlu1 %76 }
  0x93   :  { %v86_v33 = vsel %vm80_vm3, %v65_v26, %v67_v61  ;;  %v87_v34 = vsel %vm80_vm3, %v63_v0, %v65_v26  ;;  %v88_v35 = vsel %vm80_vm3, %v77_v30, %v63_v0 }
  0x94   :  { %v134_v37 = vmul.f32 %v10259_v21, %v87_v34  ;;  %v135_v38 = vmul.f32 %v10264_v24, %v86_v33  ;;  %v133_v39 = vmul.f32 %v10268_v25, %v88_v35  ;;  %v10360_v33 = vrot.slane %v873_v53, %v9986_v3 }
  0x95   :  { %3159 = vrot.lane.b32.xlu0 %v10029_v15, %s9938_s12  ;;  %3225 = vrot.lane.b32.xlu1 %v10054_v20, %s9940_s17  ;;  %v10363_v34 = vrot.slane %v873_v53, %v9989_v4 }
  0x96   :  { %v75_v43 = vpop.permute.xlu0 %74  ;;  %9523 = vmatprep.subr.msk.mxu0 %vm226_vm1, %v134_v37  ;;  %9527 = vmatpush1.msk.msra.mxu1 %vm226_vm1, %v135_v38  ;;  %v71_v46 = vpop.permute.xlu1 %70 }
  0x97   :  { %v81_v47 = vsel %vm80_vm3, %v75_v43, %v77_v30  ;;  %9524 = vmatpush1.msk.msra.mxu0 %vm226_vm1, %v133_v39  ;;  %9528 = vmatmul.mubr.msk.f32.vlgmr.msra.gmra.mrb[0].mxu1 %vm223_vm2, %v10054_v20  ;;  %v84_v55 = vsel %vm80_vm3, %v69_v63, %v71_v46  ;;  %v10343_v63 = vrot.slane %v873_v53, %v9992_v5 }
  0x98   :  { %v140_v51 = vmul.f32 %v10288_v40, %v81_v47  ;;  %9525 = vmatmul.mubr.msk.f32.vlgmr.msra.gmra.mrb[0].mxu0 %vm223_vm2, %v10054_v20  ;;  %838 = vmatprep.mubr.f32.mxu1 %v12074_v13  ;;  %v137_v0 = vmul.f32 %v10326_v54, %v84_v55  ;;  %v10354_v30 = vrot.slane %v873_v53, %v9995_v6  ;;  %v9549_v47 = vld [vmem:[%s12070_s1 + $0x3] ss:$8 sm:$0xf] }
  0x99   :  { %767 = vmatprep.mubr.f32.mxu0 %v12074_v13  ;;  %3546 = vperm.xlu0 %9920, %v10054_v20  }
  0x9a   :  { %v73_v57 = vpop.permute.xlu0 %72  ;;  %9532 = vmatprep.subr.msk.mxu1 %vm226_vm1, %v140_v51  ;;  %v850_v58 = vpop.permute.xlu1 %849  ;;  %3647 = vrot.lane.b32.xlu1 %v10314_v50, %s9940_s17  ;;  %v9550_v51 = vld [vmem:[%s12070_s1 + $0x3] ss:$8 sm:$0xf0] }
  0x9b   :  { %v82_v59 = vsel %vm80_vm3, %v73_v57, %v75_v43  ;;  %v83_v56 = vsel %vm80_vm3, %v71_v46, %v73_v57  ;;  %v10382_v46 = vrot.slane %v873_v53, %v10004_v9 }
  0x9c   :  { %v138_v60 = vmul.f32 %v10307_v49, %v83_v56  ;;  %v139_v61 = vmul.f32 %v10319_v52, %v82_v59  ;;  %v10399_v56 = vrot.slane %v873_v53, %v10035_v17 }
  0x9d   :  { %4254 = vrot.lane.b32.xlu0 %v10314_v50, %s9936_s6 }
  0x9e   :  { %v852_v2 = vpop.permute.xlu0 %851  ;;  %9529 = vmatprep.subr.msk.mxu0 %vm226_vm1, %v138_v60  ;;  %9533 = vmatpush1.msk.msra.mxu1 %vm226_vm1, %v139_v61  ;;  %v846_v22 = vpop.permute.xlu1 %845  ;;  %v10402_v60 = vrot.slane %v873_v53, %v10017_v12  ;;  %v1271_v61 = vor.u32 %v9550_v51, %v9549_v47 }
  0x9f   :  { %v866_v26 = vsel %vm861_vm4, %v850_v58, %v852_v2  ;;  %9530 = vmatpush1.msk.msra.mxu0 %vm226_vm1, %v137_v0  ;;  %9534 = vmatmul.mubr.msk.f32.vlgmr.msra.gmra.mrb[2].mxu1 %vm223_vm2, %v10054_v20  ;;  %v10405_v0 = vrot.slane %v873_v53, %v10032_v16 }
  0xa0   :  { %v918_v31 = vmul.f32 %v10343_v63, %v866_v26  ;;  %9531 = vmatmul.mubr.msk.f32.vlgmr.msra.gmra.mrb[2].mxu0 %vm223_vm2, %v10054_v20  ;;  %1086 = vmatprep.mubr.f32.mxu1 %v12074_v13  ;;  %v10434_v47 = vrot.slane %v1271_v61, %v9995_v6  ;;  %v10437_v51 = vrot.slane %v1271_v61, %v9986_v3 }
  0xa1   :  { %1015 = vmatprep.mubr.f32.mxu0 %v12074_v13  ;;  %4582 = vrot.lane.b32.xlu1 %v10314_v50, %s9941_s27 }
  0xa2   :  { %v848_v35 = vpop.permute.xlu0 %847  ;;  %9540 = vmatprep.subr.msk.mxu1 %vm226_vm1, %v918_v31  ;;  %v860_v37 = vpop.permute.xlu1 %859 }
  0xa3   :  { %v867_v38 = vsel %vm861_vm4, %v848_v35, %v850_v58  ;;  %v868_v39 = vsel %vm861_vm4, %v846_v22, %v848_v35  ;;  %v869_v20 = vsel %vm861_vm4, %v860_v37, %v846_v22 }
  0xa4   :  { %v916_v41 = vmul.f32 %v10354_v30, %v868_v39  ;;  %v917_v42 = vmul.f32 %v10360_v33, %v867_v38  ;;  %v915_v43 = vmul.f32 %v10363_v34, %v869_v20 }
  0xa5   :  { %4878 = vrot.lane.b32.xlu1 %v10314_v50, %s9942_s9 }
  0xa6   :  { %v858_v55 = vpop.permute.xlu0 %857  ;;  %9537 = vmatprep.subr.msk.mxu0 %vm226_vm1, %v916_v41  ;;  %9541 = vmatpush1.msk.msra.mxu1 %vm226_vm1, %v917_v42  ;;  %v854_v57 = vpop.permute.xlu1 %853 }
  0xa7   :  { %v862_v58 = vsel %vm861_vm4, %v858_v55, %v860_v37  ;;  %9538 = vmatpush1.msk.msra.mxu0 %vm226_vm1, %v915_v43  ;;  %v865_v22 = vsel %vm861_vm4, %v852_v2, %v854_v57  ;;  %v10421_v2 = vrot.slane %v1271_v61, %v9992_v5 }
  0xa8   :  { %v922_v59 = vmul.f32 %v10382_v46, %v862_v58  ;;  %v919_v39 = vmul.f32 %v10405_v0, %v865_v22 }
  0xaa   :  { %v856_v26 = vpop.permute.xlu0 %855  ;;  %9546 = vmatprep.subr.msk.mxu1 %vm226_vm1, %v922_v59  ;;  %v924_v31 = vpop.permute.xlu1 %923 }
  0xab   :  { %v863_v35 = vsel %vm861_vm4, %v856_v26, %v858_v55  ;;  %v864_v37 = vsel %vm861_vm4, %v854_v57, %v856_v26  ;;  %9539 = vmatmul.mubr.msk.f32.vlgmr.msra.gmra.mrb[0].mxu0 %vm223_vm2, %v924_v31  ;;  %9542 = vmatmul.mubr.msk.f32.vlgmr.msra.gmra.mrb[0].mxu1 %vm223_vm2, %v924_v31 }
  0xac   :  { %v920_v53 = vmul.f32 %v10399_v56, %v864_v37  ;;  %v921_v38 = vmul.f32 %v10402_v60, %v863_v35  ;;  %1228 = vmatprep.mubr.f32.mxu1 %v12074_v13  ;;  %1157 = vmatprep.mubr.f32.mxu0 %v12074_v13  ;;  %v10452_v35 = vrot.slane %v1271_v61, %v10004_v9 }
  0xae   :  { %v1248_v20 = vpop.permute.xlu0 %1247  ;;  %9543 = vmatprep.subr.msk.mxu0 %vm226_vm1, %v920_v53  ;;  %9547 = vmatpush1.msk.msra.mxu1 %vm226_vm1, %v921_v38  ;;  %v1250_v41 = vpop.permute.xlu1 %1249 }
  0xaf   :  { %v1264_v42 = vsel %vm1259_vm5, %v1248_v20, %v1250_v41  ;;  %9544 = vmatpush1.msk.msra.mxu0 %vm226_vm1, %v919_v39  ;;  %9548 = vmatmul.mubr.msk.f32.vlgmr.msra.gmra.mrb[2].mxu1 %vm223_vm2, %v924_v31 }
  0xb0   :  { %v1316_v43 = vmul.f32 %v10421_v2, %v1264_v42  ;;  %9545 = vmatmul.mubr.msk.f32.vlgmr.msra.gmra.mrb[2].mxu0 %vm223_vm2, %v924_v31  ;;  %1484 = vmatprep.mubr.f32.mxu1 %v12074_v13  ;;  %v10449_v31 = vrot.slane %v1271_v61, %v9989_v4 }
  0xb1   :  { %1413 = vmatprep.mubr.f32.mxu0 %v12074_v13 }
  0xb2   :  { %v1244_v55 = vpop.permute.xlu0 %1243  ;;  %9554 = vmatprep.subr.msk.mxu1 %vm226_vm1, %v1316_v43  ;;  %v1246_v57 = vpop.permute.xlu1 %1245 }
  0xb3   :  { %v1265_v58 = vsel %vm1259_vm5, %v1246_v57, %v1248_v20  ;;  %v1266_v59 = vsel %vm1259_vm5, %v1244_v55, %v1246_v57  ;;  %v10461_v20 = vrot.slane %v1271_v61, %v10032_v16  ;;  %v10466_v57 = vrot.slane %v1271_v61, %v10035_v17 }
  0xb4   :  { %v1314_v22 = vmul.f32 %v10434_v47, %v1266_v59  ;;  %v1315_v26 = vmul.f32 %v10437_v51, %v1265_v58  ;;  %v10469_v58 = vrot.slane %v1271_v61, %v10017_v12 }
  0xb5   :  { %12195 = vst [vmem:[#allocation9_spill] sm:$0xff] %v10461_v20  ;;  %12196 = vst [vmem:[#allocation10_spill] sm:$0xff] %v10466_v57 }
  0xb6   :  { %v1258_v37 = vpop.permute.xlu0 %1257  ;;  %9551 = vmatprep.subr.msk.mxu0 %vm226_vm1, %v1314_v22  ;;  %9555 = vmatpush1.msk.msra.mxu1 %vm226_vm1, %v1315_v26  ;;  %v1256_v53 = vpop.permute.xlu1 %1255  ;;  %12197 = vst [vmem:[#allocation11_spill] sm:$0xff] %v10469_v58 }
  0xb7   :  { %v1267_v38 = vsel %vm1259_vm5, %v1258_v37, %v1244_v55  ;;  %v1260_v39 = vsel %vm1259_vm5, %v1256_v53, %v1258_v37 }
  0xb8   :  { %v1313_v42 = vmul.f32 %v10449_v31, %v1267_v38  ;;  %v1320_v43 = vmul.f32 %v10452_v35, %v1260_v39 }
  0xba   :  { %v1252_v59 = vpop.permute.xlu0 %1251  ;;  %9552 = vmatpush1.msk.msra.mxu0 %vm226_vm1, %v1313_v42  ;;  %9560 = vmatprep.subr.msk.mxu1 %vm226_vm1, %v1320_v43  ;;  %v1254_v55 = vpop.permute.xlu1 %1253  ;;  %v9575_v42 = vld [vmem:[%s12070_s1 + $0x5] ss:$8 sm:$0xf] }
  0xbb   :  { %v1263_v22 = vsel %vm1259_vm5, %v1250_v41, %v1252_v59  ;;  %v1261_v26 = vsel %vm1259_vm5, %v1254_v55, %v1256_v53  ;;  %v1262_v37 = vsel %vm1259_vm5, %v1252_v59, %v1254_v55  ;;  %v9576_v41 = vld [vmem:[%s12070_s1 + $0x5] ss:$8 sm:$0xf0] }
  0xbc   :  { %v1317_v38 = vmul.f32 %v10461_v20, %v1263_v22  ;;  %v1318_v61 = vmul.f32 %v10466_v57, %v1262_v37  ;;  %v1319_v39 = vmul.f32 %v10469_v58, %v1261_v26  ;;  %v1981_v59 = vor.u32 %v9576_v41, %v9575_v42 }
  0xbe   :  { %v1322_v43 = vpop.permute.xlu0 %1321  ;;  %9557 = vmatprep.subr.msk.mxu0 %vm226_vm1, %v1318_v61  ;;  %v1642_v53 = vpop.permute.xlu1 %1641  ;;  %v10501_v26 = vrot.slane %v1981_v59, %v9992_v5 }
  0xbf   :  { %9553 = vmatmul.mubr.msk.f32.vlgmr.msra.gmra.mrb[0].mxu0 %vm223_vm2, %v1322_v43  ;;  %9556 = vmatmul.mubr.msk.f32.vlgmr.msra.gmra.mrb[0].mxu1 %vm223_vm2, %v1322_v43 }
  0xc0   :  { %9558 = vmatpush1.msk.msra.mxu0 %vm226_vm1, %v1317_v38  ;;  %9561 = vmatpush1.msk.msra.mxu1 %vm226_vm1, %v1319_v39  ;;  %12198 = vst [vmem:[#allocation12_spill] sm:$0xff] %v10501_v26 }
  0xc1   :  { %1555 = vmatprep.mubr.f32.mxu0 %v12074_v13  ;;  %1626 = vmatprep.mubr.f32.mxu1 %v12074_v13 }
  0xc2   :  { %v1960_v55 = vpop.permute.xlu0 %1959  ;;  %v1962_v22 = vpop.permute.xlu1 %1961  ;;  %9566 = vmatprep.subr.msk.mxu1 %vm226_vm1, %v10011_v10  ;;  %9563 = vmatprep.subr.msk.mxu0 %vm226_vm1, %v10014_v11  ;;  %v10512_v10 = vrot.slane %v1981_v59, %v9995_v6  ;;  %v10515_v11 = vrot.slane %v1981_v59, %v9986_v3 }
  0xc3   :  { %9559 = vmatmul.mubr.msk.f32.vlgmr.msra.gmra.mrb[2].mxu0 %vm223_vm2, %v1322_v43  ;;  %9562 = vmatmul.mubr.msk.f32.vlgmr.msra.gmra.mrb[2].mxu1 %vm223_vm2, %v1322_v43  ;;  %v1973_v37 = vsel %vm1969_vm6, %v1960_v55, %v1962_v22 }
  0xc4   :  { %9567 = vmatpush1.msk.msra.mxu1 %vm226_vm1, %v9998_v7  ;;  %9564 = vmatpush1.msk.msra.mxu0 %vm226_vm1, %v10001_v8  ;;  %12199 = vst [vmem:[#allocation13_spill] sm:$0xff] %v10512_v10  ;;  %12200 = vst [vmem:[#allocation14_spill] sm:$0xff] %v10515_v11  ;;  %v10524_v7 = vrot.slane %v1981_v59, %v9989_v4  ;;  %v2026_v8 = vmul.f32 %v10501_v26, %v1973_v37 }
  0xc5   :  { %1725 = vmatprep.mubr.f32.mxu0 %v12074_v13  ;;  %1796 = vmatprep.mubr.f32.mxu1 %v12074_v13  ;;  %v10547_v37 = vrot.slane %v1981_v59, %v10032_v16 }
  0xc6   :  { %v1956_v38 = vpop.permute.xlu0 %1955  ;;  %9572 = vmatprep.subr.msk.mxu1 %vm226_vm1, %v10026_v14  ;;  %v1958_v61 = vpop.permute.xlu1 %1957  ;;  %9569 = vmatprep.subr.msk.mxu0 %vm226_vm1, %v10045_v19  ;;  %12201 = vst [vmem:[#allocation15_spill] sm:$0xff] %v10524_v7  ;;  %v10540_v19 = vrot.slane %v1981_v59, %v10004_v9 }
  0xc7   :  { %v1974_v39 = vsel %vm1969_vm6, %v1958_v61, %v1960_v55  ;;  %v1975_v42 = vsel %vm1969_vm6, %v1956_v38, %v1958_v61  ;;  %9565 = vmatmul.mubr.msk.f32.vlgmr.msra.gmra.mrb[0].mxu0 %vm223_vm2, %v1642_v53  ;;  %9568 = vmatmul.mubr.msk.f32.vlgmr.msra.gmra.mrb[0].mxu1 %vm223_vm2, %v1642_v53  ;;  %12203 = vst [vmem:[#allocation17_spill] sm:$0xff] %v10547_v37 }
  0xc8   :  { %v2024_v14 = vmul.f32 %v10512_v10, %v1975_v42  ;;  %v2025_v41 = vmul.f32 %v10515_v11, %v1974_v39  ;;  %9573 = vmatpush1.msk.msra.mxu1 %vm226_vm1, %v10029_v15  ;;  %9570 = vmatpush1.msk.msra.mxu0 %vm226_vm1, %v10042_v18  ;;  %12202 = vst [vmem:[#allocation16_spill] sm:$0xff] %v10540_v19 }
  0xc9   :  { %9580 = vmatprep.subr.msk.mxu1 %vm226_vm1, %v2026_v8  ;;  %1867 = vmatprep.mubr.f32.mxu0 %v12074_v13  ;;  %v10556_v61 = vrot.slane %v1981_v59, %v10035_v17  ;;  %v10562_v42 = vrot.slane %v1981_v59, %v10017_v12 }
  0xca   :  { %v1954_v43 = vpop.permute.xlu0 %1953  ;;  %1938 = vmatprep.mubr.f32.mxu1 %v12074_v13  ;;  %9577 = vmatprep.subr.msk.mxu0 %vm226_vm1, %v2024_v14  ;;  %v1968_v55 = vpop.permute.xlu1 %1967 }
  0xcb   :  { %v1976_v15 = vsel %vm1969_vm6, %v1954_v43, %v1956_v38  ;;  %v1977_v18 = vsel %vm1969_vm6, %v1968_v55, %v1954_v43  ;;  %9571 = vmatmul.mubr.msk.f32.vlgmr.msra.gmra.mrb[2].mxu0 %vm223_vm2, %v1642_v53  ;;  %9574 = vmatmul.mubr.msk.f32.vlgmr.msra.gmra.mrb[2].mxu1 %vm223_vm2, %v1642_v53  ;;  %12204 = vst [vmem:[#allocation18_spill] sm:$0xff] %v10556_v61  ;;  %12205 = vst [vmem:[#allocation19_spill] sm:$0xff] %v10562_v42  ;;  %v9589_v53 = vld [vmem:[%s12070_s1 + $0x6] ss:$8 sm:$0xf] }
  0xcc   :  { %v2023_v8 = vmul.f32 %v10524_v7, %v1976_v15  ;;  %v2030_v39 = vmul.f32 %v10540_v19, %v1977_v18  ;;  %9581 = vmatpush1.msk.msra.mxu1 %vm226_vm1, %v2025_v41  ;;  %2123 = vmatprep.mubr.f32.mxu0 %v12074_v13  ;;  %v9590_v38 = vld [vmem:[%s12070_s1 + $0x6] ss:$8 sm:$0xf0] }
  0xcd   :  { %2194 = vmatprep.mubr.f32.mxu1 %v12074_v13  ;;  %v2379_v19 = vor.u32 %v9590_v38, %v9589_v53 }
  0xce   :  { %v1964_v14 = vpop.permute.xlu0 %1963  ;;  %9578 = vmatpush1.msk.msra.mxu0 %vm226_vm1, %v2023_v8  ;;  %9586 = vmatprep.subr.msk.mxu1 %vm226_vm1, %v2030_v39  ;;  %v1966_v41 = vpop.permute.xlu1 %1965 }
  0xcf   :  { %v1972_v59 = vsel %vm1969_vm6, %v1962_v22, %v1964_v14  ;;  %v1970_v43 = vsel %vm1969_vm6, %v1966_v41, %v1968_v55  ;;  %v1971_v15 = vsel %vm1969_vm6, %v1964_v14, %v1966_v41  ;;  %v10590_v22 = vrot.slane %v2379_v19, %v9992_v5 }
  0xd0   :  { %v2027_v18 = vmul.f32 %v10547_v37, %v1972_v59  ;;  %v2028_v13 = vmul.f32 %v10556_v61, %v1971_v15  ;;  %v2029_v1 = vmul.f32 %v10562_v42, %v1970_v43  ;;  %v12207_v55 = vmov 0.0  }
  0xd1   :  { %12206 = vst [vmem:[#allocation20_spill] sm:$0xff] %v10590_v22  ;;  %v10603_v41 = vrot.slane %v2379_v19, %v9986_v3  ;;  %v10606_v59 = vrot.slane %v2379_v19, %v9989_v4  ;;  %v10621_v42 = vrot.slane %v2379_v19, %v10004_v9 }
  0xd2   :  { %v2032_v8 = vpop.permute.xlu0 %2031  ;;  %9583 = vmatprep.subr.msk.mxu0 %vm226_vm1, %v2028_v13  ;;  %v2358_v39 = vpop.permute.xlu1 %2357 }
  0xd3   :  { %9579 = vmatmul.mubr.msk.f32.vlgmr.msra.gmra.mrb[0].mxu0 %vm223_vm2, %v2032_v8  ;;  %9582 = vmatmul.mubr.msk.f32.vlgmr.msra.gmra.mrb[0].mxu1 %vm223_vm2, %v2032_v8  ;;  %12209 = vst [vmem:[#allocation22_spill] sm:$0xff] %v10603_v41  ;;  %12210 = vst [vmem:[#allocation23_spill] sm:$0xff] %v10606_v59 }
  0xd4   :  { %9584 = vmatpush1.msk.msra.mxu0 %vm226_vm1, %v2027_v18  ;;  %9587 = vmatpush1.msk.msra.mxu1 %vm226_vm1, %v2029_v1  ;;  %v10599_v1 = vrot.slane %v2379_v19, %v9995_v6  ;;  %12211 = vst [vmem:[#allocation24_spill] sm:$0xff] %v10621_v42 }
  0xd5   :  { %2265 = vmatprep.mubr.f32.mxu0 %v12207_v55  ;;  %2336 = vmatprep.mubr.f32.mxu1 %v12207_v55 }
  0xd6   :  { %v2360_v53 = vpop.permute.xlu0 %2359  ;;  %v2354_v13 = vpop.permute.xlu1 %2353  ;;  %12208 = vst [vmem:[#allocation21_spill] sm:$0xff] %v10599_v1 }
  0xd7   :  { %v2371_v38 = vsel %vm2367_vm7, %v2358_v39, %v2360_v53  ;;  %9585 = vmatmul.mubr.msk.f32.vlgmr.msra.gmra.mrb[2].mxu0 %vm223_vm2, %v2032_v8  ;;  %9588 = vmatmul.mubr.msk.f32.vlgmr.msra.gmra.mrb[2].mxu1 %vm223_vm2, %v2032_v8 }
  0xd8   :  { %v2424_v14 = vmul.f32 %v10590_v22, %v2371_v38  ;;  %2521 = vmatprep.mubr.f32.mxu0 %v12207_v55  ;;  %2592 = vmatprep.mubr.f32.mxu1 %v12207_v55 }
  0xda   :  { %v2356_v43 = vpop.permute.xlu0 %2355  ;;  %9594 = vmatprep.subr.msk.mxu1 %vm226_vm1, %v2424_v14  ;;  %v2352_v15 = vpop.permute.xlu1 %2351  ;;  %v9603_v14 = vld [vmem:[%s12070_s1 + $0x7] ss:$8 sm:$0xf] }
  0xdb   :  { %v2372_v18 = vsel %vm2367_vm7, %v2356_v43, %v2358_v39  ;;  %v2373_v8 = vsel %vm2367_vm7, %v2354_v13, %v2356_v43  ;;  %v2374_v38 = vsel %vm2367_vm7, %v2352_v15, %v2354_v13  ;;  %v9604_v39 = vld [vmem:[%s12070_s1 + $0x7] ss:$8 sm:$0xf0] }
  0xdc   :  { %v2422_v22 = vmul.f32 %v10599_v1, %v2373_v8  ;;  %v2423_v61 = vmul.f32 %v10603_v41, %v2372_v18  ;;  %v2421_v37 = vmul.f32 %v10606_v59, %v2374_v38  ;;  %v10636_v38 = vrot.slane %v2379_v19, %v10035_v17 }
  0xdd   :  { %v10639_v59 = vrot.slane %v2379_v19, %v10017_v12  ;;  %v2777_v1 = vor.u32 %v9604_v39, %v9603_v14  ;;  %v10642_v41 = vrot.slane %v2379_v19, %v10032_v16 }
  0xde   :  { %v2366_v43 = vpop.permute.xlu0 %2365  ;;  %9591 = vmatprep.subr.msk.mxu0 %vm226_vm1, %v2422_v22  ;;  %9595 = vmatpush1.msk.msra.mxu1 %vm226_vm1, %v2423_v61  ;;  %v2362_v13 = vpop.permute.xlu1 %2361  ;;  %12212 = vst [vmem:[#allocation25_spill] sm:$0xff] %v10636_v38 }
  0xdf   :  { %v2375_v18 = vsel %vm2367_vm7, %v2366_v43, %v2352_v15  ;;  %9592 = vmatpush1.msk.msra.mxu0 %vm226_vm1, %v2421_v37  ;;  %12213 = vst [vmem:[#allocation26_spill] sm:$0xff] %v10639_v59  ;;  %12214 = vst [vmem:[#allocation27_spill] sm:$0xff] %v10642_v41  ;;  %v2370_v61 = vsel %vm2367_vm7, %v2360_v53, %v2362_v13  ;;  %v10658_v53 = vrot.slane %v2777_v1, %v9992_v5 }
  0xe0   :  { %v2428_v8 = vmul.f32 %v10621_v42, %v2375_v18  ;;  %v2425_v39 = vmul.f32 %v10642_v41, %v2370_v61  ;;  %v10674_v61 = vrot.slane %v2777_v1, %v9986_v3  ;;  %v10686_v41 = vrot.slane %v2777_v1, %v9989_v4 }
  0xe1   :  { %12215 = vst [vmem:[#allocation28_spill] sm:$0xff] %v10658_v53 }
  0xe2   :  { %v2364_v22 = vpop.permute.xlu0 %2363  ;;  %9600 = vmatprep.subr.msk.mxu1 %vm226_vm1, %v2428_v8  ;;  %v2430_v15 = vpop.permute.xlu1 %2429  ;;  %12217 = vst [vmem:[#allocation30_spill] sm:$0xff] %v10674_v61  ;;  %12218 = vst [vmem:[#allocation31_spill] sm:$0xff] %v10686_v41 }
  0xe3   :  { %v2368_v37 = vsel %vm2367_vm7, %v2364_v22, %v2366_v43  ;;  %v2369_v18 = vsel %vm2367_vm7, %v2362_v13, %v2364_v22  ;;  %9593 = vmatmul.mubr.msk.f32.vlgmr.msra.gmra.mrb[0].mxu0 %vm223_vm2, %v2430_v15  ;;  %9596 = vmatmul.mubr.msk.f32.vlgmr.msra.gmra.mrb[0].mxu1 %vm223_vm2, %v2430_v15 }
  0xe4   :  { %v2426_v19 = vmul.f32 %v10636_v38, %v2369_v18  ;;  %v2427_v14 = vmul.f32 %v10639_v59, %v2368_v37  ;;  %2734 = vmatprep.mubr.f32.mxu1 %v12207_v55  ;;  %2663 = vmatprep.mubr.f32.mxu0 %v12207_v55  ;;  %v10671_v37 = vrot.slane %v2777_v1, %v9995_v6 }
  0xe6   :  { %v2756_v43 = vpop.permute.xlu0 %2755  ;;  %9597 = vmatprep.subr.msk.mxu0 %vm226_vm1, %v2426_v19  ;;  %9601 = vmatpush1.msk.msra.mxu1 %vm226_vm1, %v2427_v14  ;;  %v2758_v13 = vpop.permute.xlu1 %2757  ;;  %12216 = vst [vmem:[#allocation29_spill] sm:$0xff] %v10671_v37 }
  0xe7   :  { %v2769_v8 = vsel %vm2765_vm8, %v2756_v43, %v2758_v13  ;;  %9598 = vmatpush1.msk.msra.mxu0 %vm226_vm1, %v2425_v39  ;;  %9602 = vmatmul.mubr.msk.f32.vlgmr.msra.gmra.mrb[2].mxu1 %vm223_vm2, %v2430_v15 }
  0xe8   :  { %v2822_v22 = vmul.f32 %v10658_v53, %v2769_v8  ;;  %9599 = vmatmul.mubr.msk.f32.vlgmr.msra.gmra.mrb[2].mxu0 %vm223_vm2, %v2430_v15  ;;  %2990 = vmatprep.mubr.f32.mxu1 %v12207_v55  ;;  %v10689_v53 = vrot.slane %v2777_v1, %v10004_v9 }
  0xe9   :  { %2919 = vmatprep.mubr.f32.mxu0 %v12207_v55 }
  0xea   :  { %v2752_v18 = vpop.permute.xlu0 %2751  ;;  %9608 = vmatprep.subr.msk.mxu1 %vm226_vm1, %v2822_v22  ;;  %v2754_v19 = vpop.permute.xlu1 %2753  ;;  %12219 = vst [vmem:[#allocation32_spill] sm:$0xff] %v10689_v53 }
  0xeb   :  { %v2770_v14 = vsel %vm2765_vm8, %v2754_v19, %v2756_v43  ;;  %v2771_v15 = vsel %vm2765_vm8, %v2752_v18, %v2754_v19 }
  0xec   :  { %v2820_v39 = vmul.f32 %v10671_v37, %v2771_v15  ;;  %v2821_v8 = vmul.f32 %v10674_v61, %v2770_v14  ;;  %v10698_v14 = vrot.slane %v2777_v1, %v10032_v16  ;;  %v10703_v37 = vrot.slane %v2777_v1, %v10035_v17 }
  0xee   :  { %v2750_v59 = vpop.permute.xlu0 %2749  ;;  %9605 = vmatprep.subr.msk.mxu0 %vm226_vm1, %v2820_v39  ;;  %9609 = vmatpush1.msk.msra.mxu1 %vm226_vm1, %v2821_v8  ;;  %v2764_v22 = vpop.permute.xlu1 %2763  ;;  %12220 = vst [vmem:[#allocation33_spill] sm:$0xff] %v10698_v14  ;;  %12221 = vst [vmem:[#allocation34_spill] sm:$0xff] %v10703_v37  ;;  %v10706_v39 = vrot.slane %v2777_v1, %v10017_v12 }
  0xef   :  { %v2772_v43 = vsel %vm2765_vm8, %v2750_v59, %v2752_v18  ;;  %v2773_v19 = vsel %vm2765_vm8, %v2764_v22, %v2750_v59  ;;  %v9617_v18 = vld [vmem:[%s12070_s1 + $0x40] ss:$8 sm:$0xf] }
  0xf0   :  { %v2819_v15 = vmul.f32 %v10686_v41, %v2772_v43  ;;  %v2826_v61 = vmul.f32 %v10689_v53, %v2773_v19  ;;  %12222 = vst [vmem:[#allocation35_spill] sm:$0xff] %v10706_v39  ;;  %v9618_v59 = vld [vmem:[%s12070_s1 + $0x40] ss:$8 sm:$0xf0]  ;;  %s9943_s1 = smov 88  }
  0xf1   :  { %v3175_v7 = vor.u32 %v9618_v59, %v9617_v18  ;;  %5206 = vrot.lane.b32.xlu1 %v10314_v50, %s9943_s1 }
  0xf2   :  { %v2760_v8 = vpop.permute.xlu0 %2759  ;;  %9606 = vmatpush1.msk.msra.mxu0 %vm226_vm1, %v2819_v15  ;;  %9614 = vmatprep.subr.msk.mxu1 %vm226_vm1, %v2826_v61  ;;  %v2762_v43 = vpop.permute.xlu1 %2761 }
  0xf3   :  { %v2768_v19 = vsel %vm2765_vm8, %v2758_v13, %v2760_v8  ;;  %v2766_v1 = vsel %vm2765_vm8, %v2762_v43, %v2764_v22  ;;  %v2767_v53 = vsel %vm2765_vm8, %v2760_v8, %v2762_v43  ;;  %v10732_v13 = vrot.slane %v3175_v7, %v9992_v5 }
  0xf4   :  { %v2823_v41 = vmul.f32 %v10698_v14, %v2768_v19  ;;  %v2824_v38 = vmul.f32 %v10703_v37, %v2767_v53  ;;  %v2825_v42 = vmul.f32 %v10706_v39, %v2766_v1  ;;  %v10744_v5 = vrot.slane %v3175_v7, %v9995_v6  ;;  %v10984_v37 = vld [vmem:[%s12072_s4] sm:$0x1] }
  0xf5   :  { %12223 = vst [vmem:[#allocation36_spill] sm:$0xff] %v10732_v13  ;;  %v10750_v18 = vrot.slane %v3175_v7, %v9989_v4  ;;  %12242 = vst [vmem:[#allocation55_spill] sm:$0xff] %v10984_v37  ;;  %v10990_v14 = vrot.slane %v10984_v37, %v9989_v4 }
  0xf6   :  { %v2828_v15 = vpop.permute.xlu0 %2827  ;;  %9611 = vmatprep.subr.msk.mxu0 %vm226_vm1, %v2824_v38  ;;  %v3154_v61 = vpop.permute.xlu1 %3153  ;;  %12224 = vst [vmem:[#allocation37_spill] sm:$0xff] %v10744_v5 }
  0xf7   :  { %9607 = vmatmul.mubr.msk.f32.vlgmr.msra.gmra.mrb[0].mxu0 %vm223_vm2, %v2828_v15  ;;  %9610 = vmatmul.mubr.msk.f32.vlgmr.msra.gmra.mrb[0].mxu1 %vm223_vm2, %v2828_v15  ;;  %12226 = vst [vmem:[#allocation39_spill] sm:$0xff] %v10750_v18  ;;  %12243 = vst [vmem:[#allocation56_spill] sm:$0xff] %v10990_v14 }
  0xf8   :  { %9612 = vmatpush1.msk.msra.mxu0 %vm226_vm1, %v2823_v41  ;;  %9615 = vmatpush1.msk.msra.mxu1 %vm226_vm1, %v2825_v42  ;;  %v10747_v41 = vrot.slane %v3175_v7, %v9986_v3 }
  0xf9   :  { %3061 = vmatprep.mubr.f32.mxu0 %v12207_v55  ;;  %3132 = vmatprep.mubr.f32.mxu1 %v12207_v55 }
  0xfa   :  { %v3156_v53 = vpop.permute.xlu0 %3155  ;;  %v3150_v38 = vpop.permute.xlu1 %3149  ;;  %12225 = vst [vmem:[#allocation38_spill] sm:$0xff] %v10747_v41 }
  0xfb   :  { %v3167_v22 = vsel %vm3163_vm9, %v3154_v61, %v3156_v53  ;;  %9613 = vmatmul.mubr.msk.f32.vlgmr.msra.gmra.mrb[2].mxu0 %vm223_vm2, %v2828_v15  ;;  %9616 = vmatmul.mubr.msk.f32.vlgmr.msra.gmra.mrb[2].mxu1 %vm223_vm2, %v2828_v15 }
  0xfc   :  { %v3220_v42 = vmul.f32 %v10732_v13, %v3167_v22  ;;  %3317 = vmatprep.mubr.f32.mxu0 %v12207_v55  ;;  %3388 = vmatprep.mubr.f32.mxu1 %v12207_v55  ;;  %v10763_v22 = vrot.slane %v3175_v7, %v10004_v9  ;;  %v10778_v9 = vrot.slane %v3175_v7, %v10032_v16  ;;  %v9946_v13 = vmov 72  }
  0xfd   :  { %9921 = vset.pattern.permute.xlu0 %v9946_v13 }
  0xfe   :  { %9622 = vmatprep.subr.msk.mxu1 %vm226_vm1, %v3220_v42  ;;  %12227 = vst [vmem:[#allocation40_spill] sm:$0xff] %v10763_v22  ;;  %12230 = vst [vmem:[#allocation43_spill] sm:$0xff] %v10778_v9 }
  0xff   :  { %v3152_v59 = vpop.permute.xlu0 %3151  ;;  %v3148_v8 = vpop.permute.xlu1 %3147 }
 0x100   :  { %v3168_v43 = vsel %vm3163_vm9, %v3152_v59, %v3154_v61  ;;  %v3169_v19 = vsel %vm3163_vm9, %v3150_v38, %v3152_v59  ;;  %v3170_v6 = vsel %vm3163_vm9, %v3148_v8, %v3150_v38 }
 0x101   :  { %v3218_v1 = vmul.f32 %v10744_v5, %v3169_v19  ;;  %v3219_v3 = vmul.f32 %v10747_v41, %v3168_v43  ;;  %v3217_v15 = vmul.f32 %v10750_v18, %v3170_v6  ;;  %v10772_v43 = vrot.slane %v3175_v7, %v10035_v17 }
 0x102   :  { %v10775_v19 = vrot.slane %v3175_v7, %v10017_v12 }
 0x103   :  { %v3162_v42 = vpop.permute.xlu0 %3161  ;;  %9619 = vmatprep.subr.msk.mxu0 %vm226_vm1, %v3218_v1  ;;  %9623 = vmatpush1.msk.msra.mxu1 %vm226_vm1, %v3219_v3  ;;  %v3158_v61 = vpop.permute.xlu1 %3157  ;;  %12228 = vst [vmem:[#allocation41_spill] sm:$0xff] %v10772_v43 }
 0x104   :  { %v3171_v59 = vsel %vm3163_vm9, %v3162_v42, %v3148_v8  ;;  %9620 = vmatpush1.msk.msra.mxu0 %vm226_vm1, %v3217_v15  ;;  %12229 = vst [vmem:[#allocation42_spill] sm:$0xff] %v10775_v19  ;;  %v3166_v6 = vsel %vm3163_vm9, %v3156_v53, %v3158_v61 }
 0x105   :  { %v3224_v38 = vmul.f32 %v10763_v22, %v3171_v59  ;;  %v3221_v7 = vmul.f32 %v10778_v9, %v3166_v6 }
 0x107   :  { %v3160_v1 = vpop.permute.xlu0 %3159  ;;  %9628 = vmatprep.subr.msk.mxu1 %vm226_vm1, %v3224_v38  ;;  %v3226_v8 = vpop.permute.xlu1 %3225 }
 0x108   :  { %v3164_v3 = vsel %vm3163_vm9, %v3160_v1, %v3162_v42  ;;  %v3165_v17 = vsel %vm3163_vm9, %v3158_v61, %v3160_v1  ;;  %9621 = vmatmul.mubr.msk.f32.vlgmr.msra.gmra.mrb[0].mxu0 %vm223_vm2, %v3226_v8  ;;  %9624 = vmatmul.mubr.msk.f32.vlgmr.msra.gmra.mrb[0].mxu1 %vm223_vm2, %v3226_v8 }
 0x109   :  { %v3222_v12 = vmul.f32 %v10772_v43, %v3165_v17  ;;  %v3223_v16 = vmul.f32 %v10775_v19, %v3164_v3  ;;  %3530 = vmatprep.mubr.f32.mxu1 %v12207_v55  ;;  %3459 = vmatprep.mubr.f32.mxu0 %v12207_v55 }
 0x10b   :  { %9625 = vmatprep.subr.msk.mxu0 %vm226_vm1, %v3222_v12  ;;  %9629 = vmatpush1.msk.msra.mxu1 %vm226_vm1, %v3223_v16 }
 0x10c   :  { %9626 = vmatpush1.msk.msra.mxu0 %vm226_vm1, %v3221_v7  ;;  %9630 = vmatmul.mubr.msk.f32.vlgmr.msra.gmra.mrb[2].mxu1 %vm223_vm2, %v3226_v8 }
 0x10d   :  { %9627 = vmatmul.mubr.msk.f32.vlgmr.msra.gmra.mrb[2].mxu0 %vm223_vm2, %v3226_v8  ;;  %3787 = vmatprep.mubr.f32.mxu1 %v12207_v55 }
 0x10e   :  { %3716 = vmatprep.mubr.f32.mxu0 %v12207_v55 }
 0x118   :  { %v10803_v53 = vpop.permute.xlu0 %3546 }
 0x1db   :  { %v3319_v15 = vpop.f32.mrb[0].mxu0  ;;  %v3390_v42 = vpop.f32.mrb[0].mxu1 }
 0x1dc   :  { %v3549_v61 = vadd.f32 %v10803_v53, %v3319_v15  ;;  %v3551_v59 = vadd.f32 %v10803_v53, %v3390_v42  ;;  %v3321_v38 = vpop.f32.mrb[1].mxu0  ;;  %v3392_v6 = vpop.f32.mrb[1].mxu1 }
 0x1dd   :  { %v3552_v15 = vadd.f32 %v10803_v53, %v3392_v6  ;;  %v3550_v42 = vadd.f32 %v10803_v53, %v3321_v38 }
 0x1de   :  { %vm3557_vm10 = vcmp.gt.f32.partialorder %v3549_v61, 0.0  ;;  %v3565_v1 = vmul.f32 0.2, %v3549_v61  ;;  %vm3559_vm11 = vcmp.gt.f32.partialorder %v3551_v59, 0.0  ;;  %v3567_v8 = vmul.f32 0.2, %v3551_v59 }
 0x1df   :  { %v3532_v12 = vpop.f32.mrb[2].mxu1  ;;  %vm3560_vm12 = vcmp.gt.f32.partialorder %v3552_v15, 0.0  ;;  %vm3558_vm13 = vcmp.gt.f32.partialorder %v3550_v42, 0.0 }
 0x1e0   :  { %v10807_v3 = vsel %vm3557_vm10, %v3549_v61, %v3565_v1  ;;  %v10809_v17 = vsel %vm3559_vm11, %v3551_v59, %v3567_v8  ;;  %v3461_v16 = vpop.f32.mrb[2].mxu0  ;;  %v3534_v7 = vpop.f32.mrb[3].mxu1  ;;  %v3568_v61 = vmul.f32 0.2, %v3552_v15  ;;  %v3566_v59 = vmul.f32 0.2, %v3550_v42 }
 0x1e1   :  { %12231 = vst [vmem:[#allocation44_spill] sm:$0xff] %v10807_v3  ;;  %12232 = vst [vmem:[#allocation45_spill] sm:$0xff] %v10809_v17  ;;  %3618 = vrot.lane.b32.xlu1 %v10809_v17, %s9924_s0  ;;  %v3463_v9 = vpop.f32.mrb[3].mxu0  ;;  %3581 = vrot.lane.b32.xlu0 %v10807_v3, %s9927_s23  ;;  %v3555_v38 = vadd.f32 %v10803_v53, %v3532_v12  ;;  %vm3649_vm10 = vcmask 64512  }
 0x1e2   :  { %v10833_v1 = vsel %vm3560_vm12, %v3552_v15, %v3568_v61  ;;  %v10835_v6 = vsel %vm3558_vm13, %v3550_v42, %v3566_v59  ;;  %v3553_v15 = vadd.f32 %v10803_v53, %v3461_v16  ;;  %v3556_v16 = vadd.f32 %v10803_v53, %v3534_v7 }
 0x1e3   :  { %12233 = vst [vmem:[#allocation46_spill] sm:$0xff] %v10833_v1  ;;  %12234 = vst [vmem:[#allocation47_spill] sm:$0xff] %v10835_v6  ;;  %v3571_v8 = vmul.f32 0.2, %v3555_v38  ;;  %vm3563_vm14 = vcmp.gt.f32.partialorder %v3555_v38, 0.0 }
 0x1e4   :  { %v3569_v61 = vmul.f32 0.2, %v3553_v15  ;;  %vm3561_vm15 = vcmp.gt.f32.partialorder %v3553_v15, 0.0  ;;  %v3572_v59 = vmul.f32 0.2, %v3556_v16  ;;  %vm3564_vm1 = vcmp.gt.f32.partialorder %v3556_v16, 0.0 }
 0x1e5   :  { %3614 = vrot.lane.b32.xlu1 %v10807_v3, %s9924_s0  ;;  %4222 = vrot.lane.b32.xlu0 %v10807_v3, %s9928_s2  ;;  %v10859_v42 = vsel %vm3563_vm14, %v3555_v38, %v3571_v8  ;;  %v3554_v8 = vadd.f32 %v10803_v53, %v3463_v9  ;;  %v10921_v9 = vpop.permute.xlu1 %3647 }
 0x1e6   :  { %12235 = vst [vmem:[#allocation48_spill] sm:$0xff] %v10859_v42  ;;  %v10865_v12 = vsel %vm3561_vm15, %v3553_v15, %v3569_v61  ;;  %v10884_v38 = vsel %vm3564_vm1, %v3556_v16, %v3572_v59  ;;  %v10949_v59 = vpop.permute.xlu0 %4254 }
 0x1e7   :  { %12236 = vst [vmem:[#allocation49_spill] sm:$0xff] %v10865_v12  ;;  %12237 = vst [vmem:[#allocation50_spill] sm:$0xff] %v10884_v38  ;;  %v3570_v7 = vmul.f32 0.2, %v3554_v8  ;;  %vm3562_vm2 = vcmp.gt.f32.partialorder %v3554_v8, 0.0 }
 0x1e9   :  { %3585 = vrot.lane.b32.xlu1 %v10809_v17, %s9927_s23  ;;  %4554 = vrot.lane.b32.xlu0 %v10809_v17, %s9930_s25  ;;  %v10895_v15 = vsel %vm3562_vm2, %v3554_v8, %v3570_v7  ;;  %v10929_v53 = vpop.permute.xlu1 %4582 }
 0x1ea   :  { %12238 = vst [vmem:[#allocation51_spill] sm:$0xff] %v10895_v15 }
 0x1ed   :  { %4226 = vrot.lane.b32.xlu1 %v10809_v17, %s9928_s2  ;;  %5178 = vrot.lane.b32.xlu0 %v10809_v17, %s9926_s22  ;;  %v10937_v61 = vpop.permute.xlu1 %4878 }
 0x1ee   :  { %12239 = vst [vmem:[#allocation52_spill] sm:$0xff] %v10937_v61 }
 0x1f1   :  { %4550 = vrot.lane.b32.xlu1 %v10807_v3, %s9930_s25  ;;  %5174 = vrot.lane.b32.xlu0 %v10807_v3, %s9926_s22  ;;  %v10945_v16 = vpop.permute.xlu1 %5206 }
 0x1f2   :  { %12240 = vst [vmem:[#allocation53_spill] sm:$0xff] %v10945_v16 }
 0x1f5   :  { %3620 = vrot.lane.b32.xlu1 %v10833_v1, %s9924_s0  ;;  %3616 = vrot.lane.b32.xlu0 %v10835_v6, %s9924_s0 }
 0x1f9   :  { %3583 = vrot.lane.b32.xlu1 %v10835_v6, %s9927_s23  ;;  %3587 = vrot.lane.b32.xlu0 %v10833_v1, %s9927_s23 }
 0x1fd   :  { %4224 = vrot.lane.b32.xlu1 %v10835_v6, %s9928_s2  ;;  %4228 = vrot.lane.b32.xlu0 %v10833_v1, %s9928_s2 }
 0x201   :  { %4556 = vrot.lane.b32.xlu1 %v10833_v1, %s9930_s25  ;;  %4552 = vrot.lane.b32.xlu0 %v10835_v6, %s9930_s25 }
 0x205   :  { %5176 = vrot.lane.b32.xlu1 %v10835_v6, %s9926_s22  ;;  %5180 = vrot.lane.b32.xlu0 %v10833_v1, %s9926_s22 }
 0x209   :  { %5508 = vrot.lane.b32.xlu1 %v10833_v1, %s9934_s29  ;;  %3626 = vrot.lane.b32.xlu0 %v10859_v42, %s9924_s0 }
 0x20d   :  { %3593 = vrot.lane.b32.xlu1 %v10859_v42, %s9927_s23  ;;  %3622 = vrot.lane.b32.xlu0 %v10865_v12, %s9924_s0 }
 0x211   :  { %4234 = vrot.lane.b32.xlu1 %v10859_v42, %s9928_s2  ;;  %3589 = vrot.lane.b32.xlu0 %v10865_v12, %s9927_s23 }
 0x215   :  { %4230 = vrot.lane.b32.xlu1 %v10865_v12, %s9928_s2  ;;  %4562 = vrot.lane.b32.xlu0 %v10859_v42, %s9930_s25 }
 0x219   :  { %5182 = vrot.lane.b32.xlu1 %v10865_v12, %s9926_s22  ;;  %4558 = vrot.lane.b32.xlu0 %v10865_v12, %s9930_s25 }
 0x21d   :  { %3628 = vrot.lane.b32.xlu1 %v10884_v38, %s9924_s0  ;;  %5186 = vrot.lane.b32.xlu0 %v10859_v42, %s9926_s22 }
 0x221   :  { %5506 = vrot.lane.b32.xlu1 %v10809_v17, %s9934_s29  ;;  %5510 = vrot.lane.b32.xlu0 %v10865_v12, %s9934_s29 }
 0x225   :  { %3591 = vrot.lane.b32.xlu1 %v10895_v15, %s9927_s23  ;;  %3624 = vrot.lane.b32.xlu0 %v10895_v15, %s9924_s0 }
 0x229   :  { %5502 = vrot.lane.b32.xlu1 %v10807_v3, %s9934_s29  ;;  %3595 = vrot.lane.b32.xlu0 %v10884_v38, %s9927_s23 }
 0x22d   :  { %4232 = vrot.lane.b32.xlu1 %v10895_v15, %s9928_s2  ;;  %5504 = vrot.lane.b32.xlu0 %v10835_v6, %s9934_s29 }
 0x231   :  { %5514 = vrot.lane.b32.xlu1 %v10859_v42, %s9934_s29  ;;  %4236 = vrot.lane.b32.xlu0 %v10884_v38, %s9928_s2 }
 0x235   :  { %4564 = vrot.lane.b32.xlu1 %v10884_v38, %s9930_s25  ;;  %5534 = vrot.lane.b32.xlu0 %v10314_v50, %s9944_s10 }
 0x239   :  { %5838 = vrot.lane.b32.xlu1 %v10865_v12, %s9936_s6  ;;  %5836 = vrot.lane.b32.xlu0 %v10833_v1, %s9936_s6 }
 0x23d   :  { %5832 = vrot.lane.b32.xlu1 %v10835_v6, %s9936_s6  ;;  %4560 = vrot.lane.b32.xlu0 %v10895_v15, %s9930_s25 }
 0x241   :  { %5862 = vrot.lane.b32.xlu1 %v10314_v50, %s9945_s11  ;;  %5834 = vrot.lane.b32.xlu0 %v10809_v17, %s9936_s6 }
 0x245   :  { %5188 = vrot.lane.b32.xlu1 %v10884_v38, %s9926_s22  ;;  %5830 = vrot.lane.b32.xlu0 %v10807_v3, %s9936_s6 }
 0x249   :  { %6164 = vrot.lane.b32.xlu1 %v10833_v1, %s9938_s12  ;;  %5842 = vrot.lane.b32.xlu0 %v10859_v42, %s9936_s6 }
 0x24d   :  { %6162 = vrot.lane.b32.xlu1 %v10809_v17, %s9938_s12  ;;  %5184 = vrot.lane.b32.xlu0 %v10895_v15, %s9926_s22 }
 0x251   :  { %5512 = vrot.lane.b32.xlu1 %v10895_v15, %s9934_s29  ;;  %5516 = vrot.lane.b32.xlu0 %v10884_v38, %s9934_s29 }
 0x253   :  { %v3619_v8 = vpop.permute.xlu1 %3618  ;;  %v10955_v7 = vpop.permute.xlu0 %3581 }
 0x255   :  { %5844 = vrot.lane.b32.xlu1 %v10884_v38, %s9936_s6  ;;  %6166 = vrot.lane.b32.xlu0 %v10865_v12, %s9938_s12 }
 0x257   :  { %v3615_v19 = vpop.permute.xlu1 %3614  ;;  %v10961_v18 = vpop.permute.xlu0 %4222 }
 0x259   :  { %6158 = vrot.lane.b32.xlu1 %v10807_v3, %s9938_s12  ;;  %6160 = vrot.lane.b32.xlu0 %v10835_v6, %s9938_s12 }
 0x25b   :  { %v10967_v43 = vpop.permute.xlu1 %3585  ;;  %v10969_v5 = vpop.permute.xlu0 %4554 }
 0x25d   :  { %6170 = vrot.lane.b32.xlu1 %v10859_v42, %s9938_s12  ;;  %5840 = vrot.lane.b32.xlu0 %v10895_v15, %s9936_s6 }
 0x25f   :  { %v10975_v22 = vpop.permute.xlu1 %4226  ;;  %v10977_v41 = vpop.permute.xlu0 %5178 }
 0x260   :  { %12241 = vst [vmem:[#allocation54_spill] sm:$0xff] %v10977_v41 }
 0x261   :  { %6168 = vrot.lane.b32.xlu1 %v10895_v15, %s9938_s12  ;;  %6172 = vrot.lane.b32.xlu0 %v10884_v38, %s9938_s12 }
 0x263   :  { %v10992_v39 = vpop.permute.xlu1 %4550  ;;  %v10994_v16 = vpop.permute.xlu0 %5174 }
 0x264   :  { %12244 = vst [vmem:[#allocation57_spill] sm:$0xff] %v10994_v16 }
 0x265   :  { %7198 = vrot.lane.b32.xlu1 %v10990_v14, %s9936_s6  ;;  %6190 = vrot.lane.b32.xlu0 %v10314_v50, %s9947_s15 }
 0x267   :  { %v3621_v13 = vpop.permute.xlu1 %3620  ;;  %v3617_v11 = vpop.permute.xlu0 %3616 }
 0x268   :  { %v3634_v12 = vsel %vm158_vm0, %v3619_v8, %v3621_v13  ;;  %v3635_v4 = vsel %vm158_vm0, %v3617_v11, %v3619_v8  ;;  %v3636_v37 = vsel %vm158_vm0, %v3615_v19, %v3617_v11 }
 0x269   :  { %v3641_v42 = vmul.f32 %v3634_v12, %v10166_v27  ;;  %7822 = vrot.lane.b32.xlu1 %v10990_v14, %s9942_s9  ;;  %v3640_v10 = vmul.f32 %v3635_v4, %v10172_v29  ;;  %v3639_v26 = vmul.f32 %v3636_v37, %v10169_v28  ;;  %6487 = vperm.xlu0 %9921, %v10314_v50  }
 0x26b   :  { %3723 = vmatprep.subr.mxu1 %v3641_v42  ;;  %v3584_v61 = vpop.permute.xlu1 %3583  ;;  %v11012_v15 = vpop.permute.xlu0 %3587  ;;  %3652 = vmatprep.subr.mxu0 %v3639_v26 }
 0x26c   :  { %3724 = vmatpush1.msra.mxu1 %v3640_v10 }
 0x26d   :  { %9632 = vmatmul.mubr.msk.f32.vlgmr.msra.gmra.mrb[4].mxu1 %vm3649_vm10, %v10921_v9  ;;  %6592 = vrot.lane.b32.xlu0 %v10990_v14, %s9940_s17 }
 0x26e   :  { %3929 = vmatprep.mubr.f32.mxu1 %v12207_v55 }
 0x26f   :  { %v11019_v4 = vpop.permute.xlu1 %4224  ;;  %v11021_v11 = vpop.permute.xlu0 %4228 }
 0x271   :  { %7526 = vrot.lane.b32.xlu0 %v10990_v14, %s9941_s27 }
 0x273   :  { %v11025_v50 = vpop.permute.xlu1 %4556  ;;  %v11027_v37 = vpop.permute.xlu0 %4552 }
 0x277   :  { %v11029_v26 = vpop.permute.xlu1 %5176  ;;  %v11031_v10 = vpop.permute.xlu0 %5180 }
 0x278   :  { %12245 = vst [vmem:[#allocation58_spill] sm:$0xff] %v11029_v26  ;;  %12246 = vst [vmem:[#allocation59_spill] sm:$0xff] %v11031_v10 }
 0x27b   :  { %v11033_v42 = vpop.permute.xlu1 %5508  ;;  %v3627_v12 = vpop.permute.xlu0 %3626 }
 0x27c   :  { %12247 = vst [vmem:[#allocation60_spill] sm:$0xff] %v11033_v42 }
 0x27f   :  { %v3594_v8 = vpop.permute.xlu1 %3593  ;;  %v3623_v29 = vpop.permute.xlu0 %3622 }
 0x283   :  { %v11035_v28 = vpop.permute.xlu1 %4234  ;;  %v3590_v27 = vpop.permute.xlu0 %3589 }
 0x287   :  { %v11037_v16 = vpop.permute.xlu1 %4230  ;;  %v11039_v38 = vpop.permute.xlu0 %4562 }
 0x28b   :  { %v11041_v14 = vpop.permute.xlu1 %5182  ;;  %v11043_v3 = vpop.permute.xlu0 %4558 }
 0x28c   :  { %12248 = vst [vmem:[#allocation61_spill] sm:$0xff] %v11041_v14 }
 0x28f   :  { %v3629_v17 = vpop.permute.xlu1 %3628  ;;  %v11045_v26 = vpop.permute.xlu0 %5186 }
 0x290   :  { %12249 = vst [vmem:[#allocation62_spill] sm:$0xff] %v11045_v26  ;;  %v3630_v42 = vsel %vm158_vm0, %v3627_v12, %v3629_v17  ;;  %v3637_v10 = vsel %vm158_vm0, %v3629_v17, %v3615_v19  ;;  %v3602_v19 = vsel %vm80_vm3, %v3584_v61, %v10967_v43  ;;  %v3633_v17 = vsel %vm158_vm0, %v3621_v13, %v3623_v29 }
 0x291   :  { %v3638_v41 = vmul.f32 %v3637_v10, %v10184_v36  ;;  %v3645_v6 = vmul.f32 %v3630_v42, %v10175_v32 }
 0x293   :  { %3653 = vmatpush1.msra.mxu0 %v3638_v41  ;;  %3865 = vmatprep.subr.mxu1 %v3645_v6  ;;  %v11053_v1 = vpop.permute.xlu1 %5506  ;;  %v11055_v14 = vpop.permute.xlu0 %5510  ;;  %v3601_v41 = vsel %vm80_vm3, %v10967_v43, %v11012_v15  ;;  %v3603_v6 = vsel %vm80_vm3, %v10955_v7, %v3584_v61  ;;  %v3607_v43 = vmul.f32 %v3602_v19, %v10264_v24 }
 0x294   :  { %12250 = vst [vmem:[#allocation63_spill] sm:$0xff] %v11053_v1  ;;  %12251 = vst [vmem:[#allocation64_spill] sm:$0xff] %v11055_v14  ;;  %9631 = vmatmul.mubr.msk.f32.vlgmr.msra.gmra.mrb[4].mxu0 %vm3649_vm10, %v10921_v9  ;;  %v3642_v1 = vmul.f32 %v3633_v17, %v10201_v44  ;;  %v3608_v61 = vmul.f32 %v3601_v41, %v10245_v62 }
 0x295   :  { %3858 = vmatprep.mubr.f32.mxu0 %v12207_v55 }
 0x297   :  { %v3592_v26 = vpop.permute.xlu1 %3591  ;;  %v3625_v10 = vpop.permute.xlu0 %3624 }
 0x298   :  { %v3631_v42 = vsel %vm158_vm0, %v3625_v10, %v3627_v12  ;;  %v3632_v32 = vsel %vm158_vm0, %v3623_v29, %v3625_v10  ;;  %v3606_v12 = vmul.f32 %v3603_v6, %v10259_v21  ;;  %v3599_v29 = vsel %vm80_vm3, %v3590_v27, %v3592_v26  ;;  %v9922_v6 = vld [vmem:[%s12071_s3] sm:$0xff] }
 0x299   :  { %v3644_v36 = vmul.f32 %v3631_v42, %v10212_v48  ;;  %v3643_v13 = vmul.f32 %v3632_v32, %v10204_v45 }
 0x29b   :  { %v11079_v14 = vpop.permute.xlu1 %5502  ;;  %v3596_v20 = vpop.permute.xlu0 %3595  ;;  %3794 = vmatprep.subr.mxu0 %v3643_v13  ;;  %3866 = vmatpush1.msra.mxu1 %v3644_v36  ;;  %v3598_v36 = vsel %vm80_vm3, %v3592_v26, %v3594_v8  ;;  %v4244_v26 = vsel %vm861_vm4, %v10961_v18, %v11019_v4 }
 0x29c   :  { %v3597_v10 = vsel %vm80_vm3, %v3594_v8, %v3596_v20  ;;  %v3604_v32 = vsel %vm80_vm3, %v3596_v20, %v10955_v7  ;;  %3795 = vmatpush1.msra.mxu0 %v3642_v1  ;;  %9634 = vmatmul.mubr.msk.f32.vlgmr.msra.gmra.mrb[6].mxu1 %vm3649_vm10, %v10921_v9  ;;  %v4242_v20 = vsel %vm861_vm4, %v10975_v22, %v11021_v11 }
 0x29d   :  { %v3605_v19 = vmul.f32 %v3604_v32, %v10268_v25  ;;  %4009 = vmatprep.subr.mxu1 %v3608_v61  ;;  %9633 = vmatmul.mubr.msk.f32.vlgmr.msra.gmra.mrb[6].mxu0 %vm3649_vm10, %v10921_v9  ;;  %v3612_v17 = vmul.f32 %v3597_v10, %v10288_v40  ;;  %v3600_v1 = vsel %vm80_vm3, %v11012_v15, %v3590_v27 }
 0x29e   :  { %3938 = vmatprep.subr.mxu0 %v3606_v12  ;;  %4010 = vmatpush1.msra.mxu1 %v3607_v43  ;;  %v3610_v8 = vmul.f32 %v3599_v29, %v10307_v49  ;;  %v4243_v27 = vsel %vm861_vm4, %v11019_v4, %v10975_v22  ;;  %v3611_v15 = vmul.f32 %v3598_v36, %v10319_v52 }
 0x29f   :  { %v4233_v7 = vpop.permute.xlu1 %4232  ;;  %v11110_v9 = vpop.permute.xlu0 %5504  ;;  %3939 = vmatpush1.msra.mxu0 %v3605_v19  ;;  %4073 = vmatprep.mubr.f32.mxu1 %v12207_v55  ;;  %v3609_v41 = vmul.f32 %v3600_v1, %v10326_v54  ;;  %v4249_v42 = vmul.f32 %v4242_v20, %v10343_v63  ;;  %v4247_v22 = vmul.f32 %v4244_v26, %v10354_v30 }
 0x2a0   :  { %4151 = vmatprep.subr.mxu1 %v3612_v17  ;;  %4002 = vmatprep.mubr.f32.mxu0 %v12207_v55  ;;  %v4248_v13 = vmul.f32 %v4243_v27, %v10360_v33  ;;  %v4240_v61 = vsel %vm861_vm4, %v11037_v16, %v4233_v7  ;;  %v4239_v10 = vsel %vm861_vm4, %v4233_v7, %v11035_v28 }
 0x2a1   :  { %9636 = vmatmul.mubr.msk.f32.vlgmr.msra.gmra.mrb[4].mxu1 %vm3649_vm10, %v9922_v6  ;;  %4080 = vmatprep.subr.mxu0 %v3610_v8  ;;  %v4570_v19 = vsel %vm1259_vm5, %v10969_v5, %v11025_v50  ;;  %v4572_v17 = vsel %vm1259_vm5, %v10992_v39, %v11027_v37  ;;  %v4251_v1 = vmul.f32 %v4240_v61, %v10399_v56 }
 0x2a2   :  { %4152 = vmatpush1.msra.mxu1 %v3611_v15  ;;  %9635 = vmatmul.mubr.msk.f32.vlgmr.msra.gmra.mrb[4].mxu0 %vm3649_vm10, %v9922_v6  ;;  %v4252_v7 = vmul.f32 %v4239_v10, %v10402_v60  ;;  %v4577_v26 = vmul.f32 %v4570_v19, %v10421_v2  ;;  %v12253_v10 = vld [vmem:[#allocation46_spill] sm:$0xff] }
 0x2a3   :  { %v11128_v4 = vpop.permute.xlu1 %5514  ;;  %4081 = vmatpush1.msra.mxu0 %v3609_v41  ;;  %4329 = vmatprep.subr.mxu1 %v4249_v42  ;;  %v4237_v43 = vpop.permute.xlu0 %4236  ;;  %v12255_v19 = vld [vmem:[#allocation54_spill] sm:$0xff] }
 0x2a4   :  { %4258 = vmatprep.subr.mxu0 %v4247_v22  ;;  %v4238_v12 = vsel %vm861_vm4, %v11035_v28, %v4237_v43  ;;  %v4245_v29 = vsel %vm861_vm4, %v4237_v43, %v10961_v18  ;;  %4215 = vmatprep.mubr.f32.mxu1 %v12207_v55  ;;  %v4241_v18 = vsel %vm861_vm4, %v11021_v11, %v11037_v16 }
 0x2a5   :  { %v4246_v32 = vmul.f32 %v4245_v29, %v10363_v34  ;;  %4144 = vmatprep.mubr.f32.mxu0 %v12207_v55  ;;  %9638 = vmatmul.mubr.msk.f32.vlgmr.msra.gmra.mrb[6].mxu1 %vm3649_vm10, %v9922_v6  ;;  %v4253_v36 = vmul.f32 %v4238_v12, %v10382_v46  ;;  %v4571_v16 = vsel %vm1259_vm5, %v11027_v37, %v10969_v5 }
 0x2a6   :  { %4330 = vmatpush1.msra.mxu1 %v4248_v13  ;;  %9637 = vmatmul.mubr.msk.f32.vlgmr.msra.gmra.mrb[6].mxu0 %vm3649_vm10, %v9922_v6  ;;  %v4250_v11 = vmul.f32 %v4241_v18, %v10405_v0  ;;  %v4575_v5 = vmul.f32 %v4572_v17, %v10434_v47  ;;  %v4576_v41 = vmul.f32 %v4571_v16, %v10437_v51  ;;  %v12256_v18 = vld [vmem:[#allocation58_spill] sm:$0xff]  ;;  %v12257_v17 = vld [vmem:[#allocation61_spill] sm:$0xff] }
 0x2a7   :  { %v4565_v28 = vpop.permute.xlu1 %4564  ;;  %v11161_v20 = vpop.permute.xlu0 %5534  ;;  %4259 = vmatpush1.msra.mxu0 %v4246_v32  ;;  %4393 = vmatprep.mubr.f32.mxu1 %v12207_v55  ;;  %v4569_v22 = vsel %vm1259_vm5, %v11025_v50, %v11043_v3  ;;  %v12252_v50 = vld [vmem:[#allocation9_spill] sm:$0xff]  ;;  %v12254_v32 = vld [vmem:[#allocation47_spill] sm:$0xff] }
 0x2a8   :  { %4471 = vmatprep.subr.mxu1 %v4253_v36  ;;  %4322 = vmatprep.mubr.f32.mxu0 %v12207_v55  ;;  %v4566_v8 = vsel %vm1259_vm5, %v11039_v38, %v4565_v28  ;;  %v4573_v27 = vsel %vm1259_vm5, %v4565_v28, %v10992_v39  ;;  %v4578_v29 = vmul.f32 %v4569_v22, %v12252_v50  ;;  %v12259_v16 = vld [vmem:[#allocation45_spill] sm:$0xff] }
 0x2a9   :  { %9640 = vmatmul.mubr.msk.f32.vlgmr.msra.gmra.mrb[4].mxu1 %vm3649_vm10, %v10949_v59  ;;  %4400 = vmatprep.subr.mxu0 %v4251_v1  ;;  %v4574_v6 = vmul.f32 %v4573_v27, %v10449_v31  ;;  %v4581_v39 = vmul.f32 %v4566_v8, %v10452_v35  ;;  %v5195_v28 = vsel %vm1969_vm6, %v12256_v18, %v12255_v19  ;;  %v12258_v1 = vld [vmem:[#allocation59_spill] sm:$0xff]  ;;  %v12262_v8 = vld [vmem:[#allocation57_spill] sm:$0xff] }
 0x2aa   :  { %4472 = vmatpush1.msra.mxu1 %v4252_v7  ;;  %9639 = vmatmul.mubr.msk.f32.vlgmr.msra.gmra.mrb[4].mxu0 %vm3649_vm10, %v10949_v59  ;;  %v5193_v7 = vsel %vm1969_vm6, %v12258_v1, %v12257_v17  ;;  %v5196_v27 = vsel %vm1969_vm6, %v12262_v8, %v12256_v18  ;;  %v12270_v18 = vld [vmem:[#allocation15_spill] sm:$0xff] }
 0x2ab   :  { %v11184_v37 = vpop.permute.xlu1 %5838  ;;  %4401 = vmatpush1.msra.mxu0 %v4250_v11  ;;  %4657 = vmatprep.subr.mxu1 %v4577_v26  ;;  %v11186_v15 = vpop.permute.xlu0 %5836  ;;  %v12260_v11 = vld [vmem:[#allocation44_spill] sm:$0xff] }
 0x2ac   :  { %4586 = vmatprep.subr.mxu0 %v4575_v5  ;;  %4535 = vmatprep.mubr.f32.mxu1 %v12207_v55  ;;  %v12263_v5 = vld [vmem:[#allocation51_spill] sm:$0xff] }
 0x2ad   :  { %4464 = vmatprep.mubr.f32.mxu0 %v12207_v55  ;;  %9642 = vmatmul.mubr.msk.f32.vlgmr.msra.gmra.mrb[6].mxu1 %vm3649_vm10, %v10949_v59 }
 0x2ae   :  { %4658 = vmatpush1.msra.mxu1 %v4576_v41  ;;  %9641 = vmatmul.mubr.msk.f32.vlgmr.msra.gmra.mrb[6].mxu0 %vm3649_vm10, %v10949_v59  ;;  %v5194_v41 = vsel %vm1969_vm6, %v12255_v19, %v12258_v1  ;;  %v5198_v1 = vmul.f32 %v5196_v27, %v12270_v18  ;;  %v12274_v27 = vld [vmem:[#allocation60_spill] sm:$0xff] }
 0x2af   :  { %v11197_v42 = vpop.permute.xlu1 %5832  ;;  %4587 = vmatpush1.msra.mxu0 %v4574_v6  ;;  %4799 = vmatprep.subr.mxu1 %v4581_v39  ;;  %v4561_v13 = vpop.permute.xlu0 %4560  ;;  %v12264_v6 = vld [vmem:[#allocation52_spill] sm:$0xff] }
 0x2b0   :  { %v4567_v43 = vsel %vm1259_vm5, %v4561_v13, %v11039_v38  ;;  %v4568_v61 = vsel %vm1259_vm5, %v11043_v3, %v4561_v13  ;;  %4721 = vmatprep.mubr.f32.mxu1 %v12207_v55  ;;  %4650 = vmatprep.mubr.f32.mxu0 %v12207_v55  ;;  %v12265_v39 = vld [vmem:[#allocation12_spill] sm:$0xff]  ;;  %v12266_v13 = vld [vmem:[#allocation13_spill] sm:$0xff] }
 0x2b1   :  { %v4579_v59 = vmul.f32 %v4568_v61, %v10466_v57  ;;  %v4580_v12 = vmul.f32 %v4567_v43, %v10469_v58  ;;  %9644 = vmatmul.mubr.msk.f32.vlgmr.msra.gmra.mrb[4].mxu1 %vm3649_vm10, %v10929_v53  ;;  %v5201_v22 = vmul.f32 %v5193_v7, %v12265_v39  ;;  %v5199_v43 = vmul.f32 %v5195_v28, %v12266_v13  ;;  %v12271_v28 = vld [vmem:[#allocation62_spill] sm:$0xff] }
 0x2b2   :  { %9643 = vmatmul.mubr.msk.f32.vlgmr.msra.gmra.mrb[4].mxu0 %vm3649_vm10, %v10929_v53  ;;  %4863 = vmatprep.mubr.f32.mxu1 %v12207_v55  ;;  %v12322_v13 = vld [vmem:[#allocation6_spill] sm:$0xff] }
 0x2b3   :  { %v11219_v38 = vpop.permute.xlu1 %5862  ;;  %v11221_v3 = vpop.permute.xlu0 %5834  ;;  %4728 = vmatprep.subr.mxu0 %v4579_v59  ;;  %4800 = vmatpush1.msra.mxu1 %v4580_v12  ;;  %v12267_v12 = vld [vmem:[#allocation48_spill] sm:$0xff] }
 0x2b4   :  { %4729 = vmatpush1.msra.mxu0 %v4578_v29  ;;  %4792 = vmatprep.mubr.f32.mxu0 %v12207_v55  ;;  %v12268_v29 = vld [vmem:[#allocation49_spill] sm:$0xff] }
 0x2b5   :  { %9646 = vmatmul.mubr.msk.f32.vlgmr.msra.gmra.mrb[6].mxu1 %vm3649_vm10, %v10929_v53  ;;  %4953 = vmatprep.subr.mxu1 %v12253_v10 }
 0x2b6   :  { %9645 = vmatmul.mubr.msk.f32.vlgmr.msra.gmra.mrb[6].mxu0 %vm3649_vm10, %v10929_v53  ;;  %4882 = vmatprep.subr.mxu0 %v12254_v32  ;;  %v12261_v53 = vld [vmem:[#allocation50_spill] sm:$0xff] }
 0x2b7   :  { %v5189_v36 = vpop.permute.xlu1 %5188  ;;  %4954 = vmatpush1.msra.mxu1 %v12259_v16  ;;  %4883 = vmatpush1.msra.mxu0 %v12260_v11  ;;  %v11240_v26 = vpop.permute.xlu0 %5830  ;;  %v12269_v32 = vld [vmem:[#allocation14_spill] sm:$0xff]  ;;  %v12272_v16 = vld [vmem:[#allocation16_spill] sm:$0xff] }
 0x2b8   :  { %5095 = vmatprep.subr.mxu1 %v12261_v53  ;;  %5017 = vmatprep.mubr.f32.mxu1 %v12207_v55  ;;  %v5197_v59 = vsel %vm1969_vm6, %v5189_v36, %v12262_v8  ;;  %v5200_v19 = vmul.f32 %v5194_v41, %v12269_v32  ;;  %v5190_v7 = vsel %vm1969_vm6, %v12271_v28, %v5189_v36  ;;  %v12273_v8 = vld [vmem:[#allocation64_spill] sm:$0xff] }
 0x2b9   :  { %5024 = vmatprep.subr.mxu0 %v12263_v5  ;;  %4946 = vmatprep.mubr.f32.mxu0 %v12207_v55  ;;  %v5205_v11 = vmul.f32 %v5197_v59, %v12272_v16  ;;  %v5521_v5 = vsel %vm2367_vm7, %v12274_v27, %v12273_v8  ;;  %v12276_v59 = vld [vmem:[#allocation19_spill] sm:$0xff]  ;;  %v12284_v16 = vld [vmem:[#allocation21_spill] sm:$0xff] }
 0x2ba   :  { %9648 = vmatmul.mubr.msk.f32.vlgmr.msra.gmra.mrb[4].mxu1 %vm3649_vm10, %v12264_v6  ;;  %9647 = vmatmul.mubr.msk.f32.vlgmr.msra.gmra.mrb[4].mxu0 %vm3649_vm10, %v12264_v6 }
 0x2bb   :  { %v11260_v61 = vpop.permute.xlu1 %6164  ;;  %5096 = vmatpush1.msra.mxu1 %v12267_v12  ;;  %5025 = vmatpush1.msra.mxu0 %v12268_v29  ;;  %v11267_v10 = vpop.permute.xlu0 %5842  ;;  %v5204_v12 = vmul.f32 %v5190_v7, %v12276_v59  ;;  %v12277_v29 = vld [vmem:[#allocation17_spill] sm:$0xff] }
 0x2bc   :  { %5281 = vmatprep.subr.mxu1 %v5201_v22  ;;  %5210 = vmatprep.subr.mxu0 %v5199_v43 }
 0x2bd   :  { %5159 = vmatprep.mubr.f32.mxu1 %v12207_v55  ;;  %5088 = vmatprep.mubr.f32.mxu0 %v12207_v55 }
 0x2be   :  { %9650 = vmatmul.mubr.msk.f32.vlgmr.msra.gmra.mrb[6].mxu1 %vm3649_vm10, %v12264_v6  ;;  %9649 = vmatmul.mubr.msk.f32.vlgmr.msra.gmra.mrb[6].mxu0 %vm3649_vm10, %v12264_v6  ;;  %v12275_v6 = vld [vmem:[#allocation63_spill] sm:$0xff] }
 0x2bf   :  { %v11281_v53 = vpop.permute.xlu1 %6162  ;;  %5282 = vmatpush1.msra.mxu1 %v5200_v19  ;;  %5211 = vmatpush1.msra.mxu0 %v5198_v1  ;;  %v5185_v41 = vpop.permute.xlu0 %5184  ;;  %v5522_v43 = vsel %vm2367_vm7, %v12275_v6, %v12274_v27  ;;  %v12278_v1 = vld [vmem:[#allocation18_spill] sm:$0xff]  ;;  %v12280_v27 = vld [vmem:[#allocation20_spill] sm:$0xff] }
 0x2c0   :  { %5423 = vmatprep.subr.mxu1 %v5205_v11  ;;  %v5191_v36 = vsel %vm1969_vm6, %v5185_v41, %v12271_v28  ;;  %v5192_v22 = vsel %vm1969_vm6, %v12257_v17, %v5185_v41  ;;  %5345 = vmatprep.mubr.f32.mxu1 %v12207_v55  ;;  %v5523_v17 = vsel %vm2367_vm7, %v11110_v9, %v12275_v6  ;;  %v12279_v28 = vld [vmem:[#allocation53_spill] sm:$0xff] }
 0x2c1   :  { %v5202_v19 = vmul.f32 %v5192_v22, %v12277_v29  ;;  %v5203_v11 = vmul.f32 %v5191_v36, %v12278_v1  ;;  %5274 = vmatprep.mubr.f32.mxu0 %v12207_v55  ;;  %v5529_v41 = vmul.f32 %v5521_v5, %v12280_v27  ;;  %v5524_v36 = vsel %vm2367_vm7, %v11079_v14, %v11110_v9  ;;  %v12281_v1 = vld [vmem:[#allocation22_spill] sm:$0xff]  ;;  %v12282_v9 = vld [vmem:[#allocation24_spill] sm:$0xff] }
 0x2c2   :  { %9652 = vmatmul.mubr.msk.f32.vlgmr.msra.gmra.mrb[4].mxu1 %vm3649_vm10, %v12279_v28  ;;  %9651 = vmatmul.mubr.msk.f32.vlgmr.msra.gmra.mrb[4].mxu0 %vm3649_vm10, %v12279_v28  ;;  %v5528_v29 = vmul.f32 %v5522_v43, %v12281_v1  ;;  %v5527_v43 = vmul.f32 %v5523_v17, %v12284_v16 }
 0x2c3   :  { %v5513_v7 = vpop.permute.xlu1 %5512  ;;  %5424 = vmatpush1.msra.mxu1 %v5204_v12  ;;  %v5517_v22 = vpop.permute.xlu0 %5516  ;;  %5352 = vmatprep.subr.mxu0 %v5203_v11  ;;  %v12283_v11 = vld [vmem:[#allocation25_spill] sm:$0xff] }
 0x2c4   :  { %v5519_v6 = vsel %vm2367_vm7, %v5513_v7, %v11128_v4  ;;  %5609 = vmatprep.subr.mxu1 %v5529_v41  ;;  %v5518_v5 = vsel %vm2367_vm7, %v11128_v4, %v5517_v22  ;;  %v5525_v27 = vsel %vm2367_vm7, %v5517_v22, %v11079_v14  ;;  %5487 = vmatprep.mubr.f32.mxu1 %v12207_v55  ;;  %v12285_v41 = vld [vmem:[#allocation23_spill] sm:$0xff]  ;;  %v12287_v22 = vld [vmem:[#allocation28_spill] sm:$0xff] }
 0x2c5   :  { %v5533_v12 = vmul.f32 %v5525_v27, %v12282_v9  ;;  %v5531_v59 = vmul.f32 %v5519_v6, %v12283_v11  ;;  %5353 = vmatpush1.msra.mxu0 %v5202_v19  ;;  %5416 = vmatprep.mubr.f32.mxu0 %v12207_v55  ;;  %v5526_v1 = vmul.f32 %v5524_v36, %v12285_v41  ;;  %v12286_v27 = vld [vmem:[#allocation26_spill] sm:$0xff] }
 0x2c6   :  { %9654 = vmatmul.mubr.msk.f32.vlgmr.msra.gmra.mrb[6].mxu1 %vm3649_vm10, %v12279_v28  ;;  %9653 = vmatmul.mubr.msk.f32.vlgmr.msra.gmra.mrb[6].mxu0 %vm3649_vm10, %v12279_v28  ;;  %v5849_v4 = vsel %vm2765_vm8, %v11186_v15, %v11184_v37  ;;  %v5532_v19 = vmul.f32 %v5518_v5, %v12286_v27  ;;  %v5520_v17 = vsel %vm2367_vm7, %v12273_v8, %v5513_v7 }
 0x2c7   :  { %v5845_v14 = vpop.permute.xlu1 %5844  ;;  %5610 = vmatpush1.msra.mxu1 %v5528_v29  ;;  %5538 = vmatprep.subr.mxu0 %v5527_v43  ;;  %v11343_v36 = vpop.permute.xlu0 %6166  ;;  %v5851_v28 = vsel %vm2765_vm8, %v11197_v42, %v11221_v3  ;;  %v5857_v6 = vmul.f32 %v5849_v4, %v12287_v22  ;;  %v5850_v8 = vsel %vm2765_vm8, %v11221_v3, %v11186_v15  ;;  %v12288_v29 = vld [vmem:[#allocation27_spill] sm:$0xff]  ;;  %v12290_v3 = vld [vmem:[#allocation30_spill] sm:$0xff]  ;;  %v12292_v22 = vld [vmem:[#allocation32_spill] sm:$0xff] }
 0x2c8   :  { %5539 = vmatpush1.msra.mxu0 %v5526_v1  ;;  %5673 = vmatprep.mubr.f32.mxu1 %v12207_v55  ;;  %v5530_v7 = vmul.f32 %v5520_v17, %v12288_v29  ;;  %v12289_v1 = vld [vmem:[#allocation29_spill] sm:$0xff]  ;;  %v5856_v4 = vmul.f32 %v5850_v8, %v12290_v3  ;;  %v12291_v17 = vld [vmem:[#allocation31_spill] sm:$0xff]  ;;  %v12295_v3 = vld [vmem:[#allocation34_spill] sm:$0xff] }
 0x2c9   :  { %5680 = vmatprep.subr.mxu0 %v5531_v59  ;;  %5751 = vmatprep.subr.mxu1 %v5533_v12  ;;  %v5855_v43 = vmul.f32 %v5851_v28, %v12289_v1  ;;  %v5852_v59 = vsel %vm2765_vm8, %v11240_v26, %v11197_v42  ;;  %v5853_v12 = vsel %vm2765_vm8, %v5845_v14, %v11240_v26 }
 0x2ca   :  { %5602 = vmatprep.mubr.f32.mxu0 %v12207_v55  ;;  %9656 = vmatmul.mubr.msk.f32.vlgmr.msra.gmra.mrb[4].mxu1 %vm3649_vm10, %v11161_v20  ;;  %v5854_v28 = vmul.f32 %v5852_v59, %v12291_v17  ;;  %v5846_v42 = vsel %vm2765_vm8, %v11267_v10, %v5845_v14  ;;  %v5861_v26 = vmul.f32 %v5853_v12, %v12292_v22  ;;  %v12294_v12 = vld [vmem:[#allocation33_spill] sm:$0xff] }
 0x2cb   :  { %v6159_v5 = vpop.permute.xlu1 %6158  ;;  %5752 = vmatpush1.msra.mxu1 %v5532_v19  ;;  %9655 = vmatmul.mubr.msk.f32.vlgmr.msra.gmra.mrb[4].mxu0 %vm3649_vm10, %v11161_v20  ;;  %v6161_v15 = vpop.permute.xlu0 %6160 }
 0x2cc   :  { %5681 = vmatpush1.msra.mxu0 %v5530_v7  ;;  %5937 = vmatprep.subr.mxu1 %v5857_v6  ;;  %v6177_v6 = vsel %vm3163_vm9, %v11260_v61, %v11343_v36 }
 0x2cd   :  { %5866 = vmatprep.subr.mxu0 %v5855_v43  ;;  %5815 = vmatprep.mubr.f32.mxu1 %v12207_v55  ;;  %v12293_v43 = vld [vmem:[#allocation35_spill] sm:$0xff] }
 0x2ce   :  { %5744 = vmatprep.mubr.f32.mxu0 %v12207_v55  ;;  %9658 = vmatmul.mubr.msk.f32.vlgmr.msra.gmra.mrb[6].mxu1 %vm3649_vm10, %v11161_v20  ;;  %v5860_v59 = vmul.f32 %v5846_v42, %v12293_v43  ;;  %v6179_v42 = vsel %vm3163_vm9, %v6161_v15, %v11281_v53 }
 0x2cf   :  { %v6171_v19 = vpop.permute.xlu1 %6170  ;;  %5938 = vmatpush1.msra.mxu1 %v5856_v4  ;;  %9657 = vmatmul.mubr.msk.f32.vlgmr.msra.gmra.mrb[6].mxu0 %vm3649_vm10, %v11161_v20  ;;  %v5841_v8 = vpop.permute.xlu0 %5840  ;;  %v6178_v20 = vsel %vm3163_vm9, %v11281_v53, %v11260_v61  ;;  %v6180_v61 = vsel %vm3163_vm9, %v6159_v5, %v6161_v15 }
 0x2d0   :  { %5867 = vmatpush1.msra.mxu0 %v5854_v28  ;;  %6079 = vmatprep.subr.mxu1 %v5861_v26  ;;  %v5847_v14 = vsel %vm2765_vm8, %v5841_v8, %v11267_v10  ;;  %v5848_v7 = vsel %vm2765_vm8, %v11184_v37, %v5841_v8  ;;  %v12296_v10 = vld [vmem:[#allocation36_spill] sm:$0xff] }
 0x2d1   :  { %v5858_v22 = vmul.f32 %v5848_v7, %v12294_v12  ;;  %v5859_v4 = vmul.f32 %v5847_v14, %v12295_v3  ;;  %6001 = vmatprep.mubr.f32.mxu1 %v12207_v55  ;;  %5930 = vmatprep.mubr.f32.mxu0 %v12207_v55  ;;  %v6185_v28 = vmul.f32 %v6177_v6, %v12296_v10  ;;  %v12297_v14 = vld [vmem:[#allocation38_spill] sm:$0xff]  ;;  %v12299_v12 = vld [vmem:[#allocation37_spill] sm:$0xff] }
 0x2d2   :  { %9660 = vmatmul.mubr.msk.f32.vlgmr.msra.gmra.mrb[4].mxu1 %vm3649_vm10, %v11219_v38  ;;  %v6184_v7 = vmul.f32 %v6178_v20, %v12297_v14  ;;  %v6183_v43 = vmul.f32 %v6179_v42, %v12299_v12  ;;  %v12300_v3 = vld [vmem:[#allocation41_spill] sm:$0xff] }
 0x2d3   :  { %v6169_v37 = vpop.permute.xlu1 %6168  ;;  %6080 = vmatpush1.msra.mxu1 %v5860_v59  ;;  %9659 = vmatmul.mubr.msk.f32.vlgmr.msra.gmra.mrb[4].mxu0 %vm3649_vm10, %v11219_v38  ;;  %v6173_v26 = vpop.permute.xlu0 %6172  ;;  %v12298_v59 = vld [vmem:[#allocation40_spill] sm:$0xff] }
 0x2d4   :  { %v6175_v8 = vsel %vm3163_vm9, %v6169_v37, %v6171_v19  ;;  %6265 = vmatprep.subr.mxu1 %v6185_v28  ;;  %v6181_v6 = vsel %vm3163_vm9, %v6173_v26, %v6159_v5  ;;  %6008 = vmatprep.subr.mxu0 %v5859_v4  ;;  %v6174_v53 = vsel %vm3163_vm9, %v6171_v19, %v6173_v26  ;;  %v12301_v5 = vld [vmem:[#allocation39_spill] sm:$0xff] }
 0x2d5   :  { %v6189_v10 = vmul.f32 %v6181_v6, %v12298_v59  ;;  %6143 = vmatprep.mubr.f32.mxu1 %v12207_v55  ;;  %6009 = vmatpush1.msra.mxu0 %v5858_v22  ;;  %v6187_v17 = vmul.f32 %v6175_v8, %v12300_v3  ;;  %v6182_v15 = vmul.f32 %v6180_v61, %v12301_v5  ;;  %v12302_v22 = vld [vmem:[#allocation42_spill] sm:$0xff]  ;;  %v12303_v28 = vld [vmem:[#allocation43_spill] sm:$0xff]  ;;  %v12316_v5 = vld [vmem:[#allocation4_spill] sm:$0xff] }
 0x2d6   :  { %6072 = vmatprep.mubr.f32.mxu0 %v12207_v55  ;;  %9662 = vmatmul.mubr.msk.f32.vlgmr.msra.gmra.mrb[6].mxu1 %vm3649_vm10, %v11219_v38  ;;  %v6176_v19 = vsel %vm3163_vm9, %v11343_v36, %v6169_v37  ;;  %v6188_v4 = vmul.f32 %v6174_v53, %v12302_v22 }
 0x2d7   :  { %6266 = vmatpush1.msra.mxu1 %v6184_v7  ;;  %9661 = vmatmul.mubr.msk.f32.vlgmr.msra.gmra.mrb[6].mxu0 %vm3649_vm10, %v11219_v38  ;;  %v6191_v20 = vpop.permute.xlu0 %6190  ;;  %v6186_v42 = vmul.f32 %v6176_v19, %v12303_v28 }
 0x2d8   :  { %6194 = vmatprep.subr.mxu0 %v6183_v43  ;;  %6329 = vmatprep.mubr.f32.mxu1 %v12207_v55 }
 0x2d9   :  { %6195 = vmatpush1.msra.mxu0 %v6182_v15  ;;  %6407 = vmatprep.subr.mxu1 %v6189_v10 }
 0x2da   :  { %6336 = vmatprep.subr.mxu0 %v6187_v17  ;;  %6258 = vmatprep.mubr.f32.mxu0 %v12207_v55 }
 0x2db   :  { %9664 = vmatmul.mubr.msk.f32.vlgmr.msra.gmra.mrb[4].mxu1 %vm3649_vm10, %v6191_v20  ;;  %9663 = vmatmul.mubr.msk.f32.vlgmr.msra.gmra.mrb[4].mxu0 %vm3649_vm10, %v6191_v20 }
 0x2dc   :  { %6408 = vmatpush1.msra.mxu1 %v6188_v4  ;;  %6337 = vmatpush1.msra.mxu0 %v6186_v42 }
 0x2dd   :  { %6471 = vmatprep.mubr.f32.mxu1 %v12207_v55  ;;  %6400 = vmatprep.mubr.f32.mxu0 %v12207_v55 }
 0x2df   :  { %9666 = vmatmul.mubr.msk.f32.vlgmr.msra.gmra.mrb[6].mxu1 %vm3649_vm10, %v6191_v20  ;;  %9665 = vmatmul.mubr.msk.f32.vlgmr.msra.gmra.mrb[6].mxu0 %vm3649_vm10, %v6191_v20 }
 0x2e0   :  { %6731 = vmatprep.mubr.f32.mxu1 %v12207_v55  ;;  %6660 = vmatprep.mubr.f32.mxu0 %v12207_v55 }
 0x2e8   :  { %v6488_v38 = vpop.permute.xlu0 %6487 }
 0x3ae   :  { %v6331_v36 = vpop.f32.mrb[4].mxu1  ;;  %v6260_v17 = vpop.f32.mrb[4].mxu0 }
 0x3af   :  { %v6492_v43 = vadd.f32 %v6488_v38, %v6331_v36  ;;  %v6333_v10 = vpop.f32.mrb[5].mxu1  ;;  %v6262_v37 = vpop.f32.mrb[5].mxu0  ;;  %v6490_v42 = vadd.f32 %v6488_v38, %v6260_v17 }
 0x3b0   :  { %v6493_v7 = vadd.f32 %v6488_v38, %v6333_v10  ;;  %v6491_v10 = vadd.f32 %v6488_v38, %v6262_v37 }
 0x3b1   :  { %vm6500_vm11 = vcmp.gt.f32.partialorder %v6492_v43, 0.0  ;;  %v6508_v26 = vmul.f32 0.2, %v6492_v43  ;;  %v6506_v36 = vmul.f32 0.2, %v6490_v42  ;;  %vm6498_vm13 = vcmp.gt.f32.partialorder %v6490_v42, 0.0 }
 0x3b2   :  { %v6473_v61 = vpop.f32.mrb[6].mxu1  ;;  %v6402_v6 = vpop.f32.mrb[6].mxu0  ;;  %v6509_v4 = vmul.f32 0.2, %v6493_v7  ;;  %vm6501_vm12 = vcmp.gt.f32.partialorder %v6493_v7, 0.0  ;;  %vm6499_vm14 = vcmp.gt.f32.partialorder %v6491_v10, 0.0 }
 0x3b3   :  { %v11442_v8 = vsel %vm6500_vm11, %v6492_v43, %v6508_v26  ;;  %v6475_v53 = vpop.f32.mrb[7].mxu1  ;;  %v6404_v15 = vpop.f32.mrb[7].mxu0  ;;  %v11466_v43 = vsel %vm6498_vm13, %v6490_v42, %v6506_v36  ;;  %v6507_v17 = vmul.f32 0.2, %v6491_v10  ;;  %v6496_v26 = vadd.f32 %v6488_v38, %v6473_v61 }
 0x3b4   :  { %12304 = vst [vmem:[#allocation46_spill] sm:$0xff] %v11442_v8  ;;  %6526 = vrot.lane.b32.xlu1 %v11442_v8, %s9927_s23  ;;  %6559 = vrot.lane.b32.xlu0 %v11442_v8, %s9924_s0  ;;  %v6495_v19 = vadd.f32 %v6488_v38, %v6404_v15  ;;  %v11452_v20 = vsel %vm6501_vm12, %v6493_v7, %v6509_v4  ;;  %12306 = vst [vmem:[#allocation54_spill] sm:$0xff] %v11466_v43 }
 0x3b5   :  { %12305 = vst [vmem:[#allocation47_spill] sm:$0xff] %v11452_v20  ;;  %v11476_v7 = vsel %vm6499_vm14, %v6491_v10, %v6507_v17  ;;  %v6512_v15 = vmul.f32 0.2, %v6496_v26  ;;  %vm6504_vm15 = vcmp.gt.f32.partialorder %v6496_v26, 0.0  ;;  %v6497_v61 = vadd.f32 %v6488_v38, %v6475_v53  ;;  %v12312_v17 = vld [vmem:[#allocation56_spill] sm:$0xff] }
 0x3b6   :  { %12307 = vst [vmem:[#allocation58_spill] sm:$0xff] %v11476_v7  ;;  %v6494_v42 = vadd.f32 %v6488_v38, %v6402_v6  ;;  %v6511_v38 = vmul.f32 0.2, %v6495_v19  ;;  %vm6503_vm11 = vcmp.gt.f32.partialorder %v6495_v19, 0.0 }
 0x3b7   :  { %v11482_v37 = vsel %vm6504_vm15, %v6496_v26, %v6512_v15  ;;  %v6513_v4 = vmul.f32 0.2, %v6497_v61  ;;  %vm6505_vm1 = vcmp.gt.f32.partialorder %v6497_v61, 0.0  ;;  %v11564_v26 = vpop.permute.xlu0 %6592 }
 0x3b8   :  { %7170 = vrot.lane.b32.xlu1 %v11442_v8, %s9928_s2  ;;  %7498 = vrot.lane.b32.xlu0 %v11442_v8, %s9930_s25  ;;  %12308 = vst [vmem:[#allocation61_spill] sm:$0xff] %v11482_v37  ;;  %v6510_v53 = vmul.f32 0.2, %v6494_v42  ;;  %vm6502_vm2 = vcmp.gt.f32.partialorder %v6494_v42, 0.0  ;;  %v11520_v6 = vsel %vm6503_vm11, %v6495_v19, %v6511_v38  ;;  %v11562_v19 = vpop.permute.xlu1 %7198 }
 0x3b9   :  { %v11500_v36 = vsel %vm6505_vm1, %v6497_v61, %v6513_v4  ;;  %12311 = vst [vmem:[#allocation44_spill] sm:$0xff] %v11520_v6 }
 0x3ba   :  { %12309 = vst [vmem:[#allocation59_spill] sm:$0xff] %v11500_v36  ;;  %v11510_v10 = vsel %vm6502_vm2, %v6494_v42, %v6510_v53 }
 0x3bb   :  { %12310 = vst [vmem:[#allocation45_spill] sm:$0xff] %v11510_v10  ;;  %v11576_v61 = vpop.permute.xlu0 %7526 }
 0x3bc   :  { %8122 = vrot.lane.b32.xlu1 %v11442_v8, %s9926_s22  ;;  %6528 = vrot.lane.b32.xlu0 %v11452_v20, %s9927_s23  ;;  %v11572_v15 = vpop.permute.xlu1 %7822  ;;  %12314 = vst [vmem:[#allocation57_spill] sm:$0xff] %v11576_v61 }
 0x3bd   :  { %12313 = vst [vmem:[#allocation50_spill] sm:$0xff] %v11572_v15 }
 0x3c0   :  { %6561 = vrot.lane.b32.xlu1 %v11452_v20, %s9924_s0  ;;  %7172 = vrot.lane.b32.xlu0 %v11452_v20, %s9928_s2 }
 0x3c4   :  { %7500 = vrot.lane.b32.xlu1 %v11452_v20, %s9930_s25  ;;  %8124 = vrot.lane.b32.xlu0 %v11452_v20, %s9926_s22 }
 0x3c8   :  { %6555 = vrot.lane.b32.xlu1 %v11466_v43, %s9924_s0  ;;  %7494 = vrot.lane.b32.xlu0 %v11466_v43, %s9930_s25 }
 0x3cc   :  { %6522 = vrot.lane.b32.xlu1 %v11466_v43, %s9927_s23  ;;  %8118 = vrot.lane.b32.xlu0 %v11466_v43, %s9926_s22 }
 0x3d0   :  { %7166 = vrot.lane.b32.xlu1 %v11466_v43, %s9928_s2  ;;  %6524 = vrot.lane.b32.xlu0 %v11476_v7, %s9927_s23 }
 0x3d4   :  { %6557 = vrot.lane.b32.xlu1 %v11476_v7, %s9924_s0  ;;  %6534 = vrot.lane.b32.xlu0 %v11482_v37, %s9927_s23 }
 0x3d8   :  { %6567 = vrot.lane.b32.xlu1 %v11482_v37, %s9924_s0  ;;  %7168 = vrot.lane.b32.xlu0 %v11476_v7, %s9928_s2 }
 0x3dc   :  { %7496 = vrot.lane.b32.xlu1 %v11476_v7, %s9930_s25  ;;  %7178 = vrot.lane.b32.xlu0 %v11482_v37, %s9928_s2 }
 0x3e0   :  { %7506 = vrot.lane.b32.xlu1 %v11482_v37, %s9930_s25  ;;  %8120 = vrot.lane.b32.xlu0 %v11476_v7, %s9926_s22 }
 0x3e4   :  { %6536 = vrot.lane.b32.xlu1 %v11500_v36, %s9927_s23  ;;  %6569 = vrot.lane.b32.xlu0 %v11500_v36, %s9924_s0 }
 0x3e8   :  { %7180 = vrot.lane.b32.xlu1 %v11500_v36, %s9928_s2  ;;  %7508 = vrot.lane.b32.xlu0 %v11500_v36, %s9930_s25 }
 0x3ec   :  { %6563 = vrot.lane.b32.xlu1 %v11510_v10, %s9924_s0  ;;  %6530 = vrot.lane.b32.xlu0 %v11510_v10, %s9927_s23 }
 0x3f0   :  { %7502 = vrot.lane.b32.xlu1 %v11510_v10, %s9930_s25  ;;  %7174 = vrot.lane.b32.xlu0 %v11510_v10, %s9928_s2 }
 0x3f4   :  { %8126 = vrot.lane.b32.xlu1 %v11510_v10, %s9926_s22  ;;  %6565 = vrot.lane.b32.xlu0 %v11520_v6, %s9924_s0 }
 0x3f8   :  { %8132 = vrot.lane.b32.xlu1 %v11500_v36, %s9926_s22  ;;  %8130 = vrot.lane.b32.xlu0 %v11482_v37, %s9926_s22 }
 0x3fc   :  { %8448 = vrot.lane.b32.xlu1 %v11476_v7, %s9934_s29  ;;  %8150 = vrot.lane.b32.xlu0 %v12312_v17, %s9943_s1 }
 0x400   :  { %6532 = vrot.lane.b32.xlu1 %v11520_v6, %s9927_s23  ;;  %8450 = vrot.lane.b32.xlu0 %v11442_v8, %s9934_s29 }
 0x404   :  { %8452 = vrot.lane.b32.xlu1 %v11452_v20, %s9934_s29  ;;  %8454 = vrot.lane.b32.xlu0 %v11510_v10, %s9934_s29 }
 0x408   :  { %7176 = vrot.lane.b32.xlu1 %v11520_v6, %s9928_s2  ;;  %8460 = vrot.lane.b32.xlu0 %v11500_v36, %s9934_s29 }
 0x40c   :  { %8446 = vrot.lane.b32.xlu1 %v11466_v43, %s9934_s29  ;;  %7504 = vrot.lane.b32.xlu0 %v11520_v6, %s9930_s25 }
 0x410   :  { %8458 = vrot.lane.b32.xlu1 %v11482_v37, %s9934_s29  ;;  %8776 = vrot.lane.b32.xlu0 %v11476_v7, %s9936_s6 }
 0x414   :  { %8478 = vrot.lane.b32.xlu1 %v12312_v17, %s9944_s10  ;;  %8780 = vrot.lane.b32.xlu0 %v11452_v20, %s9936_s6 }
 0x418   :  { %8778 = vrot.lane.b32.xlu1 %v11442_v8, %s9936_s6  ;;  %8774 = vrot.lane.b32.xlu0 %v11466_v43, %s9936_s6 }
 0x41c   :  { %8782 = vrot.lane.b32.xlu1 %v11510_v10, %s9936_s6  ;;  %8786 = vrot.lane.b32.xlu0 %v11482_v37, %s9936_s6 }
 0x420   :  { %8128 = vrot.lane.b32.xlu1 %v11520_v6, %s9926_s22  ;;  %8806 = vrot.lane.b32.xlu0 %v12312_v17, %s9945_s11 }
 0x424   :  { %8788 = vrot.lane.b32.xlu1 %v11500_v36, %s9936_s6  ;;  %8456 = vrot.lane.b32.xlu0 %v11520_v6, %s9934_s29 }
 0x426   :  { %v11582_v4 = vpop.permute.xlu1 %6526  ;;  %v6560_v42 = vpop.permute.xlu0 %6559 }
 0x428   :  { %9104 = vrot.lane.b32.xlu1 %v11476_v7, %s9938_s12  ;;  %9106 = vrot.lane.b32.xlu0 %v11442_v8, %s9938_s12  ;;  %v12325_v8 = vld [vmem:[#allocation7_spill] sm:$0xff] }
 0x42a   :  { %v11588_v53 = vpop.permute.xlu1 %7170  ;;  %v11590_v38 = vpop.permute.xlu0 %7498 }
 0x42c   :  { %9108 = vrot.lane.b32.xlu1 %v11452_v20, %s9938_s12  ;;  %9110 = vrot.lane.b32.xlu0 %v11510_v10, %s9938_s12 }
 0x42e   :  { %v11596_v28 = vpop.permute.xlu1 %8122  ;;  %v11598_v22 = vpop.permute.xlu0 %6528 }
 0x42f   :  { %12315 = vst [vmem:[#allocation51_spill] sm:$0xff] %v11596_v28 }
 0x430   :  { %8784 = vrot.lane.b32.xlu1 %v11520_v6, %s9936_s6  ;;  %9112 = vrot.lane.b32.xlu0 %v11520_v6, %s9938_s12 }
 0x432   :  { %v6562_v3 = vpop.permute.xlu1 %6561  ;;  %v11604_v59 = vpop.permute.xlu0 %7172 }
 0x433   :  { %v6575_v14 = vsel %vm158_vm0, %v6560_v42, %v6562_v3  ;;  %v11612_v12 = vsel %vm861_vm4, %v11588_v53, %v11604_v59 }
 0x434   :  { %v6582_v1 = vmul.f32 %v6575_v14, %v12316_v5  ;;  %9102 = vrot.lane.b32.xlu1 %v11466_v43, %s9938_s12  ;;  %9116 = vrot.lane.b32.xlu0 %v11500_v36, %s9938_s12 }
 0x436   :  { %6667 = vmatprep.subr.mxu1 %v6582_v1  ;;  %v11619_v29 = vpop.permute.xlu1 %7500  ;;  %v11621_v27 = vpop.permute.xlu0 %8124  ;;  %v12319_v1 = vld [vmem:[#allocation55_spill] sm:$0xff] }
 0x437   :  { %12317 = vst [vmem:[#allocation52_spill] sm:$0xff] %v11621_v27  ;;  %v11627_v41 = vsel %vm1259_vm5, %v11590_v38, %v11619_v29  ;;  %v11633_v14 = vsel %vm1969_vm6, %v11596_v28, %v11621_v27 }
 0x438   :  { %12318 = vst [vmem:[#allocation48_spill] sm:$0xff] %v11633_v14  ;;  %9114 = vrot.lane.b32.xlu1 %v11482_v37, %s9938_s12  ;;  %9431 = vperm.xlu0 %9921, %v12319_v1   ;;  %v12321_v37 = vld [vmem:[#allocation5_spill] sm:$0xff] }
 0x43a   :  { %v6556_v5 = vpop.permute.xlu1 %6555  ;;  %v11638_v11 = vpop.permute.xlu0 %7494 }
 0x43c   :  { %9134 = vrot.lane.b32.xlu1 %v12312_v17, %s9947_s15 }
 0x43e   :  { %v6523_v9 = vpop.permute.xlu1 %6522  ;;  %v11642_v16 = vpop.permute.xlu0 %8118 }
 0x43f   :  { %12320 = vst [vmem:[#allocation49_spill] sm:$0xff] %v11642_v16 }
 0x442   :  { %v11644_v18 = vpop.permute.xlu1 %7166  ;;  %v6525_v32 = vpop.permute.xlu0 %6524 }
 0x446   :  { %v6558_v10 = vpop.permute.xlu1 %6557  ;;  %v11646_v15 = vpop.permute.xlu0 %6534 }
 0x447   :  { %v6576_v14 = vsel %vm158_vm0, %v6558_v10, %v6560_v42  ;;  %v6577_v1 = vsel %vm158_vm0, %v6556_v5, %v6558_v10 }
 0x448   :  { %v6580_v39 = vmul.f32 %v6577_v1, %v12321_v37  ;;  %v6581_v6 = vmul.f32 %v6576_v14, %v12322_v13  ;;  %v12324_v14 = vld [vmem:[#allocation8_spill] sm:$0xff] }
 0x44a   :  { %6596 = vmatprep.subr.mxu0 %v6580_v39  ;;  %6668 = vmatpush1.msra.mxu1 %v6581_v6  ;;  %v6568_v17 = vpop.permute.xlu1 %6567  ;;  %v11654_v16 = vpop.permute.xlu0 %7168 }
 0x44b   :  { %9668 = vmatmul.mubr.msk.f32.vlgmr.msra.gmra.mrb[8].mxu1 %vm3649_vm10, %v11564_v26 }
 0x44c   :  { %6873 = vmatprep.mubr.f32.mxu1 %v12207_v55 }
 0x44e   :  { %v11659_v36 = vpop.permute.xlu1 %7496  ;;  %v11661_v42 = vpop.permute.xlu0 %7178 }
 0x452   :  { %v11663_v43 = vpop.permute.xlu1 %7506  ;;  %v11665_v10 = vpop.permute.xlu0 %8120 }
 0x453   :  { %12323 = vst [vmem:[#allocation62_spill] sm:$0xff] %v11665_v10 }
 0x456   :  { %v6537_v37 = vpop.permute.xlu1 %6536  ;;  %v6570_v13 = vpop.permute.xlu0 %6569 }
 0x457   :  { %v6571_v39 = vsel %vm158_vm0, %v6568_v17, %v6570_v13  ;;  %v6578_v6 = vsel %vm158_vm0, %v6570_v13, %v6556_v5  ;;  %v6538_v58 = vsel %vm80_vm3, %v11646_v15, %v6537_v37 }
 0x458   :  { %v6579_v1 = vmul.f32 %v6578_v6, %v12324_v14  ;;  %v6586_v27 = vmul.f32 %v6571_v39, %v12325_v8  ;;  %v6543_v14 = vsel %vm80_vm3, %v6525_v32, %v11582_v4 }
 0x45a   :  { %v7181_v28 = vpop.permute.xlu1 %7180  ;;  %v11673_v7 = vpop.permute.xlu0 %7508  ;;  %6597 = vmatpush1.msra.mxu0 %v6579_v1  ;;  %6809 = vmatprep.subr.mxu1 %v6586_v27  ;;  %v6542_v27 = vsel %vm80_vm3, %v11582_v4, %v11598_v22  ;;  %v6544_v1 = vsel %vm80_vm3, %v6523_v9, %v6525_v32 }
 0x45b   :  { %9667 = vmatmul.mubr.msk.f32.vlgmr.msra.gmra.mrb[8].mxu0 %vm3649_vm10, %v11564_v26  ;;  %v6549_v4 = vmul.f32 %v6542_v27, %v10245_v62 }
 0x45c   :  { %6802 = vmatprep.mubr.f32.mxu0 %v12207_v55 }
 0x45e   :  { %v6564_v10 = vpop.permute.xlu1 %6563  ;;  %v6531_v20 = vpop.permute.xlu0 %6530 }
 0x45f   :  { %v6574_v8 = vsel %vm158_vm0, %v6562_v3, %v6564_v10 }
 0x462   :  { %v11678_v61 = vpop.permute.xlu1 %7502  ;;  %v11680_v50 = vpop.permute.xlu0 %7174 }
 0x466   :  { %v11682_v5 = vpop.permute.xlu1 %8126  ;;  %v6566_v13 = vpop.permute.xlu0 %6565 }
 0x467   :  { %12326 = vst [vmem:[#allocation64_spill] sm:$0xff] %v11682_v5  ;;  %v6572_v39 = vsel %vm158_vm0, %v6566_v13, %v6568_v17  ;;  %v6573_v6 = vsel %vm158_vm0, %v6564_v10, %v6566_v13  ;;  %v6545_v17 = vsel %vm80_vm3, %v6537_v37, %v6523_v9  ;;  %v6583_v10 = vmul.f32 %v6574_v8, %v10201_v44 }
 0x468   :  { %v6584_v3 = vmul.f32 %v6573_v6, %v10204_v45  ;;  %v6585_v5 = vmul.f32 %v6572_v39, %v10212_v48  ;;  %v6547_v45 = vmul.f32 %v6544_v1, %v10259_v21  ;;  %v6548_v48 = vmul.f32 %v6543_v14, %v10264_v24  ;;  %v9923_v24 = vld [vmem:[%s12072_s4] sm:$0x1] }
 0x469   :  { %v6546_v32 = vmul.f32 %v6545_v17, %v10268_v25  ;;  %v6553_v44 = vmul.f32 %v6538_v58, %v10288_v40  ;;  %v6541_v25 = vsel %vm80_vm3, %v11598_v22, %v6531_v20  ;;  %v7187_v37 = vsel %vm861_vm4, %v11654_v16, %v11588_v53  ;;  %v12327_v14 = vld [vmem:[#allocation10_spill] sm:$0xff] }
 0x46a   :  { %v11707_v13 = vpop.permute.xlu1 %8132  ;;  %v11710_v57 = vpop.permute.xlu0 %8130  ;;  %6738 = vmatprep.subr.mxu0 %v6584_v3  ;;  %6810 = vmatpush1.msra.mxu1 %v6585_v5  ;;  %v7188_v22 = vsel %vm861_vm4, %v11644_v18, %v11654_v16  ;;  %v6550_v27 = vmul.f32 %v6541_v25, %v10326_v54  ;;  %v7193_v53 = vmul.f32 %v11612_v12, %v10343_v63  ;;  %v12336_v25 = vld [vmem:[#allocation52_spill] sm:$0xff] }
 0x46b   :  { %6739 = vmatpush1.msra.mxu0 %v6583_v10  ;;  %9670 = vmatmul.mubr.msk.f32.vlgmr.msra.gmra.mrb[10].mxu1 %vm3649_vm10, %v11564_v26  ;;  %v7185_v63 = vsel %vm861_vm4, %v11604_v59, %v11680_v50  ;;  %v7516_v59 = vsel %vm1259_vm5, %v11638_v11, %v11659_v36 }
 0x46c   :  { %6953 = vmatprep.subr.mxu1 %v6549_v4  ;;  %9669 = vmatmul.mubr.msk.f32.vlgmr.msra.gmra.mrb[10].mxu0 %vm3649_vm10, %v11564_v26  ;;  %v12332_v4 = vld [vmem:[#allocation58_spill] sm:$0xff] }
 0x46d   :  { %6882 = vmatprep.subr.mxu0 %v6547_v45  ;;  %6954 = vmatpush1.msra.mxu1 %v6548_v48  ;;  %v12333_v48 = vld [vmem:[#allocation51_spill] sm:$0xff] }
 0x46e   :  { %v11720_v62 = vpop.permute.xlu1 %8448  ;;  %6883 = vmatpush1.msra.mxu0 %v6546_v32  ;;  %7095 = vmatprep.subr.mxu1 %v6553_v44  ;;  %v11722_v21 = vpop.permute.xlu0 %8150  ;;  %v12334_v32 = vld [vmem:[#allocation62_spill] sm:$0xff] }
 0x46f   :  { %7017 = vmatprep.mubr.f32.mxu1 %v12207_v55  ;;  %6946 = vmatprep.mubr.f32.mxu0 %v12207_v55  ;;  %v8139_v44 = vsel %vm1969_vm6, %v12334_v32, %v12333_v48 }
 0x470   :  { %9672 = vmatmul.mubr.msk.f32.vlgmr.msra.gmra.mrb[8].mxu1 %vm3649_vm10, %v9923_v24  ;;  %9671 = vmatmul.mubr.msk.f32.vlgmr.msra.gmra.mrb[8].mxu0 %vm3649_vm10, %v9923_v24 }
 0x471   :  { %7159 = vmatprep.mubr.f32.mxu1 %v12207_v55  ;;  %7088 = vmatprep.mubr.f32.mxu0 %v12207_v55 }
 0x472   :  { %v6533_v40 = vpop.permute.xlu1 %6532  ;;  %v11736_v58 = vpop.permute.xlu0 %8450 }
 0x473   :  { %v6539_v9 = vsel %vm80_vm3, %v6533_v40, %v11646_v15  ;;  %v6540_v26 = vsel %vm80_vm3, %v6531_v20, %v6533_v40  ;;  %v7182_v15 = vsel %vm861_vm4, %v11661_v42, %v7181_v28  ;;  %v7189_v20 = vsel %vm861_vm4, %v7181_v28, %v11644_v18 }
 0x474   :  { %v6551_v5 = vmul.f32 %v6540_v26, %v10307_v49  ;;  %v6552_v8 = vmul.f32 %v6539_v9, %v10319_v52  ;;  %v7191_v49 = vmul.f32 %v7188_v22, %v10354_v30  ;;  %v7192_v52 = vmul.f32 %v7187_v37, %v10360_v33  ;;  %v12337_v9 = vld [vmem:[#allocation46_spill] sm:$0xff]  ;;  %v12339_v22 = vld [vmem:[#allocation59_spill] sm:$0xff] }
 0x475   :  { %v7190_v18 = vmul.f32 %v7189_v20, %v10363_v34  ;;  %v7197_v54 = vmul.f32 %v7182_v15, %v10382_v46  ;;  %v7521_v33 = vmul.f32 %v11627_v41, %v10421_v2  ;;  %v7517_v28 = vsel %vm1259_vm5, %v11673_v7, %v11638_v11  ;;  %v12338_v26 = vld [vmem:[#allocation54_spill] sm:$0xff]  ;;  %v12341_v15 = vld [vmem:[#allocation49_spill] sm:$0xff] }
 0x476   :  { %7024 = vmatprep.subr.mxu0 %v6551_v5  ;;  %7096 = vmatpush1.msra.mxu1 %v6552_v8  ;;  %v11762_v16 = vpop.permute.xlu1 %8452  ;;  %v11766_v39 = vpop.permute.xlu0 %8454  ;;  %v7518_v11 = vmul.f32 %v7517_v28, %v10449_v31  ;;  %v12340_v5 = vld [vmem:[#allocation44_spill] sm:$0xff]  ;;  %v8140_v20 = vsel %vm1969_vm6, %v12341_v15, %v12334_v32  ;;  %v8134_v28 = vsel %vm1969_vm6, %v11710_v57, %v11707_v13  ;;  %v12356_v32 = vld [vmem:[#allocation21_spill] sm:$0xff] }
 0x477   :  { %7025 = vmatpush1.msra.mxu0 %v6550_v27  ;;  %9674 = vmatmul.mubr.msk.f32.vlgmr.msra.gmra.mrb[10].mxu1 %vm3649_vm10, %v9923_v24  ;;  %v12342_v27 = vld [vmem:[#allocation13_spill] sm:$0xff] }
 0x478   :  { %7273 = vmatprep.subr.mxu1 %v7193_v53  ;;  %9673 = vmatmul.mubr.msk.f32.vlgmr.msra.gmra.mrb[10].mxu0 %vm3649_vm10, %v9923_v24  ;;  %v12335_v24 = vld [vmem:[#allocation64_spill] sm:$0xff]  ;;  %v8143_v53 = vmul.f32 %v8139_v44, %v12342_v27  ;;  %v12361_v27 = vld [vmem:[#allocation27_spill] sm:$0xff] }
 0x479   :  { %7202 = vmatprep.subr.mxu0 %v7191_v49  ;;  %7274 = vmatpush1.msra.mxu1 %v7192_v52  ;;  %v8137_v40 = vsel %vm1969_vm6, %v12336_v25, %v12335_v24  ;;  %v12343_v49 = vld [vmem:[#allocation12_spill] sm:$0xff] }
 0x47a   :  { %7203 = vmatpush1.msra.mxu0 %v7190_v18  ;;  %7415 = vmatprep.subr.mxu1 %v7197_v54  ;;  %v7177_v30 = vpop.permute.xlu1 %7176  ;;  %v11778_v12 = vpop.permute.xlu0 %8460  ;;  %v8145_v52 = vmul.f32 %v8137_v40, %v12343_v49  ;;  %v12344_v18 = vld [vmem:[#allocation50_spill] sm:$0xff]  ;;  %v8141_v54 = vsel %vm1969_vm6, %v11707_v13, %v12341_v15  ;;  %v12358_v40 = vld [vmem:[#allocation25_spill] sm:$0xff] }
 0x47b   :  { %7337 = vmatprep.mubr.f32.mxu1 %v12207_v55  ;;  %v7183_v34 = vsel %vm861_vm4, %v7177_v30, %v11661_v42  ;;  %v7184_v46 = vsel %vm861_vm4, %v11680_v50, %v7177_v30  ;;  %7266 = vmatprep.mubr.f32.mxu0 %v12207_v55  ;;  %v7515_v50 = vsel %vm1259_vm5, %v11659_v36, %v11590_v38  ;;  %v12346_v30 = vld [vmem:[#allocation45_spill] sm:$0xff] }
 0x47c   :  { %v7195_v2 = vmul.f32 %v7184_v46, %v10399_v56  ;;  %v7196_v41 = vmul.f32 %v7183_v34, %v10402_v60  ;;  %9676 = vmatmul.mubr.msk.f32.vlgmr.msra.gmra.mrb[8].mxu1 %vm3649_vm10, %v11562_v19  ;;  %9675 = vmatmul.mubr.msk.f32.vlgmr.msra.gmra.mrb[8].mxu0 %vm3649_vm10, %v11562_v19  ;;  %v7194_v56 = vmul.f32 %v7185_v63, %v10405_v0  ;;  %v12345_v63 = vld [vmem:[#allocation61_spill] sm:$0xff]  ;;  %v12347_v46 = vld [vmem:[#allocation14_spill] sm:$0xff] }
 0x47d   :  { %7479 = vmatprep.mubr.f32.mxu1 %v12207_v55  ;;  %7408 = vmatprep.mubr.f32.mxu0 %v12207_v55  ;;  %v7510_v60 = vsel %vm1259_vm5, %v11663_v43, %v11673_v7  ;;  %v7519_v36 = vmul.f32 %v7516_v59, %v10434_v47  ;;  %v7520_v0 = vmul.f32 %v7515_v50, %v10437_v51  ;;  %v12348_v59 = vld [vmem:[#allocation48_spill] sm:$0xff] }
 0x47e   :  { %7344 = vmatprep.subr.mxu0 %v7195_v2  ;;  %7416 = vmatpush1.msra.mxu1 %v7196_v41  ;;  %v11813_v42 = vpop.permute.xlu1 %8446  ;;  %v7505_v38 = vpop.permute.xlu0 %7504  ;;  %v7525_v47 = vmul.f32 %v7510_v60, %v10452_v35  ;;  %v7513_v51 = vsel %vm1259_vm5, %v11619_v29, %v11678_v61  ;;  %v12329_v35 = vld [vmem:[#allocation9_spill] sm:$0xff]  ;;  %v8144_v2 = vmul.f32 %v12348_v59, %v12347_v46  ;;  %v12349_v41 = vld [vmem:[#allocation15_spill] sm:$0xff]  ;;  %v12365_v59 = vld [vmem:[#allocation30_spill] sm:$0xff] }
 0x47f   :  { %7345 = vmatpush1.msra.mxu0 %v7194_v56  ;;  %7601 = vmatprep.subr.mxu1 %v7521_v33  ;;  %v7511_v6 = vsel %vm1259_vm5, %v7505_v38, %v11663_v43  ;;  %v7512_v7 = vsel %vm1259_vm5, %v11678_v61, %v7505_v38  ;;  %v12328_v43 = vld [vmem:[#allocation11_spill] sm:$0xff]  ;;  %v7522_v10 = vmul.f32 %v7513_v51, %v12329_v35  ;;  %v12330_v29 = vld [vmem:[#allocation57_spill] sm:$0xff]  ;;  %v12350_v56 = vld [vmem:[#allocation16_spill] sm:$0xff] }
 0x480   :  { %9678 = vmatmul.mubr.msk.f32.vlgmr.msra.gmra.mrb[10].mxu1 %vm3649_vm10, %v11562_v19  ;;  %v7523_v31 = vmul.f32 %v7512_v7, %v12327_v14  ;;  %9677 = vmatmul.mubr.msk.f32.vlgmr.msra.gmra.mrb[10].mxu0 %vm3649_vm10, %v11562_v19  ;;  %v7524_v1 = vmul.f32 %v7511_v6, %v12328_v43  ;;  %v12331_v61 = vld [vmem:[#allocation47_spill] sm:$0xff]  ;;  %v8142_v50 = vmul.f32 %v8140_v20, %v12349_v41  ;;  %v12353_v14 = vld [vmem:[#allocation18_spill] sm:$0xff] }
 0x481   :  { %7530 = vmatprep.subr.mxu0 %v7519_v36  ;;  %7602 = vmatpush1.msra.mxu1 %v7520_v0  ;;  %v8149_v60 = vmul.f32 %v8141_v54, %v12350_v56  ;;  %v8465_v36 = vsel %vm2367_vm7, %v11762_v16, %v11766_v39  ;;  %v12351_v6 = vld [vmem:[#allocation19_spill] sm:$0xff]  ;;  %v8466_v43 = vsel %vm2367_vm7, %v11736_v58, %v11762_v16  ;;  %v12363_v54 = vld [vmem:[#allocation28_spill] sm:$0xff] }
 0x482   :  { %7531 = vmatpush1.msra.mxu0 %v7518_v11  ;;  %v11835_v3 = vpop.permute.xlu1 %8458  ;;  %7743 = vmatprep.subr.mxu1 %v7525_v47  ;;  %v11837_v17 = vpop.permute.xlu0 %8776  ;;  %v8148_v7 = vmul.f32 %v8134_v28, %v12351_v6  ;;  %v12352_v47 = vld [vmem:[#allocation17_spill] sm:$0xff] }
 0x483   :  { %7665 = vmatprep.mubr.f32.mxu1 %v12207_v55  ;;  %7672 = vmatprep.subr.mxu0 %v7523_v31 }
 0x484   :  { %7594 = vmatprep.mubr.f32.mxu0 %v12207_v55  ;;  %9680 = vmatmul.mubr.msk.f32.vlgmr.msra.gmra.mrb[8].mxu1 %vm3649_vm10, %v12330_v29 }
 0x485   :  { %9679 = vmatmul.mubr.msk.f32.vlgmr.msra.gmra.mrb[8].mxu0 %vm3649_vm10, %v12330_v29  ;;  %7744 = vmatpush1.msra.mxu1 %v7524_v1  ;;  %v12354_v1 = vld [vmem:[#allocation20_spill] sm:$0xff] }
 0x486   :  { %7673 = vmatpush1.msra.mxu0 %v7522_v10  ;;  %v11846_v19 = vpop.permute.xlu1 %8478  ;;  %7897 = vmatprep.subr.mxu1 %v12331_v61  ;;  %v11850_v45 = vpop.permute.xlu0 %8780  ;;  %v8473_v35 = vmul.f32 %v8465_v36, %v12354_v1  ;;  %v8469_v10 = vsel %vm2367_vm7, %v11778_v12, %v11813_v42 }
 0x487   :  { %7826 = vmatprep.subr.mxu0 %v12332_v4  ;;  %7807 = vmatprep.mubr.f32.mxu1 %v12207_v55  ;;  %v12355_v4 = vld [vmem:[#allocation22_spill] sm:$0xff] }
 0x488   :  { %7736 = vmatprep.mubr.f32.mxu0 %v12207_v55  ;;  %9682 = vmatmul.mubr.msk.f32.vlgmr.msra.gmra.mrb[10].mxu1 %vm3649_vm10, %v12330_v29  ;;  %v8472_v48 = vmul.f32 %v8466_v43, %v12355_v4 }
 0x489   :  { %9681 = vmatmul.mubr.msk.f32.vlgmr.msra.gmra.mrb[10].mxu0 %vm3649_vm10, %v12330_v29  ;;  %7898 = vmatpush1.msra.mxu1 %v12337_v9  ;;  %v8468_v29 = vsel %vm2367_vm7, %v11813_v42, %v11720_v62 }
 0x48a   :  { %7827 = vmatpush1.msra.mxu0 %v12338_v26  ;;  %v11868_v37 = vpop.permute.xlu1 %8778  ;;  %8039 = vmatprep.subr.mxu1 %v12339_v22  ;;  %v11872_v8 = vpop.permute.xlu0 %8774  ;;  %v8462_v26 = vsel %vm2367_vm7, %v11835_v3, %v11778_v12 }
 0x48b   :  { %7968 = vmatprep.subr.mxu0 %v12340_v5  ;;  %7961 = vmatprep.mubr.f32.mxu1 %v12207_v55  ;;  %v8795_v15 = vsel %vm2765_vm8, %v11837_v17, %v11868_v37  ;;  %v8796_v49 = vsel %vm2765_vm8, %v11872_v8, %v11837_v17  ;;  %v12364_v17 = vld [vmem:[#allocation31_spill] sm:$0xff] }
 0x48c   :  { %7890 = vmatprep.mubr.f32.mxu0 %v12207_v55  ;;  %9684 = vmatmul.mubr.msk.f32.vlgmr.msra.gmra.mrb[8].mxu1 %vm3649_vm10, %v12344_v18  ;;  %v8798_v46 = vmul.f32 %v8796_v49, %v12364_v17 }
 0x48d   :  { %9683 = vmatmul.mubr.msk.f32.vlgmr.msra.gmra.mrb[8].mxu0 %vm3649_vm10, %v12344_v18  ;;  %8040 = vmatpush1.msra.mxu1 %v12345_v63 }
 0x48e   :  { %7969 = vmatpush1.msra.mxu0 %v12346_v30  ;;  %v11892_v33 = vpop.permute.xlu1 %8782  ;;  %8225 = vmatprep.subr.mxu1 %v8145_v52  ;;  %v11894_v34 = vpop.permute.xlu0 %8786  ;;  %v12362_v52 = vld [vmem:[#allocation29_spill] sm:$0xff] }
 0x48f   :  { %8154 = vmatprep.subr.mxu0 %v8143_v53  ;;  %8103 = vmatprep.mubr.f32.mxu1 %v12207_v55  ;;  %v8793_v20 = vsel %vm2765_vm8, %v11850_v45, %v11892_v33 }
 0x490   :  { %8032 = vmatprep.mubr.f32.mxu0 %v12207_v55  ;;  %9686 = vmatmul.mubr.msk.f32.vlgmr.msra.gmra.mrb[10].mxu1 %vm3649_vm10, %v12344_v18  ;;  %v8801_v63 = vmul.f32 %v8793_v20, %v12363_v54  ;;  %v12379_v54 = vld [vmem:[#allocation2_spill] sm:$0xff] }
 0x491   :  { %9685 = vmatmul.mubr.msk.f32.vlgmr.msra.gmra.mrb[10].mxu0 %vm3649_vm10, %v12344_v18  ;;  %8226 = vmatpush1.msra.mxu1 %v8144_v2  ;;  %v8799_v18 = vmul.f32 %v8795_v15, %v12362_v52 }
 0x492   :  { %8155 = vmatpush1.msra.mxu0 %v8142_v50  ;;  %v8129_v38 = vpop.permute.xlu1 %8128  ;;  %8367 = vmatprep.subr.mxu1 %v8149_v60  ;;  %v11914_v0 = vpop.permute.xlu0 %8806  ;;  %v12366_v50 = vld [vmem:[#allocation32_spill] sm:$0xff] }
 0x493   :  { %8289 = vmatprep.mubr.f32.mxu1 %v12207_v55  ;;  %v8135_v13 = vsel %vm1969_vm6, %v8129_v38, %v11710_v57  ;;  %v8136_v11 = vsel %vm1969_vm6, %v12335_v24, %v8129_v38  ;;  %8218 = vmatprep.mubr.f32.mxu0 %v12207_v55  ;;  %v8467_v57 = vsel %vm2367_vm7, %v11720_v62, %v11736_v58  ;;  %v12357_v24 = vld [vmem:[#allocation24_spill] sm:$0xff]  ;;  %v12359_v62 = vld [vmem:[#allocation23_spill] sm:$0xff] }
 0x494   :  { %v8146_v51 = vmul.f32 %v8136_v11, %v12352_v47  ;;  %v8147_v31 = vmul.f32 %v8135_v13, %v12353_v14  ;;  %9688 = vmatmul.mubr.msk.f32.vlgmr.msra.gmra.mrb[8].mxu1 %vm3649_vm10, %v11722_v21  ;;  %v8471_v44 = vmul.f32 %v8467_v57, %v12356_v32  ;;  %v8477_v25 = vmul.f32 %v8469_v10, %v12357_v24  ;;  %v12367_v13 = vld [vmem:[#allocation34_spill] sm:$0xff]  ;;  %v12368_v11 = vld [vmem:[#allocation35_spill] sm:$0xff]  ;;  %v12370_v14 = vld [vmem:[#allocation36_spill] sm:$0xff] }
 0x495   :  { %9687 = vmatmul.mubr.msk.f32.vlgmr.msra.gmra.mrb[8].mxu0 %vm3649_vm10, %v11722_v21  ;;  %8368 = vmatpush1.msra.mxu1 %v8148_v7  ;;  %v8470_v42 = vmul.f32 %v8468_v29, %v12359_v62  ;;  %v12369_v7 = vld [vmem:[#allocation33_spill] sm:$0xff]  ;;  %v12371_v57 = vld [vmem:[#allocation39_spill] sm:$0xff]  ;;  %v12376_v62 = vld [vmem:[#allocation42_spill] sm:$0xff] }
 0x496   :  { %8296 = vmatprep.subr.mxu0 %v8147_v31  ;;  %v8789_v16 = vpop.permute.xlu1 %8788  ;;  %8553 = vmatprep.subr.mxu1 %v8473_v35  ;;  %v8457_v61 = vpop.permute.xlu0 %8456 }
 0x497   :  { %8431 = vmatprep.mubr.f32.mxu1 %v12207_v55  ;;  %v8463_v58 = vsel %vm2367_vm7, %v8457_v61, %v11835_v3  ;;  %8297 = vmatpush1.msra.mxu0 %v8146_v51  ;;  %v8464_v22 = vsel %vm2367_vm7, %v11766_v39, %v8457_v61  ;;  %v12360_v39 = vld [vmem:[#allocation26_spill] sm:$0xff]  ;;  %v8790_v41 = vsel %vm2765_vm8, %v11894_v34, %v8789_v16 }
 0x498   :  { %v8475_v9 = vmul.f32 %v8463_v58, %v12358_v40  ;;  %8360 = vmatprep.mubr.f32.mxu0 %v12207_v55  ;;  %9690 = vmatmul.mubr.msk.f32.vlgmr.msra.gmra.mrb[10].mxu1 %vm3649_vm10, %v11722_v21  ;;  %v8476_v3 = vmul.f32 %v8462_v26, %v12360_v39  ;;  %v8474_v53 = vmul.f32 %v8464_v22, %v12361_v27  ;;  %v12373_v61 = vld [vmem:[#allocation38_spill] sm:$0xff]  ;;  %v12375_v40 = vld [vmem:[#allocation41_spill] sm:$0xff] }
 0x499   :  { %8554 = vmatpush1.msra.mxu1 %v8472_v48  ;;  %9689 = vmatmul.mubr.msk.f32.vlgmr.msra.gmra.mrb[10].mxu0 %vm3649_vm10, %v11722_v21  ;;  %v8794_v21 = vsel %vm2765_vm8, %v11868_v37, %v11850_v45  ;;  %v8797_v37 = vsel %vm2765_vm8, %v8789_v16, %v11872_v8  ;;  %v8804_v6 = vmul.f32 %v8790_v41, %v12368_v11  ;;  %v12372_v16 = vld [vmem:[#allocation37_spill] sm:$0xff]  ;;  %v12374_v48 = vld [vmem:[#allocation40_spill] sm:$0xff] }
 0x49a   :  { %v9105_v5 = vpop.permute.xlu1 %9104  ;;  %8482 = vmatprep.subr.mxu0 %v8471_v44  ;;  %8695 = vmatprep.subr.mxu1 %v8477_v25  ;;  %v9107_v12 = vpop.permute.xlu0 %9106  ;;  %v8800_v2 = vmul.f32 %v8794_v21, %v12365_v59  ;;  %v8805_v28 = vmul.f32 %v8797_v37, %v12366_v50 }
 0x49b   :  { %8483 = vmatpush1.msra.mxu0 %v8470_v42  ;;  %8617 = vmatprep.mubr.f32.mxu1 %v12207_v55  ;;  %v9123_v51 = vsel %vm3163_vm9, %v9105_v5, %v9107_v12 }
 0x49c   :  { %8624 = vmatprep.subr.mxu0 %v8475_v9  ;;  %8546 = vmatprep.mubr.f32.mxu0 %v12207_v55  ;;  %v9127_v29 = vmul.f32 %v9123_v51, %v12372_v16 }
 0x49d   :  { %9692 = vmatmul.mubr.msk.f32.vlgmr.msra.gmra.mrb[8].mxu1 %vm3649_vm10, %v11846_v19  ;;  %9691 = vmatmul.mubr.msk.f32.vlgmr.msra.gmra.mrb[8].mxu0 %vm3649_vm10, %v11846_v19 }
 0x49e   :  { %v9109_v45 = vpop.permute.xlu1 %9108  ;;  %8696 = vmatpush1.msra.mxu1 %v8476_v3  ;;  %8625 = vmatpush1.msra.mxu0 %v8474_v53  ;;  %v9111_v30 = vpop.permute.xlu0 %9110 }
 0x49f   :  { %8881 = vmatprep.subr.mxu1 %v8801_v63  ;;  %8810 = vmatprep.subr.mxu0 %v8799_v18  ;;  %v9121_v56 = vsel %vm3163_vm9, %v9109_v45, %v9111_v30 }
 0x4a0   :  { %8759 = vmatprep.mubr.f32.mxu1 %v12207_v55  ;;  %8688 = vmatprep.mubr.f32.mxu0 %v12207_v55  ;;  %v9129_v31 = vmul.f32 %v9121_v56, %v12370_v14 }
 0x4a1   :  { %9694 = vmatmul.mubr.msk.f32.vlgmr.msra.gmra.mrb[10].mxu1 %vm3649_vm10, %v11846_v19  ;;  %9693 = vmatmul.mubr.msk.f32.vlgmr.msra.gmra.mrb[10].mxu0 %vm3649_vm10, %v11846_v19 }
 0x4a2   :  { %v8785_v8 = vpop.permute.xlu1 %8784  ;;  %8882 = vmatpush1.msra.mxu1 %v8800_v2  ;;  %8811 = vmatpush1.msra.mxu0 %v8798_v46  ;;  %v9113_v60 = vpop.permute.xlu0 %9112 }
 0x4a3   :  { %v8791_v36 = vsel %vm2765_vm8, %v8785_v8, %v11894_v34  ;;  %v8792_v38 = vsel %vm2765_vm8, %v11892_v33, %v8785_v8  ;;  %9023 = vmatprep.subr.mxu1 %v8805_v28  ;;  %8945 = vmatprep.mubr.f32.mxu1 %v12207_v55  ;;  %v9122_v34 = vsel %vm3163_vm9, %v9107_v12, %v9109_v45  ;;  %v12378_v12 = vld [vmem:[#allocation3_spill] sm:$0xff] }
 0x4a4   :  { %v8803_v19 = vmul.f32 %v8791_v36, %v12367_v13  ;;  %v8802_v47 = vmul.f32 %v8792_v38, %v12369_v7  ;;  %8874 = vmatprep.mubr.f32.mxu0 %v12207_v55  ;;  %v9128_v4 = vmul.f32 %v9122_v34, %v12373_v61  ;;  %v9120_v44 = vsel %vm3163_vm9, %v9111_v30, %v9113_v60 }
 0x4a5   :  { %9696 = vmatmul.mubr.msk.f32.vlgmr.msra.gmra.mrb[8].mxu1 %vm3649_vm10, %v11914_v0  ;;  %9695 = vmatmul.mubr.msk.f32.vlgmr.msra.gmra.mrb[8].mxu0 %vm3649_vm10, %v11914_v0 }
 0x4a6   :  { %v9103_v33 = vpop.permute.xlu1 %9102  ;;  %9024 = vmatpush1.msra.mxu1 %v8804_v6  ;;  %v9117_v43 = vpop.permute.xlu0 %9116  ;;  %8952 = vmatprep.subr.mxu0 %v8803_v19 }
 0x4a7   :  { %v9124_v1 = vsel %vm3163_vm9, %v9103_v33, %v9105_v5  ;;  %9209 = vmatprep.subr.mxu1 %v9129_v31  ;;  %9087 = vmatprep.mubr.f32.mxu1 %v12207_v55  ;;  %v9125_v35 = vsel %vm3163_vm9, %v9117_v43, %v9103_v33  ;;  %v9459_v5 = vunpack.c.l.s4 %v9948_v23 }
 0x4a8   :  { %v9126_v10 = vmul.f32 %v9124_v1, %v12371_v57  ;;  %v9133_v58 = vmul.f32 %v9125_v35, %v12374_v48  ;;  %8953 = vmatpush1.msra.mxu0 %v8802_v47  ;;  %9016 = vmatprep.mubr.f32.mxu0 %v12207_v55 }
 0x4a9   :  { %9698 = vmatmul.mubr.msk.f32.vlgmr.msra.gmra.mrb[10].mxu1 %vm3649_vm10, %v11914_v0  ;;  %9697 = vmatmul.mubr.msk.f32.vlgmr.msra.gmra.mrb[10].mxu0 %vm3649_vm10, %v11914_v0  ;;  %v12377_v0 = vld [vmem:[#allocation43_spill] sm:$0xff]  ;;  %v9460_v20 = vunpack.c.0.s8 %v9459_v5 }
 0x4aa   :  { %v9115_v32 = vpop.permute.xlu1 %9114  ;;  %9210 = vmatpush1.msra.mxu1 %v9128_v4  ;;  %9138 = vmatprep.subr.mxu0 %v9127_v29  ;;  %v9130_v26 = vmul.f32 %v9120_v44, %v12377_v0 }
 0x4ab   :  { %v9118_v24 = vsel %vm3163_vm9, %v9115_v32, %v9117_v43  ;;  %v9119_v25 = vsel %vm3163_vm9, %v9113_v60, %v9115_v32  ;;  %9139 = vmatpush1.msra.mxu0 %v9126_v10  ;;  %9351 = vmatprep.subr.mxu1 %v9133_v58  ;;  %v9463_v63 = vsub.s32 %v9460_v20, %v12379_v54 }
 0x4ac   :  { %v9131_v9 = vmul.f32 %v9119_v25, %v12375_v40  ;;  %v9132_v42 = vmul.f32 %v9118_v24, %v12376_v62  ;;  %9202 = vmatprep.mubr.f32.mxu0 %v12207_v55  ;;  %9273 = vmatprep.mubr.f32.mxu1 %v12207_v55 }
 0x4ae   :  { %9280 = vmatprep.subr.mxu0 %v9131_v9  ;;  %v9135_v22 = vpop.permute.xlu1 %9134 }
 0x4af   :  { %9699 = vmatmul.mubr.msk.f32.vlgmr.msra.gmra.mrb[8].mxu0 %vm3649_vm10, %v9135_v22  ;;  %9700 = vmatmul.mubr.msk.f32.vlgmr.msra.gmra.mrb[8].mxu1 %vm3649_vm10, %v9135_v22 }
 0x4b0   :  { %9281 = vmatpush1.msra.mxu0 %v9130_v26  ;;  %9352 = vmatpush1.msra.mxu1 %v9132_v42 }
 0x4b1   :  { %9344 = vmatprep.mubr.f32.mxu0 %v12207_v55  ;;  %9415 = vmatprep.mubr.f32.mxu1 %v12207_v55 }
 0x4b3   :  { %9701 = vmatmul.mubr.msk.f32.vlgmr.msra.gmra.mrb[10].mxu0 %vm3649_vm10, %v9135_v22  ;;  %9702 = vmatmul.mubr.msk.f32.vlgmr.msra.gmra.mrb[10].mxu1 %vm3649_vm10, %v9135_v22 }
 0x4b7   :  { %v9432_v15 = vpop.permute.xlu0 %9431 }
 0x4b8   :  { %v9437_v39 = vrot.slane %v9432_v15, %v12378_v12 }
 0x582   :  { %v9204_v3 = vpop.f32.mrb[8].mxu0  ;;  %v9275_v21 = vpop.f32.mrb[8].mxu1 }
 0x583   :  { %v9438_v27 = vadd.f32 %v9437_v39, %v9204_v3  ;;  %v9440_v53 = vadd.f32 %v9437_v39, %v9275_v21  ;;  %v9206_v49 = vpop.f32.mrb[9].mxu0  ;;  %v9277_v52 = vpop.f32.mrb[9].mxu1 }
 0x584   :  { %v9439_v18 = vadd.f32 %v9437_v39, %v9206_v49  ;;  %v9441_v55 = vadd.f32 %v9437_v39, %v9277_v52 }
 0x586   :  { %v9454_v45 = vcombine.low %v9438_v27, %v9439_v18  ;;  %v9455_v37 = vcombine.low %v9440_v53, %v9441_v55  ;;  %v9346_v30 = vpop.f32.mrb[10].mxu0  ;;  %v9417_v17 = vpop.f32.mrb[10].mxu1 }
 0x587   :  { %v9442_v46 = vadd.f32 %v9437_v39, %v9346_v30  ;;  %v9444_v59 = vadd.f32 %v9437_v39, %v9417_v17  ;;  %v9348_v2 = vpop.f32.mrb[11].mxu0  ;;  %v9419_v41 = vpop.f32.mrb[11].mxu1 }
 0x588   :  { %v9464_v50 = vrot.slane %v9454_v45, %v9463_v63  ;;  %v9471_v28 = vrot.slane %v9455_v37, %v9463_v63  ;;  %v9443_v8 = vadd.f32 %v9437_v39, %v9348_v2  ;;  %v9445_v56 = vadd.f32 %v9437_v39, %v9419_v41 }
 0x58a   :  { %v9486_v60 = vcombine.low %v9464_v50, %v9471_v28  ;;  %v9456_v36 = vcombine.low %v9442_v46, %v9443_v8  ;;  %v9457_v38 = vcombine.low %v9444_v59, %v9445_v56 }
 0x58c   :  { %v9478_v13 = vrot.slane %v9456_v36, %v9463_v63  ;;  %v9485_v19 = vrot.slane %v9457_v38, %v9463_v63  ;;  %v9494_v6 = vrot.slane %v9486_v60, %v9463_v63 }
 0x58e   :  { %v9487_v11 = vcombine.low %v9478_v13, %v9485_v19 }
 0x590   :  { %v9501_v7 = vrot.slane %v9487_v11, %v9463_v63 }
 0x592   :  { %v9502_v47 = vcombine.low %v9494_v6, %v9501_v7 }
 0x594   :  { %9504 = vst [vmem:[%s12073_s5] sm:$0xff] %v9502_v47 }

</bundles_post_ra>
